<compile_context>
chip_gen: v7x
topology: tpu7x:2x2x1
jax: 0.10.0
libtpu: 0.0.40
codegen_flags: <defaults>
</compile_context>

<pallas_src>
import functools

import jax
import jax.numpy as jnp
import numpy as np
from jax import lax
from jax.experimental import pallas as pl
from jax.experimental.pallas import tpu as pltpu

# Keep kernel and reference matmuls at the same (full f32) precision so the
# 1e-3 check against the pure-JAX reference is tight.  Drop this (and cast the
# GEMM operands to bf16) for production v6e/v7x throughput.
jax.config.update("jax_default_matmul_precision", "highest")

_LN_EPS = 1e-5


def _round_up(a, b):
    return (a + b - 1) // b * b


def _sigmoid(v):
    # tanh-form sigmoid: one EUP push instead of exp + reciprocal.
    return 0.5 * jnp.tanh(0.5 * v) + 0.5


def _gru_cell(gx, h_prev, w_hh, b_hn, hd):
    """One GRU step.  gx = W_ih @ x + b_ih + [b_hr, b_hz, 0]  (precomputed)."""
    gh = jnp.dot(h_prev, w_hh, preferred_element_type=jnp.float32)       # (bt, 3*hd)
    r = _sigmoid(gx[:, :hd] + gh[:, :hd])
    z = _sigmoid(gx[:, hd:2 * hd] + gh[:, hd:2 * hd])
    n = jnp.tanh(gx[:, 2 * hd:] + r * (gh[:, 2 * hd:] + b_hn))
    return (1.0 - z) * n + z * h_prev


def _gru_ln_kernel(x_ref, wxf_ref, wxb_ref, bxf_ref, bxb_ref,
                   whf_ref, whb_ref, bhnf_ref, bhnb_ref,
                   gamma_ref, beta_ref, out_ref,
                   projf_ref, projb_ref, seq_ref,
                   *, bt, t_len, unroll):
    hidden = seq_ref.shape[1]           # H
    hd = hidden // 2                    # per-direction hidden
    n_layers = wxf_ref.shape[0]

    for layer in range(n_layers):       # static unroll (2 layers)
        # Fused per-direction input projections for ALL timesteps: one lane-
        # dense GEMM per direction; b_ih + b_hh[r,z] folded in once (the n-gate
        # hidden bias stays inside r*(...) in the recurrence).
        src = x_ref[0] if layer == 0 else seq_ref[...]
        projf_ref[...] = (jnp.dot(src, wxf_ref[layer],
                                  preferred_element_type=jnp.float32)
                          + bxf_ref[layer])
        projb_ref[...] = (jnp.dot(src, wxb_ref[layer],
                                  preferred_element_type=jnp.float32)
                          + bxb_ref[layer])

        def step(t, carry, layer=layer):
            hf, hb = carry
            row_f = pl.multiple_of(t * bt, bt)                     # sublane-aligned
            row_b = pl.multiple_of((t_len - 1 - t) * bt, bt)

            hf = _gru_cell(projf_ref[pl.ds(row_f, bt), :], hf,
                           whf_ref[layer], bhnf_ref[layer], hd)
            hb = _gru_cell(projb_ref[pl.ds(row_b, bt), :], hb,
                           whb_ref[layer], bhnb_ref[layer], hd)

            seq_ref[pl.ds(row_f, bt), :hd] = hf
            seq_ref[pl.ds(row_b, bt), hd:] = hb
            return hf, hb

        h0 = jnp.zeros((bt, hd), jnp.float32)
        lax.fori_loop(0, t_len, step, (h0, h0), unroll=unroll)

    # Residual + LayerNorm over the last (lane) dim; x re-read here so it is
    # not held live across the recurrence loops.  One full-block store.
    y = seq_ref[...] + x_ref[0]                                    # (T*bt, H)
    mu = jnp.mean(y, axis=-1, keepdims=True)
    d = y - mu
    var = jnp.mean(d * d, axis=-1, keepdims=True)
    out_ref[0] = d * lax.rsqrt(var + _LN_EPS) * gamma_ref[...] + beta_ref[...]


def _pack_params(params, H):
    """Torch-layout GRU params -> fused, per-direction, MXU-friendly operands."""
    Hd = H // 2
    zero_n = jnp.zeros((Hd,), jnp.float32)
    wxf, wxb, bxf, bxb, whf, whb, bhnf, bhnb = ([] for _ in range(8))
    for p in params["gru"]:
        wxf.append(p["w_ih_f"].T)                                            # (H, 3Hd)
        wxb.append(p["w_ih_b"].T)
        bxf.append((p["b_ih_f"]
                    + jnp.concatenate([p["b_hh_f"][:2 * Hd], zero_n]))[None, :])
        bxb.append((p["b_ih_b"]
                    + jnp.concatenate([p["b_hh_b"][:2 * Hd], zero_n]))[None, :])
        whf.append(p["w_hh_f"].T)                                            # (Hd, 3Hd)
        whb.append(p["w_hh_b"].T)
        bhnf.append(p["b_hh_f"][2 * Hd:][None, :])                           # (1, Hd)
        bhnb.append(p["b_hh_b"][2 * Hd:][None, :])
    return (jnp.stack(wxf), jnp.stack(wxb), jnp.stack(bxf), jnp.stack(bxb),
            jnp.stack(whf), jnp.stack(whb), jnp.stack(bhnf), jnp.stack(bhnb),
            params["gamma"][None, :], params["beta"][None, :])


def residual_gru(x, params, batch_tile=None):
    """Forward pass of ResidualGRU: LayerNorm(BiGRU(x) + x)."""
    B, T, H = x.shape
    assert H % 2 == 0
    Hd = H // 2

    if batch_tile is None:
        # Size the batch tile toward the MXU's 128-row dimension, but (a) do
        # not pad tiny batches up to 128 and (b) keep >=2 tiles for larger
        # batches so both v7x TensorCores get grid work.
        b8 = _round_up(B, 8)
        if b8 <= 16:
            batch_tile = b8
        else:
            batch_tile = min(128, _round_up(pl.cdiv(b8, 2), 8))
    batch_tile = max(8, _round_up(batch_tile, 8))

    packed = _pack_params(params, H)

    Bp = _round_up(B, batch_tile)
    nb = Bp // batch_tile
    rows = T * batch_tile

    # Time-major rows inside each batch tile: row (t*bt + b) of tile i holds
    # (batch i*bt + b, time t), so every dynamic slice start is sublane-aligned.
    x_pad = jnp.pad(x, ((0, Bp - B), (0, 0), (0, 0)))
    x_tiles = (x_pad.reshape(nb, batch_tile, T, H)
               .transpose(0, 2, 1, 3)
               .reshape(nb, rows, H))

    io_spec = pl.BlockSpec((1, rows, H), lambda i: (i, 0, 0))
    # Whole-array, single-buffered VMEM residents (constant across the grid).
    vmem_full = pl.BlockSpec(memory_space=pltpu.MemorySpace.VMEM)
    in_specs = [io_spec] + [vmem_full] * len(packed)

    # Explicit VMEM budget: scratch + double-buffered in/out blocks + weights.
    f32b = 4
    param_bytes = sum(int(np.prod(a.shape)) * f32b for a in packed)
    scratch_bytes = (2 * rows * 3 * Hd + rows * H) * f32b
    io_bytes = 2 * 2 * rows * H * f32b
    vmem_limit = min(100 << 20,
                     max(32 << 20,
                         int((param_bytes + scratch_bytes + io_bytes) * 1.25)))

    unroll = True if T <= 16 else 4
    kernel = functools.partial(_gru_ln_kernel, bt=batch_tile, t_len=T,
                               unroll=unroll)

    y_tiles = pl.pallas_call(
        kernel,
        grid=(nb,),
        in_specs=in_specs,
        out_specs=io_spec,
        out_shape=jax.ShapeDtypeStruct((nb, rows, H), jnp.float32),
        scratch_shapes=[
            pltpu.VMEM((rows, 3 * Hd), jnp.float32),   # fwd gate projections
            pltpu.VMEM((rows, 3 * Hd), jnp.float32),   # bwd gate projections
            pltpu.VMEM((rows, H), jnp.float32),        # [fwd | bwd] layer outputs
        ],
        compiler_params=pltpu.CompilerParams(
            dimension_semantics=("parallel",),          # batch-tile axis
            vmem_limit_bytes=vmem_limit),
    )(x_tiles, *packed)

    y = (y_tiles.reshape(nb, T, batch_tile, H)
         .transpose(0, 2, 1, 3)
         .reshape(Bp, T, H))
    return y[:B]


def init_params(key, hidden_size, num_layers=2):
    """Synthetic torch-style GRU + LayerNorm parameters (uniform 1/sqrt(Hd))."""
    Hd = hidden_size // 2
    bound = 1.0 / np.sqrt(Hd)

    def u(k, shape):
        return jax.random.uniform(k, shape, jnp.float32, -bound, bound)

    layers = []
    for _ in range(num_layers):
        key, *ks = jax.random.split(key, 9)
        layers.append(dict(
            w_ih_f=u(ks[0], (3 * Hd, hidden_size)), w_hh_f=u(ks[1], (3 * Hd, Hd)),
            b_ih_f=u(ks[2], (3 * Hd,)), b_hh_f=u(ks[3], (3 * Hd,)),
            w_ih_b=u(ks[4], (3 * Hd, hidden_size)), w_hh_b=u(ks[5], (3 * Hd, Hd)),
            b_ih_b=u(ks[6], (3 * Hd,)), b_hh_b=u(ks[7], (3 * Hd,)),
        ))
    key, kg, kb = jax.random.split(key, 3)
    gamma = 1.0 + 0.1 * jax.random.normal(kg, (hidden_size,), jnp.float32)
    beta = 0.1 * jax.random.normal(kb, (hidden_size,), jnp.float32)
    return dict(gru=layers, gamma=gamma, beta=beta)


def reference(x, params):
    """Pure-JAX reference mirroring the PyTorch forward (eval mode)."""
    B, T, H = x.shape
    Hd = H // 2

    def cell(xt, h, w_ih, w_hh, b_ih, b_hh):
        gx = xt @ w_ih.T + b_ih
        gh = h @ w_hh.T + b_hh
        r = jax.nn.sigmoid(gx[:, :Hd] + gh[:, :Hd])
        z = jax.nn.sigmoid(gx[:, Hd:2 * Hd] + gh[:, Hd:2 * Hd])
        n = jnp.tanh(gx[:, 2 * Hd:] + r * gh[:, 2 * Hd:])
        return (1.0 - z) * n + z * h

    layer_in = x
    for p in params["gru"]:
        h = jnp.zeros((B, Hd), jnp.float32)
        outs_f = []
        for t in range(T):
            h = cell(layer_in[:, t], h, p["w_ih_f"], p["w_hh_f"], p["b_ih_f"], p["b_hh_f"])
            outs_f.append(h)
        h = jnp.zeros((B, Hd), jnp.float32)
        outs_b = [None] * T
        for t in range(T - 1, -1, -1):
            h = cell(layer_in[:, t], h, p["w_ih_b"], p["w_hh_b"], p["b_ih_b"], p["b_hh_b"])
            outs_b[t] = h
        layer_in = jnp.concatenate(
            [jnp.stack(outs_f, axis=1), jnp.stack(outs_b, axis=1)], axis=-1)

    y = layer_in + x
    mu = y.mean(axis=-1, keepdims=True)
    var = ((y - mu) ** 2).mean(axis=-1, keepdims=True)
    return (y - mu) / jnp.sqrt(var + _LN_EPS) * params["gamma"] + params["beta"]


if __name__ == "__main__":
    key = jax.random.PRNGKey(0)
    kx, kp = jax.random.split(key)

    B, T, H = 2, 8, 32          # batch=2, seq=8, hidden=32 (per-direction 16)
    x = jax.random.normal(kx, (B, T, H), dtype=jnp.float32)
    params = init_params(kp, H, num_layers=2)

    y = residual_gru(x, params)
    jax.block_until_ready(y)

    y_ref = reference(x, params)
    np.testing.assert_allclose(np.asarray(y), np.asarray(y_ref), rtol=1e-3, atol=1e-3)

    print("KERNEL_OK")
</pallas_src>

<mosaic_0001>
module attributes {stable_mosaic.version = 11 : i64} {
  func.func @_gru_ln_kernel(%arg0: i32, %arg1: memref<1x64x32xf32, #tpu.memory_space<vmem>>, %arg2: memref<2x32x48xf32, #tpu.memory_space<vmem>>, %arg3: memref<2x32x48xf32, #tpu.memory_space<vmem>>, %arg4: memref<2x1x48xf32, #tpu.memory_space<vmem>>, %arg5: memref<2x1x48xf32, #tpu.memory_space<vmem>>, %arg6: memref<2x16x48xf32, #tpu.memory_space<vmem>>, %arg7: memref<2x16x48xf32, #tpu.memory_space<vmem>>, %arg8: memref<2x1x16xf32, #tpu.memory_space<vmem>>, %arg9: memref<2x1x16xf32, #tpu.memory_space<vmem>>, %arg10: memref<1x32xf32, #tpu.memory_space<vmem>>, %arg11: memref<1x32xf32, #tpu.memory_space<vmem>>, %arg12: memref<1x64x32xf32, #tpu.memory_space<vmem>>, %arg13: memref<64x48xf32, #tpu.memory_space<vmem>>, %arg14: memref<64x48xf32, #tpu.memory_space<vmem>>, %arg15: memref<64x32xf32, #tpu.memory_space<vmem>>) attributes {dimension_semantics = [#tpu.dimension_semantics<parallel>], iteration_bounds = array<i64: 1>, scalar_prefetch = 0 : i64, scratch_operands = 3 : i64, tpu.core_type = #tpu.core_type<tc>, window_params = [{transform_indices = @transform_0, window_bounds = array<i64: 1, 64, 32>}, {pipeline_mode = #tpu.pipeline_mode<synchronous>, transform_indices = @transform_1, window_bounds = array<i64: 2, 32, 48>}, {pipeline_mode = #tpu.pipeline_mode<synchronous>, transform_indices = @transform_2, window_bounds = array<i64: 2, 32, 48>}, {pipeline_mode = #tpu.pipeline_mode<synchronous>, transform_indices = @transform_3, window_bounds = array<i64: 2, 1, 48>}, {pipeline_mode = #tpu.pipeline_mode<synchronous>, transform_indices = @transform_4, window_bounds = array<i64: 2, 1, 48>}, {pipeline_mode = #tpu.pipeline_mode<synchronous>, transform_indices = @transform_5, window_bounds = array<i64: 2, 16, 48>}, {pipeline_mode = #tpu.pipeline_mode<synchronous>, transform_indices = @transform_6, window_bounds = array<i64: 2, 16, 48>}, {pipeline_mode = #tpu.pipeline_mode<synchronous>, transform_indices = @transform_7, window_bounds = array<i64: 2, 1, 16>}, {pipeline_mode = #tpu.pipeline_mode<synchronous>, transform_indices = @transform_8, window_bounds = array<i64: 2, 1, 16>}, {pipeline_mode = #tpu.pipeline_mode<synchronous>, transform_indices = @transform_9, window_bounds = array<i64: 1, 32>}, {pipeline_mode = #tpu.pipeline_mode<synchronous>, transform_indices = @transform_10, window_bounds = array<i64: 1, 32>}, {transform_indices = @transform_11, window_bounds = array<i64: 1, 64, 32>}]} {
    %c0 = arith.constant 0 : index
    %c0_0 = arith.constant 0 : index
    %c0_1 = arith.constant 0 : index
    %0 = vector.load %arg1[%c0, %c0_0, %c0_1] : memref<1x64x32xf32, #tpu.memory_space<vmem>>, vector<1x64x32xf32>
    %1 = vector.shape_cast %0 : vector<1x64x32xf32> to vector<64x32xf32>
    %c0_2 = arith.constant 0 : index
    %c0_3 = arith.constant 0 : index
    %c0_4 = arith.constant 0 : index
    %2 = vector.load %arg2[%c0_2, %c0_3, %c0_4] : memref<2x32x48xf32, #tpu.memory_space<vmem>>, vector<1x32x48xf32>
    %3 = vector.shape_cast %2 : vector<1x32x48xf32> to vector<32x48xf32>
    %cst = arith.constant dense<0.000000e+00> : vector<64x48xf32>
    %4 = tpu.matmul %1, %3, %cst {dimension_numbers = #tpu.dot_dimension_numbers<[1], [0], [0], [1], [0, 0, 1, 1], [], []>, precision = #tpu.contract_precision<fp32>} : vector<64x32xf32>, vector<32x48xf32>, vector<64x48xf32> -> vector<64x48xf32>
    %c0_5 = arith.constant 0 : index
    %c0_6 = arith.constant 0 : index
    %c0_7 = arith.constant 0 : index
    %5 = vector.load %arg4[%c0_5, %c0_6, %c0_7] : memref<2x1x48xf32, #tpu.memory_space<vmem>>, vector<1x1x48xf32>
    %6 = vector.shape_cast %5 : vector<1x1x48xf32> to vector<1x48xf32>
    %7 = vector.broadcast %6 : vector<1x48xf32> to vector<64x48xf32>
    %8 = arith.addf %4, %7 : vector<64x48xf32>
    %c0_8 = arith.constant 0 : index
    %c0_9 = arith.constant 0 : index
    %9 = vector.load %arg13[%c0_8, %c0_9] : memref<64x48xf32, #tpu.memory_space<vmem>>, vector<64x48xf32>
    tpu.vector_store %arg13[%c0_8, %c0_9], %8 {strides = array<i32>} : memref<64x48xf32, #tpu.memory_space<vmem>>, vector<64x48xf32>,
    %c0_10 = arith.constant 0 : index
    %c0_11 = arith.constant 0 : index
    %c0_12 = arith.constant 0 : index
    %10 = vector.load %arg3[%c0_10, %c0_11, %c0_12] : memref<2x32x48xf32, #tpu.memory_space<vmem>>, vector<1x32x48xf32>
    %11 = vector.shape_cast %10 : vector<1x32x48xf32> to vector<32x48xf32>
    %cst_13 = arith.constant dense<0.000000e+00> : vector<64x48xf32>
    %12 = tpu.matmul %1, %11, %cst_13 {dimension_numbers = #tpu.dot_dimension_numbers<[1], [0], [0], [1], [0, 0, 1, 1], [], []>, precision = #tpu.contract_precision<fp32>} : vector<64x32xf32>, vector<32x48xf32>, vector<64x48xf32> -> vector<64x48xf32>
    %c0_14 = arith.constant 0 : index
    %c0_15 = arith.constant 0 : index
    %c0_16 = arith.constant 0 : index
    %13 = vector.load %arg5[%c0_14, %c0_15, %c0_16] : memref<2x1x48xf32, #tpu.memory_space<vmem>>, vector<1x1x48xf32>
    %14 = vector.shape_cast %13 : vector<1x1x48xf32> to vector<1x48xf32>
    %15 = vector.broadcast %14 : vector<1x48xf32> to vector<64x48xf32>
    %16 = arith.addf %12, %15 : vector<64x48xf32>
    %c0_17 = arith.constant 0 : index
    %c0_18 = arith.constant 0 : index
    %17 = vector.load %arg14[%c0_17, %c0_18] : memref<64x48xf32, #tpu.memory_space<vmem>>, vector<64x48xf32>
    tpu.vector_store %arg14[%c0_17, %c0_18], %16 {strides = array<i32>} : memref<64x48xf32, #tpu.memory_space<vmem>>, vector<64x48xf32>,
    %cst_19 = arith.constant 0.000000e+00 : f32
    %18 = vector.broadcast %cst_19 : f32 to vector<8x16xf32>
    %c0_i32 = arith.constant 0 : i32
    %c8_i32 = arith.constant 8 : i32
    %19 = arith.muli %c0_i32, %c8_i32 : i32
    %20 = tpu.assume_multiple %19, 8 : i32
    %c7_i32 = arith.constant 7 : i32
    %21 = arith.subi %c7_i32, %c0_i32 : i32
    %c8_i32_20 = arith.constant 8 : i32
    %22 = arith.muli %21, %c8_i32_20 : i32
    %23 = tpu.assume_multiple %22, 8 : i32
    %24 = arith.index_cast %20 : i32 to index
    %c0_21 = arith.constant 0 : index
    %25 = vector.load %arg13[%24, %c0_21] : memref<64x48xf32, #tpu.memory_space<vmem>>, vector<8x48xf32>
    %c0_22 = arith.constant 0 : index
    %c0_23 = arith.constant 0 : index
    %c0_24 = arith.constant 0 : index
    %26 = vector.load %arg6[%c0_22, %c0_23, %c0_24] : memref<2x16x48xf32, #tpu.memory_space<vmem>>, vector<1x16x48xf32>
    %27 = vector.shape_cast %26 : vector<1x16x48xf32> to vector<16x48xf32>
    %c0_25 = arith.constant 0 : index
    %c0_26 = arith.constant 0 : index
    %c0_27 = arith.constant 0 : index
    %28 = vector.load %arg8[%c0_25, %c0_26, %c0_27] : memref<2x1x16xf32, #tpu.memory_space<vmem>>, vector<1x1x16xf32>
    %29 = vector.shape_cast %28 : vector<1x1x16xf32> to vector<1x16xf32>
    %cst_28 = arith.constant dense<0.000000e+00> : vector<8x48xf32>
    %30 = tpu.matmul %18, %27, %cst_28 {dimension_numbers = #tpu.dot_dimension_numbers<[1], [0], [0], [1], [0, 0, 1, 1], [], []>, precision = #tpu.contract_precision<fp32>} : vector<8x16xf32>, vector<16x48xf32>, vector<8x48xf32> -> vector<8x48xf32>
    %31 = vector.extract_strided_slice %25 {offsets = [0, 0], sizes = [8, 16], strides = [1, 1]} : vector<8x48xf32> to vector<8x16xf32>
    %32 = vector.extract_strided_slice %30 {offsets = [0, 0], sizes = [8, 16], strides = [1, 1]} : vector<8x48xf32> to vector<8x16xf32>
    %33 = arith.addf %31, %32 : vector<8x16xf32>
    %cst_29 = arith.constant 5.000000e-01 : f32
    %34 = vector.broadcast %cst_29 : f32 to vector<8x16xf32>
    %35 = arith.mulf %34, %33 : vector<8x16xf32>
    %36 = math.tanh %35 : vector<8x16xf32>
    %cst_30 = arith.constant 5.000000e-01 : f32
    %37 = vector.broadcast %cst_30 : f32 to vector<8x16xf32>
    %38 = arith.mulf %37, %36 : vector<8x16xf32>
    %cst_31 = arith.constant 5.000000e-01 : f32
    %39 = vector.broadcast %cst_31 : f32 to vector<8x16xf32>
    %40 = arith.addf %38, %39 : vector<8x16xf32>
    %41 = vector.extract_strided_slice %25 {offsets = [0, 16], sizes = [8, 16], strides = [1, 1]} : vector<8x48xf32> to vector<8x16xf32>
    %42 = vector.extract_strided_slice %30 {offsets = [0, 16], sizes = [8, 16], strides = [1, 1]} : vector<8x48xf32> to vector<8x16xf32>
    %43 = arith.addf %41, %42 : vector<8x16xf32>
    %cst_32 = arith.constant 5.000000e-01 : f32
    %44 = vector.broadcast %cst_32 : f32 to vector<8x16xf32>
    %45 = arith.mulf %44, %43 : vector<8x16xf32>
    %46 = math.tanh %45 : vector<8x16xf32>
    %cst_33 = arith.constant 5.000000e-01 : f32
    %47 = vector.broadcast %cst_33 : f32 to vector<8x16xf32>
    %48 = arith.mulf %47, %46 : vector<8x16xf32>
    %cst_34 = arith.constant 5.000000e-01 : f32
    %49 = vector.broadcast %cst_34 : f32 to vector<8x16xf32>
    %50 = arith.addf %48, %49 : vector<8x16xf32>
    %51 = vector.extract_strided_slice %25 {offsets = [0, 32], sizes = [8, 16], strides = [1, 1]} : vector<8x48xf32> to vector<8x16xf32>
    %52 = vector.extract_strided_slice %30 {offsets = [0, 32], sizes = [8, 16], strides = [1, 1]} : vector<8x48xf32> to vector<8x16xf32>
    %53 = vector.broadcast %29 : vector<1x16xf32> to vector<8x16xf32>
    %54 = arith.addf %52, %53 : vector<8x16xf32>
    %55 = arith.mulf %40, %54 : vector<8x16xf32>
    %56 = arith.addf %51, %55 : vector<8x16xf32>
    %57 = math.tanh %56 : vector<8x16xf32>
    %cst_35 = arith.constant 1.000000e+00 : f32
    %58 = vector.broadcast %cst_35 : f32 to vector<8x16xf32>
    %59 = arith.subf %58, %50 : vector<8x16xf32>
    %60 = arith.mulf %59, %57 : vector<8x16xf32>
    %61 = arith.mulf %50, %18 : vector<8x16xf32>
    %62 = arith.addf %60, %61 : vector<8x16xf32>
    %63 = arith.index_cast %23 : i32 to index
    %c0_36 = arith.constant 0 : index
    %64 = vector.load %arg14[%63, %c0_36] : memref<64x48xf32, #tpu.memory_space<vmem>>, vector<8x48xf32>
    %c0_37 = arith.constant 0 : index
    %c0_38 = arith.constant 0 : index
    %c0_39 = arith.constant 0 : index
    %65 = vector.load %arg7[%c0_37, %c0_38, %c0_39] : memref<2x16x48xf32, #tpu.memory_space<vmem>>, vector<1x16x48xf32>
    %66 = vector.shape_cast %65 : vector<1x16x48xf32> to vector<16x48xf32>
    %c0_40 = arith.constant 0 : index
    %c0_41 = arith.constant 0 : index
    %c0_42 = arith.constant 0 : index
    %67 = vector.load %arg9[%c0_40, %c0_41, %c0_42] : memref<2x1x16xf32, #tpu.memory_space<vmem>>, vector<1x1x16xf32>
    %68 = vector.shape_cast %67 : vector<1x1x16xf32> to vector<1x16xf32>
    %cst_43 = arith.constant dense<0.000000e+00> : vector<8x48xf32>
    %69 = tpu.matmul %18, %66, %cst_43 {dimension_numbers = #tpu.dot_dimension_numbers<[1], [0], [0], [1], [0, 0, 1, 1], [], []>, precision = #tpu.contract_precision<fp32>} : vector<8x16xf32>, vector<16x48xf32>, vector<8x48xf32> -> vector<8x48xf32>
    %70 = vector.extract_strided_slice %64 {offsets = [0, 0], sizes = [8, 16], strides = [1, 1]} : vector<8x48xf32> to vector<8x16xf32>
    %71 = vector.extract_strided_slice %69 {offsets = [0, 0], sizes = [8, 16], strides = [1, 1]} : vector<8x48xf32> to vector<8x16xf32>
    %72 = arith.addf %70, %71 : vector<8x16xf32>
    %cst_44 = arith.constant 5.000000e-01 : f32
    %73 = vector.broadcast %cst_44 : f32 to vector<8x16xf32>
    %74 = arith.mulf %73, %72 : vector<8x16xf32>
    %75 = math.tanh %74 : vector<8x16xf32>
    %cst_45 = arith.constant 5.000000e-01 : f32
    %76 = vector.broadcast %cst_45 : f32 to vector<8x16xf32>
    %77 = arith.mulf %76, %75 : vector<8x16xf32>
    %cst_46 = arith.constant 5.000000e-01 : f32
    %78 = vector.broadcast %cst_46 : f32 to vector<8x16xf32>
    %79 = arith.addf %77, %78 : vector<8x16xf32>
    %80 = vector.extract_strided_slice %64 {offsets = [0, 16], sizes = [8, 16], strides = [1, 1]} : vector<8x48xf32> to vector<8x16xf32>
    %81 = vector.extract_strided_slice %69 {offsets = [0, 16], sizes = [8, 16], strides = [1, 1]} : vector<8x48xf32> to vector<8x16xf32>
    %82 = arith.addf %80, %81 : vector<8x16xf32>
    %cst_47 = arith.constant 5.000000e-01 : f32
    %83 = vector.broadcast %cst_47 : f32 to vector<8x16xf32>
    %84 = arith.mulf %83, %82 : vector<8x16xf32>
    %85 = math.tanh %84 : vector<8x16xf32>
    %cst_48 = arith.constant 5.000000e-01 : f32
    %86 = vector.broadcast %cst_48 : f32 to vector<8x16xf32>
    %87 = arith.mulf %86, %85 : vector<8x16xf32>
    %cst_49 = arith.constant 5.000000e-01 : f32
    %88 = vector.broadcast %cst_49 : f32 to vector<8x16xf32>
    %89 = arith.addf %87, %88 : vector<8x16xf32>
    %90 = vector.extract_strided_slice %64 {offsets = [0, 32], sizes = [8, 16], strides = [1, 1]} : vector<8x48xf32> to vector<8x16xf32>
    %91 = vector.extract_strided_slice %69 {offsets = [0, 32], sizes = [8, 16], strides = [1, 1]} : vector<8x48xf32> to vector<8x16xf32>
    %92 = vector.broadcast %68 : vector<1x16xf32> to vector<8x16xf32>
    %93 = arith.addf %91, %92 : vector<8x16xf32>
    %94 = arith.mulf %79, %93 : vector<8x16xf32>
    %95 = arith.addf %90, %94 : vector<8x16xf32>
    %96 = math.tanh %95 : vector<8x16xf32>
    %cst_50 = arith.constant 1.000000e+00 : f32
    %97 = vector.broadcast %cst_50 : f32 to vector<8x16xf32>
    %98 = arith.subf %97, %89 : vector<8x16xf32>
    %99 = arith.mulf %98, %96 : vector<8x16xf32>
    %100 = arith.mulf %89, %18 : vector<8x16xf32>
    %101 = arith.addf %99, %100 : vector<8x16xf32>
    %102 = arith.index_cast %20 : i32 to index
    %c0_51 = arith.constant 0 : index
    %103 = vector.load %arg15[%102, %c0_51] : memref<64x32xf32, #tpu.memory_space<vmem>>, vector<8x16xf32>
    tpu.vector_store %arg15[%102, %c0_51], %62 {strides = array<i32>} : memref<64x32xf32, #tpu.memory_space<vmem>>, vector<8x16xf32>,
    %104 = arith.index_cast %23 : i32 to index
    %c16 = arith.constant 16 : index
    %105 = vector.load %arg15[%104, %c16] : memref<64x32xf32, #tpu.memory_space<vmem>>, vector<8x16xf32>
    tpu.vector_store %arg15[%104, %c16], %101 {strides = array<i32>} : memref<64x32xf32, #tpu.memory_space<vmem>>, vector<8x16xf32>,
    %c1_i32 = arith.constant 1 : i32
    %c8_i32_52 = arith.constant 8 : i32
    %106 = arith.muli %c1_i32, %c8_i32_52 : i32
    %107 = tpu.assume_multiple %106, 8 : i32
    %c7_i32_53 = arith.constant 7 : i32
    %108 = arith.subi %c7_i32_53, %c1_i32 : i32
    %c8_i32_54 = arith.constant 8 : i32
    %109 = arith.muli %108, %c8_i32_54 : i32
    %110 = tpu.assume_multiple %109, 8 : i32
    %111 = arith.index_cast %107 : i32 to index
    %c0_55 = arith.constant 0 : index
    %112 = vector.load %arg13[%111, %c0_55] : memref<64x48xf32, #tpu.memory_space<vmem>>, vector<8x48xf32>
    %c0_56 = arith.constant 0 : index
    %c0_57 = arith.constant 0 : index
    %c0_58 = arith.constant 0 : index
    %113 = vector.load %arg6[%c0_56, %c0_57, %c0_58] : memref<2x16x48xf32, #tpu.memory_space<vmem>>, vector<1x16x48xf32>
    %114 = vector.shape_cast %113 : vector<1x16x48xf32> to vector<16x48xf32>
    %c0_59 = arith.constant 0 : index
    %c0_60 = arith.constant 0 : index
    %c0_61 = arith.constant 0 : index
    %115 = vector.load %arg8[%c0_59, %c0_60, %c0_61] : memref<2x1x16xf32, #tpu.memory_space<vmem>>, vector<1x1x16xf32>
    %116 = vector.shape_cast %115 : vector<1x1x16xf32> to vector<1x16xf32>
    %cst_62 = arith.constant dense<0.000000e+00> : vector<8x48xf32>
    %117 = tpu.matmul %62, %114, %cst_62 {dimension_numbers = #tpu.dot_dimension_numbers<[1], [0], [0], [1], [0, 0, 1, 1], [], []>, precision = #tpu.contract_precision<fp32>} : vector<8x16xf32>, vector<16x48xf32>, vector<8x48xf32> -> vector<8x48xf32>
    %118 = vector.extract_strided_slice %112 {offsets = [0, 0], sizes = [8, 16], strides = [1, 1]} : vector<8x48xf32> to vector<8x16xf32>
    %119 = vector.extract_strided_slice %117 {offsets = [0, 0], sizes = [8, 16], strides = [1, 1]} : vector<8x48xf32> to vector<8x16xf32>
    %120 = arith.addf %118, %119 : vector<8x16xf32>
    %cst_63 = arith.constant 5.000000e-01 : f32
    %121 = vector.broadcast %cst_63 : f32 to vector<8x16xf32>
    %122 = arith.mulf %121, %120 : vector<8x16xf32>
    %123 = math.tanh %122 : vector<8x16xf32>
    %cst_64 = arith.constant 5.000000e-01 : f32
    %124 = vector.broadcast %cst_64 : f32 to vector<8x16xf32>
    %125 = arith.mulf %124, %123 : vector<8x16xf32>
    %cst_65 = arith.constant 5.000000e-01 : f32
    %126 = vector.broadcast %cst_65 : f32 to vector<8x16xf32>
    %127 = arith.addf %125, %126 : vector<8x16xf32>
    %128 = vector.extract_strided_slice %112 {offsets = [0, 16], sizes = [8, 16], strides = [1, 1]} : vector<8x48xf32> to vector<8x16xf32>
    %129 = vector.extract_strided_slice %117 {offsets = [0, 16], sizes = [8, 16], strides = [1, 1]} : vector<8x48xf32> to vector<8x16xf32>
    %130 = arith.addf %128, %129 : vector<8x16xf32>
    %cst_66 = arith.constant 5.000000e-01 : f32
    %131 = vector.broadcast %cst_66 : f32 to vector<8x16xf32>
    %132 = arith.mulf %131, %130 : vector<8x16xf32>
    %133 = math.tanh %132 : vector<8x16xf32>
    %cst_67 = arith.constant 5.000000e-01 : f32
    %134 = vector.broadcast %cst_67 : f32 to vector<8x16xf32>
    %135 = arith.mulf %134, %133 : vector<8x16xf32>
    %cst_68 = arith.constant 5.000000e-01 : f32
    %136 = vector.broadcast %cst_68 : f32 to vector<8x16xf32>
    %137 = arith.addf %135, %136 : vector<8x16xf32>
    %138 = vector.extract_strided_slice %112 {offsets = [0, 32], sizes = [8, 16], strides = [1, 1]} : vector<8x48xf32> to vector<8x16xf32>
    %139 = vector.extract_strided_slice %117 {offsets = [0, 32], sizes = [8, 16], strides = [1, 1]} : vector<8x48xf32> to vector<8x16xf32>
    %140 = vector.broadcast %116 : vector<1x16xf32> to vector<8x16xf32>
    %141 = arith.addf %139, %140 : vector<8x16xf32>
    %142 = arith.mulf %127, %141 : vector<8x16xf32>
    %143 = arith.addf %138, %142 : vector<8x16xf32>
    %144 = math.tanh %143 : vector<8x16xf32>
    %cst_69 = arith.constant 1.000000e+00 : f32
    %145 = vector.broadcast %cst_69 : f32 to vector<8x16xf32>
    %146 = arith.subf %145, %137 : vector<8x16xf32>
    %147 = arith.mulf %146, %144 : vector<8x16xf32>
    %148 = arith.mulf %137, %62 : vector<8x16xf32>
    %149 = arith.addf %147, %148 : vector<8x16xf32>
    %150 = arith.index_cast %110 : i32 to index
    %c0_70 = arith.constant 0 : index
    %151 = vector.load %arg14[%150, %c0_70] : memref<64x48xf32, #tpu.memory_space<vmem>>, vector<8x48xf32>
    %c0_71 = arith.constant 0 : index
    %c0_72 = arith.constant 0 : index
    %c0_73 = arith.constant 0 : index
    %152 = vector.load %arg7[%c0_71, %c0_72, %c0_73] : memref<2x16x48xf32, #tpu.memory_space<vmem>>, vector<1x16x48xf32>
    %153 = vector.shape_cast %152 : vector<1x16x48xf32> to vector<16x48xf32>
    %c0_74 = arith.constant 0 : index
    %c0_75 = arith.constant 0 : index
    %c0_76 = arith.constant 0 : index
    %154 = vector.load %arg9[%c0_74, %c0_75, %c0_76] : memref<2x1x16xf32, #tpu.memory_space<vmem>>, vector<1x1x16xf32>
    %155 = vector.shape_cast %154 : vector<1x1x16xf32> to vector<1x16xf32>
    %cst_77 = arith.constant dense<0.000000e+00> : vector<8x48xf32>
    %156 = tpu.matmul %101, %153, %cst_77 {dimension_numbers = #tpu.dot_dimension_numbers<[1], [0], [0], [1], [0, 0, 1, 1], [], []>, precision = #tpu.contract_precision<fp32>} : vector<8x16xf32>, vector<16x48xf32>, vector<8x48xf32> -> vector<8x48xf32>
    %157 = vector.extract_strided_slice %151 {offsets = [0, 0], sizes = [8, 16], strides = [1, 1]} : vector<8x48xf32> to vector<8x16xf32>
    %158 = vector.extract_strided_slice %156 {offsets = [0, 0], sizes = [8, 16], strides = [1, 1]} : vector<8x48xf32> to vector<8x16xf32>
    %159 = arith.addf %157, %158 : vector<8x16xf32>
    %cst_78 = arith.constant 5.000000e-01 : f32
    %160 = vector.broadcast %cst_78 : f32 to vector<8x16xf32>
    %161 = arith.mulf %160, %159 : vector<8x16xf32>
    %162 = math.tanh %161 : vector<8x16xf32>
    %cst_79 = arith.constant 5.000000e-01 : f32
    %163 = vector.broadcast %cst_79 : f32 to vector<8x16xf32>
    %164 = arith.mulf %163, %162 : vector<8x16xf32>
    %cst_80 = arith.constant 5.000000e-01 : f32
    %165 = vector.broadcast %cst_80 : f32 to vector<8x16xf32>
    %166 = arith.addf %164, %165 : vector<8x16xf32>
    %167 = vector.extract_strided_slice %151 {offsets = [0, 16], sizes = [8, 16], strides = [1, 1]} : vector<8x48xf32> to vector<8x16xf32>
    %168 = vector.extract_strided_slice %156 {offsets = [0, 16], sizes = [8, 16], strides = [1, 1]} : vector<8x48xf32> to vector<8x16xf32>
    %169 = arith.addf %167, %168 : vector<8x16xf32>
    %cst_81 = arith.constant 5.000000e-01 : f32
    %170 = vector.broadcast %cst_81 : f32 to vector<8x16xf32>
    %171 = arith.mulf %170, %169 : vector<8x16xf32>
    %172 = math.tanh %171 : vector<8x16xf32>
    %cst_82 = arith.constant 5.000000e-01 : f32
    %173 = vector.broadcast %cst_82 : f32 to vector<8x16xf32>
    %174 = arith.mulf %173, %172 : vector<8x16xf32>
    %cst_83 = arith.constant 5.000000e-01 : f32
    %175 = vector.broadcast %cst_83 : f32 to vector<8x16xf32>
    %176 = arith.addf %174, %175 : vector<8x16xf32>
    %177 = vector.extract_strided_slice %151 {offsets = [0, 32], sizes = [8, 16], strides = [1, 1]} : vector<8x48xf32> to vector<8x16xf32>
    %178 = vector.extract_strided_slice %156 {offsets = [0, 32], sizes = [8, 16], strides = [1, 1]} : vector<8x48xf32> to vector<8x16xf32>
    %179 = vector.broadcast %155 : vector<1x16xf32> to vector<8x16xf32>
    %180 = arith.addf %178, %179 : vector<8x16xf32>
    %181 = arith.mulf %166, %180 : vector<8x16xf32>
    %182 = arith.addf %177, %181 : vector<8x16xf32>
    %183 = math.tanh %182 : vector<8x16xf32>
    %cst_84 = arith.constant 1.000000e+00 : f32
    %184 = vector.broadcast %cst_84 : f32 to vector<8x16xf32>
    %185 = arith.subf %184, %176 : vector<8x16xf32>
    %186 = arith.mulf %185, %183 : vector<8x16xf32>
    %187 = arith.mulf %176, %101 : vector<8x16xf32>
    %188 = arith.addf %186, %187 : vector<8x16xf32>
    %189 = arith.index_cast %107 : i32 to index
    %c0_85 = arith.constant 0 : index
    %190 = vector.load %arg15[%189, %c0_85] : memref<64x32xf32, #tpu.memory_space<vmem>>, vector<8x16xf32>
    tpu.vector_store %arg15[%189, %c0_85], %149 {strides = array<i32>} : memref<64x32xf32, #tpu.memory_space<vmem>>, vector<8x16xf32>,
    %191 = arith.index_cast %110 : i32 to index
    %c16_86 = arith.constant 16 : index
    %192 = vector.load %arg15[%191, %c16_86] : memref<64x32xf32, #tpu.memory_space<vmem>>, vector<8x16xf32>
    tpu.vector_store %arg15[%191, %c16_86], %188 {strides = array<i32>} : memref<64x32xf32, #tpu.memory_space<vmem>>, vector<8x16xf32>,
    %c2_i32 = arith.constant 2 : i32
    %c8_i32_87 = arith.constant 8 : i32
    %193 = arith.muli %c2_i32, %c8_i32_87 : i32
    %194 = tpu.assume_multiple %193, 8 : i32
    %c7_i32_88 = arith.constant 7 : i32
    %195 = arith.subi %c7_i32_88, %c2_i32 : i32
    %c8_i32_89 = arith.constant 8 : i32
    %196 = arith.muli %195, %c8_i32_89 : i32
    %197 = tpu.assume_multiple %196, 8 : i32
    %198 = arith.index_cast %194 : i32 to index
    %c0_90 = arith.constant 0 : index
    %199 = vector.load %arg13[%198, %c0_90] : memref<64x48xf32, #tpu.memory_space<vmem>>, vector<8x48xf32>
    %c0_91 = arith.constant 0 : index
    %c0_92 = arith.constant 0 : index
    %c0_93 = arith.constant 0 : index
    %200 = vector.load %arg6[%c0_91, %c0_92, %c0_93] : memref<2x16x48xf32, #tpu.memory_space<vmem>>, vector<1x16x48xf32>
    %201 = vector.shape_cast %200 : vector<1x16x48xf32> to vector<16x48xf32>
    %c0_94 = arith.constant 0 : index
    %c0_95 = arith.constant 0 : index
    %c0_96 = arith.constant 0 : index
    %202 = vector.load %arg8[%c0_94, %c0_95, %c0_96] : memref<2x1x16xf32, #tpu.memory_space<vmem>>, vector<1x1x16xf32>
    %203 = vector.shape_cast %202 : vector<1x1x16xf32> to vector<1x16xf32>
    %cst_97 = arith.constant dense<0.000000e+00> : vector<8x48xf32>
    %204 = tpu.matmul %149, %201, %cst_97 {dimension_numbers = #tpu.dot_dimension_numbers<[1], [0], [0], [1], [0, 0, 1, 1], [], []>, precision = #tpu.contract_precision<fp32>} : vector<8x16xf32>, vector<16x48xf32>, vector<8x48xf32> -> vector<8x48xf32>
    %205 = vector.extract_strided_slice %199 {offsets = [0, 0], sizes = [8, 16], strides = [1, 1]} : vector<8x48xf32> to vector<8x16xf32>
    %206 = vector.extract_strided_slice %204 {offsets = [0, 0], sizes = [8, 16], strides = [1, 1]} : vector<8x48xf32> to vector<8x16xf32>
    %207 = arith.addf %205, %206 : vector<8x16xf32>
    %cst_98 = arith.constant 5.000000e-01 : f32
    %208 = vector.broadcast %cst_98 : f32 to vector<8x16xf32>
    %209 = arith.mulf %208, %207 : vector<8x16xf32>
    %210 = math.tanh %209 : vector<8x16xf32>
    %cst_99 = arith.constant 5.000000e-01 : f32
    %211 = vector.broadcast %cst_99 : f32 to vector<8x16xf32>
    %212 = arith.mulf %211, %210 : vector<8x16xf32>
    %cst_100 = arith.constant 5.000000e-01 : f32
    %213 = vector.broadcast %cst_100 : f32 to vector<8x16xf32>
    %214 = arith.addf %212, %213 : vector<8x16xf32>
    %215 = vector.extract_strided_slice %199 {offsets = [0, 16], sizes = [8, 16], strides = [1, 1]} : vector<8x48xf32> to vector<8x16xf32>
    %216 = vector.extract_strided_slice %204 {offsets = [0, 16], sizes = [8, 16], strides = [1, 1]} : vector<8x48xf32> to vector<8x16xf32>
    %217 = arith.addf %215, %216 : vector<8x16xf32>
    %cst_101 = arith.constant 5.000000e-01 : f32
    %218 = vector.broadcast %cst_101 : f32 to vector<8x16xf32>
    %219 = arith.mulf %218, %217 : vector<8x16xf32>
    %220 = math.tanh %219 : vector<8x16xf32>
    %cst_102 = arith.constant 5.000000e-01 : f32
    %221 = vector.broadcast %cst_102 : f32 to vector<8x16xf32>
    %222 = arith.mulf %221, %220 : vector<8x16xf32>
    %cst_103 = arith.constant 5.000000e-01 : f32
    %223 = vector.broadcast %cst_103 : f32 to vector<8x16xf32>
    %224 = arith.addf %222, %223 : vector<8x16xf32>
    %225 = vector.extract_strided_slice %199 {offsets = [0, 32], sizes = [8, 16], strides = [1, 1]} : vector<8x48xf32> to vector<8x16xf32>
    %226 = vector.extract_strided_slice %204 {offsets = [0, 32], sizes = [8, 16], strides = [1, 1]} : vector<8x48xf32> to vector<8x16xf32>
    %227 = vector.broadcast %203 : vector<1x16xf32> to vector<8x16xf32>
    %228 = arith.addf %226, %227 : vector<8x16xf32>
    %229 = arith.mulf %214, %228 : vector<8x16xf32>
    %230 = arith.addf %225, %229 : vector<8x16xf32>
    %231 = math.tanh %230 : vector<8x16xf32>
    %cst_104 = arith.constant 1.000000e+00 : f32
    %232 = vector.broadcast %cst_104 : f32 to vector<8x16xf32>
    %233 = arith.subf %232, %224 : vector<8x16xf32>
    %234 = arith.mulf %233, %231 : vector<8x16xf32>
    %235 = arith.mulf %224, %149 : vector<8x16xf32>
    %236 = arith.addf %234, %235 : vector<8x16xf32>
    %237 = arith.index_cast %197 : i32 to index
    %c0_105 = arith.constant 0 : index
    %238 = vector.load %arg14[%237, %c0_105] : memref<64x48xf32, #tpu.memory_space<vmem>>, vector<8x48xf32>
    %c0_106 = arith.constant 0 : index
    %c0_107 = arith.constant 0 : index
    %c0_108 = arith.constant 0 : index
    %239 = vector.load %arg7[%c0_106, %c0_107, %c0_108] : memref<2x16x48xf32, #tpu.memory_space<vmem>>, vector<1x16x48xf32>
    %240 = vector.shape_cast %239 : vector<1x16x48xf32> to vector<16x48xf32>
    %c0_109 = arith.constant 0 : index
    %c0_110 = arith.constant 0 : index
    %c0_111 = arith.constant 0 : index
    %241 = vector.load %arg9[%c0_109, %c0_110, %c0_111] : memref<2x1x16xf32, #tpu.memory_space<vmem>>, vector<1x1x16xf32>
    %242 = vector.shape_cast %241 : vector<1x1x16xf32> to vector<1x16xf32>
    %cst_112 = arith.constant dense<0.000000e+00> : vector<8x48xf32>
    %243 = tpu.matmul %188, %240, %cst_112 {dimension_numbers = #tpu.dot_dimension_numbers<[1], [0], [0], [1], [0, 0, 1, 1], [], []>, precision = #tpu.contract_precision<fp32>} : vector<8x16xf32>, vector<16x48xf32>, vector<8x48xf32> -> vector<8x48xf32>
    %244 = vector.extract_strided_slice %238 {offsets = [0, 0], sizes = [8, 16], strides = [1, 1]} : vector<8x48xf32> to vector<8x16xf32>
    %245 = vector.extract_strided_slice %243 {offsets = [0, 0], sizes = [8, 16], strides = [1, 1]} : vector<8x48xf32> to vector<8x16xf32>
    %246 = arith.addf %244, %245 : vector<8x16xf32>
    %cst_113 = arith.constant 5.000000e-01 : f32
    %247 = vector.broadcast %cst_113 : f32 to vector<8x16xf32>
    %248 = arith.mulf %247, %246 : vector<8x16xf32>
    %249 = math.tanh %248 : vector<8x16xf32>
    %cst_114 = arith.constant 5.000000e-01 : f32
    %250 = vector.broadcast %cst_114 : f32 to vector<8x16xf32>
    %251 = arith.mulf %250, %249 : vector<8x16xf32>
    %cst_115 = arith.constant 5.000000e-01 : f32
    %252 = vector.broadcast %cst_115 : f32 to vector<8x16xf32>
    %253 = arith.addf %251, %252 : vector<8x16xf32>
    %254 = vector.extract_strided_slice %238 {offsets = [0, 16], sizes = [8, 16], strides = [1, 1]} : vector<8x48xf32> to vector<8x16xf32>
    %255 = vector.extract_strided_slice %243 {offsets = [0, 16], sizes = [8, 16], strides = [1, 1]} : vector<8x48xf32> to vector<8x16xf32>
    %256 = arith.addf %254, %255 : vector<8x16xf32>
    %cst_116 = arith.constant 5.000000e-01 : f32
    %257 = vector.broadcast %cst_116 : f32 to vector<8x16xf32>
    %258 = arith.mulf %257, %256 : vector<8x16xf32>
    %259 = math.tanh %258 : vector<8x16xf32>
    %cst_117 = arith.constant 5.000000e-01 : f32
    %260 = vector.broadcast %cst_117 : f32 to vector<8x16xf32>
    %261 = arith.mulf %260, %259 : vector<8x16xf32>
    %cst_118 = arith.constant 5.000000e-01 : f32
    %262 = vector.broadcast %cst_118 : f32 to vector<8x16xf32>
    %263 = arith.addf %261, %262 : vector<8x16xf32>
    %264 = vector.extract_strided_slice %238 {offsets = [0, 32], sizes = [8, 16], strides = [1, 1]} : vector<8x48xf32> to vector<8x16xf32>
    %265 = vector.extract_strided_slice %243 {offsets = [0, 32], sizes = [8, 16], strides = [1, 1]} : vector<8x48xf32> to vector<8x16xf32>
    %266 = vector.broadcast %242 : vector<1x16xf32> to vector<8x16xf32>
    %267 = arith.addf %265, %266 : vector<8x16xf32>
    %268 = arith.mulf %253, %267 : vector<8x16xf32>
    %269 = arith.addf %264, %268 : vector<8x16xf32>
    %270 = math.tanh %269 : vector<8x16xf32>
    %cst_119 = arith.constant 1.000000e+00 : f32
    %271 = vector.broadcast %cst_119 : f32 to vector<8x16xf32>
    %272 = arith.subf %271, %263 : vector<8x16xf32>
    %273 = arith.mulf %272, %270 : vector<8x16xf32>
    %274 = arith.mulf %263, %188 : vector<8x16xf32>
    %275 = arith.addf %273, %274 : vector<8x16xf32>
    %276 = arith.index_cast %194 : i32 to index
    %c0_120 = arith.constant 0 : index
    %277 = vector.load %arg15[%276, %c0_120] : memref<64x32xf32, #tpu.memory_space<vmem>>, vector<8x16xf32>
    tpu.vector_store %arg15[%276, %c0_120], %236 {strides = array<i32>} : memref<64x32xf32, #tpu.memory_space<vmem>>, vector<8x16xf32>,
    %278 = arith.index_cast %197 : i32 to index
    %c16_121 = arith.constant 16 : index
    %279 = vector.load %arg15[%278, %c16_121] : memref<64x32xf32, #tpu.memory_space<vmem>>, vector<8x16xf32>
    tpu.vector_store %arg15[%278, %c16_121], %275 {strides = array<i32>} : memref<64x32xf32, #tpu.memory_space<vmem>>, vector<8x16xf32>,
    %c3_i32 = arith.constant 3 : i32
    %c8_i32_122 = arith.constant 8 : i32
    %280 = arith.muli %c3_i32, %c8_i32_122 : i32
    %281 = tpu.assume_multiple %280, 8 : i32
    %c7_i32_123 = arith.constant 7 : i32
    %282 = arith.subi %c7_i32_123, %c3_i32 : i32
    %c8_i32_124 = arith.constant 8 : i32
    %283 = arith.muli %282, %c8_i32_124 : i32
    %284 = tpu.assume_multiple %283, 8 : i32
    %285 = arith.index_cast %281 : i32 to index
    %c0_125 = arith.constant 0 : index
    %286 = vector.load %arg13[%285, %c0_125] : memref<64x48xf32, #tpu.memory_space<vmem>>, vector<8x48xf32>
    %c0_126 = arith.constant 0 : index
    %c0_127 = arith.constant 0 : index
    %c0_128 = arith.constant 0 : index
    %287 = vector.load %arg6[%c0_126, %c0_127, %c0_128] : memref<2x16x48xf32, #tpu.memory_space<vmem>>, vector<1x16x48xf32>
    %288 = vector.shape_cast %287 : vector<1x16x48xf32> to vector<16x48xf32>
    %c0_129 = arith.constant 0 : index
    %c0_130 = arith.constant 0 : index
    %c0_131 = arith.constant 0 : index
    %289 = vector.load %arg8[%c0_129, %c0_130, %c0_131] : memref<2x1x16xf32, #tpu.memory_space<vmem>>, vector<1x1x16xf32>
    %290 = vector.shape_cast %289 : vector<1x1x16xf32> to vector<1x16xf32>
    %cst_132 = arith.constant dense<0.000000e+00> : vector<8x48xf32>
    %291 = tpu.matmul %236, %288, %cst_132 {dimension_numbers = #tpu.dot_dimension_numbers<[1], [0], [0], [1], [0, 0, 1, 1], [], []>, precision = #tpu.contract_precision<fp32>} : vector<8x16xf32>, vector<16x48xf32>, vector<8x48xf32> -> vector<8x48xf32>
    %292 = vector.extract_strided_slice %286 {offsets = [0, 0], sizes = [8, 16], strides = [1, 1]} : vector<8x48xf32> to vector<8x16xf32>
    %293 = vector.extract_strided_slice %291 {offsets = [0, 0], sizes = [8, 16], strides = [1, 1]} : vector<8x48xf32> to vector<8x16xf32>
    %294 = arith.addf %292, %293 : vector<8x16xf32>
    %cst_133 = arith.constant 5.000000e-01 : f32
    %295 = vector.broadcast %cst_133 : f32 to vector<8x16xf32>
    %296 = arith.mulf %295, %294 : vector<8x16xf32>
    %297 = math.tanh %296 : vector<8x16xf32>
    %cst_134 = arith.constant 5.000000e-01 : f32
    %298 = vector.broadcast %cst_134 : f32 to vector<8x16xf32>
    %299 = arith.mulf %298, %297 : vector<8x16xf32>
    %cst_135 = arith.constant 5.000000e-01 : f32
    %300 = vector.broadcast %cst_135 : f32 to vector<8x16xf32>
    %301 = arith.addf %299, %300 : vector<8x16xf32>
    %302 = vector.extract_strided_slice %286 {offsets = [0, 16], sizes = [8, 16], strides = [1, 1]} : vector<8x48xf32> to vector<8x16xf32>
    %303 = vector.extract_strided_slice %291 {offsets = [0, 16], sizes = [8, 16], strides = [1, 1]} : vector<8x48xf32> to vector<8x16xf32>
    %304 = arith.addf %302, %303 : vector<8x16xf32>
    %cst_136 = arith.constant 5.000000e-01 : f32
    %305 = vector.broadcast %cst_136 : f32 to vector<8x16xf32>
    %306 = arith.mulf %305, %304 : vector<8x16xf32>
    %307 = math.tanh %306 : vector<8x16xf32>
    %cst_137 = arith.constant 5.000000e-01 : f32
    %308 = vector.broadcast %cst_137 : f32 to vector<8x16xf32>
    %309 = arith.mulf %308, %307 : vector<8x16xf32>
    %cst_138 = arith.constant 5.000000e-01 : f32
    %310 = vector.broadcast %cst_138 : f32 to vector<8x16xf32>
    %311 = arith.addf %309, %310 : vector<8x16xf32>
    %312 = vector.extract_strided_slice %286 {offsets = [0, 32], sizes = [8, 16], strides = [1, 1]} : vector<8x48xf32> to vector<8x16xf32>
    %313 = vector.extract_strided_slice %291 {offsets = [0, 32], sizes = [8, 16], strides = [1, 1]} : vector<8x48xf32> to vector<8x16xf32>
    %314 = vector.broadcast %290 : vector<1x16xf32> to vector<8x16xf32>
    %315 = arith.addf %313, %314 : vector<8x16xf32>
    %316 = arith.mulf %301, %315 : vector<8x16xf32>
    %317 = arith.addf %312, %316 : vector<8x16xf32>
    %318 = math.tanh %317 : vector<8x16xf32>
    %cst_139 = arith.constant 1.000000e+00 : f32
    %319 = vector.broadcast %cst_139 : f32 to vector<8x16xf32>
    %320 = arith.subf %319, %311 : vector<8x16xf32>
    %321 = arith.mulf %320, %318 : vector<8x16xf32>
    %322 = arith.mulf %311, %236 : vector<8x16xf32>
    %323 = arith.addf %321, %322 : vector<8x16xf32>
    %324 = arith.index_cast %284 : i32 to index
    %c0_140 = arith.constant 0 : index
    %325 = vector.load %arg14[%324, %c0_140] : memref<64x48xf32, #tpu.memory_space<vmem>>, vector<8x48xf32>
    %c0_141 = arith.constant 0 : index
    %c0_142 = arith.constant 0 : index
    %c0_143 = arith.constant 0 : index
    %326 = vector.load %arg7[%c0_141, %c0_142, %c0_143] : memref<2x16x48xf32, #tpu.memory_space<vmem>>, vector<1x16x48xf32>
    %327 = vector.shape_cast %326 : vector<1x16x48xf32> to vector<16x48xf32>
    %c0_144 = arith.constant 0 : index
    %c0_145 = arith.constant 0 : index
    %c0_146 = arith.constant 0 : index
    %328 = vector.load %arg9[%c0_144, %c0_145, %c0_146] : memref<2x1x16xf32, #tpu.memory_space<vmem>>, vector<1x1x16xf32>
    %329 = vector.shape_cast %328 : vector<1x1x16xf32> to vector<1x16xf32>
    %cst_147 = arith.constant dense<0.000000e+00> : vector<8x48xf32>
    %330 = tpu.matmul %275, %327, %cst_147 {dimension_numbers = #tpu.dot_dimension_numbers<[1], [0], [0], [1], [0, 0, 1, 1], [], []>, precision = #tpu.contract_precision<fp32>} : vector<8x16xf32>, vector<16x48xf32>, vector<8x48xf32> -> vector<8x48xf32>
    %331 = vector.extract_strided_slice %325 {offsets = [0, 0], sizes = [8, 16], strides = [1, 1]} : vector<8x48xf32> to vector<8x16xf32>
    %332 = vector.extract_strided_slice %330 {offsets = [0, 0], sizes = [8, 16], strides = [1, 1]} : vector<8x48xf32> to vector<8x16xf32>
    %333 = arith.addf %331, %332 : vector<8x16xf32>
    %cst_148 = arith.constant 5.000000e-01 : f32
    %334 = vector.broadcast %cst_148 : f32 to vector<8x16xf32>
    %335 = arith.mulf %334, %333 : vector<8x16xf32>
    %336 = math.tanh %335 : vector<8x16xf32>
    %cst_149 = arith.constant 5.000000e-01 : f32
    %337 = vector.broadcast %cst_149 : f32 to vector<8x16xf32>
    %338 = arith.mulf %337, %336 : vector<8x16xf32>
    %cst_150 = arith.constant 5.000000e-01 : f32
    %339 = vector.broadcast %cst_150 : f32 to vector<8x16xf32>
    %340 = arith.addf %338, %339 : vector<8x16xf32>
    %341 = vector.extract_strided_slice %325 {offsets = [0, 16], sizes = [8, 16], strides = [1, 1]} : vector<8x48xf32> to vector<8x16xf32>
    %342 = vector.extract_strided_slice %330 {offsets = [0, 16], sizes = [8, 16], strides = [1, 1]} : vector<8x48xf32> to vector<8x16xf32>
    %343 = arith.addf %341, %342 : vector<8x16xf32>
    %cst_151 = arith.constant 5.000000e-01 : f32
    %344 = vector.broadcast %cst_151 : f32 to vector<8x16xf32>
    %345 = arith.mulf %344, %343 : vector<8x16xf32>
    %346 = math.tanh %345 : vector<8x16xf32>
    %cst_152 = arith.constant 5.000000e-01 : f32
    %347 = vector.broadcast %cst_152 : f32 to vector<8x16xf32>
    %348 = arith.mulf %347, %346 : vector<8x16xf32>
    %cst_153 = arith.constant 5.000000e-01 : f32
    %349 = vector.broadcast %cst_153 : f32 to vector<8x16xf32>
    %350 = arith.addf %348, %349 : vector<8x16xf32>
    %351 = vector.extract_strided_slice %325 {offsets = [0, 32], sizes = [8, 16], strides = [1, 1]} : vector<8x48xf32> to vector<8x16xf32>
    %352 = vector.extract_strided_slice %330 {offsets = [0, 32], sizes = [8, 16], strides = [1, 1]} : vector<8x48xf32> to vector<8x16xf32>
    %353 = vector.broadcast %329 : vector<1x16xf32> to vector<8x16xf32>
    %354 = arith.addf %352, %353 : vector<8x16xf32>
    %355 = arith.mulf %340, %354 : vector<8x16xf32>
    %356 = arith.addf %351, %355 : vector<8x16xf32>
    %357 = math.tanh %356 : vector<8x16xf32>
    %cst_154 = arith.constant 1.000000e+00 : f32
    %358 = vector.broadcast %cst_154 : f32 to vector<8x16xf32>
    %359 = arith.subf %358, %350 : vector<8x16xf32>
    %360 = arith.mulf %359, %357 : vector<8x16xf32>
    %361 = arith.mulf %350, %275 : vector<8x16xf32>
    %362 = arith.addf %360, %361 : vector<8x16xf32>
    %363 = arith.index_cast %281 : i32 to index
    %c0_155 = arith.constant 0 : index
    %364 = vector.load %arg15[%363, %c0_155] : memref<64x32xf32, #tpu.memory_space<vmem>>, vector<8x16xf32>
    tpu.vector_store %arg15[%363, %c0_155], %323 {strides = array<i32>} : memref<64x32xf32, #tpu.memory_space<vmem>>, vector<8x16xf32>,
    %365 = arith.index_cast %284 : i32 to index
    %c16_156 = arith.constant 16 : index
    %366 = vector.load %arg15[%365, %c16_156] : memref<64x32xf32, #tpu.memory_space<vmem>>, vector<8x16xf32>
    tpu.vector_store %arg15[%365, %c16_156], %362 {strides = array<i32>} : memref<64x32xf32, #tpu.memory_space<vmem>>, vector<8x16xf32>,
    %c4_i32 = arith.constant 4 : i32
    %c8_i32_157 = arith.constant 8 : i32
    %367 = arith.muli %c4_i32, %c8_i32_157 : i32
    %368 = tpu.assume_multiple %367, 8 : i32
    %c7_i32_158 = arith.constant 7 : i32
    %369 = arith.subi %c7_i32_158, %c4_i32 : i32
    %c8_i32_159 = arith.constant 8 : i32
    %370 = arith.muli %369, %c8_i32_159 : i32
    %371 = tpu.assume_multiple %370, 8 : i32
    %372 = arith.index_cast %368 : i32 to index
    %c0_160 = arith.constant 0 : index
    %373 = vector.load %arg13[%372, %c0_160] : memref<64x48xf32, #tpu.memory_space<vmem>>, vector<8x48xf32>
    %c0_161 = arith.constant 0 : index
    %c0_162 = arith.constant 0 : index
    %c0_163 = arith.constant 0 : index
    %374 = vector.load %arg6[%c0_161, %c0_162, %c0_163] : memref<2x16x48xf32, #tpu.memory_space<vmem>>, vector<1x16x48xf32>
    %375 = vector.shape_cast %374 : vector<1x16x48xf32> to vector<16x48xf32>
    %c0_164 = arith.constant 0 : index
    %c0_165 = arith.constant 0 : index
    %c0_166 = arith.constant 0 : index
    %376 = vector.load %arg8[%c0_164, %c0_165, %c0_166] : memref<2x1x16xf32, #tpu.memory_space<vmem>>, vector<1x1x16xf32>
    %377 = vector.shape_cast %376 : vector<1x1x16xf32> to vector<1x16xf32>
    %cst_167 = arith.constant dense<0.000000e+00> : vector<8x48xf32>
    %378 = tpu.matmul %323, %375, %cst_167 {dimension_numbers = #tpu.dot_dimension_numbers<[1], [0], [0], [1], [0, 0, 1, 1], [], []>, precision = #tpu.contract_precision<fp32>} : vector<8x16xf32>, vector<16x48xf32>, vector<8x48xf32> -> vector<8x48xf32>
    %379 = vector.extract_strided_slice %373 {offsets = [0, 0], sizes = [8, 16], strides = [1, 1]} : vector<8x48xf32> to vector<8x16xf32>
    %380 = vector.extract_strided_slice %378 {offsets = [0, 0], sizes = [8, 16], strides = [1, 1]} : vector<8x48xf32> to vector<8x16xf32>
    %381 = arith.addf %379, %380 : vector<8x16xf32>
    %cst_168 = arith.constant 5.000000e-01 : f32
    %382 = vector.broadcast %cst_168 : f32 to vector<8x16xf32>
    %383 = arith.mulf %382, %381 : vector<8x16xf32>
    %384 = math.tanh %383 : vector<8x16xf32>
    %cst_169 = arith.constant 5.000000e-01 : f32
    %385 = vector.broadcast %cst_169 : f32 to vector<8x16xf32>
    %386 = arith.mulf %385, %384 : vector<8x16xf32>
    %cst_170 = arith.constant 5.000000e-01 : f32
    %387 = vector.broadcast %cst_170 : f32 to vector<8x16xf32>
    %388 = arith.addf %386, %387 : vector<8x16xf32>
    %389 = vector.extract_strided_slice %373 {offsets = [0, 16], sizes = [8, 16], strides = [1, 1]} : vector<8x48xf32> to vector<8x16xf32>
    %390 = vector.extract_strided_slice %378 {offsets = [0, 16], sizes = [8, 16], strides = [1, 1]} : vector<8x48xf32> to vector<8x16xf32>
    %391 = arith.addf %389, %390 : vector<8x16xf32>
    %cst_171 = arith.constant 5.000000e-01 : f32
    %392 = vector.broadcast %cst_171 : f32 to vector<8x16xf32>
    %393 = arith.mulf %392, %391 : vector<8x16xf32>
    %394 = math.tanh %393 : vector<8x16xf32>
    %cst_172 = arith.constant 5.000000e-01 : f32
    %395 = vector.broadcast %cst_172 : f32 to vector<8x16xf32>
    %396 = arith.mulf %395, %394 : vector<8x16xf32>
    %cst_173 = arith.constant 5.000000e-01 : f32
    %397 = vector.broadcast %cst_173 : f32 to vector<8x16xf32>
    %398 = arith.addf %396, %397 : vector<8x16xf32>
    %399 = vector.extract_strided_slice %373 {offsets = [0, 32], sizes = [8, 16], strides = [1, 1]} : vector<8x48xf32> to vector<8x16xf32>
    %400 = vector.extract_strided_slice %378 {offsets = [0, 32], sizes = [8, 16], strides = [1, 1]} : vector<8x48xf32> to vector<8x16xf32>
    %401 = vector.broadcast %377 : vector<1x16xf32> to vector<8x16xf32>
    %402 = arith.addf %400, %401 : vector<8x16xf32>
    %403 = arith.mulf %388, %402 : vector<8x16xf32>
    %404 = arith.addf %399, %403 : vector<8x16xf32>
    %405 = math.tanh %404 : vector<8x16xf32>
    %cst_174 = arith.constant 1.000000e+00 : f32
    %406 = vector.broadcast %cst_174 : f32 to vector<8x16xf32>
    %407 = arith.subf %406, %398 : vector<8x16xf32>
    %408 = arith.mulf %407, %405 : vector<8x16xf32>
    %409 = arith.mulf %398, %323 : vector<8x16xf32>
    %410 = arith.addf %408, %409 : vector<8x16xf32>
    %411 = arith.index_cast %371 : i32 to index
    %c0_175 = arith.constant 0 : index
    %412 = vector.load %arg14[%411, %c0_175] : memref<64x48xf32, #tpu.memory_space<vmem>>, vector<8x48xf32>
    %c0_176 = arith.constant 0 : index
    %c0_177 = arith.constant 0 : index
    %c0_178 = arith.constant 0 : index
    %413 = vector.load %arg7[%c0_176, %c0_177, %c0_178] : memref<2x16x48xf32, #tpu.memory_space<vmem>>, vector<1x16x48xf32>
    %414 = vector.shape_cast %413 : vector<1x16x48xf32> to vector<16x48xf32>
    %c0_179 = arith.constant 0 : index
    %c0_180 = arith.constant 0 : index
    %c0_181 = arith.constant 0 : index
    %415 = vector.load %arg9[%c0_179, %c0_180, %c0_181] : memref<2x1x16xf32, #tpu.memory_space<vmem>>, vector<1x1x16xf32>
    %416 = vector.shape_cast %415 : vector<1x1x16xf32> to vector<1x16xf32>
    %cst_182 = arith.constant dense<0.000000e+00> : vector<8x48xf32>
    %417 = tpu.matmul %362, %414, %cst_182 {dimension_numbers = #tpu.dot_dimension_numbers<[1], [0], [0], [1], [0, 0, 1, 1], [], []>, precision = #tpu.contract_precision<fp32>} : vector<8x16xf32>, vector<16x48xf32>, vector<8x48xf32> -> vector<8x48xf32>
    %418 = vector.extract_strided_slice %412 {offsets = [0, 0], sizes = [8, 16], strides = [1, 1]} : vector<8x48xf32> to vector<8x16xf32>
    %419 = vector.extract_strided_slice %417 {offsets = [0, 0], sizes = [8, 16], strides = [1, 1]} : vector<8x48xf32> to vector<8x16xf32>
    %420 = arith.addf %418, %419 : vector<8x16xf32>
    %cst_183 = arith.constant 5.000000e-01 : f32
    %421 = vector.broadcast %cst_183 : f32 to vector<8x16xf32>
    %422 = arith.mulf %421, %420 : vector<8x16xf32>
    %423 = math.tanh %422 : vector<8x16xf32>
    %cst_184 = arith.constant 5.000000e-01 : f32
    %424 = vector.broadcast %cst_184 : f32 to vector<8x16xf32>
    %425 = arith.mulf %424, %423 : vector<8x16xf32>
    %cst_185 = arith.constant 5.000000e-01 : f32
    %426 = vector.broadcast %cst_185 : f32 to vector<8x16xf32>
    %427 = arith.addf %425, %426 : vector<8x16xf32>
    %428 = vector.extract_strided_slice %412 {offsets = [0, 16], sizes = [8, 16], strides = [1, 1]} : vector<8x48xf32> to vector<8x16xf32>
    %429 = vector.extract_strided_slice %417 {offsets = [0, 16], sizes = [8, 16], strides = [1, 1]} : vector<8x48xf32> to vector<8x16xf32>
    %430 = arith.addf %428, %429 : vector<8x16xf32>
    %cst_186 = arith.constant 5.000000e-01 : f32
    %431 = vector.broadcast %cst_186 : f32 to vector<8x16xf32>
    %432 = arith.mulf %431, %430 : vector<8x16xf32>
    %433 = math.tanh %432 : vector<8x16xf32>
    %cst_187 = arith.constant 5.000000e-01 : f32
    %434 = vector.broadcast %cst_187 : f32 to vector<8x16xf32>
    %435 = arith.mulf %434, %433 : vector<8x16xf32>
    %cst_188 = arith.constant 5.000000e-01 : f32
    %436 = vector.broadcast %cst_188 : f32 to vector<8x16xf32>
    %437 = arith.addf %435, %436 : vector<8x16xf32>
    %438 = vector.extract_strided_slice %412 {offsets = [0, 32], sizes = [8, 16], strides = [1, 1]} : vector<8x48xf32> to vector<8x16xf32>
    %439 = vector.extract_strided_slice %417 {offsets = [0, 32], sizes = [8, 16], strides = [1, 1]} : vector<8x48xf32> to vector<8x16xf32>
    %440 = vector.broadcast %416 : vector<1x16xf32> to vector<8x16xf32>
    %441 = arith.addf %439, %440 : vector<8x16xf32>
    %442 = arith.mulf %427, %441 : vector<8x16xf32>
    %443 = arith.addf %438, %442 : vector<8x16xf32>
    %444 = math.tanh %443 : vector<8x16xf32>
    %cst_189 = arith.constant 1.000000e+00 : f32
    %445 = vector.broadcast %cst_189 : f32 to vector<8x16xf32>
    %446 = arith.subf %445, %437 : vector<8x16xf32>
    %447 = arith.mulf %446, %444 : vector<8x16xf32>
    %448 = arith.mulf %437, %362 : vector<8x16xf32>
    %449 = arith.addf %447, %448 : vector<8x16xf32>
    %450 = arith.index_cast %368 : i32 to index
    %c0_190 = arith.constant 0 : index
    %451 = vector.load %arg15[%450, %c0_190] : memref<64x32xf32, #tpu.memory_space<vmem>>, vector<8x16xf32>
    tpu.vector_store %arg15[%450, %c0_190], %410 {strides = array<i32>} : memref<64x32xf32, #tpu.memory_space<vmem>>, vector<8x16xf32>,
    %452 = arith.index_cast %371 : i32 to index
    %c16_191 = arith.constant 16 : index
    %453 = vector.load %arg15[%452, %c16_191] : memref<64x32xf32, #tpu.memory_space<vmem>>, vector<8x16xf32>
    tpu.vector_store %arg15[%452, %c16_191], %449 {strides = array<i32>} : memref<64x32xf32, #tpu.memory_space<vmem>>, vector<8x16xf32>,
    %c5_i32 = arith.constant 5 : i32
    %c8_i32_192 = arith.constant 8 : i32
    %454 = arith.muli %c5_i32, %c8_i32_192 : i32
    %455 = tpu.assume_multiple %454, 8 : i32
    %c7_i32_193 = arith.constant 7 : i32
    %456 = arith.subi %c7_i32_193, %c5_i32 : i32
    %c8_i32_194 = arith.constant 8 : i32
    %457 = arith.muli %456, %c8_i32_194 : i32
    %458 = tpu.assume_multiple %457, 8 : i32
    %459 = arith.index_cast %455 : i32 to index
    %c0_195 = arith.constant 0 : index
    %460 = vector.load %arg13[%459, %c0_195] : memref<64x48xf32, #tpu.memory_space<vmem>>, vector<8x48xf32>
    %c0_196 = arith.constant 0 : index
    %c0_197 = arith.constant 0 : index
    %c0_198 = arith.constant 0 : index
    %461 = vector.load %arg6[%c0_196, %c0_197, %c0_198] : memref<2x16x48xf32, #tpu.memory_space<vmem>>, vector<1x16x48xf32>
    %462 = vector.shape_cast %461 : vector<1x16x48xf32> to vector<16x48xf32>
    %c0_199 = arith.constant 0 : index
    %c0_200 = arith.constant 0 : index
    %c0_201 = arith.constant 0 : index
    %463 = vector.load %arg8[%c0_199, %c0_200, %c0_201] : memref<2x1x16xf32, #tpu.memory_space<vmem>>, vector<1x1x16xf32>
    %464 = vector.shape_cast %463 : vector<1x1x16xf32> to vector<1x16xf32>
    %cst_202 = arith.constant dense<0.000000e+00> : vector<8x48xf32>
    %465 = tpu.matmul %410, %462, %cst_202 {dimension_numbers = #tpu.dot_dimension_numbers<[1], [0], [0], [1], [0, 0, 1, 1], [], []>, precision = #tpu.contract_precision<fp32>} : vector<8x16xf32>, vector<16x48xf32>, vector<8x48xf32> -> vector<8x48xf32>
    %466 = vector.extract_strided_slice %460 {offsets = [0, 0], sizes = [8, 16], strides = [1, 1]} : vector<8x48xf32> to vector<8x16xf32>
    %467 = vector.extract_strided_slice %465 {offsets = [0, 0], sizes = [8, 16], strides = [1, 1]} : vector<8x48xf32> to vector<8x16xf32>
    %468 = arith.addf %466, %467 : vector<8x16xf32>
    %cst_203 = arith.constant 5.000000e-01 : f32
    %469 = vector.broadcast %cst_203 : f32 to vector<8x16xf32>
    %470 = arith.mulf %469, %468 : vector<8x16xf32>
    %471 = math.tanh %470 : vector<8x16xf32>
    %cst_204 = arith.constant 5.000000e-01 : f32
    %472 = vector.broadcast %cst_204 : f32 to vector<8x16xf32>
    %473 = arith.mulf %472, %471 : vector<8x16xf32>
    %cst_205 = arith.constant 5.000000e-01 : f32
    %474 = vector.broadcast %cst_205 : f32 to vector<8x16xf32>
    %475 = arith.addf %473, %474 : vector<8x16xf32>
    %476 = vector.extract_strided_slice %460 {offsets = [0, 16], sizes = [8, 16], strides = [1, 1]} : vector<8x48xf32> to vector<8x16xf32>
    %477 = vector.extract_strided_slice %465 {offsets = [0, 16], sizes = [8, 16], strides = [1, 1]} : vector<8x48xf32> to vector<8x16xf32>
    %478 = arith.addf %476, %477 : vector<8x16xf32>
    %cst_206 = arith.constant 5.000000e-01 : f32
    %479 = vector.broadcast %cst_206 : f32 to vector<8x16xf32>
    %480 = arith.mulf %479, %478 : vector<8x16xf32>
    %481 = math.tanh %480 : vector<8x16xf32>
    %cst_207 = arith.constant 5.000000e-01 : f32
    %482 = vector.broadcast %cst_207 : f32 to vector<8x16xf32>
    %483 = arith.mulf %482, %481 : vector<8x16xf32>
    %cst_208 = arith.constant 5.000000e-01 : f32
    %484 = vector.broadcast %cst_208 : f32 to vector<8x16xf32>
    %485 = arith.addf %483, %484 : vector<8x16xf32>
    %486 = vector.extract_strided_slice %460 {offsets = [0, 32], sizes = [8, 16], strides = [1, 1]} : vector<8x48xf32> to vector<8x16xf32>
    %487 = vector.extract_strided_slice %465 {offsets = [0, 32], sizes = [8, 16], strides = [1, 1]} : vector<8x48xf32> to vector<8x16xf32>
    %488 = vector.broadcast %464 : vector<1x16xf32> to vector<8x16xf32>
    %489 = arith.addf %487, %488 : vector<8x16xf32>
    %490 = arith.mulf %475, %489 : vector<8x16xf32>
    %491 = arith.addf %486, %490 : vector<8x16xf32>
    %492 = math.tanh %491 : vector<8x16xf32>
    %cst_209 = arith.constant 1.000000e+00 : f32
    %493 = vector.broadcast %cst_209 : f32 to vector<8x16xf32>
    %494 = arith.subf %493, %485 : vector<8x16xf32>
    %495 = arith.mulf %494, %492 : vector<8x16xf32>
    %496 = arith.mulf %485, %410 : vector<8x16xf32>
    %497 = arith.addf %495, %496 : vector<8x16xf32>
    %498 = arith.index_cast %458 : i32 to index
    %c0_210 = arith.constant 0 : index
    %499 = vector.load %arg14[%498, %c0_210] : memref<64x48xf32, #tpu.memory_space<vmem>>, vector<8x48xf32>
    %c0_211 = arith.constant 0 : index
    %c0_212 = arith.constant 0 : index
    %c0_213 = arith.constant 0 : index
    %500 = vector.load %arg7[%c0_211, %c0_212, %c0_213] : memref<2x16x48xf32, #tpu.memory_space<vmem>>, vector<1x16x48xf32>
    %501 = vector.shape_cast %500 : vector<1x16x48xf32> to vector<16x48xf32>
    %c0_214 = arith.constant 0 : index
    %c0_215 = arith.constant 0 : index
    %c0_216 = arith.constant 0 : index
    %502 = vector.load %arg9[%c0_214, %c0_215, %c0_216] : memref<2x1x16xf32, #tpu.memory_space<vmem>>, vector<1x1x16xf32>
    %503 = vector.shape_cast %502 : vector<1x1x16xf32> to vector<1x16xf32>
    %cst_217 = arith.constant dense<0.000000e+00> : vector<8x48xf32>
    %504 = tpu.matmul %449, %501, %cst_217 {dimension_numbers = #tpu.dot_dimension_numbers<[1], [0], [0], [1], [0, 0, 1, 1], [], []>, precision = #tpu.contract_precision<fp32>} : vector<8x16xf32>, vector<16x48xf32>, vector<8x48xf32> -> vector<8x48xf32>
    %505 = vector.extract_strided_slice %499 {offsets = [0, 0], sizes = [8, 16], strides = [1, 1]} : vector<8x48xf32> to vector<8x16xf32>
    %506 = vector.extract_strided_slice %504 {offsets = [0, 0], sizes = [8, 16], strides = [1, 1]} : vector<8x48xf32> to vector<8x16xf32>
    %507 = arith.addf %505, %506 : vector<8x16xf32>
    %cst_218 = arith.constant 5.000000e-01 : f32
    %508 = vector.broadcast %cst_218 : f32 to vector<8x16xf32>
    %509 = arith.mulf %508, %507 : vector<8x16xf32>
    %510 = math.tanh %509 : vector<8x16xf32>
    %cst_219 = arith.constant 5.000000e-01 : f32
    %511 = vector.broadcast %cst_219 : f32 to vector<8x16xf32>
    %512 = arith.mulf %511, %510 : vector<8x16xf32>
    %cst_220 = arith.constant 5.000000e-01 : f32
    %513 = vector.broadcast %cst_220 : f32 to vector<8x16xf32>
    %514 = arith.addf %512, %513 : vector<8x16xf32>
    %515 = vector.extract_strided_slice %499 {offsets = [0, 16], sizes = [8, 16], strides = [1, 1]} : vector<8x48xf32> to vector<8x16xf32>
    %516 = vector.extract_strided_slice %504 {offsets = [0, 16], sizes = [8, 16], strides = [1, 1]} : vector<8x48xf32> to vector<8x16xf32>
    %517 = arith.addf %515, %516 : vector<8x16xf32>
    %cst_221 = arith.constant 5.000000e-01 : f32
    %518 = vector.broadcast %cst_221 : f32 to vector<8x16xf32>
    %519 = arith.mulf %518, %517 : vector<8x16xf32>
    %520 = math.tanh %519 : vector<8x16xf32>
    %cst_222 = arith.constant 5.000000e-01 : f32
    %521 = vector.broadcast %cst_222 : f32 to vector<8x16xf32>
    %522 = arith.mulf %521, %520 : vector<8x16xf32>
    %cst_223 = arith.constant 5.000000e-01 : f32
    %523 = vector.broadcast %cst_223 : f32 to vector<8x16xf32>
    %524 = arith.addf %522, %523 : vector<8x16xf32>
    %525 = vector.extract_strided_slice %499 {offsets = [0, 32], sizes = [8, 16], strides = [1, 1]} : vector<8x48xf32> to vector<8x16xf32>
    %526 = vector.extract_strided_slice %504 {offsets = [0, 32], sizes = [8, 16], strides = [1, 1]} : vector<8x48xf32> to vector<8x16xf32>
    %527 = vector.broadcast %503 : vector<1x16xf32> to vector<8x16xf32>
    %528 = arith.addf %526, %527 : vector<8x16xf32>
    %529 = arith.mulf %514, %528 : vector<8x16xf32>
    %530 = arith.addf %525, %529 : vector<8x16xf32>
    %531 = math.tanh %530 : vector<8x16xf32>
    %cst_224 = arith.constant 1.000000e+00 : f32
    %532 = vector.broadcast %cst_224 : f32 to vector<8x16xf32>
    %533 = arith.subf %532, %524 : vector<8x16xf32>
    %534 = arith.mulf %533, %531 : vector<8x16xf32>
    %535 = arith.mulf %524, %449 : vector<8x16xf32>
    %536 = arith.addf %534, %535 : vector<8x16xf32>
    %537 = arith.index_cast %455 : i32 to index
    %c0_225 = arith.constant 0 : index
    %538 = vector.load %arg15[%537, %c0_225] : memref<64x32xf32, #tpu.memory_space<vmem>>, vector<8x16xf32>
    tpu.vector_store %arg15[%537, %c0_225], %497 {strides = array<i32>} : memref<64x32xf32, #tpu.memory_space<vmem>>, vector<8x16xf32>,
    %539 = arith.index_cast %458 : i32 to index
    %c16_226 = arith.constant 16 : index
    %540 = vector.load %arg15[%539, %c16_226] : memref<64x32xf32, #tpu.memory_space<vmem>>, vector<8x16xf32>
    tpu.vector_store %arg15[%539, %c16_226], %536 {strides = array<i32>} : memref<64x32xf32, #tpu.memory_space<vmem>>, vector<8x16xf32>,
    %c6_i32 = arith.constant 6 : i32
    %c8_i32_227 = arith.constant 8 : i32
    %541 = arith.muli %c6_i32, %c8_i32_227 : i32
    %542 = tpu.assume_multiple %541, 8 : i32
    %c7_i32_228 = arith.constant 7 : i32
    %543 = arith.subi %c7_i32_228, %c6_i32 : i32
    %c8_i32_229 = arith.constant 8 : i32
    %544 = arith.muli %543, %c8_i32_229 : i32
    %545 = tpu.assume_multiple %544, 8 : i32
    %546 = arith.index_cast %542 : i32 to index
    %c0_230 = arith.constant 0 : index
    %547 = vector.load %arg13[%546, %c0_230] : memref<64x48xf32, #tpu.memory_space<vmem>>, vector<8x48xf32>
    %c0_231 = arith.constant 0 : index
    %c0_232 = arith.constant 0 : index
    %c0_233 = arith.constant 0 : index
    %548 = vector.load %arg6[%c0_231, %c0_232, %c0_233] : memref<2x16x48xf32, #tpu.memory_space<vmem>>, vector<1x16x48xf32>
    %549 = vector.shape_cast %548 : vector<1x16x48xf32> to vector<16x48xf32>
    %c0_234 = arith.constant 0 : index
    %c0_235 = arith.constant 0 : index
    %c0_236 = arith.constant 0 : index
    %550 = vector.load %arg8[%c0_234, %c0_235, %c0_236] : memref<2x1x16xf32, #tpu.memory_space<vmem>>, vector<1x1x16xf32>
    %551 = vector.shape_cast %550 : vector<1x1x16xf32> to vector<1x16xf32>
    %cst_237 = arith.constant dense<0.000000e+00> : vector<8x48xf32>
    %552 = tpu.matmul %497, %549, %cst_237 {dimension_numbers = #tpu.dot_dimension_numbers<[1], [0], [0], [1], [0, 0, 1, 1], [], []>, precision = #tpu.contract_precision<fp32>} : vector<8x16xf32>, vector<16x48xf32>, vector<8x48xf32> -> vector<8x48xf32>
    %553 = vector.extract_strided_slice %547 {offsets = [0, 0], sizes = [8, 16], strides = [1, 1]} : vector<8x48xf32> to vector<8x16xf32>
    %554 = vector.extract_strided_slice %552 {offsets = [0, 0], sizes = [8, 16], strides = [1, 1]} : vector<8x48xf32> to vector<8x16xf32>
    %555 = arith.addf %553, %554 : vector<8x16xf32>
    %cst_238 = arith.constant 5.000000e-01 : f32
    %556 = vector.broadcast %cst_238 : f32 to vector<8x16xf32>
    %557 = arith.mulf %556, %555 : vector<8x16xf32>
    %558 = math.tanh %557 : vector<8x16xf32>
    %cst_239 = arith.constant 5.000000e-01 : f32
    %559 = vector.broadcast %cst_239 : f32 to vector<8x16xf32>
    %560 = arith.mulf %559, %558 : vector<8x16xf32>
    %cst_240 = arith.constant 5.000000e-01 : f32
    %561 = vector.broadcast %cst_240 : f32 to vector<8x16xf32>
    %562 = arith.addf %560, %561 : vector<8x16xf32>
    %563 = vector.extract_strided_slice %547 {offsets = [0, 16], sizes = [8, 16], strides = [1, 1]} : vector<8x48xf32> to vector<8x16xf32>
    %564 = vector.extract_strided_slice %552 {offsets = [0, 16], sizes = [8, 16], strides = [1, 1]} : vector<8x48xf32> to vector<8x16xf32>
    %565 = arith.addf %563, %564 : vector<8x16xf32>
    %cst_241 = arith.constant 5.000000e-01 : f32
    %566 = vector.broadcast %cst_241 : f32 to vector<8x16xf32>
    %567 = arith.mulf %566, %565 : vector<8x16xf32>
    %568 = math.tanh %567 : vector<8x16xf32>
    %cst_242 = arith.constant 5.000000e-01 : f32
    %569 = vector.broadcast %cst_242 : f32 to vector<8x16xf32>
    %570 = arith.mulf %569, %568 : vector<8x16xf32>
    %cst_243 = arith.constant 5.000000e-01 : f32
    %571 = vector.broadcast %cst_243 : f32 to vector<8x16xf32>
    %572 = arith.addf %570, %571 : vector<8x16xf32>
    %573 = vector.extract_strided_slice %547 {offsets = [0, 32], sizes = [8, 16], strides = [1, 1]} : vector<8x48xf32> to vector<8x16xf32>
    %574 = vector.extract_strided_slice %552 {offsets = [0, 32], sizes = [8, 16], strides = [1, 1]} : vector<8x48xf32> to vector<8x16xf32>
    %575 = vector.broadcast %551 : vector<1x16xf32> to vector<8x16xf32>
    %576 = arith.addf %574, %575 : vector<8x16xf32>
    %577 = arith.mulf %562, %576 : vector<8x16xf32>
    %578 = arith.addf %573, %577 : vector<8x16xf32>
    %579 = math.tanh %578 : vector<8x16xf32>
    %cst_244 = arith.constant 1.000000e+00 : f32
    %580 = vector.broadcast %cst_244 : f32 to vector<8x16xf32>
    %581 = arith.subf %580, %572 : vector<8x16xf32>
    %582 = arith.mulf %581, %579 : vector<8x16xf32>
    %583 = arith.mulf %572, %497 : vector<8x16xf32>
    %584 = arith.addf %582, %583 : vector<8x16xf32>
    %585 = arith.index_cast %545 : i32 to index
    %c0_245 = arith.constant 0 : index
    %586 = vector.load %arg14[%585, %c0_245] : memref<64x48xf32, #tpu.memory_space<vmem>>, vector<8x48xf32>
    %c0_246 = arith.constant 0 : index
    %c0_247 = arith.constant 0 : index
    %c0_248 = arith.constant 0 : index
    %587 = vector.load %arg7[%c0_246, %c0_247, %c0_248] : memref<2x16x48xf32, #tpu.memory_space<vmem>>, vector<1x16x48xf32>
    %588 = vector.shape_cast %587 : vector<1x16x48xf32> to vector<16x48xf32>
    %c0_249 = arith.constant 0 : index
    %c0_250 = arith.constant 0 : index
    %c0_251 = arith.constant 0 : index
    %589 = vector.load %arg9[%c0_249, %c0_250, %c0_251] : memref<2x1x16xf32, #tpu.memory_space<vmem>>, vector<1x1x16xf32>
    %590 = vector.shape_cast %589 : vector<1x1x16xf32> to vector<1x16xf32>
    %cst_252 = arith.constant dense<0.000000e+00> : vector<8x48xf32>
    %591 = tpu.matmul %536, %588, %cst_252 {dimension_numbers = #tpu.dot_dimension_numbers<[1], [0], [0], [1], [0, 0, 1, 1], [], []>, precision = #tpu.contract_precision<fp32>} : vector<8x16xf32>, vector<16x48xf32>, vector<8x48xf32> -> vector<8x48xf32>
    %592 = vector.extract_strided_slice %586 {offsets = [0, 0], sizes = [8, 16], strides = [1, 1]} : vector<8x48xf32> to vector<8x16xf32>
    %593 = vector.extract_strided_slice %591 {offsets = [0, 0], sizes = [8, 16], strides = [1, 1]} : vector<8x48xf32> to vector<8x16xf32>
    %594 = arith.addf %592, %593 : vector<8x16xf32>
    %cst_253 = arith.constant 5.000000e-01 : f32
    %595 = vector.broadcast %cst_253 : f32 to vector<8x16xf32>
    %596 = arith.mulf %595, %594 : vector<8x16xf32>
    %597 = math.tanh %596 : vector<8x16xf32>
    %cst_254 = arith.constant 5.000000e-01 : f32
    %598 = vector.broadcast %cst_254 : f32 to vector<8x16xf32>
    %599 = arith.mulf %598, %597 : vector<8x16xf32>
    %cst_255 = arith.constant 5.000000e-01 : f32
    %600 = vector.broadcast %cst_255 : f32 to vector<8x16xf32>
    %601 = arith.addf %599, %600 : vector<8x16xf32>
    %602 = vector.extract_strided_slice %586 {offsets = [0, 16], sizes = [8, 16], strides = [1, 1]} : vector<8x48xf32> to vector<8x16xf32>
    %603 = vector.extract_strided_slice %591 {offsets = [0, 16], sizes = [8, 16], strides = [1, 1]} : vector<8x48xf32> to vector<8x16xf32>
    %604 = arith.addf %602, %603 : vector<8x16xf32>
    %cst_256 = arith.constant 5.000000e-01 : f32
    %605 = vector.broadcast %cst_256 : f32 to vector<8x16xf32>
    %606 = arith.mulf %605, %604 : vector<8x16xf32>
    %607 = math.tanh %606 : vector<8x16xf32>
    %cst_257 = arith.constant 5.000000e-01 : f32
    %608 = vector.broadcast %cst_257 : f32 to vector<8x16xf32>
    %609 = arith.mulf %608, %607 : vector<8x16xf32>
    %cst_258 = arith.constant 5.000000e-01 : f32
    %610 = vector.broadcast %cst_258 : f32 to vector<8x16xf32>
    %611 = arith.addf %609, %610 : vector<8x16xf32>
    %612 = vector.extract_strided_slice %586 {offsets = [0, 32], sizes = [8, 16], strides = [1, 1]} : vector<8x48xf32> to vector<8x16xf32>
    %613 = vector.extract_strided_slice %591 {offsets = [0, 32], sizes = [8, 16], strides = [1, 1]} : vector<8x48xf32> to vector<8x16xf32>
    %614 = vector.broadcast %590 : vector<1x16xf32> to vector<8x16xf32>
    %615 = arith.addf %613, %614 : vector<8x16xf32>
    %616 = arith.mulf %601, %615 : vector<8x16xf32>
    %617 = arith.addf %612, %616 : vector<8x16xf32>
    %618 = math.tanh %617 : vector<8x16xf32>
    %cst_259 = arith.constant 1.000000e+00 : f32
    %619 = vector.broadcast %cst_259 : f32 to vector<8x16xf32>
    %620 = arith.subf %619, %611 : vector<8x16xf32>
    %621 = arith.mulf %620, %618 : vector<8x16xf32>
    %622 = arith.mulf %611, %536 : vector<8x16xf32>
    %623 = arith.addf %621, %622 : vector<8x16xf32>
    %624 = arith.index_cast %542 : i32 to index
    %c0_260 = arith.constant 0 : index
    %625 = vector.load %arg15[%624, %c0_260] : memref<64x32xf32, #tpu.memory_space<vmem>>, vector<8x16xf32>
    tpu.vector_store %arg15[%624, %c0_260], %584 {strides = array<i32>} : memref<64x32xf32, #tpu.memory_space<vmem>>, vector<8x16xf32>,
    %626 = arith.index_cast %545 : i32 to index
    %c16_261 = arith.constant 16 : index
    %627 = vector.load %arg15[%626, %c16_261] : memref<64x32xf32, #tpu.memory_space<vmem>>, vector<8x16xf32>
    tpu.vector_store %arg15[%626, %c16_261], %623 {strides = array<i32>} : memref<64x32xf32, #tpu.memory_space<vmem>>, vector<8x16xf32>,
    %c7_i32_262 = arith.constant 7 : i32
    %c8_i32_263 = arith.constant 8 : i32
    %628 = arith.muli %c7_i32_262, %c8_i32_263 : i32
    %629 = tpu.assume_multiple %628, 8 : i32
    %c7_i32_264 = arith.constant 7 : i32
    %630 = arith.subi %c7_i32_264, %c7_i32_262 : i32
    %c8_i32_265 = arith.constant 8 : i32
    %631 = arith.muli %630, %c8_i32_265 : i32
    %632 = tpu.assume_multiple %631, 8 : i32
    %633 = arith.index_cast %629 : i32 to index
    %c0_266 = arith.constant 0 : index
    %634 = vector.load %arg13[%633, %c0_266] : memref<64x48xf32, #tpu.memory_space<vmem>>, vector<8x48xf32>
    %c0_267 = arith.constant 0 : index
    %c0_268 = arith.constant 0 : index
    %c0_269 = arith.constant 0 : index
    %635 = vector.load %arg6[%c0_267, %c0_268, %c0_269] : memref<2x16x48xf32, #tpu.memory_space<vmem>>, vector<1x16x48xf32>
    %636 = vector.shape_cast %635 : vector<1x16x48xf32> to vector<16x48xf32>
    %c0_270 = arith.constant 0 : index
    %c0_271 = arith.constant 0 : index
    %c0_272 = arith.constant 0 : index
    %637 = vector.load %arg8[%c0_270, %c0_271, %c0_272] : memref<2x1x16xf32, #tpu.memory_space<vmem>>, vector<1x1x16xf32>
    %638 = vector.shape_cast %637 : vector<1x1x16xf32> to vector<1x16xf32>
    %cst_273 = arith.constant dense<0.000000e+00> : vector<8x48xf32>
    %639 = tpu.matmul %584, %636, %cst_273 {dimension_numbers = #tpu.dot_dimension_numbers<[1], [0], [0], [1], [0, 0, 1, 1], [], []>, precision = #tpu.contract_precision<fp32>} : vector<8x16xf32>, vector<16x48xf32>, vector<8x48xf32> -> vector<8x48xf32>
    %640 = vector.extract_strided_slice %634 {offsets = [0, 0], sizes = [8, 16], strides = [1, 1]} : vector<8x48xf32> to vector<8x16xf32>
    %641 = vector.extract_strided_slice %639 {offsets = [0, 0], sizes = [8, 16], strides = [1, 1]} : vector<8x48xf32> to vector<8x16xf32>
    %642 = arith.addf %640, %641 : vector<8x16xf32>
    %cst_274 = arith.constant 5.000000e-01 : f32
    %643 = vector.broadcast %cst_274 : f32 to vector<8x16xf32>
    %644 = arith.mulf %643, %642 : vector<8x16xf32>
    %645 = math.tanh %644 : vector<8x16xf32>
    %cst_275 = arith.constant 5.000000e-01 : f32
    %646 = vector.broadcast %cst_275 : f32 to vector<8x16xf32>
    %647 = arith.mulf %646, %645 : vector<8x16xf32>
    %cst_276 = arith.constant 5.000000e-01 : f32
    %648 = vector.broadcast %cst_276 : f32 to vector<8x16xf32>
    %649 = arith.addf %647, %648 : vector<8x16xf32>
    %650 = vector.extract_strided_slice %634 {offsets = [0, 16], sizes = [8, 16], strides = [1, 1]} : vector<8x48xf32> to vector<8x16xf32>
    %651 = vector.extract_strided_slice %639 {offsets = [0, 16], sizes = [8, 16], strides = [1, 1]} : vector<8x48xf32> to vector<8x16xf32>
    %652 = arith.addf %650, %651 : vector<8x16xf32>
    %cst_277 = arith.constant 5.000000e-01 : f32
    %653 = vector.broadcast %cst_277 : f32 to vector<8x16xf32>
    %654 = arith.mulf %653, %652 : vector<8x16xf32>
    %655 = math.tanh %654 : vector<8x16xf32>
    %cst_278 = arith.constant 5.000000e-01 : f32
    %656 = vector.broadcast %cst_278 : f32 to vector<8x16xf32>
    %657 = arith.mulf %656, %655 : vector<8x16xf32>
    %cst_279 = arith.constant 5.000000e-01 : f32
    %658 = vector.broadcast %cst_279 : f32 to vector<8x16xf32>
    %659 = arith.addf %657, %658 : vector<8x16xf32>
    %660 = vector.extract_strided_slice %634 {offsets = [0, 32], sizes = [8, 16], strides = [1, 1]} : vector<8x48xf32> to vector<8x16xf32>
    %661 = vector.extract_strided_slice %639 {offsets = [0, 32], sizes = [8, 16], strides = [1, 1]} : vector<8x48xf32> to vector<8x16xf32>
    %662 = vector.broadcast %638 : vector<1x16xf32> to vector<8x16xf32>
    %663 = arith.addf %661, %662 : vector<8x16xf32>
    %664 = arith.mulf %649, %663 : vector<8x16xf32>
    %665 = arith.addf %660, %664 : vector<8x16xf32>
    %666 = math.tanh %665 : vector<8x16xf32>
    %cst_280 = arith.constant 1.000000e+00 : f32
    %667 = vector.broadcast %cst_280 : f32 to vector<8x16xf32>
    %668 = arith.subf %667, %659 : vector<8x16xf32>
    %669 = arith.mulf %668, %666 : vector<8x16xf32>
    %670 = arith.mulf %659, %584 : vector<8x16xf32>
    %671 = arith.addf %669, %670 : vector<8x16xf32>
    %672 = arith.index_cast %632 : i32 to index
    %c0_281 = arith.constant 0 : index
    %673 = vector.load %arg14[%672, %c0_281] : memref<64x48xf32, #tpu.memory_space<vmem>>, vector<8x48xf32>
    %c0_282 = arith.constant 0 : index
    %c0_283 = arith.constant 0 : index
    %c0_284 = arith.constant 0 : index
    %674 = vector.load %arg7[%c0_282, %c0_283, %c0_284] : memref<2x16x48xf32, #tpu.memory_space<vmem>>, vector<1x16x48xf32>
    %675 = vector.shape_cast %674 : vector<1x16x48xf32> to vector<16x48xf32>
    %c0_285 = arith.constant 0 : index
    %c0_286 = arith.constant 0 : index
    %c0_287 = arith.constant 0 : index
    %676 = vector.load %arg9[%c0_285, %c0_286, %c0_287] : memref<2x1x16xf32, #tpu.memory_space<vmem>>, vector<1x1x16xf32>
    %677 = vector.shape_cast %676 : vector<1x1x16xf32> to vector<1x16xf32>
    %cst_288 = arith.constant dense<0.000000e+00> : vector<8x48xf32>
    %678 = tpu.matmul %623, %675, %cst_288 {dimension_numbers = #tpu.dot_dimension_numbers<[1], [0], [0], [1], [0, 0, 1, 1], [], []>, precision = #tpu.contract_precision<fp32>} : vector<8x16xf32>, vector<16x48xf32>, vector<8x48xf32> -> vector<8x48xf32>
    %679 = vector.extract_strided_slice %673 {offsets = [0, 0], sizes = [8, 16], strides = [1, 1]} : vector<8x48xf32> to vector<8x16xf32>
    %680 = vector.extract_strided_slice %678 {offsets = [0, 0], sizes = [8, 16], strides = [1, 1]} : vector<8x48xf32> to vector<8x16xf32>
    %681 = arith.addf %679, %680 : vector<8x16xf32>
    %cst_289 = arith.constant 5.000000e-01 : f32
    %682 = vector.broadcast %cst_289 : f32 to vector<8x16xf32>
    %683 = arith.mulf %682, %681 : vector<8x16xf32>
    %684 = math.tanh %683 : vector<8x16xf32>
    %cst_290 = arith.constant 5.000000e-01 : f32
    %685 = vector.broadcast %cst_290 : f32 to vector<8x16xf32>
    %686 = arith.mulf %685, %684 : vector<8x16xf32>
    %cst_291 = arith.constant 5.000000e-01 : f32
    %687 = vector.broadcast %cst_291 : f32 to vector<8x16xf32>
    %688 = arith.addf %686, %687 : vector<8x16xf32>
    %689 = vector.extract_strided_slice %673 {offsets = [0, 16], sizes = [8, 16], strides = [1, 1]} : vector<8x48xf32> to vector<8x16xf32>
    %690 = vector.extract_strided_slice %678 {offsets = [0, 16], sizes = [8, 16], strides = [1, 1]} : vector<8x48xf32> to vector<8x16xf32>
    %691 = arith.addf %689, %690 : vector<8x16xf32>
    %cst_292 = arith.constant 5.000000e-01 : f32
    %692 = vector.broadcast %cst_292 : f32 to vector<8x16xf32>
    %693 = arith.mulf %692, %691 : vector<8x16xf32>
    %694 = math.tanh %693 : vector<8x16xf32>
    %cst_293 = arith.constant 5.000000e-01 : f32
    %695 = vector.broadcast %cst_293 : f32 to vector<8x16xf32>
    %696 = arith.mulf %695, %694 : vector<8x16xf32>
    %cst_294 = arith.constant 5.000000e-01 : f32
    %697 = vector.broadcast %cst_294 : f32 to vector<8x16xf32>
    %698 = arith.addf %696, %697 : vector<8x16xf32>
    %699 = vector.extract_strided_slice %673 {offsets = [0, 32], sizes = [8, 16], strides = [1, 1]} : vector<8x48xf32> to vector<8x16xf32>
    %700 = vector.extract_strided_slice %678 {offsets = [0, 32], sizes = [8, 16], strides = [1, 1]} : vector<8x48xf32> to vector<8x16xf32>
    %701 = vector.broadcast %677 : vector<1x16xf32> to vector<8x16xf32>
    %702 = arith.addf %700, %701 : vector<8x16xf32>
    %703 = arith.mulf %688, %702 : vector<8x16xf32>
    %704 = arith.addf %699, %703 : vector<8x16xf32>
    %705 = math.tanh %704 : vector<8x16xf32>
    %cst_295 = arith.constant 1.000000e+00 : f32
    %706 = vector.broadcast %cst_295 : f32 to vector<8x16xf32>
    %707 = arith.subf %706, %698 : vector<8x16xf32>
    %708 = arith.mulf %707, %705 : vector<8x16xf32>
    %709 = arith.mulf %698, %623 : vector<8x16xf32>
    %710 = arith.addf %708, %709 : vector<8x16xf32>
    %711 = arith.index_cast %629 : i32 to index
    %c0_296 = arith.constant 0 : index
    %712 = vector.load %arg15[%711, %c0_296] : memref<64x32xf32, #tpu.memory_space<vmem>>, vector<8x16xf32>
    tpu.vector_store %arg15[%711, %c0_296], %671 {strides = array<i32>} : memref<64x32xf32, #tpu.memory_space<vmem>>, vector<8x16xf32>,
    %713 = arith.index_cast %632 : i32 to index
    %c16_297 = arith.constant 16 : index
    %714 = vector.load %arg15[%713, %c16_297] : memref<64x32xf32, #tpu.memory_space<vmem>>, vector<8x16xf32>
    tpu.vector_store %arg15[%713, %c16_297], %710 {strides = array<i32>} : memref<64x32xf32, #tpu.memory_space<vmem>>, vector<8x16xf32>,
    %c8_i32_298 = arith.constant 8 : i32
    %c0_299 = arith.constant 0 : index
    %c0_300 = arith.constant 0 : index
    %715 = vector.load %arg15[%c0_299, %c0_300] : memref<64x32xf32, #tpu.memory_space<vmem>>, vector<64x32xf32>
    %c1 = arith.constant 1 : index
    %c0_301 = arith.constant 0 : index
    %c0_302 = arith.constant 0 : index
    %716 = vector.load %arg2[%c1, %c0_301, %c0_302] : memref<2x32x48xf32, #tpu.memory_space<vmem>>, vector<1x32x48xf32>
    %717 = vector.shape_cast %716 : vector<1x32x48xf32> to vector<32x48xf32>
    %cst_303 = arith.constant dense<0.000000e+00> : vector<64x48xf32>
    %718 = tpu.matmul %715, %717, %cst_303 {dimension_numbers = #tpu.dot_dimension_numbers<[1], [0], [0], [1], [0, 0, 1, 1], [], []>, precision = #tpu.contract_precision<fp32>} : vector<64x32xf32>, vector<32x48xf32>, vector<64x48xf32> -> vector<64x48xf32>
    %c1_304 = arith.constant 1 : index
    %c0_305 = arith.constant 0 : index
    %c0_306 = arith.constant 0 : index
    %719 = vector.load %arg4[%c1_304, %c0_305, %c0_306] : memref<2x1x48xf32, #tpu.memory_space<vmem>>, vector<1x1x48xf32>
    %720 = vector.shape_cast %719 : vector<1x1x48xf32> to vector<1x48xf32>
    %721 = vector.broadcast %720 : vector<1x48xf32> to vector<64x48xf32>
    %722 = arith.addf %718, %721 : vector<64x48xf32>
    %c0_307 = arith.constant 0 : index
    %c0_308 = arith.constant 0 : index
    %723 = vector.load %arg13[%c0_307, %c0_308] : memref<64x48xf32, #tpu.memory_space<vmem>>, vector<64x48xf32>
    tpu.vector_store %arg13[%c0_307, %c0_308], %722 {strides = array<i32>} : memref<64x48xf32, #tpu.memory_space<vmem>>, vector<64x48xf32>,
    %c1_309 = arith.constant 1 : index
    %c0_310 = arith.constant 0 : index
    %c0_311 = arith.constant 0 : index
    %724 = vector.load %arg3[%c1_309, %c0_310, %c0_311] : memref<2x32x48xf32, #tpu.memory_space<vmem>>, vector<1x32x48xf32>
    %725 = vector.shape_cast %724 : vector<1x32x48xf32> to vector<32x48xf32>
    %cst_312 = arith.constant dense<0.000000e+00> : vector<64x48xf32>
    %726 = tpu.matmul %715, %725, %cst_312 {dimension_numbers = #tpu.dot_dimension_numbers<[1], [0], [0], [1], [0, 0, 1, 1], [], []>, precision = #tpu.contract_precision<fp32>} : vector<64x32xf32>, vector<32x48xf32>, vector<64x48xf32> -> vector<64x48xf32>
    %c1_313 = arith.constant 1 : index
    %c0_314 = arith.constant 0 : index
    %c0_315 = arith.constant 0 : index
    %727 = vector.load %arg5[%c1_313, %c0_314, %c0_315] : memref<2x1x48xf32, #tpu.memory_space<vmem>>, vector<1x1x48xf32>
    %728 = vector.shape_cast %727 : vector<1x1x48xf32> to vector<1x48xf32>
    %729 = vector.broadcast %728 : vector<1x48xf32> to vector<64x48xf32>
    %730 = arith.addf %726, %729 : vector<64x48xf32>
    %c0_316 = arith.constant 0 : index
    %c0_317 = arith.constant 0 : index
    %731 = vector.load %arg14[%c0_316, %c0_317] : memref<64x48xf32, #tpu.memory_space<vmem>>, vector<64x48xf32>
    tpu.vector_store %arg14[%c0_316, %c0_317], %730 {strides = array<i32>} : memref<64x48xf32, #tpu.memory_space<vmem>>, vector<64x48xf32>,
    %cst_318 = arith.constant 0.000000e+00 : f32
    %732 = vector.broadcast %cst_318 : f32 to vector<8x16xf32>
    %c0_i32_319 = arith.constant 0 : i32
    %c8_i32_320 = arith.constant 8 : i32
    %733 = arith.muli %c0_i32_319, %c8_i32_320 : i32
    %734 = tpu.assume_multiple %733, 8 : i32
    %c7_i32_321 = arith.constant 7 : i32
    %735 = arith.subi %c7_i32_321, %c0_i32_319 : i32
    %c8_i32_322 = arith.constant 8 : i32
    %736 = arith.muli %735, %c8_i32_322 : i32
    %737 = tpu.assume_multiple %736, 8 : i32
    %738 = arith.index_cast %734 : i32 to index
    %c0_323 = arith.constant 0 : index
    %739 = vector.load %arg13[%738, %c0_323] : memref<64x48xf32, #tpu.memory_space<vmem>>, vector<8x48xf32>
    %c1_324 = arith.constant 1 : index
    %c0_325 = arith.constant 0 : index
    %c0_326 = arith.constant 0 : index
    %740 = vector.load %arg6[%c1_324, %c0_325, %c0_326] : memref<2x16x48xf32, #tpu.memory_space<vmem>>, vector<1x16x48xf32>
    %741 = vector.shape_cast %740 : vector<1x16x48xf32> to vector<16x48xf32>
    %c1_327 = arith.constant 1 : index
    %c0_328 = arith.constant 0 : index
    %c0_329 = arith.constant 0 : index
    %742 = vector.load %arg8[%c1_327, %c0_328, %c0_329] : memref<2x1x16xf32, #tpu.memory_space<vmem>>, vector<1x1x16xf32>
    %743 = vector.shape_cast %742 : vector<1x1x16xf32> to vector<1x16xf32>
    %cst_330 = arith.constant dense<0.000000e+00> : vector<8x48xf32>
    %744 = tpu.matmul %732, %741, %cst_330 {dimension_numbers = #tpu.dot_dimension_numbers<[1], [0], [0], [1], [0, 0, 1, 1], [], []>, precision = #tpu.contract_precision<fp32>} : vector<8x16xf32>, vector<16x48xf32>, vector<8x48xf32> -> vector<8x48xf32>
    %745 = vector.extract_strided_slice %739 {offsets = [0, 0], sizes = [8, 16], strides = [1, 1]} : vector<8x48xf32> to vector<8x16xf32>
    %746 = vector.extract_strided_slice %744 {offsets = [0, 0], sizes = [8, 16], strides = [1, 1]} : vector<8x48xf32> to vector<8x16xf32>
    %747 = arith.addf %745, %746 : vector<8x16xf32>
    %cst_331 = arith.constant 5.000000e-01 : f32
    %748 = vector.broadcast %cst_331 : f32 to vector<8x16xf32>
    %749 = arith.mulf %748, %747 : vector<8x16xf32>
    %750 = math.tanh %749 : vector<8x16xf32>
    %cst_332 = arith.constant 5.000000e-01 : f32
    %751 = vector.broadcast %cst_332 : f32 to vector<8x16xf32>
    %752 = arith.mulf %751, %750 : vector<8x16xf32>
    %cst_333 = arith.constant 5.000000e-01 : f32
    %753 = vector.broadcast %cst_333 : f32 to vector<8x16xf32>
    %754 = arith.addf %752, %753 : vector<8x16xf32>
    %755 = vector.extract_strided_slice %739 {offsets = [0, 16], sizes = [8, 16], strides = [1, 1]} : vector<8x48xf32> to vector<8x16xf32>
    %756 = vector.extract_strided_slice %744 {offsets = [0, 16], sizes = [8, 16], strides = [1, 1]} : vector<8x48xf32> to vector<8x16xf32>
    %757 = arith.addf %755, %756 : vector<8x16xf32>
    %cst_334 = arith.constant 5.000000e-01 : f32
    %758 = vector.broadcast %cst_334 : f32 to vector<8x16xf32>
    %759 = arith.mulf %758, %757 : vector<8x16xf32>
    %760 = math.tanh %759 : vector<8x16xf32>
    %cst_335 = arith.constant 5.000000e-01 : f32
    %761 = vector.broadcast %cst_335 : f32 to vector<8x16xf32>
    %762 = arith.mulf %761, %760 : vector<8x16xf32>
    %cst_336 = arith.constant 5.000000e-01 : f32
    %763 = vector.broadcast %cst_336 : f32 to vector<8x16xf32>
    %764 = arith.addf %762, %763 : vector<8x16xf32>
    %765 = vector.extract_strided_slice %739 {offsets = [0, 32], sizes = [8, 16], strides = [1, 1]} : vector<8x48xf32> to vector<8x16xf32>
    %766 = vector.extract_strided_slice %744 {offsets = [0, 32], sizes = [8, 16], strides = [1, 1]} : vector<8x48xf32> to vector<8x16xf32>
    %767 = vector.broadcast %743 : vector<1x16xf32> to vector<8x16xf32>
    %768 = arith.addf %766, %767 : vector<8x16xf32>
    %769 = arith.mulf %754, %768 : vector<8x16xf32>
    %770 = arith.addf %765, %769 : vector<8x16xf32>
    %771 = math.tanh %770 : vector<8x16xf32>
    %cst_337 = arith.constant 1.000000e+00 : f32
    %772 = vector.broadcast %cst_337 : f32 to vector<8x16xf32>
    %773 = arith.subf %772, %764 : vector<8x16xf32>
    %774 = arith.mulf %773, %771 : vector<8x16xf32>
    %775 = arith.mulf %764, %732 : vector<8x16xf32>
    %776 = arith.addf %774, %775 : vector<8x16xf32>
    %777 = arith.index_cast %737 : i32 to index
    %c0_338 = arith.constant 0 : index
    %778 = vector.load %arg14[%777, %c0_338] : memref<64x48xf32, #tpu.memory_space<vmem>>, vector<8x48xf32>
    %c1_339 = arith.constant 1 : index
    %c0_340 = arith.constant 0 : index
    %c0_341 = arith.constant 0 : index
    %779 = vector.load %arg7[%c1_339, %c0_340, %c0_341] : memref<2x16x48xf32, #tpu.memory_space<vmem>>, vector<1x16x48xf32>
    %780 = vector.shape_cast %779 : vector<1x16x48xf32> to vector<16x48xf32>
    %c1_342 = arith.constant 1 : index
    %c0_343 = arith.constant 0 : index
    %c0_344 = arith.constant 0 : index
    %781 = vector.load %arg9[%c1_342, %c0_343, %c0_344] : memref<2x1x16xf32, #tpu.memory_space<vmem>>, vector<1x1x16xf32>
    %782 = vector.shape_cast %781 : vector<1x1x16xf32> to vector<1x16xf32>
    %cst_345 = arith.constant dense<0.000000e+00> : vector<8x48xf32>
    %783 = tpu.matmul %732, %780, %cst_345 {dimension_numbers = #tpu.dot_dimension_numbers<[1], [0], [0], [1], [0, 0, 1, 1], [], []>, precision = #tpu.contract_precision<fp32>} : vector<8x16xf32>, vector<16x48xf32>, vector<8x48xf32> -> vector<8x48xf32>
    %784 = vector.extract_strided_slice %778 {offsets = [0, 0], sizes = [8, 16], strides = [1, 1]} : vector<8x48xf32> to vector<8x16xf32>
    %785 = vector.extract_strided_slice %783 {offsets = [0, 0], sizes = [8, 16], strides = [1, 1]} : vector<8x48xf32> to vector<8x16xf32>
    %786 = arith.addf %784, %785 : vector<8x16xf32>
    %cst_346 = arith.constant 5.000000e-01 : f32
    %787 = vector.broadcast %cst_346 : f32 to vector<8x16xf32>
    %788 = arith.mulf %787, %786 : vector<8x16xf32>
    %789 = math.tanh %788 : vector<8x16xf32>
    %cst_347 = arith.constant 5.000000e-01 : f32
    %790 = vector.broadcast %cst_347 : f32 to vector<8x16xf32>
    %791 = arith.mulf %790, %789 : vector<8x16xf32>
    %cst_348 = arith.constant 5.000000e-01 : f32
    %792 = vector.broadcast %cst_348 : f32 to vector<8x16xf32>
    %793 = arith.addf %791, %792 : vector<8x16xf32>
    %794 = vector.extract_strided_slice %778 {offsets = [0, 16], sizes = [8, 16], strides = [1, 1]} : vector<8x48xf32> to vector<8x16xf32>
    %795 = vector.extract_strided_slice %783 {offsets = [0, 16], sizes = [8, 16], strides = [1, 1]} : vector<8x48xf32> to vector<8x16xf32>
    %796 = arith.addf %794, %795 : vector<8x16xf32>
    %cst_349 = arith.constant 5.000000e-01 : f32
    %797 = vector.broadcast %cst_349 : f32 to vector<8x16xf32>
    %798 = arith.mulf %797, %796 : vector<8x16xf32>
    %799 = math.tanh %798 : vector<8x16xf32>
    %cst_350 = arith.constant 5.000000e-01 : f32
    %800 = vector.broadcast %cst_350 : f32 to vector<8x16xf32>
    %801 = arith.mulf %800, %799 : vector<8x16xf32>
    %cst_351 = arith.constant 5.000000e-01 : f32
    %802 = vector.broadcast %cst_351 : f32 to vector<8x16xf32>
    %803 = arith.addf %801, %802 : vector<8x16xf32>
    %804 = vector.extract_strided_slice %778 {offsets = [0, 32], sizes = [8, 16], strides = [1, 1]} : vector<8x48xf32> to vector<8x16xf32>
    %805 = vector.extract_strided_slice %783 {offsets = [0, 32], sizes = [8, 16], strides = [1, 1]} : vector<8x48xf32> to vector<8x16xf32>
    %806 = vector.broadcast %782 : vector<1x16xf32> to vector<8x16xf32>
    %807 = arith.addf %805, %806 : vector<8x16xf32>
    %808 = arith.mulf %793, %807 : vector<8x16xf32>
    %809 = arith.addf %804, %808 : vector<8x16xf32>
    %810 = math.tanh %809 : vector<8x16xf32>
    %cst_352 = arith.constant 1.000000e+00 : f32
    %811 = vector.broadcast %cst_352 : f32 to vector<8x16xf32>
    %812 = arith.subf %811, %803 : vector<8x16xf32>
    %813 = arith.mulf %812, %810 : vector<8x16xf32>
    %814 = arith.mulf %803, %732 : vector<8x16xf32>
    %815 = arith.addf %813, %814 : vector<8x16xf32>
    %816 = arith.index_cast %734 : i32 to index
    %c0_353 = arith.constant 0 : index
    %817 = vector.load %arg15[%816, %c0_353] : memref<64x32xf32, #tpu.memory_space<vmem>>, vector<8x16xf32>
    tpu.vector_store %arg15[%816, %c0_353], %776 {strides = array<i32>} : memref<64x32xf32, #tpu.memory_space<vmem>>, vector<8x16xf32>,
    %818 = arith.index_cast %737 : i32 to index
    %c16_354 = arith.constant 16 : index
    %819 = vector.load %arg15[%818, %c16_354] : memref<64x32xf32, #tpu.memory_space<vmem>>, vector<8x16xf32>
    tpu.vector_store %arg15[%818, %c16_354], %815 {strides = array<i32>} : memref<64x32xf32, #tpu.memory_space<vmem>>, vector<8x16xf32>,
    %c1_i32_355 = arith.constant 1 : i32
    %c8_i32_356 = arith.constant 8 : i32
    %820 = arith.muli %c1_i32_355, %c8_i32_356 : i32
    %821 = tpu.assume_multiple %820, 8 : i32
    %c7_i32_357 = arith.constant 7 : i32
    %822 = arith.subi %c7_i32_357, %c1_i32_355 : i32
    %c8_i32_358 = arith.constant 8 : i32
    %823 = arith.muli %822, %c8_i32_358 : i32
    %824 = tpu.assume_multiple %823, 8 : i32
    %825 = arith.index_cast %821 : i32 to index
    %c0_359 = arith.constant 0 : index
    %826 = vector.load %arg13[%825, %c0_359] : memref<64x48xf32, #tpu.memory_space<vmem>>, vector<8x48xf32>
    %c1_360 = arith.constant 1 : index
    %c0_361 = arith.constant 0 : index
    %c0_362 = arith.constant 0 : index
    %827 = vector.load %arg6[%c1_360, %c0_361, %c0_362] : memref<2x16x48xf32, #tpu.memory_space<vmem>>, vector<1x16x48xf32>
    %828 = vector.shape_cast %827 : vector<1x16x48xf32> to vector<16x48xf32>
    %c1_363 = arith.constant 1 : index
    %c0_364 = arith.constant 0 : index
    %c0_365 = arith.constant 0 : index
    %829 = vector.load %arg8[%c1_363, %c0_364, %c0_365] : memref<2x1x16xf32, #tpu.memory_space<vmem>>, vector<1x1x16xf32>
    %830 = vector.shape_cast %829 : vector<1x1x16xf32> to vector<1x16xf32>
    %cst_366 = arith.constant dense<0.000000e+00> : vector<8x48xf32>
    %831 = tpu.matmul %776, %828, %cst_366 {dimension_numbers = #tpu.dot_dimension_numbers<[1], [0], [0], [1], [0, 0, 1, 1], [], []>, precision = #tpu.contract_precision<fp32>} : vector<8x16xf32>, vector<16x48xf32>, vector<8x48xf32> -> vector<8x48xf32>
    %832 = vector.extract_strided_slice %826 {offsets = [0, 0], sizes = [8, 16], strides = [1, 1]} : vector<8x48xf32> to vector<8x16xf32>
    %833 = vector.extract_strided_slice %831 {offsets = [0, 0], sizes = [8, 16], strides = [1, 1]} : vector<8x48xf32> to vector<8x16xf32>
    %834 = arith.addf %832, %833 : vector<8x16xf32>
    %cst_367 = arith.constant 5.000000e-01 : f32
    %835 = vector.broadcast %cst_367 : f32 to vector<8x16xf32>
    %836 = arith.mulf %835, %834 : vector<8x16xf32>
    %837 = math.tanh %836 : vector<8x16xf32>
    %cst_368 = arith.constant 5.000000e-01 : f32
    %838 = vector.broadcast %cst_368 : f32 to vector<8x16xf32>
    %839 = arith.mulf %838, %837 : vector<8x16xf32>
    %cst_369 = arith.constant 5.000000e-01 : f32
    %840 = vector.broadcast %cst_369 : f32 to vector<8x16xf32>
    %841 = arith.addf %839, %840 : vector<8x16xf32>
    %842 = vector.extract_strided_slice %826 {offsets = [0, 16], sizes = [8, 16], strides = [1, 1]} : vector<8x48xf32> to vector<8x16xf32>
    %843 = vector.extract_strided_slice %831 {offsets = [0, 16], sizes = [8, 16], strides = [1, 1]} : vector<8x48xf32> to vector<8x16xf32>
    %844 = arith.addf %842, %843 : vector<8x16xf32>
    %cst_370 = arith.constant 5.000000e-01 : f32
    %845 = vector.broadcast %cst_370 : f32 to vector<8x16xf32>
    %846 = arith.mulf %845, %844 : vector<8x16xf32>
    %847 = math.tanh %846 : vector<8x16xf32>
    %cst_371 = arith.constant 5.000000e-01 : f32
    %848 = vector.broadcast %cst_371 : f32 to vector<8x16xf32>
    %849 = arith.mulf %848, %847 : vector<8x16xf32>
    %cst_372 = arith.constant 5.000000e-01 : f32
    %850 = vector.broadcast %cst_372 : f32 to vector<8x16xf32>
    %851 = arith.addf %849, %850 : vector<8x16xf32>
    %852 = vector.extract_strided_slice %826 {offsets = [0, 32], sizes = [8, 16], strides = [1, 1]} : vector<8x48xf32> to vector<8x16xf32>
    %853 = vector.extract_strided_slice %831 {offsets = [0, 32], sizes = [8, 16], strides = [1, 1]} : vector<8x48xf32> to vector<8x16xf32>
    %854 = vector.broadcast %830 : vector<1x16xf32> to vector<8x16xf32>
    %855 = arith.addf %853, %854 : vector<8x16xf32>
    %856 = arith.mulf %841, %855 : vector<8x16xf32>
    %857 = arith.addf %852, %856 : vector<8x16xf32>
    %858 = math.tanh %857 : vector<8x16xf32>
    %cst_373 = arith.constant 1.000000e+00 : f32
    %859 = vector.broadcast %cst_373 : f32 to vector<8x16xf32>
    %860 = arith.subf %859, %851 : vector<8x16xf32>
    %861 = arith.mulf %860, %858 : vector<8x16xf32>
    %862 = arith.mulf %851, %776 : vector<8x16xf32>
    %863 = arith.addf %861, %862 : vector<8x16xf32>
    %864 = arith.index_cast %824 : i32 to index
    %c0_374 = arith.constant 0 : index
    %865 = vector.load %arg14[%864, %c0_374] : memref<64x48xf32, #tpu.memory_space<vmem>>, vector<8x48xf32>
    %c1_375 = arith.constant 1 : index
    %c0_376 = arith.constant 0 : index
    %c0_377 = arith.constant 0 : index
    %866 = vector.load %arg7[%c1_375, %c0_376, %c0_377] : memref<2x16x48xf32, #tpu.memory_space<vmem>>, vector<1x16x48xf32>
    %867 = vector.shape_cast %866 : vector<1x16x48xf32> to vector<16x48xf32>
    %c1_378 = arith.constant 1 : index
    %c0_379 = arith.constant 0 : index
    %c0_380 = arith.constant 0 : index
    %868 = vector.load %arg9[%c1_378, %c0_379, %c0_380] : memref<2x1x16xf32, #tpu.memory_space<vmem>>, vector<1x1x16xf32>
    %869 = vector.shape_cast %868 : vector<1x1x16xf32> to vector<1x16xf32>
    %cst_381 = arith.constant dense<0.000000e+00> : vector<8x48xf32>
    %870 = tpu.matmul %815, %867, %cst_381 {dimension_numbers = #tpu.dot_dimension_numbers<[1], [0], [0], [1], [0, 0, 1, 1], [], []>, precision = #tpu.contract_precision<fp32>} : vector<8x16xf32>, vector<16x48xf32>, vector<8x48xf32> -> vector<8x48xf32>
    %871 = vector.extract_strided_slice %865 {offsets = [0, 0], sizes = [8, 16], strides = [1, 1]} : vector<8x48xf32> to vector<8x16xf32>
    %872 = vector.extract_strided_slice %870 {offsets = [0, 0], sizes = [8, 16], strides = [1, 1]} : vector<8x48xf32> to vector<8x16xf32>
    %873 = arith.addf %871, %872 : vector<8x16xf32>
    %cst_382 = arith.constant 5.000000e-01 : f32
    %874 = vector.broadcast %cst_382 : f32 to vector<8x16xf32>
    %875 = arith.mulf %874, %873 : vector<8x16xf32>
    %876 = math.tanh %875 : vector<8x16xf32>
    %cst_383 = arith.constant 5.000000e-01 : f32
    %877 = vector.broadcast %cst_383 : f32 to vector<8x16xf32>
    %878 = arith.mulf %877, %876 : vector<8x16xf32>
    %cst_384 = arith.constant 5.000000e-01 : f32
    %879 = vector.broadcast %cst_384 : f32 to vector<8x16xf32>
    %880 = arith.addf %878, %879 : vector<8x16xf32>
    %881 = vector.extract_strided_slice %865 {offsets = [0, 16], sizes = [8, 16], strides = [1, 1]} : vector<8x48xf32> to vector<8x16xf32>
    %882 = vector.extract_strided_slice %870 {offsets = [0, 16], sizes = [8, 16], strides = [1, 1]} : vector<8x48xf32> to vector<8x16xf32>
    %883 = arith.addf %881, %882 : vector<8x16xf32>
    %cst_385 = arith.constant 5.000000e-01 : f32
    %884 = vector.broadcast %cst_385 : f32 to vector<8x16xf32>
    %885 = arith.mulf %884, %883 : vector<8x16xf32>
    %886 = math.tanh %885 : vector<8x16xf32>
    %cst_386 = arith.constant 5.000000e-01 : f32
    %887 = vector.broadcast %cst_386 : f32 to vector<8x16xf32>
    %888 = arith.mulf %887, %886 : vector<8x16xf32>
    %cst_387 = arith.constant 5.000000e-01 : f32
    %889 = vector.broadcast %cst_387 : f32 to vector<8x16xf32>
    %890 = arith.addf %888, %889 : vector<8x16xf32>
    %891 = vector.extract_strided_slice %865 {offsets = [0, 32], sizes = [8, 16], strides = [1, 1]} : vector<8x48xf32> to vector<8x16xf32>
    %892 = vector.extract_strided_slice %870 {offsets = [0, 32], sizes = [8, 16], strides = [1, 1]} : vector<8x48xf32> to vector<8x16xf32>
    %893 = vector.broadcast %869 : vector<1x16xf32> to vector<8x16xf32>
    %894 = arith.addf %892, %893 : vector<8x16xf32>
    %895 = arith.mulf %880, %894 : vector<8x16xf32>
    %896 = arith.addf %891, %895 : vector<8x16xf32>
    %897 = math.tanh %896 : vector<8x16xf32>
    %cst_388 = arith.constant 1.000000e+00 : f32
    %898 = vector.broadcast %cst_388 : f32 to vector<8x16xf32>
    %899 = arith.subf %898, %890 : vector<8x16xf32>
    %900 = arith.mulf %899, %897 : vector<8x16xf32>
    %901 = arith.mulf %890, %815 : vector<8x16xf32>
    %902 = arith.addf %900, %901 : vector<8x16xf32>
    %903 = arith.index_cast %821 : i32 to index
    %c0_389 = arith.constant 0 : index
    %904 = vector.load %arg15[%903, %c0_389] : memref<64x32xf32, #tpu.memory_space<vmem>>, vector<8x16xf32>
    tpu.vector_store %arg15[%903, %c0_389], %863 {strides = array<i32>} : memref<64x32xf32, #tpu.memory_space<vmem>>, vector<8x16xf32>,
    %905 = arith.index_cast %824 : i32 to index
    %c16_390 = arith.constant 16 : index
    %906 = vector.load %arg15[%905, %c16_390] : memref<64x32xf32, #tpu.memory_space<vmem>>, vector<8x16xf32>
    tpu.vector_store %arg15[%905, %c16_390], %902 {strides = array<i32>} : memref<64x32xf32, #tpu.memory_space<vmem>>, vector<8x16xf32>,
    %c2_i32_391 = arith.constant 2 : i32
    %c8_i32_392 = arith.constant 8 : i32
    %907 = arith.muli %c2_i32_391, %c8_i32_392 : i32
    %908 = tpu.assume_multiple %907, 8 : i32
    %c7_i32_393 = arith.constant 7 : i32
    %909 = arith.subi %c7_i32_393, %c2_i32_391 : i32
    %c8_i32_394 = arith.constant 8 : i32
    %910 = arith.muli %909, %c8_i32_394 : i32
    %911 = tpu.assume_multiple %910, 8 : i32
    %912 = arith.index_cast %908 : i32 to index
    %c0_395 = arith.constant 0 : index
    %913 = vector.load %arg13[%912, %c0_395] : memref<64x48xf32, #tpu.memory_space<vmem>>, vector<8x48xf32>
    %c1_396 = arith.constant 1 : index
    %c0_397 = arith.constant 0 : index
    %c0_398 = arith.constant 0 : index
    %914 = vector.load %arg6[%c1_396, %c0_397, %c0_398] : memref<2x16x48xf32, #tpu.memory_space<vmem>>, vector<1x16x48xf32>
    %915 = vector.shape_cast %914 : vector<1x16x48xf32> to vector<16x48xf32>
    %c1_399 = arith.constant 1 : index
    %c0_400 = arith.constant 0 : index
    %c0_401 = arith.constant 0 : index
    %916 = vector.load %arg8[%c1_399, %c0_400, %c0_401] : memref<2x1x16xf32, #tpu.memory_space<vmem>>, vector<1x1x16xf32>
    %917 = vector.shape_cast %916 : vector<1x1x16xf32> to vector<1x16xf32>
    %cst_402 = arith.constant dense<0.000000e+00> : vector<8x48xf32>
    %918 = tpu.matmul %863, %915, %cst_402 {dimension_numbers = #tpu.dot_dimension_numbers<[1], [0], [0], [1], [0, 0, 1, 1], [], []>, precision = #tpu.contract_precision<fp32>} : vector<8x16xf32>, vector<16x48xf32>, vector<8x48xf32> -> vector<8x48xf32>
    %919 = vector.extract_strided_slice %913 {offsets = [0, 0], sizes = [8, 16], strides = [1, 1]} : vector<8x48xf32> to vector<8x16xf32>
    %920 = vector.extract_strided_slice %918 {offsets = [0, 0], sizes = [8, 16], strides = [1, 1]} : vector<8x48xf32> to vector<8x16xf32>
    %921 = arith.addf %919, %920 : vector<8x16xf32>
    %cst_403 = arith.constant 5.000000e-01 : f32
    %922 = vector.broadcast %cst_403 : f32 to vector<8x16xf32>
    %923 = arith.mulf %922, %921 : vector<8x16xf32>
    %924 = math.tanh %923 : vector<8x16xf32>
    %cst_404 = arith.constant 5.000000e-01 : f32
    %925 = vector.broadcast %cst_404 : f32 to vector<8x16xf32>
    %926 = arith.mulf %925, %924 : vector<8x16xf32>
    %cst_405 = arith.constant 5.000000e-01 : f32
    %927 = vector.broadcast %cst_405 : f32 to vector<8x16xf32>
    %928 = arith.addf %926, %927 : vector<8x16xf32>
    %929 = vector.extract_strided_slice %913 {offsets = [0, 16], sizes = [8, 16], strides = [1, 1]} : vector<8x48xf32> to vector<8x16xf32>
    %930 = vector.extract_strided_slice %918 {offsets = [0, 16], sizes = [8, 16], strides = [1, 1]} : vector<8x48xf32> to vector<8x16xf32>
    %931 = arith.addf %929, %930 : vector<8x16xf32>
    %cst_406 = arith.constant 5.000000e-01 : f32
    %932 = vector.broadcast %cst_406 : f32 to vector<8x16xf32>
    %933 = arith.mulf %932, %931 : vector<8x16xf32>
    %934 = math.tanh %933 : vector<8x16xf32>
    %cst_407 = arith.constant 5.000000e-01 : f32
    %935 = vector.broadcast %cst_407 : f32 to vector<8x16xf32>
    %936 = arith.mulf %935, %934 : vector<8x16xf32>
    %cst_408 = arith.constant 5.000000e-01 : f32
    %937 = vector.broadcast %cst_408 : f32 to vector<8x16xf32>
    %938 = arith.addf %936, %937 : vector<8x16xf32>
    %939 = vector.extract_strided_slice %913 {offsets = [0, 32], sizes = [8, 16], strides = [1, 1]} : vector<8x48xf32> to vector<8x16xf32>
    %940 = vector.extract_strided_slice %918 {offsets = [0, 32], sizes = [8, 16], strides = [1, 1]} : vector<8x48xf32> to vector<8x16xf32>
    %941 = vector.broadcast %917 : vector<1x16xf32> to vector<8x16xf32>
    %942 = arith.addf %940, %941 : vector<8x16xf32>
    %943 = arith.mulf %928, %942 : vector<8x16xf32>
    %944 = arith.addf %939, %943 : vector<8x16xf32>
    %945 = math.tanh %944 : vector<8x16xf32>
    %cst_409 = arith.constant 1.000000e+00 : f32
    %946 = vector.broadcast %cst_409 : f32 to vector<8x16xf32>
    %947 = arith.subf %946, %938 : vector<8x16xf32>
    %948 = arith.mulf %947, %945 : vector<8x16xf32>
    %949 = arith.mulf %938, %863 : vector<8x16xf32>
    %950 = arith.addf %948, %949 : vector<8x16xf32>
    %951 = arith.index_cast %911 : i32 to index
    %c0_410 = arith.constant 0 : index
    %952 = vector.load %arg14[%951, %c0_410] : memref<64x48xf32, #tpu.memory_space<vmem>>, vector<8x48xf32>
    %c1_411 = arith.constant 1 : index
    %c0_412 = arith.constant 0 : index
    %c0_413 = arith.constant 0 : index
    %953 = vector.load %arg7[%c1_411, %c0_412, %c0_413] : memref<2x16x48xf32, #tpu.memory_space<vmem>>, vector<1x16x48xf32>
    %954 = vector.shape_cast %953 : vector<1x16x48xf32> to vector<16x48xf32>
    %c1_414 = arith.constant 1 : index
    %c0_415 = arith.constant 0 : index
    %c0_416 = arith.constant 0 : index
    %955 = vector.load %arg9[%c1_414, %c0_415, %c0_416] : memref<2x1x16xf32, #tpu.memory_space<vmem>>, vector<1x1x16xf32>
    %956 = vector.shape_cast %955 : vector<1x1x16xf32> to vector<1x16xf32>
    %cst_417 = arith.constant dense<0.000000e+00> : vector<8x48xf32>
    %957 = tpu.matmul %902, %954, %cst_417 {dimension_numbers = #tpu.dot_dimension_numbers<[1], [0], [0], [1], [0, 0, 1, 1], [], []>, precision = #tpu.contract_precision<fp32>} : vector<8x16xf32>, vector<16x48xf32>, vector<8x48xf32> -> vector<8x48xf32>
    %958 = vector.extract_strided_slice %952 {offsets = [0, 0], sizes = [8, 16], strides = [1, 1]} : vector<8x48xf32> to vector<8x16xf32>
    %959 = vector.extract_strided_slice %957 {offsets = [0, 0], sizes = [8, 16], strides = [1, 1]} : vector<8x48xf32> to vector<8x16xf32>
    %960 = arith.addf %958, %959 : vector<8x16xf32>
    %cst_418 = arith.constant 5.000000e-01 : f32
    %961 = vector.broadcast %cst_418 : f32 to vector<8x16xf32>
    %962 = arith.mulf %961, %960 : vector<8x16xf32>
    %963 = math.tanh %962 : vector<8x16xf32>
    %cst_419 = arith.constant 5.000000e-01 : f32
    %964 = vector.broadcast %cst_419 : f32 to vector<8x16xf32>
    %965 = arith.mulf %964, %963 : vector<8x16xf32>
    %cst_420 = arith.constant 5.000000e-01 : f32
    %966 = vector.broadcast %cst_420 : f32 to vector<8x16xf32>
    %967 = arith.addf %965, %966 : vector<8x16xf32>
    %968 = vector.extract_strided_slice %952 {offsets = [0, 16], sizes = [8, 16], strides = [1, 1]} : vector<8x48xf32> to vector<8x16xf32>
    %969 = vector.extract_strided_slice %957 {offsets = [0, 16], sizes = [8, 16], strides = [1, 1]} : vector<8x48xf32> to vector<8x16xf32>
    %970 = arith.addf %968, %969 : vector<8x16xf32>
    %cst_421 = arith.constant 5.000000e-01 : f32
    %971 = vector.broadcast %cst_421 : f32 to vector<8x16xf32>
    %972 = arith.mulf %971, %970 : vector<8x16xf32>
    %973 = math.tanh %972 : vector<8x16xf32>
    %cst_422 = arith.constant 5.000000e-01 : f32
    %974 = vector.broadcast %cst_422 : f32 to vector<8x16xf32>
    %975 = arith.mulf %974, %973 : vector<8x16xf32>
    %cst_423 = arith.constant 5.000000e-01 : f32
    %976 = vector.broadcast %cst_423 : f32 to vector<8x16xf32>
    %977 = arith.addf %975, %976 : vector<8x16xf32>
    %978 = vector.extract_strided_slice %952 {offsets = [0, 32], sizes = [8, 16], strides = [1, 1]} : vector<8x48xf32> to vector<8x16xf32>
    %979 = vector.extract_strided_slice %957 {offsets = [0, 32], sizes = [8, 16], strides = [1, 1]} : vector<8x48xf32> to vector<8x16xf32>
    %980 = vector.broadcast %956 : vector<1x16xf32> to vector<8x16xf32>
    %981 = arith.addf %979, %980 : vector<8x16xf32>
    %982 = arith.mulf %967, %981 : vector<8x16xf32>
    %983 = arith.addf %978, %982 : vector<8x16xf32>
    %984 = math.tanh %983 : vector<8x16xf32>
    %cst_424 = arith.constant 1.000000e+00 : f32
    %985 = vector.broadcast %cst_424 : f32 to vector<8x16xf32>
    %986 = arith.subf %985, %977 : vector<8x16xf32>
    %987 = arith.mulf %986, %984 : vector<8x16xf32>
    %988 = arith.mulf %977, %902 : vector<8x16xf32>
    %989 = arith.addf %987, %988 : vector<8x16xf32>
    %990 = arith.index_cast %908 : i32 to index
    %c0_425 = arith.constant 0 : index
    %991 = vector.load %arg15[%990, %c0_425] : memref<64x32xf32, #tpu.memory_space<vmem>>, vector<8x16xf32>
    tpu.vector_store %arg15[%990, %c0_425], %950 {strides = array<i32>} : memref<64x32xf32, #tpu.memory_space<vmem>>, vector<8x16xf32>,
    %992 = arith.index_cast %911 : i32 to index
    %c16_426 = arith.constant 16 : index
    %993 = vector.load %arg15[%992, %c16_426] : memref<64x32xf32, #tpu.memory_space<vmem>>, vector<8x16xf32>
    tpu.vector_store %arg15[%992, %c16_426], %989 {strides = array<i32>} : memref<64x32xf32, #tpu.memory_space<vmem>>, vector<8x16xf32>,
    %c3_i32_427 = arith.constant 3 : i32
    %c8_i32_428 = arith.constant 8 : i32
    %994 = arith.muli %c3_i32_427, %c8_i32_428 : i32
    %995 = tpu.assume_multiple %994, 8 : i32
    %c7_i32_429 = arith.constant 7 : i32
    %996 = arith.subi %c7_i32_429, %c3_i32_427 : i32
    %c8_i32_430 = arith.constant 8 : i32
    %997 = arith.muli %996, %c8_i32_430 : i32
    %998 = tpu.assume_multiple %997, 8 : i32
    %999 = arith.index_cast %995 : i32 to index
    %c0_431 = arith.constant 0 : index
    %1000 = vector.load %arg13[%999, %c0_431] : memref<64x48xf32, #tpu.memory_space<vmem>>, vector<8x48xf32>
    %c1_432 = arith.constant 1 : index
    %c0_433 = arith.constant 0 : index
    %c0_434 = arith.constant 0 : index
    %1001 = vector.load %arg6[%c1_432, %c0_433, %c0_434] : memref<2x16x48xf32, #tpu.memory_space<vmem>>, vector<1x16x48xf32>
    %1002 = vector.shape_cast %1001 : vector<1x16x48xf32> to vector<16x48xf32>
    %c1_435 = arith.constant 1 : index
    %c0_436 = arith.constant 0 : index
    %c0_437 = arith.constant 0 : index
    %1003 = vector.load %arg8[%c1_435, %c0_436, %c0_437] : memref<2x1x16xf32, #tpu.memory_space<vmem>>, vector<1x1x16xf32>
    %1004 = vector.shape_cast %1003 : vector<1x1x16xf32> to vector<1x16xf32>
    %cst_438 = arith.constant dense<0.000000e+00> : vector<8x48xf32>
    %1005 = tpu.matmul %950, %1002, %cst_438 {dimension_numbers = #tpu.dot_dimension_numbers<[1], [0], [0], [1], [0, 0, 1, 1], [], []>, precision = #tpu.contract_precision<fp32>} : vector<8x16xf32>, vector<16x48xf32>, vector<8x48xf32> -> vector<8x48xf32>
    %1006 = vector.extract_strided_slice %1000 {offsets = [0, 0], sizes = [8, 16], strides = [1, 1]} : vector<8x48xf32> to vector<8x16xf32>
    %1007 = vector.extract_strided_slice %1005 {offsets = [0, 0], sizes = [8, 16], strides = [1, 1]} : vector<8x48xf32> to vector<8x16xf32>
    %1008 = arith.addf %1006, %1007 : vector<8x16xf32>
    %cst_439 = arith.constant 5.000000e-01 : f32
    %1009 = vector.broadcast %cst_439 : f32 to vector<8x16xf32>
    %1010 = arith.mulf %1009, %1008 : vector<8x16xf32>
    %1011 = math.tanh %1010 : vector<8x16xf32>
    %cst_440 = arith.constant 5.000000e-01 : f32
    %1012 = vector.broadcast %cst_440 : f32 to vector<8x16xf32>
    %1013 = arith.mulf %1012, %1011 : vector<8x16xf32>
    %cst_441 = arith.constant 5.000000e-01 : f32
    %1014 = vector.broadcast %cst_441 : f32 to vector<8x16xf32>
    %1015 = arith.addf %1013, %1014 : vector<8x16xf32>
    %1016 = vector.extract_strided_slice %1000 {offsets = [0, 16], sizes = [8, 16], strides = [1, 1]} : vector<8x48xf32> to vector<8x16xf32>
    %1017 = vector.extract_strided_slice %1005 {offsets = [0, 16], sizes = [8, 16], strides = [1, 1]} : vector<8x48xf32> to vector<8x16xf32>
    %1018 = arith.addf %1016, %1017 : vector<8x16xf32>
    %cst_442 = arith.constant 5.000000e-01 : f32
    %1019 = vector.broadcast %cst_442 : f32 to vector<8x16xf32>
    %1020 = arith.mulf %1019, %1018 : vector<8x16xf32>
    %1021 = math.tanh %1020 : vector<8x16xf32>
    %cst_443 = arith.constant 5.000000e-01 : f32
    %1022 = vector.broadcast %cst_443 : f32 to vector<8x16xf32>
    %1023 = arith.mulf %1022, %1021 : vector<8x16xf32>
    %cst_444 = arith.constant 5.000000e-01 : f32
    %1024 = vector.broadcast %cst_444 : f32 to vector<8x16xf32>
    %1025 = arith.addf %1023, %1024 : vector<8x16xf32>
    %1026 = vector.extract_strided_slice %1000 {offsets = [0, 32], sizes = [8, 16], strides = [1, 1]} : vector<8x48xf32> to vector<8x16xf32>
    %1027 = vector.extract_strided_slice %1005 {offsets = [0, 32], sizes = [8, 16], strides = [1, 1]} : vector<8x48xf32> to vector<8x16xf32>
    %1028 = vector.broadcast %1004 : vector<1x16xf32> to vector<8x16xf32>
    %1029 = arith.addf %1027, %1028 : vector<8x16xf32>
    %1030 = arith.mulf %1015, %1029 : vector<8x16xf32>
    %1031 = arith.addf %1026, %1030 : vector<8x16xf32>
    %1032 = math.tanh %1031 : vector<8x16xf32>
    %cst_445 = arith.constant 1.000000e+00 : f32
    %1033 = vector.broadcast %cst_445 : f32 to vector<8x16xf32>
    %1034 = arith.subf %1033, %1025 : vector<8x16xf32>
    %1035 = arith.mulf %1034, %1032 : vector<8x16xf32>
    %1036 = arith.mulf %1025, %950 : vector<8x16xf32>
    %1037 = arith.addf %1035, %1036 : vector<8x16xf32>
    %1038 = arith.index_cast %998 : i32 to index
    %c0_446 = arith.constant 0 : index
    %1039 = vector.load %arg14[%1038, %c0_446] : memref<64x48xf32, #tpu.memory_space<vmem>>, vector<8x48xf32>
    %c1_447 = arith.constant 1 : index
    %c0_448 = arith.constant 0 : index
    %c0_449 = arith.constant 0 : index
    %1040 = vector.load %arg7[%c1_447, %c0_448, %c0_449] : memref<2x16x48xf32, #tpu.memory_space<vmem>>, vector<1x16x48xf32>
    %1041 = vector.shape_cast %1040 : vector<1x16x48xf32> to vector<16x48xf32>
    %c1_450 = arith.constant 1 : index
    %c0_451 = arith.constant 0 : index
    %c0_452 = arith.constant 0 : index
    %1042 = vector.load %arg9[%c1_450, %c0_451, %c0_452] : memref<2x1x16xf32, #tpu.memory_space<vmem>>, vector<1x1x16xf32>
    %1043 = vector.shape_cast %1042 : vector<1x1x16xf32> to vector<1x16xf32>
    %cst_453 = arith.constant dense<0.000000e+00> : vector<8x48xf32>
    %1044 = tpu.matmul %989, %1041, %cst_453 {dimension_numbers = #tpu.dot_dimension_numbers<[1], [0], [0], [1], [0, 0, 1, 1], [], []>, precision = #tpu.contract_precision<fp32>} : vector<8x16xf32>, vector<16x48xf32>, vector<8x48xf32> -> vector<8x48xf32>
    %1045 = vector.extract_strided_slice %1039 {offsets = [0, 0], sizes = [8, 16], strides = [1, 1]} : vector<8x48xf32> to vector<8x16xf32>
    %1046 = vector.extract_strided_slice %1044 {offsets = [0, 0], sizes = [8, 16], strides = [1, 1]} : vector<8x48xf32> to vector<8x16xf32>
    %1047 = arith.addf %1045, %1046 : vector<8x16xf32>
    %cst_454 = arith.constant 5.000000e-01 : f32
    %1048 = vector.broadcast %cst_454 : f32 to vector<8x16xf32>
    %1049 = arith.mulf %1048, %1047 : vector<8x16xf32>
    %1050 = math.tanh %1049 : vector<8x16xf32>
    %cst_455 = arith.constant 5.000000e-01 : f32
    %1051 = vector.broadcast %cst_455 : f32 to vector<8x16xf32>
    %1052 = arith.mulf %1051, %1050 : vector<8x16xf32>
    %cst_456 = arith.constant 5.000000e-01 : f32
    %1053 = vector.broadcast %cst_456 : f32 to vector<8x16xf32>
    %1054 = arith.addf %1052, %1053 : vector<8x16xf32>
    %1055 = vector.extract_strided_slice %1039 {offsets = [0, 16], sizes = [8, 16], strides = [1, 1]} : vector<8x48xf32> to vector<8x16xf32>
    %1056 = vector.extract_strided_slice %1044 {offsets = [0, 16], sizes = [8, 16], strides = [1, 1]} : vector<8x48xf32> to vector<8x16xf32>
    %1057 = arith.addf %1055, %1056 : vector<8x16xf32>
    %cst_457 = arith.constant 5.000000e-01 : f32
    %1058 = vector.broadcast %cst_457 : f32 to vector<8x16xf32>
    %1059 = arith.mulf %1058, %1057 : vector<8x16xf32>
    %1060 = math.tanh %1059 : vector<8x16xf32>
    %cst_458 = arith.constant 5.000000e-01 : f32
    %1061 = vector.broadcast %cst_458 : f32 to vector<8x16xf32>
    %1062 = arith.mulf %1061, %1060 : vector<8x16xf32>
    %cst_459 = arith.constant 5.000000e-01 : f32
    %1063 = vector.broadcast %cst_459 : f32 to vector<8x16xf32>
    %1064 = arith.addf %1062, %1063 : vector<8x16xf32>
    %1065 = vector.extract_strided_slice %1039 {offsets = [0, 32], sizes = [8, 16], strides = [1, 1]} : vector<8x48xf32> to vector<8x16xf32>
    %1066 = vector.extract_strided_slice %1044 {offsets = [0, 32], sizes = [8, 16], strides = [1, 1]} : vector<8x48xf32> to vector<8x16xf32>
    %1067 = vector.broadcast %1043 : vector<1x16xf32> to vector<8x16xf32>
    %1068 = arith.addf %1066, %1067 : vector<8x16xf32>
    %1069 = arith.mulf %1054, %1068 : vector<8x16xf32>
    %1070 = arith.addf %1065, %1069 : vector<8x16xf32>
    %1071 = math.tanh %1070 : vector<8x16xf32>
    %cst_460 = arith.constant 1.000000e+00 : f32
    %1072 = vector.broadcast %cst_460 : f32 to vector<8x16xf32>
    %1073 = arith.subf %1072, %1064 : vector<8x16xf32>
    %1074 = arith.mulf %1073, %1071 : vector<8x16xf32>
    %1075 = arith.mulf %1064, %989 : vector<8x16xf32>
    %1076 = arith.addf %1074, %1075 : vector<8x16xf32>
    %1077 = arith.index_cast %995 : i32 to index
    %c0_461 = arith.constant 0 : index
    %1078 = vector.load %arg15[%1077, %c0_461] : memref<64x32xf32, #tpu.memory_space<vmem>>, vector<8x16xf32>
    tpu.vector_store %arg15[%1077, %c0_461], %1037 {strides = array<i32>} : memref<64x32xf32, #tpu.memory_space<vmem>>, vector<8x16xf32>,
    %1079 = arith.index_cast %998 : i32 to index
    %c16_462 = arith.constant 16 : index
    %1080 = vector.load %arg15[%1079, %c16_462] : memref<64x32xf32, #tpu.memory_space<vmem>>, vector<8x16xf32>
    tpu.vector_store %arg15[%1079, %c16_462], %1076 {strides = array<i32>} : memref<64x32xf32, #tpu.memory_space<vmem>>, vector<8x16xf32>,
    %c4_i32_463 = arith.constant 4 : i32
    %c8_i32_464 = arith.constant 8 : i32
    %1081 = arith.muli %c4_i32_463, %c8_i32_464 : i32
    %1082 = tpu.assume_multiple %1081, 8 : i32
    %c7_i32_465 = arith.constant 7 : i32
    %1083 = arith.subi %c7_i32_465, %c4_i32_463 : i32
    %c8_i32_466 = arith.constant 8 : i32
    %1084 = arith.muli %1083, %c8_i32_466 : i32
    %1085 = tpu.assume_multiple %1084, 8 : i32
    %1086 = arith.index_cast %1082 : i32 to index
    %c0_467 = arith.constant 0 : index
    %1087 = vector.load %arg13[%1086, %c0_467] : memref<64x48xf32, #tpu.memory_space<vmem>>, vector<8x48xf32>
    %c1_468 = arith.constant 1 : index
    %c0_469 = arith.constant 0 : index
    %c0_470 = arith.constant 0 : index
    %1088 = vector.load %arg6[%c1_468, %c0_469, %c0_470] : memref<2x16x48xf32, #tpu.memory_space<vmem>>, vector<1x16x48xf32>
    %1089 = vector.shape_cast %1088 : vector<1x16x48xf32> to vector<16x48xf32>
    %c1_471 = arith.constant 1 : index
    %c0_472 = arith.constant 0 : index
    %c0_473 = arith.constant 0 : index
    %1090 = vector.load %arg8[%c1_471, %c0_472, %c0_473] : memref<2x1x16xf32, #tpu.memory_space<vmem>>, vector<1x1x16xf32>
    %1091 = vector.shape_cast %1090 : vector<1x1x16xf32> to vector<1x16xf32>
    %cst_474 = arith.constant dense<0.000000e+00> : vector<8x48xf32>
    %1092 = tpu.matmul %1037, %1089, %cst_474 {dimension_numbers = #tpu.dot_dimension_numbers<[1], [0], [0], [1], [0, 0, 1, 1], [], []>, precision = #tpu.contract_precision<fp32>} : vector<8x16xf32>, vector<16x48xf32>, vector<8x48xf32> -> vector<8x48xf32>
    %1093 = vector.extract_strided_slice %1087 {offsets = [0, 0], sizes = [8, 16], strides = [1, 1]} : vector<8x48xf32> to vector<8x16xf32>
    %1094 = vector.extract_strided_slice %1092 {offsets = [0, 0], sizes = [8, 16], strides = [1, 1]} : vector<8x48xf32> to vector<8x16xf32>
    %1095 = arith.addf %1093, %1094 : vector<8x16xf32>
    %cst_475 = arith.constant 5.000000e-01 : f32
    %1096 = vector.broadcast %cst_475 : f32 to vector<8x16xf32>
    %1097 = arith.mulf %1096, %1095 : vector<8x16xf32>
    %1098 = math.tanh %1097 : vector<8x16xf32>
    %cst_476 = arith.constant 5.000000e-01 : f32
    %1099 = vector.broadcast %cst_476 : f32 to vector<8x16xf32>
    %1100 = arith.mulf %1099, %1098 : vector<8x16xf32>
    %cst_477 = arith.constant 5.000000e-01 : f32
    %1101 = vector.broadcast %cst_477 : f32 to vector<8x16xf32>
    %1102 = arith.addf %1100, %1101 : vector<8x16xf32>
    %1103 = vector.extract_strided_slice %1087 {offsets = [0, 16], sizes = [8, 16], strides = [1, 1]} : vector<8x48xf32> to vector<8x16xf32>
    %1104 = vector.extract_strided_slice %1092 {offsets = [0, 16], sizes = [8, 16], strides = [1, 1]} : vector<8x48xf32> to vector<8x16xf32>
    %1105 = arith.addf %1103, %1104 : vector<8x16xf32>
    %cst_478 = arith.constant 5.000000e-01 : f32
    %1106 = vector.broadcast %cst_478 : f32 to vector<8x16xf32>
    %1107 = arith.mulf %1106, %1105 : vector<8x16xf32>
    %1108 = math.tanh %1107 : vector<8x16xf32>
    %cst_479 = arith.constant 5.000000e-01 : f32
    %1109 = vector.broadcast %cst_479 : f32 to vector<8x16xf32>
    %1110 = arith.mulf %1109, %1108 : vector<8x16xf32>
    %cst_480 = arith.constant 5.000000e-01 : f32
    %1111 = vector.broadcast %cst_480 : f32 to vector<8x16xf32>
    %1112 = arith.addf %1110, %1111 : vector<8x16xf32>
    %1113 = vector.extract_strided_slice %1087 {offsets = [0, 32], sizes = [8, 16], strides = [1, 1]} : vector<8x48xf32> to vector<8x16xf32>
    %1114 = vector.extract_strided_slice %1092 {offsets = [0, 32], sizes = [8, 16], strides = [1, 1]} : vector<8x48xf32> to vector<8x16xf32>
    %1115 = vector.broadcast %1091 : vector<1x16xf32> to vector<8x16xf32>
    %1116 = arith.addf %1114, %1115 : vector<8x16xf32>
    %1117 = arith.mulf %1102, %1116 : vector<8x16xf32>
    %1118 = arith.addf %1113, %1117 : vector<8x16xf32>
    %1119 = math.tanh %1118 : vector<8x16xf32>
    %cst_481 = arith.constant 1.000000e+00 : f32
    %1120 = vector.broadcast %cst_481 : f32 to vector<8x16xf32>
    %1121 = arith.subf %1120, %1112 : vector<8x16xf32>
    %1122 = arith.mulf %1121, %1119 : vector<8x16xf32>
    %1123 = arith.mulf %1112, %1037 : vector<8x16xf32>
    %1124 = arith.addf %1122, %1123 : vector<8x16xf32>
    %1125 = arith.index_cast %1085 : i32 to index
    %c0_482 = arith.constant 0 : index
    %1126 = vector.load %arg14[%1125, %c0_482] : memref<64x48xf32, #tpu.memory_space<vmem>>, vector<8x48xf32>
    %c1_483 = arith.constant 1 : index
    %c0_484 = arith.constant 0 : index
    %c0_485 = arith.constant 0 : index
    %1127 = vector.load %arg7[%c1_483, %c0_484, %c0_485] : memref<2x16x48xf32, #tpu.memory_space<vmem>>, vector<1x16x48xf32>
    %1128 = vector.shape_cast %1127 : vector<1x16x48xf32> to vector<16x48xf32>
    %c1_486 = arith.constant 1 : index
    %c0_487 = arith.constant 0 : index
    %c0_488 = arith.constant 0 : index
    %1129 = vector.load %arg9[%c1_486, %c0_487, %c0_488] : memref<2x1x16xf32, #tpu.memory_space<vmem>>, vector<1x1x16xf32>
    %1130 = vector.shape_cast %1129 : vector<1x1x16xf32> to vector<1x16xf32>
    %cst_489 = arith.constant dense<0.000000e+00> : vector<8x48xf32>
    %1131 = tpu.matmul %1076, %1128, %cst_489 {dimension_numbers = #tpu.dot_dimension_numbers<[1], [0], [0], [1], [0, 0, 1, 1], [], []>, precision = #tpu.contract_precision<fp32>} : vector<8x16xf32>, vector<16x48xf32>, vector<8x48xf32> -> vector<8x48xf32>
    %1132 = vector.extract_strided_slice %1126 {offsets = [0, 0], sizes = [8, 16], strides = [1, 1]} : vector<8x48xf32> to vector<8x16xf32>
    %1133 = vector.extract_strided_slice %1131 {offsets = [0, 0], sizes = [8, 16], strides = [1, 1]} : vector<8x48xf32> to vector<8x16xf32>
    %1134 = arith.addf %1132, %1133 : vector<8x16xf32>
    %cst_490 = arith.constant 5.000000e-01 : f32
    %1135 = vector.broadcast %cst_490 : f32 to vector<8x16xf32>
    %1136 = arith.mulf %1135, %1134 : vector<8x16xf32>
    %1137 = math.tanh %1136 : vector<8x16xf32>
    %cst_491 = arith.constant 5.000000e-01 : f32
    %1138 = vector.broadcast %cst_491 : f32 to vector<8x16xf32>
    %1139 = arith.mulf %1138, %1137 : vector<8x16xf32>
    %cst_492 = arith.constant 5.000000e-01 : f32
    %1140 = vector.broadcast %cst_492 : f32 to vector<8x16xf32>
    %1141 = arith.addf %1139, %1140 : vector<8x16xf32>
    %1142 = vector.extract_strided_slice %1126 {offsets = [0, 16], sizes = [8, 16], strides = [1, 1]} : vector<8x48xf32> to vector<8x16xf32>
    %1143 = vector.extract_strided_slice %1131 {offsets = [0, 16], sizes = [8, 16], strides = [1, 1]} : vector<8x48xf32> to vector<8x16xf32>
    %1144 = arith.addf %1142, %1143 : vector<8x16xf32>
    %cst_493 = arith.constant 5.000000e-01 : f32
    %1145 = vector.broadcast %cst_493 : f32 to vector<8x16xf32>
    %1146 = arith.mulf %1145, %1144 : vector<8x16xf32>
    %1147 = math.tanh %1146 : vector<8x16xf32>
    %cst_494 = arith.constant 5.000000e-01 : f32
    %1148 = vector.broadcast %cst_494 : f32 to vector<8x16xf32>
    %1149 = arith.mulf %1148, %1147 : vector<8x16xf32>
    %cst_495 = arith.constant 5.000000e-01 : f32
    %1150 = vector.broadcast %cst_495 : f32 to vector<8x16xf32>
    %1151 = arith.addf %1149, %1150 : vector<8x16xf32>
    %1152 = vector.extract_strided_slice %1126 {offsets = [0, 32], sizes = [8, 16], strides = [1, 1]} : vector<8x48xf32> to vector<8x16xf32>
    %1153 = vector.extract_strided_slice %1131 {offsets = [0, 32], sizes = [8, 16], strides = [1, 1]} : vector<8x48xf32> to vector<8x16xf32>
    %1154 = vector.broadcast %1130 : vector<1x16xf32> to vector<8x16xf32>
    %1155 = arith.addf %1153, %1154 : vector<8x16xf32>
    %1156 = arith.mulf %1141, %1155 : vector<8x16xf32>
    %1157 = arith.addf %1152, %1156 : vector<8x16xf32>
    %1158 = math.tanh %1157 : vector<8x16xf32>
    %cst_496 = arith.constant 1.000000e+00 : f32
    %1159 = vector.broadcast %cst_496 : f32 to vector<8x16xf32>
    %1160 = arith.subf %1159, %1151 : vector<8x16xf32>
    %1161 = arith.mulf %1160, %1158 : vector<8x16xf32>
    %1162 = arith.mulf %1151, %1076 : vector<8x16xf32>
    %1163 = arith.addf %1161, %1162 : vector<8x16xf32>
    %1164 = arith.index_cast %1082 : i32 to index
    %c0_497 = arith.constant 0 : index
    %1165 = vector.load %arg15[%1164, %c0_497] : memref<64x32xf32, #tpu.memory_space<vmem>>, vector<8x16xf32>
    tpu.vector_store %arg15[%1164, %c0_497], %1124 {strides = array<i32>} : memref<64x32xf32, #tpu.memory_space<vmem>>, vector<8x16xf32>,
    %1166 = arith.index_cast %1085 : i32 to index
    %c16_498 = arith.constant 16 : index
    %1167 = vector.load %arg15[%1166, %c16_498] : memref<64x32xf32, #tpu.memory_space<vmem>>, vector<8x16xf32>
    tpu.vector_store %arg15[%1166, %c16_498], %1163 {strides = array<i32>} : memref<64x32xf32, #tpu.memory_space<vmem>>, vector<8x16xf32>,
    %c5_i32_499 = arith.constant 5 : i32
    %c8_i32_500 = arith.constant 8 : i32
    %1168 = arith.muli %c5_i32_499, %c8_i32_500 : i32
    %1169 = tpu.assume_multiple %1168, 8 : i32
    %c7_i32_501 = arith.constant 7 : i32
    %1170 = arith.subi %c7_i32_501, %c5_i32_499 : i32
    %c8_i32_502 = arith.constant 8 : i32
    %1171 = arith.muli %1170, %c8_i32_502 : i32
    %1172 = tpu.assume_multiple %1171, 8 : i32
    %1173 = arith.index_cast %1169 : i32 to index
    %c0_503 = arith.constant 0 : index
    %1174 = vector.load %arg13[%1173, %c0_503] : memref<64x48xf32, #tpu.memory_space<vmem>>, vector<8x48xf32>
    %c1_504 = arith.constant 1 : index
    %c0_505 = arith.constant 0 : index
    %c0_506 = arith.constant 0 : index
    %1175 = vector.load %arg6[%c1_504, %c0_505, %c0_506] : memref<2x16x48xf32, #tpu.memory_space<vmem>>, vector<1x16x48xf32>
    %1176 = vector.shape_cast %1175 : vector<1x16x48xf32> to vector<16x48xf32>
    %c1_507 = arith.constant 1 : index
    %c0_508 = arith.constant 0 : index
    %c0_509 = arith.constant 0 : index
    %1177 = vector.load %arg8[%c1_507, %c0_508, %c0_509] : memref<2x1x16xf32, #tpu.memory_space<vmem>>, vector<1x1x16xf32>
    %1178 = vector.shape_cast %1177 : vector<1x1x16xf32> to vector<1x16xf32>
    %cst_510 = arith.constant dense<0.000000e+00> : vector<8x48xf32>
    %1179 = tpu.matmul %1124, %1176, %cst_510 {dimension_numbers = #tpu.dot_dimension_numbers<[1], [0], [0], [1], [0, 0, 1, 1], [], []>, precision = #tpu.contract_precision<fp32>} : vector<8x16xf32>, vector<16x48xf32>, vector<8x48xf32> -> vector<8x48xf32>
    %1180 = vector.extract_strided_slice %1174 {offsets = [0, 0], sizes = [8, 16], strides = [1, 1]} : vector<8x48xf32> to vector<8x16xf32>
    %1181 = vector.extract_strided_slice %1179 {offsets = [0, 0], sizes = [8, 16], strides = [1, 1]} : vector<8x48xf32> to vector<8x16xf32>
    %1182 = arith.addf %1180, %1181 : vector<8x16xf32>
    %cst_511 = arith.constant 5.000000e-01 : f32
    %1183 = vector.broadcast %cst_511 : f32 to vector<8x16xf32>
    %1184 = arith.mulf %1183, %1182 : vector<8x16xf32>
    %1185 = math.tanh %1184 : vector<8x16xf32>
    %cst_512 = arith.constant 5.000000e-01 : f32
    %1186 = vector.broadcast %cst_512 : f32 to vector<8x16xf32>
    %1187 = arith.mulf %1186, %1185 : vector<8x16xf32>
    %cst_513 = arith.constant 5.000000e-01 : f32
    %1188 = vector.broadcast %cst_513 : f32 to vector<8x16xf32>
    %1189 = arith.addf %1187, %1188 : vector<8x16xf32>
    %1190 = vector.extract_strided_slice %1174 {offsets = [0, 16], sizes = [8, 16], strides = [1, 1]} : vector<8x48xf32> to vector<8x16xf32>
    %1191 = vector.extract_strided_slice %1179 {offsets = [0, 16], sizes = [8, 16], strides = [1, 1]} : vector<8x48xf32> to vector<8x16xf32>
    %1192 = arith.addf %1190, %1191 : vector<8x16xf32>
    %cst_514 = arith.constant 5.000000e-01 : f32
    %1193 = vector.broadcast %cst_514 : f32 to vector<8x16xf32>
    %1194 = arith.mulf %1193, %1192 : vector<8x16xf32>
    %1195 = math.tanh %1194 : vector<8x16xf32>
    %cst_515 = arith.constant 5.000000e-01 : f32
    %1196 = vector.broadcast %cst_515 : f32 to vector<8x16xf32>
    %1197 = arith.mulf %1196, %1195 : vector<8x16xf32>
    %cst_516 = arith.constant 5.000000e-01 : f32
    %1198 = vector.broadcast %cst_516 : f32 to vector<8x16xf32>
    %1199 = arith.addf %1197, %1198 : vector<8x16xf32>
    %1200 = vector.extract_strided_slice %1174 {offsets = [0, 32], sizes = [8, 16], strides = [1, 1]} : vector<8x48xf32> to vector<8x16xf32>
    %1201 = vector.extract_strided_slice %1179 {offsets = [0, 32], sizes = [8, 16], strides = [1, 1]} : vector<8x48xf32> to vector<8x16xf32>
    %1202 = vector.broadcast %1178 : vector<1x16xf32> to vector<8x16xf32>
    %1203 = arith.addf %1201, %1202 : vector<8x16xf32>
    %1204 = arith.mulf %1189, %1203 : vector<8x16xf32>
    %1205 = arith.addf %1200, %1204 : vector<8x16xf32>
    %1206 = math.tanh %1205 : vector<8x16xf32>
    %cst_517 = arith.constant 1.000000e+00 : f32
    %1207 = vector.broadcast %cst_517 : f32 to vector<8x16xf32>
    %1208 = arith.subf %1207, %1199 : vector<8x16xf32>
    %1209 = arith.mulf %1208, %1206 : vector<8x16xf32>
    %1210 = arith.mulf %1199, %1124 : vector<8x16xf32>
    %1211 = arith.addf %1209, %1210 : vector<8x16xf32>
    %1212 = arith.index_cast %1172 : i32 to index
    %c0_518 = arith.constant 0 : index
    %1213 = vector.load %arg14[%1212, %c0_518] : memref<64x48xf32, #tpu.memory_space<vmem>>, vector<8x48xf32>
    %c1_519 = arith.constant 1 : index
    %c0_520 = arith.constant 0 : index
    %c0_521 = arith.constant 0 : index
    %1214 = vector.load %arg7[%c1_519, %c0_520, %c0_521] : memref<2x16x48xf32, #tpu.memory_space<vmem>>, vector<1x16x48xf32>
    %1215 = vector.shape_cast %1214 : vector<1x16x48xf32> to vector<16x48xf32>
    %c1_522 = arith.constant 1 : index
    %c0_523 = arith.constant 0 : index
    %c0_524 = arith.constant 0 : index
    %1216 = vector.load %arg9[%c1_522, %c0_523, %c0_524] : memref<2x1x16xf32, #tpu.memory_space<vmem>>, vector<1x1x16xf32>
    %1217 = vector.shape_cast %1216 : vector<1x1x16xf32> to vector<1x16xf32>
    %cst_525 = arith.constant dense<0.000000e+00> : vector<8x48xf32>
    %1218 = tpu.matmul %1163, %1215, %cst_525 {dimension_numbers = #tpu.dot_dimension_numbers<[1], [0], [0], [1], [0, 0, 1, 1], [], []>, precision = #tpu.contract_precision<fp32>} : vector<8x16xf32>, vector<16x48xf32>, vector<8x48xf32> -> vector<8x48xf32>
    %1219 = vector.extract_strided_slice %1213 {offsets = [0, 0], sizes = [8, 16], strides = [1, 1]} : vector<8x48xf32> to vector<8x16xf32>
    %1220 = vector.extract_strided_slice %1218 {offsets = [0, 0], sizes = [8, 16], strides = [1, 1]} : vector<8x48xf32> to vector<8x16xf32>
    %1221 = arith.addf %1219, %1220 : vector<8x16xf32>
    %cst_526 = arith.constant 5.000000e-01 : f32
    %1222 = vector.broadcast %cst_526 : f32 to vector<8x16xf32>
    %1223 = arith.mulf %1222, %1221 : vector<8x16xf32>
    %1224 = math.tanh %1223 : vector<8x16xf32>
    %cst_527 = arith.constant 5.000000e-01 : f32
    %1225 = vector.broadcast %cst_527 : f32 to vector<8x16xf32>
    %1226 = arith.mulf %1225, %1224 : vector<8x16xf32>
    %cst_528 = arith.constant 5.000000e-01 : f32
    %1227 = vector.broadcast %cst_528 : f32 to vector<8x16xf32>
    %1228 = arith.addf %1226, %1227 : vector<8x16xf32>
    %1229 = vector.extract_strided_slice %1213 {offsets = [0, 16], sizes = [8, 16], strides = [1, 1]} : vector<8x48xf32> to vector<8x16xf32>
    %1230 = vector.extract_strided_slice %1218 {offsets = [0, 16], sizes = [8, 16], strides = [1, 1]} : vector<8x48xf32> to vector<8x16xf32>
    %1231 = arith.addf %1229, %1230 : vector<8x16xf32>
    %cst_529 = arith.constant 5.000000e-01 : f32
    %1232 = vector.broadcast %cst_529 : f32 to vector<8x16xf32>
    %1233 = arith.mulf %1232, %1231 : vector<8x16xf32>
    %1234 = math.tanh %1233 : vector<8x16xf32>
    %cst_530 = arith.constant 5.000000e-01 : f32
    %1235 = vector.broadcast %cst_530 : f32 to vector<8x16xf32>
    %1236 = arith.mulf %1235, %1234 : vector<8x16xf32>
    %cst_531 = arith.constant 5.000000e-01 : f32
    %1237 = vector.broadcast %cst_531 : f32 to vector<8x16xf32>
    %1238 = arith.addf %1236, %1237 : vector<8x16xf32>
    %1239 = vector.extract_strided_slice %1213 {offsets = [0, 32], sizes = [8, 16], strides = [1, 1]} : vector<8x48xf32> to vector<8x16xf32>
    %1240 = vector.extract_strided_slice %1218 {offsets = [0, 32], sizes = [8, 16], strides = [1, 1]} : vector<8x48xf32> to vector<8x16xf32>
    %1241 = vector.broadcast %1217 : vector<1x16xf32> to vector<8x16xf32>
    %1242 = arith.addf %1240, %1241 : vector<8x16xf32>
    %1243 = arith.mulf %1228, %1242 : vector<8x16xf32>
    %1244 = arith.addf %1239, %1243 : vector<8x16xf32>
    %1245 = math.tanh %1244 : vector<8x16xf32>
    %cst_532 = arith.constant 1.000000e+00 : f32
    %1246 = vector.broadcast %cst_532 : f32 to vector<8x16xf32>
    %1247 = arith.subf %1246, %1238 : vector<8x16xf32>
    %1248 = arith.mulf %1247, %1245 : vector<8x16xf32>
    %1249 = arith.mulf %1238, %1163 : vector<8x16xf32>
    %1250 = arith.addf %1248, %1249 : vector<8x16xf32>
    %1251 = arith.index_cast %1169 : i32 to index
    %c0_533 = arith.constant 0 : index
    %1252 = vector.load %arg15[%1251, %c0_533] : memref<64x32xf32, #tpu.memory_space<vmem>>, vector<8x16xf32>
    tpu.vector_store %arg15[%1251, %c0_533], %1211 {strides = array<i32>} : memref<64x32xf32, #tpu.memory_space<vmem>>, vector<8x16xf32>,
    %1253 = arith.index_cast %1172 : i32 to index
    %c16_534 = arith.constant 16 : index
    %1254 = vector.load %arg15[%1253, %c16_534] : memref<64x32xf32, #tpu.memory_space<vmem>>, vector<8x16xf32>
    tpu.vector_store %arg15[%1253, %c16_534], %1250 {strides = array<i32>} : memref<64x32xf32, #tpu.memory_space<vmem>>, vector<8x16xf32>,
    %c6_i32_535 = arith.constant 6 : i32
    %c8_i32_536 = arith.constant 8 : i32
    %1255 = arith.muli %c6_i32_535, %c8_i32_536 : i32
    %1256 = tpu.assume_multiple %1255, 8 : i32
    %c7_i32_537 = arith.constant 7 : i32
    %1257 = arith.subi %c7_i32_537, %c6_i32_535 : i32
    %c8_i32_538 = arith.constant 8 : i32
    %1258 = arith.muli %1257, %c8_i32_538 : i32
    %1259 = tpu.assume_multiple %1258, 8 : i32
    %1260 = arith.index_cast %1256 : i32 to index
    %c0_539 = arith.constant 0 : index
    %1261 = vector.load %arg13[%1260, %c0_539] : memref<64x48xf32, #tpu.memory_space<vmem>>, vector<8x48xf32>
    %c1_540 = arith.constant 1 : index
    %c0_541 = arith.constant 0 : index
    %c0_542 = arith.constant 0 : index
    %1262 = vector.load %arg6[%c1_540, %c0_541, %c0_542] : memref<2x16x48xf32, #tpu.memory_space<vmem>>, vector<1x16x48xf32>
    %1263 = vector.shape_cast %1262 : vector<1x16x48xf32> to vector<16x48xf32>
    %c1_543 = arith.constant 1 : index
    %c0_544 = arith.constant 0 : index
    %c0_545 = arith.constant 0 : index
    %1264 = vector.load %arg8[%c1_543, %c0_544, %c0_545] : memref<2x1x16xf32, #tpu.memory_space<vmem>>, vector<1x1x16xf32>
    %1265 = vector.shape_cast %1264 : vector<1x1x16xf32> to vector<1x16xf32>
    %cst_546 = arith.constant dense<0.000000e+00> : vector<8x48xf32>
    %1266 = tpu.matmul %1211, %1263, %cst_546 {dimension_numbers = #tpu.dot_dimension_numbers<[1], [0], [0], [1], [0, 0, 1, 1], [], []>, precision = #tpu.contract_precision<fp32>} : vector<8x16xf32>, vector<16x48xf32>, vector<8x48xf32> -> vector<8x48xf32>
    %1267 = vector.extract_strided_slice %1261 {offsets = [0, 0], sizes = [8, 16], strides = [1, 1]} : vector<8x48xf32> to vector<8x16xf32>
    %1268 = vector.extract_strided_slice %1266 {offsets = [0, 0], sizes = [8, 16], strides = [1, 1]} : vector<8x48xf32> to vector<8x16xf32>
    %1269 = arith.addf %1267, %1268 : vector<8x16xf32>
    %cst_547 = arith.constant 5.000000e-01 : f32
    %1270 = vector.broadcast %cst_547 : f32 to vector<8x16xf32>
    %1271 = arith.mulf %1270, %1269 : vector<8x16xf32>
    %1272 = math.tanh %1271 : vector<8x16xf32>
    %cst_548 = arith.constant 5.000000e-01 : f32
    %1273 = vector.broadcast %cst_548 : f32 to vector<8x16xf32>
    %1274 = arith.mulf %1273, %1272 : vector<8x16xf32>
    %cst_549 = arith.constant 5.000000e-01 : f32
    %1275 = vector.broadcast %cst_549 : f32 to vector<8x16xf32>
    %1276 = arith.addf %1274, %1275 : vector<8x16xf32>
    %1277 = vector.extract_strided_slice %1261 {offsets = [0, 16], sizes = [8, 16], strides = [1, 1]} : vector<8x48xf32> to vector<8x16xf32>
    %1278 = vector.extract_strided_slice %1266 {offsets = [0, 16], sizes = [8, 16], strides = [1, 1]} : vector<8x48xf32> to vector<8x16xf32>
    %1279 = arith.addf %1277, %1278 : vector<8x16xf32>
    %cst_550 = arith.constant 5.000000e-01 : f32
    %1280 = vector.broadcast %cst_550 : f32 to vector<8x16xf32>
    %1281 = arith.mulf %1280, %1279 : vector<8x16xf32>
    %1282 = math.tanh %1281 : vector<8x16xf32>
    %cst_551 = arith.constant 5.000000e-01 : f32
    %1283 = vector.broadcast %cst_551 : f32 to vector<8x16xf32>
    %1284 = arith.mulf %1283, %1282 : vector<8x16xf32>
    %cst_552 = arith.constant 5.000000e-01 : f32
    %1285 = vector.broadcast %cst_552 : f32 to vector<8x16xf32>
    %1286 = arith.addf %1284, %1285 : vector<8x16xf32>
    %1287 = vector.extract_strided_slice %1261 {offsets = [0, 32], sizes = [8, 16], strides = [1, 1]} : vector<8x48xf32> to vector<8x16xf32>
    %1288 = vector.extract_strided_slice %1266 {offsets = [0, 32], sizes = [8, 16], strides = [1, 1]} : vector<8x48xf32> to vector<8x16xf32>
    %1289 = vector.broadcast %1265 : vector<1x16xf32> to vector<8x16xf32>
    %1290 = arith.addf %1288, %1289 : vector<8x16xf32>
    %1291 = arith.mulf %1276, %1290 : vector<8x16xf32>
    %1292 = arith.addf %1287, %1291 : vector<8x16xf32>
    %1293 = math.tanh %1292 : vector<8x16xf32>
    %cst_553 = arith.constant 1.000000e+00 : f32
    %1294 = vector.broadcast %cst_553 : f32 to vector<8x16xf32>
    %1295 = arith.subf %1294, %1286 : vector<8x16xf32>
    %1296 = arith.mulf %1295, %1293 : vector<8x16xf32>
    %1297 = arith.mulf %1286, %1211 : vector<8x16xf32>
    %1298 = arith.addf %1296, %1297 : vector<8x16xf32>
    %1299 = arith.index_cast %1259 : i32 to index
    %c0_554 = arith.constant 0 : index
    %1300 = vector.load %arg14[%1299, %c0_554] : memref<64x48xf32, #tpu.memory_space<vmem>>, vector<8x48xf32>
    %c1_555 = arith.constant 1 : index
    %c0_556 = arith.constant 0 : index
    %c0_557 = arith.constant 0 : index
    %1301 = vector.load %arg7[%c1_555, %c0_556, %c0_557] : memref<2x16x48xf32, #tpu.memory_space<vmem>>, vector<1x16x48xf32>
    %1302 = vector.shape_cast %1301 : vector<1x16x48xf32> to vector<16x48xf32>
    %c1_558 = arith.constant 1 : index
    %c0_559 = arith.constant 0 : index
    %c0_560 = arith.constant 0 : index
    %1303 = vector.load %arg9[%c1_558, %c0_559, %c0_560] : memref<2x1x16xf32, #tpu.memory_space<vmem>>, vector<1x1x16xf32>
    %1304 = vector.shape_cast %1303 : vector<1x1x16xf32> to vector<1x16xf32>
    %cst_561 = arith.constant dense<0.000000e+00> : vector<8x48xf32>
    %1305 = tpu.matmul %1250, %1302, %cst_561 {dimension_numbers = #tpu.dot_dimension_numbers<[1], [0], [0], [1], [0, 0, 1, 1], [], []>, precision = #tpu.contract_precision<fp32>} : vector<8x16xf32>, vector<16x48xf32>, vector<8x48xf32> -> vector<8x48xf32>
    %1306 = vector.extract_strided_slice %1300 {offsets = [0, 0], sizes = [8, 16], strides = [1, 1]} : vector<8x48xf32> to vector<8x16xf32>
    %1307 = vector.extract_strided_slice %1305 {offsets = [0, 0], sizes = [8, 16], strides = [1, 1]} : vector<8x48xf32> to vector<8x16xf32>
    %1308 = arith.addf %1306, %1307 : vector<8x16xf32>
    %cst_562 = arith.constant 5.000000e-01 : f32
    %1309 = vector.broadcast %cst_562 : f32 to vector<8x16xf32>
    %1310 = arith.mulf %1309, %1308 : vector<8x16xf32>
    %1311 = math.tanh %1310 : vector<8x16xf32>
    %cst_563 = arith.constant 5.000000e-01 : f32
    %1312 = vector.broadcast %cst_563 : f32 to vector<8x16xf32>
    %1313 = arith.mulf %1312, %1311 : vector<8x16xf32>
    %cst_564 = arith.constant 5.000000e-01 : f32
    %1314 = vector.broadcast %cst_564 : f32 to vector<8x16xf32>
    %1315 = arith.addf %1313, %1314 : vector<8x16xf32>
    %1316 = vector.extract_strided_slice %1300 {offsets = [0, 16], sizes = [8, 16], strides = [1, 1]} : vector<8x48xf32> to vector<8x16xf32>
    %1317 = vector.extract_strided_slice %1305 {offsets = [0, 16], sizes = [8, 16], strides = [1, 1]} : vector<8x48xf32> to vector<8x16xf32>
    %1318 = arith.addf %1316, %1317 : vector<8x16xf32>
    %cst_565 = arith.constant 5.000000e-01 : f32
    %1319 = vector.broadcast %cst_565 : f32 to vector<8x16xf32>
    %1320 = arith.mulf %1319, %1318 : vector<8x16xf32>
    %1321 = math.tanh %1320 : vector<8x16xf32>
    %cst_566 = arith.constant 5.000000e-01 : f32
    %1322 = vector.broadcast %cst_566 : f32 to vector<8x16xf32>
    %1323 = arith.mulf %1322, %1321 : vector<8x16xf32>
    %cst_567 = arith.constant 5.000000e-01 : f32
    %1324 = vector.broadcast %cst_567 : f32 to vector<8x16xf32>
    %1325 = arith.addf %1323, %1324 : vector<8x16xf32>
    %1326 = vector.extract_strided_slice %1300 {offsets = [0, 32], sizes = [8, 16], strides = [1, 1]} : vector<8x48xf32> to vector<8x16xf32>
    %1327 = vector.extract_strided_slice %1305 {offsets = [0, 32], sizes = [8, 16], strides = [1, 1]} : vector<8x48xf32> to vector<8x16xf32>
    %1328 = vector.broadcast %1304 : vector<1x16xf32> to vector<8x16xf32>
    %1329 = arith.addf %1327, %1328 : vector<8x16xf32>
    %1330 = arith.mulf %1315, %1329 : vector<8x16xf32>
    %1331 = arith.addf %1326, %1330 : vector<8x16xf32>
    %1332 = math.tanh %1331 : vector<8x16xf32>
    %cst_568 = arith.constant 1.000000e+00 : f32
    %1333 = vector.broadcast %cst_568 : f32 to vector<8x16xf32>
    %1334 = arith.subf %1333, %1325 : vector<8x16xf32>
    %1335 = arith.mulf %1334, %1332 : vector<8x16xf32>
    %1336 = arith.mulf %1325, %1250 : vector<8x16xf32>
    %1337 = arith.addf %1335, %1336 : vector<8x16xf32>
    %1338 = arith.index_cast %1256 : i32 to index
    %c0_569 = arith.constant 0 : index
    %1339 = vector.load %arg15[%1338, %c0_569] : memref<64x32xf32, #tpu.memory_space<vmem>>, vector<8x16xf32>
    tpu.vector_store %arg15[%1338, %c0_569], %1298 {strides = array<i32>} : memref<64x32xf32, #tpu.memory_space<vmem>>, vector<8x16xf32>,
    %1340 = arith.index_cast %1259 : i32 to index
    %c16_570 = arith.constant 16 : index
    %1341 = vector.load %arg15[%1340, %c16_570] : memref<64x32xf32, #tpu.memory_space<vmem>>, vector<8x16xf32>
    tpu.vector_store %arg15[%1340, %c16_570], %1337 {strides = array<i32>} : memref<64x32xf32, #tpu.memory_space<vmem>>, vector<8x16xf32>,
    %c7_i32_571 = arith.constant 7 : i32
    %c8_i32_572 = arith.constant 8 : i32
    %1342 = arith.muli %c7_i32_571, %c8_i32_572 : i32
    %1343 = tpu.assume_multiple %1342, 8 : i32
    %c7_i32_573 = arith.constant 7 : i32
    %1344 = arith.subi %c7_i32_573, %c7_i32_571 : i32
    %c8_i32_574 = arith.constant 8 : i32
    %1345 = arith.muli %1344, %c8_i32_574 : i32
    %1346 = tpu.assume_multiple %1345, 8 : i32
    %1347 = arith.index_cast %1343 : i32 to index
    %c0_575 = arith.constant 0 : index
    %1348 = vector.load %arg13[%1347, %c0_575] : memref<64x48xf32, #tpu.memory_space<vmem>>, vector<8x48xf32>
    %c1_576 = arith.constant 1 : index
    %c0_577 = arith.constant 0 : index
    %c0_578 = arith.constant 0 : index
    %1349 = vector.load %arg6[%c1_576, %c0_577, %c0_578] : memref<2x16x48xf32, #tpu.memory_space<vmem>>, vector<1x16x48xf32>
    %1350 = vector.shape_cast %1349 : vector<1x16x48xf32> to vector<16x48xf32>
    %c1_579 = arith.constant 1 : index
    %c0_580 = arith.constant 0 : index
    %c0_581 = arith.constant 0 : index
    %1351 = vector.load %arg8[%c1_579, %c0_580, %c0_581] : memref<2x1x16xf32, #tpu.memory_space<vmem>>, vector<1x1x16xf32>
    %1352 = vector.shape_cast %1351 : vector<1x1x16xf32> to vector<1x16xf32>
    %cst_582 = arith.constant dense<0.000000e+00> : vector<8x48xf32>
    %1353 = tpu.matmul %1298, %1350, %cst_582 {dimension_numbers = #tpu.dot_dimension_numbers<[1], [0], [0], [1], [0, 0, 1, 1], [], []>, precision = #tpu.contract_precision<fp32>} : vector<8x16xf32>, vector<16x48xf32>, vector<8x48xf32> -> vector<8x48xf32>
    %1354 = vector.extract_strided_slice %1348 {offsets = [0, 0], sizes = [8, 16], strides = [1, 1]} : vector<8x48xf32> to vector<8x16xf32>
    %1355 = vector.extract_strided_slice %1353 {offsets = [0, 0], sizes = [8, 16], strides = [1, 1]} : vector<8x48xf32> to vector<8x16xf32>
    %1356 = arith.addf %1354, %1355 : vector<8x16xf32>
    %cst_583 = arith.constant 5.000000e-01 : f32
    %1357 = vector.broadcast %cst_583 : f32 to vector<8x16xf32>
    %1358 = arith.mulf %1357, %1356 : vector<8x16xf32>
    %1359 = math.tanh %1358 : vector<8x16xf32>
    %cst_584 = arith.constant 5.000000e-01 : f32
    %1360 = vector.broadcast %cst_584 : f32 to vector<8x16xf32>
    %1361 = arith.mulf %1360, %1359 : vector<8x16xf32>
    %cst_585 = arith.constant 5.000000e-01 : f32
    %1362 = vector.broadcast %cst_585 : f32 to vector<8x16xf32>
    %1363 = arith.addf %1361, %1362 : vector<8x16xf32>
    %1364 = vector.extract_strided_slice %1348 {offsets = [0, 16], sizes = [8, 16], strides = [1, 1]} : vector<8x48xf32> to vector<8x16xf32>
    %1365 = vector.extract_strided_slice %1353 {offsets = [0, 16], sizes = [8, 16], strides = [1, 1]} : vector<8x48xf32> to vector<8x16xf32>
    %1366 = arith.addf %1364, %1365 : vector<8x16xf32>
    %cst_586 = arith.constant 5.000000e-01 : f32
    %1367 = vector.broadcast %cst_586 : f32 to vector<8x16xf32>
    %1368 = arith.mulf %1367, %1366 : vector<8x16xf32>
    %1369 = math.tanh %1368 : vector<8x16xf32>
    %cst_587 = arith.constant 5.000000e-01 : f32
    %1370 = vector.broadcast %cst_587 : f32 to vector<8x16xf32>
    %1371 = arith.mulf %1370, %1369 : vector<8x16xf32>
    %cst_588 = arith.constant 5.000000e-01 : f32
    %1372 = vector.broadcast %cst_588 : f32 to vector<8x16xf32>
    %1373 = arith.addf %1371, %1372 : vector<8x16xf32>
    %1374 = vector.extract_strided_slice %1348 {offsets = [0, 32], sizes = [8, 16], strides = [1, 1]} : vector<8x48xf32> to vector<8x16xf32>
    %1375 = vector.extract_strided_slice %1353 {offsets = [0, 32], sizes = [8, 16], strides = [1, 1]} : vector<8x48xf32> to vector<8x16xf32>
    %1376 = vector.broadcast %1352 : vector<1x16xf32> to vector<8x16xf32>
    %1377 = arith.addf %1375, %1376 : vector<8x16xf32>
    %1378 = arith.mulf %1363, %1377 : vector<8x16xf32>
    %1379 = arith.addf %1374, %1378 : vector<8x16xf32>
    %1380 = math.tanh %1379 : vector<8x16xf32>
    %cst_589 = arith.constant 1.000000e+00 : f32
    %1381 = vector.broadcast %cst_589 : f32 to vector<8x16xf32>
    %1382 = arith.subf %1381, %1373 : vector<8x16xf32>
    %1383 = arith.mulf %1382, %1380 : vector<8x16xf32>
    %1384 = arith.mulf %1373, %1298 : vector<8x16xf32>
    %1385 = arith.addf %1383, %1384 : vector<8x16xf32>
    %1386 = arith.index_cast %1346 : i32 to index
    %c0_590 = arith.constant 0 : index
    %1387 = vector.load %arg14[%1386, %c0_590] : memref<64x48xf32, #tpu.memory_space<vmem>>, vector<8x48xf32>
    %c1_591 = arith.constant 1 : index
    %c0_592 = arith.constant 0 : index
    %c0_593 = arith.constant 0 : index
    %1388 = vector.load %arg7[%c1_591, %c0_592, %c0_593] : memref<2x16x48xf32, #tpu.memory_space<vmem>>, vector<1x16x48xf32>
    %1389 = vector.shape_cast %1388 : vector<1x16x48xf32> to vector<16x48xf32>
    %c1_594 = arith.constant 1 : index
    %c0_595 = arith.constant 0 : index
    %c0_596 = arith.constant 0 : index
    %1390 = vector.load %arg9[%c1_594, %c0_595, %c0_596] : memref<2x1x16xf32, #tpu.memory_space<vmem>>, vector<1x1x16xf32>
    %1391 = vector.shape_cast %1390 : vector<1x1x16xf32> to vector<1x16xf32>
    %cst_597 = arith.constant dense<0.000000e+00> : vector<8x48xf32>
    %1392 = tpu.matmul %1337, %1389, %cst_597 {dimension_numbers = #tpu.dot_dimension_numbers<[1], [0], [0], [1], [0, 0, 1, 1], [], []>, precision = #tpu.contract_precision<fp32>} : vector<8x16xf32>, vector<16x48xf32>, vector<8x48xf32> -> vector<8x48xf32>
    %1393 = vector.extract_strided_slice %1387 {offsets = [0, 0], sizes = [8, 16], strides = [1, 1]} : vector<8x48xf32> to vector<8x16xf32>
    %1394 = vector.extract_strided_slice %1392 {offsets = [0, 0], sizes = [8, 16], strides = [1, 1]} : vector<8x48xf32> to vector<8x16xf32>
    %1395 = arith.addf %1393, %1394 : vector<8x16xf32>
    %cst_598 = arith.constant 5.000000e-01 : f32
    %1396 = vector.broadcast %cst_598 : f32 to vector<8x16xf32>
    %1397 = arith.mulf %1396, %1395 : vector<8x16xf32>
    %1398 = math.tanh %1397 : vector<8x16xf32>
    %cst_599 = arith.constant 5.000000e-01 : f32
    %1399 = vector.broadcast %cst_599 : f32 to vector<8x16xf32>
    %1400 = arith.mulf %1399, %1398 : vector<8x16xf32>
    %cst_600 = arith.constant 5.000000e-01 : f32
    %1401 = vector.broadcast %cst_600 : f32 to vector<8x16xf32>
    %1402 = arith.addf %1400, %1401 : vector<8x16xf32>
    %1403 = vector.extract_strided_slice %1387 {offsets = [0, 16], sizes = [8, 16], strides = [1, 1]} : vector<8x48xf32> to vector<8x16xf32>
    %1404 = vector.extract_strided_slice %1392 {offsets = [0, 16], sizes = [8, 16], strides = [1, 1]} : vector<8x48xf32> to vector<8x16xf32>
    %1405 = arith.addf %1403, %1404 : vector<8x16xf32>
    %cst_601 = arith.constant 5.000000e-01 : f32
    %1406 = vector.broadcast %cst_601 : f32 to vector<8x16xf32>
    %1407 = arith.mulf %1406, %1405 : vector<8x16xf32>
    %1408 = math.tanh %1407 : vector<8x16xf32>
    %cst_602 = arith.constant 5.000000e-01 : f32
    %1409 = vector.broadcast %cst_602 : f32 to vector<8x16xf32>
    %1410 = arith.mulf %1409, %1408 : vector<8x16xf32>
    %cst_603 = arith.constant 5.000000e-01 : f32
    %1411 = vector.broadcast %cst_603 : f32 to vector<8x16xf32>
    %1412 = arith.addf %1410, %1411 : vector<8x16xf32>
    %1413 = vector.extract_strided_slice %1387 {offsets = [0, 32], sizes = [8, 16], strides = [1, 1]} : vector<8x48xf32> to vector<8x16xf32>
    %1414 = vector.extract_strided_slice %1392 {offsets = [0, 32], sizes = [8, 16], strides = [1, 1]} : vector<8x48xf32> to vector<8x16xf32>
    %1415 = vector.broadcast %1391 : vector<1x16xf32> to vector<8x16xf32>
    %1416 = arith.addf %1414, %1415 : vector<8x16xf32>
    %1417 = arith.mulf %1402, %1416 : vector<8x16xf32>
    %1418 = arith.addf %1413, %1417 : vector<8x16xf32>
    %1419 = math.tanh %1418 : vector<8x16xf32>
    %cst_604 = arith.constant 1.000000e+00 : f32
    %1420 = vector.broadcast %cst_604 : f32 to vector<8x16xf32>
    %1421 = arith.subf %1420, %1412 : vector<8x16xf32>
    %1422 = arith.mulf %1421, %1419 : vector<8x16xf32>
    %1423 = arith.mulf %1412, %1337 : vector<8x16xf32>
    %1424 = arith.addf %1422, %1423 : vector<8x16xf32>
    %1425 = arith.index_cast %1343 : i32 to index
    %c0_605 = arith.constant 0 : index
    %1426 = vector.load %arg15[%1425, %c0_605] : memref<64x32xf32, #tpu.memory_space<vmem>>, vector<8x16xf32>
    tpu.vector_store %arg15[%1425, %c0_605], %1385 {strides = array<i32>} : memref<64x32xf32, #tpu.memory_space<vmem>>, vector<8x16xf32>,
    %1427 = arith.index_cast %1346 : i32 to index
    %c16_606 = arith.constant 16 : index
    %1428 = vector.load %arg15[%1427, %c16_606] : memref<64x32xf32, #tpu.memory_space<vmem>>, vector<8x16xf32>
    tpu.vector_store %arg15[%1427, %c16_606], %1424 {strides = array<i32>} : memref<64x32xf32, #tpu.memory_space<vmem>>, vector<8x16xf32>,
    %c8_i32_607 = arith.constant 8 : i32
    %c0_608 = arith.constant 0 : index
    %c0_609 = arith.constant 0 : index
    %1429 = vector.load %arg15[%c0_608, %c0_609] : memref<64x32xf32, #tpu.memory_space<vmem>>, vector<64x32xf32>
    %c0_610 = arith.constant 0 : index
    %c0_611 = arith.constant 0 : index
    %c0_612 = arith.constant 0 : index
    %1430 = vector.load %arg1[%c0_610, %c0_611, %c0_612] : memref<1x64x32xf32, #tpu.memory_space<vmem>>, vector<1x64x32xf32>
    %1431 = vector.shape_cast %1430 : vector<1x64x32xf32> to vector<64x32xf32>
    %1432 = arith.addf %1429, %1431 : vector<64x32xf32>
    %cst_613 = arith.constant dense<0.000000e+00> : vector<64xf32>
    %1433 = vector.multi_reduction <add>, %1432, %cst_613 [1] : vector<64x32xf32> to vector<64xf32>
    %1434 = vector.shape_cast %1433 : vector<64xf32> to vector<64x1xf32>
    %cst_614 = arith.constant 3.200000e+01 : f32
    %1435 = vector.broadcast %cst_614 : f32 to vector<64x1xf32>
    %1436 = arith.divf %1434, %1435 : vector<64x1xf32>
    %1437 = vector.broadcast %1436 : vector<64x1xf32> to vector<64x32xf32>
    %1438 = arith.subf %1432, %1437 : vector<64x32xf32>
    %1439 = arith.mulf %1438, %1438 : vector<64x32xf32>
    %cst_615 = arith.constant dense<0.000000e+00> : vector<64xf32>
    %1440 = vector.multi_reduction <add>, %1439, %cst_615 [1] : vector<64x32xf32> to vector<64xf32>
    %1441 = vector.shape_cast %1440 : vector<64xf32> to vector<64x1xf32>
    %cst_616 = arith.constant 3.200000e+01 : f32
    %1442 = vector.broadcast %cst_616 : f32 to vector<64x1xf32>
    %1443 = arith.divf %1441, %1442 : vector<64x1xf32>
    %cst_617 = arith.constant 9.99999974E-6 : f32
    %1444 = vector.broadcast %cst_617 : f32 to vector<64x1xf32>
    %1445 = arith.addf %1443, %1444 : vector<64x1xf32>
    %1446 = math.rsqrt %1445 : vector<64x1xf32>
    %1447 = vector.broadcast %1446 : vector<64x1xf32> to vector<64x32xf32>
    %1448 = arith.mulf %1438, %1447 : vector<64x32xf32>
    %c0_618 = arith.constant 0 : index
    %c0_619 = arith.constant 0 : index
    %1449 = vector.load %arg10[%c0_618, %c0_619] : memref<1x32xf32, #tpu.memory_space<vmem>>, vector<1x32xf32>
    %1450 = vector.broadcast %1449 : vector<1x32xf32> to vector<64x32xf32>
    %1451 = arith.mulf %1448, %1450 : vector<64x32xf32>
    %c0_620 = arith.constant 0 : index
    %c0_621 = arith.constant 0 : index
    %1452 = vector.load %arg11[%c0_620, %c0_621] : memref<1x32xf32, #tpu.memory_space<vmem>>, vector<1x32xf32>
    %1453 = vector.broadcast %1452 : vector<1x32xf32> to vector<64x32xf32>
    %1454 = arith.addf %1451, %1453 : vector<64x32xf32>
    %c0_622 = arith.constant 0 : index
    %c0_623 = arith.constant 0 : index
    %c0_624 = arith.constant 0 : index
    %1455 = vector.load %arg12[%c0_622, %c0_623, %c0_624] : memref<1x64x32xf32, #tpu.memory_space<vmem>>, vector<1x64x32xf32>
    %1456 = vector.shape_cast %1455 : vector<1x64x32xf32> to vector<64x32xf32>
    %1457 = vector.shape_cast %1454 : vector<64x32xf32> to vector<1x64x32xf32>
    tpu.vector_store %arg12[%c0_622, %c0_623, %c0_624], %1457 {strides = array<i32>} : memref<1x64x32xf32, #tpu.memory_space<vmem>>, vector<1x64x32xf32>,
    return
  }
  func.func @transform_0(%arg0: i32) -> (i32, i32, i32) {
    %c0_i32 = arith.constant 0 : i32
    %c0_i32_0 = arith.constant 0 : i32
    %c0_i32_1 = arith.constant 0 : i32
    return %arg0, %c0_i32, %c0_i32_0 : i32, i32, i32
  }
  func.func @transform_1(%arg0: i32) -> (i32, i32, i32) {
    %c0_i32 = arith.constant 0 : i32
    %c0_i32_0 = arith.constant 0 : i32
    %c0_i32_1 = arith.constant 0 : i32
    %c0_i32_2 = arith.constant 0 : i32
    return %c0_i32, %c0_i32_0, %c0_i32_1 : i32, i32, i32
  }
  func.func @transform_2(%arg0: i32) -> (i32, i32, i32) {
    %c0_i32 = arith.constant 0 : i32
    %c0_i32_0 = arith.constant 0 : i32
    %c0_i32_1 = arith.constant 0 : i32
    %c0_i32_2 = arith.constant 0 : i32
    return %c0_i32, %c0_i32_0, %c0_i32_1 : i32, i32, i32
  }
  func.func @transform_3(%arg0: i32) -> (i32, i32, i32) {
    %c0_i32 = arith.constant 0 : i32
    %c0_i32_0 = arith.constant 0 : i32
    %c0_i32_1 = arith.constant 0 : i32
    %c0_i32_2 = arith.constant 0 : i32
    return %c0_i32, %c0_i32_0, %c0_i32_1 : i32, i32, i32
  }
  func.func @transform_4(%arg0: i32) -> (i32, i32, i32) {
    %c0_i32 = arith.constant 0 : i32
    %c0_i32_0 = arith.constant 0 : i32
    %c0_i32_1 = arith.constant 0 : i32
    %c0_i32_2 = arith.constant 0 : i32
    return %c0_i32, %c0_i32_0, %c0_i32_1 : i32, i32, i32
  }
  func.func @transform_5(%arg0: i32) -> (i32, i32, i32) {
    %c0_i32 = arith.constant 0 : i32
    %c0_i32_0 = arith.constant 0 : i32
    %c0_i32_1 = arith.constant 0 : i32
    %c0_i32_2 = arith.constant 0 : i32
    return %c0_i32, %c0_i32_0, %c0_i32_1 : i32, i32, i32
  }
  func.func @transform_6(%arg0: i32) -> (i32, i32, i32) {
    %c0_i32 = arith.constant 0 : i32
    %c0_i32_0 = arith.constant 0 : i32
    %c0_i32_1 = arith.constant 0 : i32
    %c0_i32_2 = arith.constant 0 : i32
    return %c0_i32, %c0_i32_0, %c0_i32_1 : i32, i32, i32
  }
  func.func @transform_7(%arg0: i32) -> (i32, i32, i32) {
    %c0_i32 = arith.constant 0 : i32
    %c0_i32_0 = arith.constant 0 : i32
    %c0_i32_1 = arith.constant 0 : i32
    %c0_i32_2 = arith.constant 0 : i32
    return %c0_i32, %c0_i32_0, %c0_i32_1 : i32, i32, i32
  }
  func.func @transform_8(%arg0: i32) -> (i32, i32, i32) {
    %c0_i32 = arith.constant 0 : i32
    %c0_i32_0 = arith.constant 0 : i32
    %c0_i32_1 = arith.constant 0 : i32
    %c0_i32_2 = arith.constant 0 : i32
    return %c0_i32, %c0_i32_0, %c0_i32_1 : i32, i32, i32
  }
  func.func @transform_9(%arg0: i32) -> (i32, i32) {
    %c0_i32 = arith.constant 0 : i32
    %c0_i32_0 = arith.constant 0 : i32
    %c0_i32_1 = arith.constant 0 : i32
    return %c0_i32, %c0_i32_0 : i32, i32
  }
  func.func @transform_10(%arg0: i32) -> (i32, i32) {
    %c0_i32 = arith.constant 0 : i32
    %c0_i32_0 = arith.constant 0 : i32
    %c0_i32_1 = arith.constant 0 : i32
    return %c0_i32, %c0_i32_0 : i32, i32
  }
  func.func @transform_11(%arg0: i32) -> (i32, i32, i32) {
    %c0_i32 = arith.constant 0 : i32
    %c0_i32_0 = arith.constant 0 : i32
    %c0_i32_1 = arith.constant 0 : i32
    return %arg0, %c0_i32, %c0_i32_0 : i32, i32, i32
  }
}

</mosaic_0001>

<bundles_post_ra>
// kernel: tpu_custom_call.1
= control target key start
LH: loop header
LB: loop body
LE: loop exit
PB: predicated region body
PF: predicated region fallthrough
CT: control target
= control target key end

     0   :  { %16 = vsyncpa [#allocation6], 0  ;;  %s26190_s0 = inlined_call_operand.vmem [shape: f32[1,64,32], index: 0, kind: input, shape index: {}]   ;;  %s26191_s1 = inlined_call_operand.vmem [shape: f32[2,32,48], index: 1, kind: input, shape index: {}]   ;;  %s26192_s2 = inlined_call_operand.hbm [shape: f32[2,32,48], index: 2, kind: input, shape index: {}]   ;;  %s26193_s3 = inlined_call_operand.vmem [shape: f32[2,1,48], index: 3, kind: input, shape index: {}]   ;;  %s26194_s4 = inlined_call_operand.vmem [shape: f32[2,1,48], index: 4, kind: input, shape index: {}]   ;;  %s26195_s5 = inlined_call_operand.vmem [shape: f32[2,16,48], index: 5, kind: input, shape index: {}]   ;;  %s26196_s6 = inlined_call_operand.hbm [shape: f32[2,16,48], index: 6, kind: input, shape index: {}]   ;;  %s26197_s7 = inlined_call_operand.vmem [shape: f32[2,1,16], index: 7, kind: input, shape index: {}]   ;;  %s26198_s8 = inlined_call_operand.vmem [shape: f32[2,1,16], index: 8, kind: input, shape index: {}]   ;;  %s26199_s9 = inlined_call_operand.vmem [shape: f32[1,32], index: 9, kind: input, shape index: {}]   ;;  %s26200_s10 = inlined_call_operand.vmem [shape: f32[1,32], index: 10, kind: input, shape index: {}]   ;;  %s26201_s11 = inlined_call_operand.vmem [shape: f32[1,64,32], index: 11, kind: output, shape index: {}]  }
   0x1   :  { %17 = vsyncpa [#allocation8], 0  ;;  %s23875_s17 = smov [#allocation5]   ;;  %s23827_s21 = scalar_lea.hbm %s26192_s2, 1024 }
   0x2   :  { %s27_s18 = sshll.u32 %s23875_s17, 4  ;;  %p23828_p0 = scmp.ne.s32.totalorder %s26192_s2, %s23827_s21  ;;  %s28_s18 = int_to_ptr.vmem [resolvable:$true] %s27_s18 }
   0x3   :  { %p23831_p1 = scmp.lt.u32.totalorder %s23827_s21, %s26192_s2 }
   0x5   :  { %p23833_p2 = pnand %p23831_p1, %p23828_p0 }
   0x7   :  { %23836 = shalt.err (!%p23833_p2)
}
   0x8   :  { %s23837_s26 = scalar_lea.vmem %s28_s18, 1024  ;;  %p23842_p4 = scmp.lt.s32.totalorder %s28_s18, %s28_s18 }
   0x9   :  { %p23838_p3 = scmp.ne.s32.totalorder %s28_s18, %s23837_s26  ;;  %p23843_p5 = scmp.lt.s32.totalorder %s23837_s26, %s23837_s26 }
   0xb   :  { %p23844_p6 = por %p23843_p5, %p23842_p4 }
   0xd   :  { %p23845_p7 = pnand %p23844_p6, %p23838_p3 }
   0xf   :  { %23848 = shalt.err (!%p23845_p7)
}
  0x10   :  { %s23876_s27 = smov 128   ;;  %s23877_s28 = smov 8  }
  0x11   :  { %33 = dma.hbm_to_vmem [thread:$0]  %s26192_s2, 1024, %s28_s18, [#allocation6], %s23876_s27, %s23876_s27, %s23877_s28  }
  0x12   :  { %s23878_s12 = smov [#allocation7]   ;;  %s23849_s16 = scalar_lea.hbm %s26196_s6, 512 }
  0x13   :  { %s45_s13 = sshll.u32 %s23878_s12, 4  ;;  %p23850_p8 = scmp.ne.s32.totalorder %s26196_s6, %s23849_s16  ;;  %s46_s13 = int_to_ptr.vmem [resolvable:$true] %s45_s13 }
  0x14   :  { %p23853_p9 = scmp.lt.u32.totalorder %s23849_s16, %s26196_s6 }
  0x16   :  { %p23855_p10 = pnand %p23853_p9, %p23850_p8 }
  0x18   :  { %23858 = shalt.err (!%p23855_p10)
}
  0x19   :  { %s23859_s22 = scalar_lea.vmem %s46_s13, 512  ;;  %p23864_p12 = scmp.lt.s32.totalorder %s46_s13, %s46_s13 }
  0x1a   :  { %p23860_p11 = scmp.ne.s32.totalorder %s46_s13, %s23859_s22  ;;  %p23865_p13 = scmp.lt.s32.totalorder %s23859_s22, %s23859_s22 }
  0x1c   :  { %p23866_p0 = por %p23865_p13, %p23864_p12 }
  0x1e   :  { %p23867_p1 = pnand %p23866_p0, %p23860_p11 }
  0x20   :  { %23870 = shalt.err (!%p23867_p1)
}
  0x21   :  { %51 = dma.hbm_to_vmem [thread:$0]  %s26196_s6, 512, %s46_s13, [#allocation8], %s23876_s27, %s23876_s27, %s23877_s28  }
  0x22   :  { %23871 = dma.done.wait [#allocation6], 1024  }
  0x23   :  { %23872 = vsyncadd [#allocation6], 4294966272 }
  0x24   :  { %23873 = dma.done.wait [#allocation8], 512  }
  0x25   :  { %23874 = vsyncadd [#allocation8], 4294966784  ;;  %v74_v0 = vld [vmem:[%s26191_s1] sm:$0xff]  ;;  %v75_v1 = vld [vmem:[%s26191_s1 + $0x8] sm:$0xff]  ;;  %vm85_vm0 = vcmask 261120   ;;  %s23879_s27 = smov 32  }
  0x26   :  { %v23975_v2 = vld [vmem:[#allocation5] sm:$0xff]  ;;  %v111_v3 = vand.u32 4294901760, %v74_v0  ;;  %v114_v4 = vand.u32 4294901760, %v75_v1  ;;  %v23977_v5 = vld [vmem:[#allocation5 + $0x8] sm:$0xff]  ;;  %v23983_v7 = vld [vmem:[%s26191_s1 + $0x10] sm:$0xff]  ;;  %vm23881_vm1 = vmmov 0  }
  0x27   :  { %v917_v6 = vand.u32 4294901760, %v23975_v2  ;;  %v23988_v8 = vld [vmem:[%s26191_s1 + $0x18] sm:$0xff]  ;;  %v920_v9 = vand.u32 4294901760, %v23977_v5  ;;  %v117_v10 = vand.u32 4294901760, %v23983_v7  ;;  %v23993_v12 = vld [vmem:[#allocation5 + $0x10] sm:$0xff]  ;;  %v66_v14 = vld [vmem:[%s26190_s0] sm:$0xff] }
  0x28   :  { %v120_v11 = vand.u32 4294901760, %v23988_v8  ;;  %v23995_v13 = vld [vmem:[#allocation5 + $0x18] sm:$0xff]  ;;  %v24000_v15 = vpack.c.bf16 %v114_v4, %v111_v3  ;;  %v923_v16 = vand.u32 4294901760, %v23993_v12  ;;  %v87_v18 = vsel %vm85_vm0, %v66_v14, 0  ;;  %v67_v19 = vld [vmem:[%s26190_s0 + $0x8] sm:$0xff]  ;;  %v68_v20 = vld [vmem:[%s26190_s0 + $0x10] sm:$0xff] }
  0x29   :  { %v926_v17 = vand.u32 4294901760, %v23995_v13  ;;  %v69_v21 = vld [vmem:[%s26190_s0 + $0x18] sm:$0xff]  ;;  %v24018_v22 = vpack.c.bf16 %v920_v9, %v917_v6  ;;  %v24024_v24 = vand.u32 4294901760, %v87_v18  ;;  %v90_v25 = vsel %vm85_vm0, %v67_v19, 0  ;;  %v70_v26 = vld [vmem:[%s26190_s0 + $0x20] sm:$0xff]  ;;  %v71_v31 = vld [vmem:[%s26190_s0 + $0x28] sm:$0xff] }
  0x2a   :  { %v24022_v23 = vpack.c.bf16 %v120_v11, %v117_v10  ;;  %22390 = vmatprep.subr.bf16.mxu0 %v24000_v15  ;;  %v24037_v28 = vand.u32 4294901760, %v90_v25  ;;  %v24039_v29 = vsub.f32 %v74_v0, %v111_v3  ;;  %v24041_v30 = vsub.f32 %v75_v1, %v114_v4  ;;  %s23883_s20 = smov 96   ;;  %s23884_s21 = smov 112  }
  0x2b   :  { %v24035_v27 = vpack.c.bf16 %v926_v17, %v923_v16  ;;  %22438 = vmatprep.subr.bf16.mxu1 %v24018_v22  ;;  %22392 = vmatpush3.bf16.msra.mxu0 %v24000_v15  ;;  %v24049_v32 = vsub.f32 %v87_v18, %v24024_v24  ;;  %v93_v33 = vsel %vm85_vm0, %v68_v20, 0  ;;  %v96_v34 = vsel %vm85_vm0, %v69_v21, 0 }
  0x2c   :  { %v99_v35 = vsel %vm85_vm0, %v70_v26, 0  ;;  %22440 = vmatpush3.bf16.msra.mxu1 %v24018_v22  ;;  %22394 = vmatprep.subr.bf16.mxu0 %v24022_v23  ;;  %v24057_v36 = vsub.f32 %v90_v25, %v24037_v28  ;;  %v262_v37 = vand.u32 4294901760, %v24039_v29  ;;  %v269_v38 = vand.u32 4294901760, %v24041_v30 }
  0x2d   :  { %v24061_v39 = vand.u32 4294901760, %v93_v33  ;;  %22442 = vmatprep.subr.bf16.mxu1 %v24035_v27  ;;  %v24065_v40 = vand.u32 4294901760, %v24049_v32  ;;  %v24067_v41 = vand.u32 4294901760, %v96_v34  ;;  %v24069_v42 = vand.u32 4294901760, %v99_v35 }
  0x2e   :  { %v102_v43 = vsel %vm85_vm0, %v71_v31, 0  ;;  %v24073_v44 = vand.u32 4294901760, %v24057_v36  ;;  %v263_v45 = vsub.f32 %v24039_v29, %v262_v37  ;;  %v270_v46 = vsub.f32 %v24041_v30, %v269_v38 }
  0x2f   :  { %v24082_v47 = vsub.f32 %v93_v33, %v24061_v39  ;;  %22396 = vmatpush3.bf16.msra.mxu0 %v24022_v23  ;;  %v182_v48 = vsub.f32 %v24049_v32, %v24065_v40  ;;  %v24088_v49 = vsub.f32 %v96_v34, %v24067_v41  ;;  %v24091_v50 = vsub.f32 %v99_v35, %v24069_v42 }
  0x30   :  { %v24093_v51 = vand.u32 4294901760, %v102_v43  ;;  %22444 = vmatpush3.bf16.msra.mxu1 %v24035_v27  ;;  %v192_v52 = vsub.f32 %v24057_v36, %v24073_v44  ;;  %v264_v53 = vand.u32 4294901760, %v263_v45  ;;  %v271_v54 = vand.u32 4294901760, %v270_v46 }
  0x31   :  { %v24099_v55 = vand.u32 4294901760, %v24082_v47  ;;  %v183_v56 = vand.u32 4294901760, %v182_v48  ;;  %v24102_v57 = vand.u32 4294901760, %v24088_v49  ;;  %v24105_v58 = vand.u32 4294901760, %v24091_v50 }
  0x32   :  { %v24108_v59 = vsub.f32 %v102_v43, %v24093_v51  ;;  %v193_v60 = vand.u32 4294901760, %v192_v52  ;;  %v22397_v61 = vpack.c.bf16 %v271_v54, %v264_v53  ;;  %v24113_v63 = vsub.f32 %v23983_v7, %v117_v10  ;;  %v72_v7 = vld [vmem:[%s26190_s0 + $0x30] sm:$0xff] }
  0x33   :  { %v202_v62 = vsub.f32 %v24082_v47, %v24099_v55  ;;  %20573 = vmatprep.mubr.f32.mxu0 %v183_v56  ;;  %20693 = vmatprep.mubr.f32.mxu1 %v183_v56  ;;  %v212_v0 = vsub.f32 %v24088_v49, %v24102_v57  ;;  %v222_v1 = vsub.f32 %v24091_v50, %v24105_v58  ;;  %vm896_vm2 = vcmask 392192  }
  0x34   :  { %v24120_v3 = vand.u32 4294901760, %v24108_v59  ;;  %v24125_v4 = vsub.f32 %v23988_v8, %v120_v11  ;;  %20574 = vmatmul.mubr.f32.vlgmr.msra.gmra.mrb[0].mxu0 %v193_v60  ;;  %22398 = vmatprep.subr.bf16.mxu0 %v22397_v61  ;;  %v276_v14 = vand.u32 4294901760, %v24113_v63  ;;  %v24134_v18 = vsub.f32 %v23975_v2, %v917_v6  ;;  %v73_v8 = vld [vmem:[%s26190_s0 + $0x38] sm:$0xff] }
  0x35   :  { %v203_v10 = vand.u32 4294901760, %v202_v62  ;;  %v24139_v19 = vsub.f32 %v23977_v5, %v920_v9  ;;  %20694 = vmatmul.mubr.f32.vlgmr.msra.gmra.mrb[0].mxu1 %v193_v60  ;;  %22400 = vmatpush3.bf16.msra.mxu0 %v22397_v61  ;;  %v213_v11 = vand.u32 4294901760, %v212_v0  ;;  %v223_v20 = vand.u32 4294901760, %v222_v1 }
  0x36   :  { %v232_v21 = vsub.f32 %v24108_v59, %v24120_v3  ;;  %v283_v25 = vand.u32 4294901760, %v24125_v4  ;;  %v277_v2 = vsub.f32 %v24113_v63, %v276_v14  ;;  %v1068_v5 = vand.u32 4294901760, %v24134_v18 }
  0x37   :  { %20576 = vmatprep.mubr.f32.mxu0 %v203_v10  ;;  %20696 = vmatprep.mubr.f32.mxu1 %v203_v10  ;;  %v1075_v6 = vand.u32 4294901760, %v24139_v19  ;;  %v105_v9 = vsel %vm85_vm0, %v72_v7, 0  ;;  %v108_v34 = vsel %vm85_vm0, %v73_v8, 0  ;;  %v24173_v53 = vsub.f32 %v23993_v12, %v923_v16 }
  0x38   :  { %v233_v26 = vand.u32 4294901760, %v232_v21  ;;  %v284_v31 = vsub.f32 %v24125_v4, %v283_v25  ;;  %v24156_v33 = vand.u32 4294901760, %v105_v9  ;;  %20577 = vmatmul.mubr.f32.gmra.mrb[2].mxu0 %v213_v11  ;;  %v278_v35 = vand.u32 4294901760, %v277_v2 }
  0x39   :  { %v1069_v43 = vsub.f32 %v24134_v18, %v1068_v5  ;;  %v1076_v45 = vsub.f32 %v24139_v19, %v1075_v6  ;;  %v24165_v46 = vand.u32 4294901760, %v108_v34  ;;  %20697 = vmatmul.mubr.f32.gmra.mrb[2].mxu1 %v213_v11  ;;  %20579 = vmatprep.mubr.f32.mxu0 %v223_v20  ;;  %v24178_v54 = vsub.f32 %v23995_v13, %v926_v17 }
  0x3a   :  { %v285_v48 = vand.u32 4294901760, %v284_v31  ;;  %v24168_v52 = vsub.f32 %v105_v9, %v24156_v33  ;;  %20699 = vmatprep.mubr.f32.mxu1 %v223_v20  ;;  %v22405_v62 = vpack.c.bf16 %v24041_v30, %v24039_v29  ;;  %v1082_v12 = vand.u32 4294901760, %v24173_v53  ;;  %v24206_v9 = vld [vmem:[%s26197_s7] ss:$0 sm:$0xff] }
  0x3b   :  { %v1070_v56 = vand.u32 4294901760, %v1069_v43  ;;  %v1077_v60 = vand.u32 4294901760, %v1076_v45  ;;  %v24181_v61 = vsub.f32 %v108_v34, %v24165_v46  ;;  %v1089_v16 = vand.u32 4294901760, %v24178_v54  ;;  %2187 = vrot.lane.b32.xlu0 %v24206_v9, %s23879_s27 }
  0x3c   :  { %v22401_v0 = vpack.c.bf16 %v285_v48, %v278_v35  ;;  %v24186_v1 = vand.u32 4294901760, %v24168_v52  ;;  %20580 = vmatmul.mubr.f32.gmra.mrb[4].mxu0 %v233_v26  ;;  %v1083_v10 = vsub.f32 %v24173_v53, %v1082_v12  ;;  %v22453_v34 = vpack.c.bf16 %v24139_v19, %v24134_v18  ;;  %v24215_v35 = vld [vmem:[%s26198_s8] ss:$0 sm:$0xff] }
  0x3d   :  { %v22445_v13 = vpack.c.bf16 %v1077_v60, %v1070_v56  ;;  %v24191_v17 = vand.u32 4294901760, %v24181_v61  ;;  %20700 = vmatmul.mubr.f32.gmra.mrb[4].mxu1 %v233_v26  ;;  %v1090_v8 = vsub.f32 %v24178_v54, %v1089_v16  ;;  %v22409_v43 = vpack.c.bf16 %v24125_v4, %v24113_v63 }
  0x3e   :  { %22402 = vmatprep.subr.bf16.mxu0 %v22401_v0  ;;  %v242_v7 = vsub.f32 %v24168_v52, %v24186_v1  ;;  %v1084_v21 = vand.u32 4294901760, %v1083_v10  ;;  %v22457_v45 = vpack.c.bf16 %v24178_v54, %v24173_v53  ;;  %v22421_v48 = vpack.c.bf16 %v269_v38, %v262_v37  ;;  %v2212_v37 = vld [vmem:[#allocation7] sm:$0xff]  ;;  %v2213_v38 = vld [vmem:[#allocation7 + $0x8] sm:$0xff] }
  0x3f   :  { %22446 = vmatprep.subr.bf16.mxu1 %v22445_v13  ;;  %22404 = vmatpush3.bf16.msra.mxu0 %v22401_v0  ;;  %v252_v11 = vsub.f32 %v24181_v61, %v24191_v17  ;;  %v1091_v2 = vand.u32 4294901760, %v1090_v8  ;;  %v22425_v29 = vpack.c.bf16 %v283_v25, %v276_v14  ;;  %v22473_v30 = vpack.c.bf16 %v1089_v16, %v1082_v12  ;;  %v19625_v53 = vld [vmem:[%s26193_s3] ss:$0 sm:$0xff] }
  0x40   :  { %22448 = vmatpush3.bf16.msra.mxu1 %v22445_v13  ;;  %v243_v20 = vand.u32 4294901760, %v242_v7  ;;  %22406 = vmatprep.subr.bf16.mxu0 %v22405_v62  ;;  %v19626_v54 = vld [vmem:[%s26194_s4] ss:$0 sm:$0xff]  ;;  %vm2713_vm3 = vcmask 261248   ;;  %vm1714_vm4 = vcmask 130048  }
  0x41   :  { %v253_v26 = vand.u32 4294901760, %v252_v11  ;;  %v22449_v31 = vpack.c.bf16 %v1091_v2, %v1084_v21  ;;  %2684 = vrot.lane.b32.xlu0 %v24215_v35, %s23879_s27 }
  0x42   :  { %20582 = vmatprep.mubr.f32.mxu0 %v243_v20  ;;  %20702 = vmatprep.mubr.f32.mxu1 %v243_v20 }
  0x43   :  { %20583 = vmatmul.mubr.f32.gmra.mrb[6].mxu0 %v253_v26  ;;  %20703 = vmatmul.mubr.f32.gmra.mrb[6].mxu1 %v253_v26 }
  0x44   :  { %22450 = vmatprep.subr.bf16.mxu1 %v22449_v31  ;;  %20593 = vmatprep.mubr.f32.mxu0 %v24024_v24 }
  0x45   :  { %22452 = vmatpush3.bf16.msra.mxu1 %v22449_v31  ;;  %20713 = vmatprep.mubr.f32.mxu1 %v24024_v24 }
  0x46   :  { %22454 = vmatprep.subr.bf16.mxu1 %v22453_v34 }
  0x47   :  { %20594 = vmatmul.mubr.f32.vlgmr.msra.gmra.mrb[0].mxu0 %v24037_v28 }
  0x48   :  { %20714 = vmatmul.mubr.f32.vlgmr.msra.gmra.mrb[0].mxu1 %v24037_v28  ;;  %22408 = vmatpush3.bf16.msra.mxu0 %v22405_v62 }
  0x49   :  { %20596 = vmatprep.mubr.f32.mxu0 %v24061_v39  ;;  %20716 = vmatprep.mubr.f32.mxu1 %v24061_v39 }
  0x4a   :  { %22410 = vmatprep.subr.bf16.mxu0 %v22409_v43  ;;  %22456 = vmatpush3.bf16.msra.mxu1 %v22453_v34 }
  0x4b   :  { %20597 = vmatmul.mubr.f32.gmra.mrb[2].mxu0 %v24067_v41  ;;  %22458 = vmatprep.subr.bf16.mxu1 %v22457_v45 }
  0x4c   :  { %20717 = vmatmul.mubr.f32.gmra.mrb[2].mxu1 %v24067_v41  ;;  %20599 = vmatprep.mubr.f32.mxu0 %v24069_v42 }
  0x4d   :  { %20719 = vmatprep.mubr.f32.mxu1 %v24069_v42  ;;  %22412 = vmatpush3.bf16.msra.mxu0 %v22409_v43 }
  0x4e   :  { %22460 = vmatpush3.bf16.msra.mxu1 %v22457_v45  ;;  %22414 = vmatprep.subr.bf16.mxu0 %v24000_v15 }
  0x4f   :  { %20600 = vmatmul.mubr.f32.gmra.mrb[4].mxu0 %v24093_v51  ;;  %22462 = vmatprep.subr.bf16.mxu1 %v24018_v22 }
  0x50   :  { %20720 = vmatmul.mubr.f32.gmra.mrb[4].mxu1 %v24093_v51  ;;  %20602 = vmatprep.mubr.f32.mxu0 %v24156_v33 }
  0x51   :  { %20722 = vmatprep.mubr.f32.mxu1 %v24156_v33 }
  0x53   :  { %20603 = vmatmul.mubr.f32.gmra.mrb[6].mxu0 %v24165_v46 }
  0x54   :  { %20723 = vmatmul.mubr.f32.gmra.mrb[6].mxu1 %v24165_v46  ;;  %20613 = vmatprep.mubr.f32.mxu0 %v24049_v32 }
  0x55   :  { %20733 = vmatprep.mubr.f32.mxu1 %v24049_v32  ;;  %v22469_v32 = vpack.c.bf16 %v1075_v6, %v1068_v5 }
  0x57   :  { %20614 = vmatmul.mubr.f32.vlgmr.msra.gmra.mrb[0].mxu0 %v24057_v36 }
  0x58   :  { %20734 = vmatmul.mubr.f32.vlgmr.msra.gmra.mrb[0].mxu1 %v24057_v36  ;;  %22416 = vmatpush3.bf16.msra.mxu0 %v24000_v15  ;;  %v23880_v36 = vmov 0.0|0.0  }
  0x59   :  { %20616 = vmatprep.mubr.f32.mxu0 %v24082_v47  ;;  %20736 = vmatprep.mubr.f32.mxu1 %v24082_v47  ;;  %v2219_v47 = vand.u32 4294901760, %v2213_v38 }
  0x5a   :  { %22418 = vmatprep.subr.bf16.mxu0 %v24022_v23  ;;  %22464 = vmatpush3.bf16.msra.mxu1 %v24018_v22 }
  0x5b   :  { %20617 = vmatmul.mubr.f32.gmra.mrb[2].mxu0 %v24088_v49  ;;  %22466 = vmatprep.subr.bf16.mxu1 %v24035_v27 }
  0x5c   :  { %20737 = vmatmul.mubr.f32.gmra.mrb[2].mxu1 %v24088_v49  ;;  %20619 = vmatprep.mubr.f32.mxu0 %v24091_v50 }
  0x5d   :  { %20739 = vmatprep.mubr.f32.mxu1 %v24091_v50  ;;  %22420 = vmatpush3.bf16.msra.mxu0 %v24022_v23 }
  0x5e   :  { %22468 = vmatpush3.bf16.msra.mxu1 %v24035_v27  ;;  %22422 = vmatprep.subr.bf16.mxu0 %v22421_v48 }
  0x5f   :  { %20620 = vmatmul.mubr.f32.gmra.mrb[4].mxu0 %v24108_v59  ;;  %22470 = vmatprep.subr.bf16.mxu1 %v22469_v32 }
  0x60   :  { %20740 = vmatmul.mubr.f32.gmra.mrb[4].mxu1 %v24108_v59  ;;  %20622 = vmatprep.mubr.f32.mxu0 %v24168_v52 }
  0x61   :  { %20742 = vmatprep.mubr.f32.mxu1 %v24168_v52 }
  0x63   :  { %20623 = vmatmul.mubr.f32.gmra.mrb[6].mxu0 %v24181_v61 }
  0x64   :  { %20743 = vmatmul.mubr.f32.gmra.mrb[6].mxu1 %v24181_v61  ;;  %20633 = vmatprep.mubr.f32.mxu0 %v24065_v40 }
  0x65   :  { %20753 = vmatprep.mubr.f32.mxu1 %v24065_v40 }
  0x67   :  { %20634 = vmatmul.mubr.f32.vlgmr.msra.gmra.mrb[0].mxu0 %v24073_v44 }
  0x68   :  { %20754 = vmatmul.mubr.f32.vlgmr.msra.gmra.mrb[0].mxu1 %v24073_v44  ;;  %22424 = vmatpush3.bf16.msra.mxu0 %v22421_v48  ;;  %v2216_v44 = vand.u32 4294901760, %v2212_v37 }
  0x69   :  { %20636 = vmatprep.mubr.f32.mxu0 %v24099_v55  ;;  %20756 = vmatprep.mubr.f32.mxu1 %v24099_v55 }
  0x6a   :  { %22426 = vmatprep.subr.bf16.mxu0 %v22425_v29  ;;  %22472 = vmatpush3.bf16.msra.mxu1 %v22469_v32  ;;  %v24335_v55 = vsub.f32 %v2212_v37, %v2216_v44 }
  0x6b   :  { %20637 = vmatmul.mubr.f32.gmra.mrb[2].mxu0 %v24102_v57  ;;  %22474 = vmatprep.subr.bf16.mxu1 %v22473_v30 }
  0x6c   :  { %20757 = vmatmul.mubr.f32.gmra.mrb[2].mxu1 %v24102_v57  ;;  %20639 = vmatprep.mubr.f32.mxu0 %v24105_v58  ;;  %v24337_v57 = vsub.f32 %v2213_v38, %v2219_v47 }
  0x6d   :  { %20759 = vmatprep.mubr.f32.mxu1 %v24105_v58  ;;  %22428 = vmatpush3.bf16.msra.mxu0 %v22425_v29  ;;  %v24339_v58 = vpack.c.bf16 %v2219_v47, %v2216_v44 }
  0x6e   :  { %22476 = vmatpush3.bf16.msra.mxu1 %v22473_v30  ;;  %22430 = vmatprep.subr.bf16.mxu0 %v24000_v15 }
  0x6f   :  { %20640 = vmatmul.mubr.f32.gmra.mrb[4].mxu0 %v24120_v3  ;;  %22478 = vmatprep.subr.bf16.mxu1 %v24018_v22 }
  0x70   :  { %20760 = vmatmul.mubr.f32.gmra.mrb[4].mxu1 %v24120_v3  ;;  %20642 = vmatprep.mubr.f32.mxu0 %v24186_v1  ;;  %v2302_v3 = vand.u32 4294901760, %v24337_v57 }
  0x71   :  { %20762 = vmatprep.mubr.f32.mxu1 %v24186_v1 }
  0x72   :  { %v2303_v14 = vsub.f32 %v24337_v57, %v2302_v3 }
  0x73   :  { %20643 = vmatmul.mubr.f32.gmra.mrb[6].mxu0 %v24191_v17 }
  0x74   :  { %20763 = vmatmul.mubr.f32.gmra.mrb[6].mxu1 %v24191_v17  ;;  %20653 = vmatprep.mubr.f32.mxu0 %v24024_v24  ;;  %v2304_v25 = vand.u32 4294901760, %v2303_v14 }
  0x75   :  { %20773 = vmatprep.mubr.f32.mxu1 %v24024_v24 }
  0x77   :  { %20654 = vmatmul.mubr.f32.vlgmr.msra.gmra.mrb[0].mxu0 %v24037_v28 }
  0x78   :  { %20774 = vmatmul.mubr.f32.vlgmr.msra.gmra.mrb[0].mxu1 %v24037_v28  ;;  %22432 = vmatpush3.bf16.msra.mxu0 %v24000_v15  ;;  %v1711_v15 = vld [vmem:[%s26195_s5] sm:$0xff] }
  0x79   :  { %20656 = vmatprep.mubr.f32.mxu0 %v24061_v39  ;;  %20776 = vmatprep.mubr.f32.mxu1 %v24061_v39 }
  0x7a   :  { %22434 = vmatprep.subr.bf16.mxu0 %v24022_v23  ;;  %22480 = vmatpush3.bf16.msra.mxu1 %v24018_v22  ;;  %v1712_v22 = vld [vmem:[%s26195_s5 + $0x8] sm:$0xff] }
  0x7b   :  { %20657 = vmatmul.mubr.f32.gmra.mrb[2].mxu0 %v24067_v41  ;;  %22482 = vmatprep.subr.bf16.mxu1 %v24035_v27  ;;  %v1722_v40 = vand.u32 4294901760, %v1712_v22 }
  0x7c   :  { %20777 = vmatmul.mubr.f32.gmra.mrb[2].mxu1 %v24067_v41  ;;  %20659 = vmatprep.mubr.f32.mxu0 %v24069_v42 }
  0x7d   :  { %20779 = vmatprep.mubr.f32.mxu1 %v24069_v42  ;;  %22436 = vmatpush3.bf16.msra.mxu0 %v24022_v23  ;;  %v1719_v23 = vand.u32 4294901760, %v1711_v15  ;;  %v24332_v50 = vsub.f32 %v1712_v22, %v1722_v40 }
  0x7e   :  { %22484 = vmatpush3.bf16.msra.mxu1 %v24035_v27  ;;  %22485 = vmatprep.subr.bf16.mxu0 %v23880_v36 }
  0x7f   :  { %20660 = vmatmul.mubr.f32.gmra.mrb[4].mxu0 %v24093_v51  ;;  %22503 = vmatprep.subr.bf16.mxu1 %v23880_v36  ;;  %v24328_v27 = vpack.c.bf16 %v1722_v40, %v1719_v23  ;;  %v24330_v49 = vsub.f32 %v1711_v15, %v1719_v23  ;;  %v1805_v63 = vand.u32 4294901760, %v24332_v50 }
  0x80   :  { %20780 = vmatmul.mubr.f32.gmra.mrb[4].mxu1 %v24093_v51  ;;  %20662 = vmatprep.mubr.f32.mxu0 %v24156_v33 }
  0x81   :  { %20782 = vmatprep.mubr.f32.mxu1 %v24156_v33  ;;  %v1798_v59 = vand.u32 4294901760, %v24330_v49  ;;  %v24387_v6 = vpack.c.bf16 %v24332_v50, %v24330_v49 }
  0x83   :  { %20663 = vmatmul.mubr.f32.gmra.mrb[6].mxu0 %v24165_v46 }
  0x84   :  { %20783 = vmatmul.mubr.f32.gmra.mrb[6].mxu1 %v24165_v46  ;;  %20673 = vmatprep.mubr.f32.mxu0 %v24024_v24 }
  0x85   :  { %20793 = vmatprep.mubr.f32.mxu1 %v24024_v24  ;;  %v2295_v24 = vand.u32 4294901760, %v24335_v55 }
  0x87   :  { %20674 = vmatmul.mubr.f32.vlgmr.msra.gmra.mrb[0].mxu0 %v24037_v28  ;;  %v2296_v4 = vsub.f32 %v24335_v55, %v2295_v24  ;;  %v24415_v52 = vpack.c.bf16 %v2302_v3, %v2295_v24 }
  0x88   :  { %20794 = vmatmul.mubr.f32.vlgmr.msra.gmra.mrb[0].mxu1 %v24037_v28  ;;  %22487 = vmatpush3.bf16.msra.mxu0 %v24328_v27  ;;  %v1799_v28 = vsub.f32 %v24330_v49, %v1798_v59 }
  0x89   :  { %20676 = vmatprep.mubr.f32.mxu0 %v24061_v39  ;;  %20796 = vmatprep.mubr.f32.mxu1 %v24061_v39  ;;  %v1806_v39 = vsub.f32 %v24332_v50, %v1805_v63  ;;  %v2297_v19 = vand.u32 4294901760, %v2296_v4 }
  0x8a   :  { %22505 = vmatpush3.bf16.msra.mxu1 %v24339_v58  ;;  %22488 = vmatprep.subr.bf16.mxu0 %v23880_v36  ;;  %v1800_v18 = vand.u32 4294901760, %v1799_v28 }
  0x8b   :  { %20677 = vmatmul.mubr.f32.gmra.mrb[2].mxu0 %v24067_v41  ;;  %22506 = vmatprep.subr.bf16.mxu1 %v23880_v36 }
  0x8c   :  { %20797 = vmatmul.mubr.f32.gmra.mrb[2].mxu1 %v24067_v41  ;;  %20679 = vmatprep.mubr.f32.mxu0 %v24069_v42  ;;  %v1807_v41 = vand.u32 4294901760, %v1806_v39 }
  0x8d   :  { %20799 = vmatprep.mubr.f32.mxu1 %v24069_v42  ;;  %v23882_v42 = vmov 0.0  }
  0x8e   :  { %v24369_v5 = vpack.c.bf16 %v1807_v41, %v1800_v18 }
  0x8f   :  { %20680 = vmatmul.mubr.f32.gmra.mrb[4].mxu0 %v24093_v51 }
  0x90   :  { %20800 = vmatmul.mubr.f32.gmra.mrb[4].mxu1 %v24093_v51  ;;  %20682 = vmatprep.mubr.f32.mxu0 %v24156_v33  ;;  %v24373_v51 = vpack.c.bf16 %v2304_v25, %v2297_v19 }
  0x91   :  { %20802 = vmatprep.mubr.f32.mxu1 %v24156_v33  ;;  %v24391_v33 = vpack.c.bf16 %v24337_v57, %v24335_v55 }
  0x93   :  { %20683 = vmatmul.mubr.f32.gmra.mrb[6].mxu0 %v24165_v46 }
  0x94   :  { %20803 = vmatmul.mubr.f32.gmra.mrb[6].mxu1 %v24165_v46  ;;  %20809 = vmatprep.mubr.msk.f32.mxu0 %vm23881_vm1, %v23882_v42  ;;  %v24413_v46 = vpack.c.bf16 %v1805_v63, %v1798_v59 }
  0x95   :  { %20851 = vmatprep.mubr.msk.f32.mxu1 %vm23881_vm1, %v23882_v42 }
  0x97   :  { %20810 = vmatmul.mubr.f32.vlgmr.msra.gmra.mrb[8].mxu0 %v23882_v42 }
  0x98   :  { %20852 = vmatmul.mubr.f32.vlgmr.msra.gmra.mrb[8].mxu1 %v23882_v42  ;;  %22490 = vmatpush3.bf16.msra.mxu0 %v24369_v5 }
  0x99   :  { %22508 = vmatpush3.bf16.msra.mxu1 %v24373_v51  ;;  %20816 = vmatprep.mubr.msk.f32.mxu0 %vm23881_vm1, %v23882_v42 }
  0x9a   :  { %20858 = vmatprep.mubr.msk.f32.mxu1 %vm23881_vm1, %v23882_v42  ;;  %22491 = vmatprep.subr.bf16.mxu0 %v23880_v36 }
  0x9b   :  { %22509 = vmatprep.subr.bf16.mxu1 %v23880_v36 }
  0x9f   :  { %20817 = vmatmul.mubr.f32.vlgmr.msra.gmra.mrb[8].mxu0 %v23882_v42 }
  0xa0   :  { %20859 = vmatmul.mubr.f32.vlgmr.msra.gmra.mrb[8].mxu1 %v23882_v42  ;;  %22493 = vmatpush3.bf16.msra.mxu0 %v24387_v6 }
  0xa1   :  { %22511 = vmatpush3.bf16.msra.mxu1 %v24391_v33  ;;  %20823 = vmatprep.mubr.msk.f32.mxu0 %vm23881_vm1, %v23882_v42 }
  0xa2   :  { %20865 = vmatprep.mubr.msk.f32.mxu1 %vm23881_vm1, %v23882_v42  ;;  %22494 = vmatprep.subr.bf16.mxu0 %v23880_v36 }
  0xa3   :  { %22512 = vmatprep.subr.bf16.mxu1 %v23880_v36 }
  0xa7   :  { %20824 = vmatmul.mubr.f32.vlgmr.msra.gmra.mrb[8].mxu0 %v23882_v42 }
  0xa8   :  { %20866 = vmatmul.mubr.f32.vlgmr.msra.gmra.mrb[8].mxu1 %v23882_v42  ;;  %22496 = vmatpush3.bf16.msra.mxu0 %v24328_v27 }
  0xa9   :  { %22514 = vmatpush3.bf16.msra.mxu1 %v24339_v58  ;;  %20830 = vmatprep.mubr.msk.f32.mxu0 %vm23881_vm1, %v23882_v42 }
  0xaa   :  { %20872 = vmatprep.mubr.msk.f32.mxu1 %vm23881_vm1, %v23882_v42  ;;  %22497 = vmatprep.subr.bf16.mxu0 %v23880_v36 }
  0xab   :  { %22515 = vmatprep.subr.bf16.mxu1 %v23880_v36 }
  0xad   :  { %v2188_v44 = vpop.permute.xlu0 %2187 }
  0xaf   :  { %20831 = vmatmul.mubr.f32.vlgmr.msra.gmra.mrb[8].mxu0 %v23882_v42 }
  0xb0   :  { %20873 = vmatmul.mubr.f32.vlgmr.msra.gmra.mrb[8].mxu1 %v23882_v42  ;;  %22499 = vmatpush3.bf16.msra.mxu0 %v24413_v46 }
  0xb1   :  { %22517 = vmatpush3.bf16.msra.mxu1 %v24415_v52  ;;  %20837 = vmatprep.mubr.msk.f32.mxu0 %vm23881_vm1, %v23882_v42 }
  0xb2   :  { %20879 = vmatprep.mubr.msk.f32.mxu1 %vm23881_vm1, %v23882_v42  ;;  %22500 = vmatprep.subr.bf16.mxu0 %v23880_v36 }
  0xb3   :  { %22518 = vmatprep.subr.bf16.mxu1 %v23880_v36  ;;  %v2685_v49 = vpop.permute.xlu0 %2684 }
  0xb7   :  { %20838 = vmatmul.mubr.f32.vlgmr.msra.gmra.mrb[8].mxu0 %v23882_v42 }
  0xb8   :  { %20880 = vmatmul.mubr.f32.vlgmr.msra.gmra.mrb[8].mxu1 %v23882_v42  ;;  %22502 = vmatpush3.bf16.msra.mxu0 %v24328_v27 }
  0xb9   :  { %22520 = vmatpush3.bf16.msra.mxu1 %v24339_v58  ;;  %20844 = vmatprep.mubr.msk.f32.mxu0 %vm23881_vm1, %v23882_v42 }
  0xba   :  { %20886 = vmatprep.mubr.msk.f32.mxu1 %vm23881_vm1, %v23882_v42  ;;  %22521 = vmatprep.subr.bf16.mxu0 %v23880_v36 }
  0xbb   :  { %22539 = vmatprep.subr.bf16.mxu1 %v23880_v36 }
  0xbf   :  { %20845 = vmatmul.mubr.f32.vlgmr.msra.gmra.mrb[8].mxu0 %v23882_v42 }
  0xc0   :  { %20887 = vmatmul.mubr.f32.vlgmr.msra.gmra.mrb[8].mxu1 %v23882_v42  ;;  %22523 = vmatpush3.bf16.msra.mxu0 %v24328_v27 }
  0xc1   :  { %20893 = vmatprep.mubr.msk.f32.mxu0 %vm23881_vm1, %v23882_v42  ;;  %22524 = vmatprep.subr.bf16.mxu0 %v23880_v36 }
  0xc2   :  { %22541 = vmatpush3.bf16.msra.mxu1 %v24339_v58  ;;  %20935 = vmatprep.mubr.msk.f32.mxu1 %vm23881_vm1, %v23882_v42 }
  0xc3   :  { %22542 = vmatprep.subr.bf16.mxu1 %v23880_v36 }
 0x15a   :  { %v20675_v56 = vpop.f32.mrb[0].mxu0 }
 0x15b   :  { %v23157_v60 = vadd.f32 %v20675_v56, %v19625_v53  ;;  %v850_v61 = vpop.f32.mrb[1].mxu0  ;;  %v20795_v62 = vpop.f32.mrb[0].mxu1 }
 0x15c   :  { %v23158_v0 = vadd.f32 %v19625_v53, %v850_v61  ;;  %v23165_v1 = vadd.f32 %v20795_v62, %v19626_v54  ;;  %v1656_v12 = vpop.f32.mrb[1].mxu1 }
 0x15d   :  { %898 = vst.msk [vmem:[#allocation2 + $0x8] sm:$0xff] %vm896_vm2, %v23157_v60  ;;  %v23166_v16 = vadd.f32 %v19626_v54, %v1656_v12 }
 0x15e   :  { %897 = vst.msk [vmem:[#allocation2] sm:$0xff] %vm896_vm2, %v23158_v0  ;;  %v20678_v13 = vpop.f32.mrb[2].mxu0  ;;  %1703 = vst.msk [vmem:[#allocation3 + $0x8] sm:$0xff] %vm896_vm2, %v23165_v1 }
 0x15f   :  { %v23159_v17 = vadd.f32 %v20678_v13, %v19625_v53  ;;  %v862_v7 = vpop.f32.mrb[3].mxu0  ;;  %1702 = vst.msk [vmem:[#allocation3] sm:$0xff] %vm896_vm2, %v23166_v16  ;;  %v20798_v10 = vpop.f32.mrb[2].mxu1 }
 0x160   :  { %v23160_v8 = vadd.f32 %v19625_v53, %v862_v7  ;;  %v23167_v11 = vadd.f32 %v20798_v10, %v19626_v54  ;;  %v1668_v20 = vpop.f32.mrb[3].mxu1 }
 0x161   :  { %900 = vst.msk [vmem:[#allocation2 + $0x18] sm:$0xff] %vm896_vm2, %v23159_v17  ;;  %v23168_v21 = vadd.f32 %v19626_v54, %v1668_v20 }
 0x162   :  { %899 = vst.msk [vmem:[#allocation2 + $0x10] sm:$0xff] %vm896_vm2, %v23160_v8  ;;  %v20681_v2 = vpop.f32.mrb[4].mxu0  ;;  %1705 = vst.msk [vmem:[#allocation3 + $0x18] sm:$0xff] %vm896_vm2, %v23167_v11 }
 0x163   :  { %v23161_v26 = vadd.f32 %v20681_v2, %v19625_v53  ;;  %v874_v31 = vpop.f32.mrb[5].mxu0  ;;  %1704 = vst.msk [vmem:[#allocation3 + $0x10] sm:$0xff] %vm896_vm2, %v23168_v21  ;;  %v20801_v34 = vpop.f32.mrb[4].mxu1 }
 0x164   :  { %v23162_v43 = vadd.f32 %v19625_v53, %v874_v31  ;;  %v23169_v45 = vadd.f32 %v20801_v34, %v19626_v54  ;;  %v1680_v48 = vpop.f32.mrb[5].mxu1 }
 0x165   :  { %902 = vst.msk [vmem:[#allocation2 + $0x28] sm:$0xff] %vm896_vm2, %v23161_v26  ;;  %v23170_v32 = vadd.f32 %v19626_v54, %v1680_v48  ;;  %v1710_v24 = vld [vmem:[#allocation2] sm:$0xff] }
 0x166   :  { %901 = vst.msk [vmem:[#allocation2 + $0x20] sm:$0xff] %vm896_vm2, %v23162_v43  ;;  %v20684_v29 = vpop.f32.mrb[6].mxu0  ;;  %1707 = vst.msk [vmem:[#allocation3 + $0x28] sm:$0xff] %vm896_vm2, %v23169_v45 }
 0x167   :  { %v23163_v30 = vadd.f32 %v20684_v29, %v19625_v53  ;;  %v886_v15 = vpop.f32.mrb[7].mxu0  ;;  %1706 = vst.msk [vmem:[#allocation3 + $0x20] sm:$0xff] %vm896_vm2, %v23170_v32  ;;  %v20804_v22 = vpop.f32.mrb[6].mxu1 }
 0x168   :  { %v23164_v37 = vadd.f32 %v19625_v53, %v886_v15  ;;  %v23171_v38 = vadd.f32 %v20804_v22, %v19626_v54  ;;  %v1692_v23 = vpop.f32.mrb[7].mxu1 }
 0x169   :  { %904 = vst.msk [vmem:[#allocation2 + $0x38] sm:$0xff] %vm896_vm2, %v23163_v30  ;;  %v23172_v40 = vadd.f32 %v19626_v54, %v1692_v23 }
 0x16a   :  { %903 = vst.msk [vmem:[#allocation2 + $0x30] sm:$0xff] %vm896_vm2, %v23164_v37  ;;  %1709 = vst.msk [vmem:[#allocation3 + $0x38] sm:$0xff] %vm896_vm2, %v23171_v38 }
 0x16b   :  { %1708 = vst.msk [vmem:[#allocation3 + $0x30] sm:$0xff] %vm896_vm2, %v23172_v40 }
 0x171   :  { %v2211_v28 = vld [vmem:[#allocation3 + $0x38] sm:$0xff] }
 0x192   :  { %v2173_v47 = vpop.f32.mrb[8].mxu0 }
 0x193   :  { %v2670_v50 = vpop.f32.mrb[8].mxu1  ;;  %v20846_v55 = vpop.f32.mrb[9].mxu0  ;;  %v2190_v57 = vadd.f32 %v2188_v44, %v2173_v47  ;;  %v2177_v3 = vadd.f32 %v2173_v47, %v1710_v24 }
 0x194   :  { %v20888_v59 = vpop.f32.mrb[9].mxu1  ;;  %v2687_v63 = vadd.f32 %v2685_v49, %v2670_v50  ;;  %v2674_v4 = vadd.f32 %v2670_v50, %v2211_v28 }
 0x195   :  { %2192 = vrot.lane.b32.xlu1 %v2190_v57, %s23883_s20  ;;  %v2178_v39 = vmul.f32 0.5, %v2177_v3 }
 0x196   :  { %v2675_v14 = vmul.f32 0.5, %v2674_v4  ;;  %v3215_v4 = vld [vmem:[#allocation3 + $0x30] sm:$0xff] }
 0x197   :  { %23679 = vtanh.f32 %v2178_v39 }
 0x198   :  { %23681 = vtanh.f32 %v2675_v14 }
 0x199   :  { %2689 = vrot.lane.b32.xlu1 %v2687_v63, %s23883_s20 }
 0x1a1   :  { %v23680_v18 = vpop.eup %23679 }
 0x1a2   :  { %v2180_v41 = vmul.f32 0.5, %v23680_v18  ;;  %v23682_v19 = vpop.eup %23681 }
 0x1a3   :  { %v2677_v53 = vmul.f32 0.5, %v23682_v19 }
 0x1a4   :  { %v2181_v25 = vadd.f32 0.5, %v2180_v41 }
 0x1a5   :  { %v2678_v60 = vadd.f32 0.5, %v2677_v53 }
 0x1a6   :  { %v2202_v7 = vsub.f32 1.0, %v2181_v25  ;;  %v2208_v8 = vmul.f32 0.0, %v2181_v25 }
 0x1a7   :  { %v2699_v21 = vsub.f32 1.0, %v2678_v60  ;;  %v2705_v26 = vmul.f32 0.0, %v2678_v60 }
 0x207   :  { %v2193_v54 = vpop.permute.xlu1 %2192 }
 0x208   :  { %v2195_v56 = vmul.f32 %v2193_v54, %v2181_v25 }
 0x20a   :  { %2197 = vrot.lane.b32.xlu0 %v2195_v56, %s23879_s27 }
 0x20b   :  { %v2690_v61 = vpop.permute.xlu1 %2689 }
 0x20c   :  { %v2692_v62 = vmul.f32 %v2690_v61, %v2678_v60 }
 0x20e   :  { %2694 = vrot.lane.b32.xlu1 %v2692_v62, %s23879_s27 }
 0x27c   :  { %v2198_v0 = vpop.permute.xlu0 %2197 }
 0x27d   :  { %v2200_v1 = vadd.f32 %v2198_v0, %v1710_v24 }
 0x27f   :  { %23683 = vtanh.f32 %v2200_v1 }
 0x280   :  { %v2695_v12 = vpop.permute.xlu1 %2694 }
 0x281   :  { %v2697_v16 = vadd.f32 %v2695_v12, %v2211_v28  ;;  %v2716_v28 = vld [vmem:[#allocation2 + $0x8] sm:$0xff] }
 0x283   :  { %23685 = vtanh.f32 %v2697_v16 }
 0x289   :  { %v23684_v13 = vpop.eup %23683 }
 0x28a   :  { %2204 = vrot.lane.b32.xlu0 %v23684_v13, %s23884_s21 }
 0x28d   :  { %v23686_v17 = vpop.eup %23685 }
 0x28e   :  { %2701 = vrot.lane.b32.xlu1 %v23686_v17, %s23884_s21 }
 0x2fc   :  { %v2205_v10 = vpop.permute.xlu0 %2204 }
 0x2fd   :  { %v2207_v11 = vmul.f32 %v2205_v10, %v2202_v7 }
 0x2ff   :  { %v24475_v20 = vadd.f32 %v2208_v8, %v2207_v11 }
 0x300   :  { %v2702_v2 = vpop.permute.xlu1 %2701 }
 0x301   :  { %v2704_v31 = vmul.f32 %v2702_v2, %v2699_v21  ;;  %2708 = vrot.lane.b32.xlu0 %v24475_v20, %s23884_s21 }
 0x303   :  { %v24479_v34 = vadd.f32 %v2705_v26, %v2704_v31 }
 0x305   :  { %3220 = vrot.lane.b32.xlu1 %v24479_v34, %s23884_s21  ;;  %3191 = vrot.lane.b32.xlu0 %v24206_v9, %s23879_s27  ;;  %2714 = vst.msk [vmem:[#allocation4 + $0x38] sm:$0xff] %vm2713_vm3, %v24479_v34 }
 0x309   :  { %3693 = vrot.lane.b32.xlu1 %v24215_v35, %s23879_s27 }
 0x373   :  { %v2709_v43 = vpop.permute.xlu0 %2708 }
 0x374   :  { %2711 = vst.msk [vmem:[#allocation4] sm:$0xff] %vm1714_vm4, %v2709_v43  ;;  %v2720_v45 = vsel %vm1714_vm4, %v2709_v43, 0 }
 0x375   :  { %v2789_v48 = vand.u32 4294901760, %v2720_v45 }
 0x377   :  { %v2790_v32 = vsub.f32 %v2720_v45, %v2789_v48  ;;  %v3221_v29 = vpop.permute.xlu1 %3220  ;;  %v3192_v49 = vpop.permute.xlu0 %3191 }
 0x378   :  { %v3222_v30 = vsel %vm1714_vm4, %v3221_v29, 0 }
 0x379   :  { %v2791_v15 = vand.u32 4294901760, %v2790_v32  ;;  %v3291_v22 = vand.u32 4294901760, %v3222_v30 }
 0x37b   :  { %v3292_v37 = vsub.f32 %v3222_v30, %v3291_v22  ;;  %v2792_v38 = vsub.f32 %v2790_v32, %v2791_v15  ;;  %v3694_v59 = vpop.permute.xlu1 %3693 }
 0x37d   :  { %v3293_v23 = vand.u32 4294901760, %v3292_v37  ;;  %v2793_v40 = vand.u32 4294901760, %v2792_v38 }
 0x37f   :  { %v3294_v44 = vsub.f32 %v3292_v37, %v3293_v23  ;;  %20894 = vmatmul.mubr.f32.vlgmr.msra.gmra.mrb[10].mxu0 %v2793_v40 }
 0x380   :  { %22526 = vmatpush3.bf16.msra.mxu0 %v24369_v5  ;;  %20900 = vmatprep.mubr.msk.f32.mxu0 %vm23881_vm1, %v23882_v42 }
 0x381   :  { %v3295_v47 = vand.u32 4294901760, %v3294_v44  ;;  %22527 = vmatprep.subr.bf16.mxu0 %v23880_v36 }
 0x383   :  { %20936 = vmatmul.mubr.f32.vlgmr.msra.gmra.mrb[10].mxu1 %v3295_v47 }
 0x384   :  { %22544 = vmatpush3.bf16.msra.mxu1 %v24373_v51  ;;  %20942 = vmatprep.mubr.msk.f32.mxu1 %vm23881_vm1, %v23882_v42 }
 0x385   :  { %22545 = vmatprep.subr.bf16.mxu1 %v23880_v36 }
 0x387   :  { %20901 = vmatmul.mubr.f32.vlgmr.msra.gmra.mrb[10].mxu0 %v2789_v48 }
 0x388   :  { %22529 = vmatpush3.bf16.msra.mxu0 %v24387_v6  ;;  %20907 = vmatprep.mubr.msk.f32.mxu0 %vm23881_vm1, %v23882_v42 }
 0x389   :  { %22530 = vmatprep.subr.bf16.mxu0 %v23880_v36 }
 0x38b   :  { %20943 = vmatmul.mubr.f32.vlgmr.msra.gmra.mrb[10].mxu1 %v3291_v22 }
 0x38c   :  { %22547 = vmatpush3.bf16.msra.mxu1 %v24391_v33  ;;  %20949 = vmatprep.mubr.msk.f32.mxu1 %vm23881_vm1, %v23882_v42 }
 0x38d   :  { %22548 = vmatprep.subr.bf16.mxu1 %v23880_v36 }
 0x38f   :  { %20908 = vmatmul.mubr.f32.vlgmr.msra.gmra.mrb[10].mxu0 %v2790_v32 }
 0x390   :  { %22532 = vmatpush3.bf16.msra.mxu0 %v24328_v27  ;;  %20914 = vmatprep.mubr.msk.f32.mxu0 %vm23881_vm1, %v23882_v42 }
 0x391   :  { %22533 = vmatprep.subr.bf16.mxu0 %v23880_v36 }
 0x393   :  { %20950 = vmatmul.mubr.f32.vlgmr.msra.gmra.mrb[10].mxu1 %v3292_v37 }
 0x394   :  { %22550 = vmatpush3.bf16.msra.mxu1 %v24339_v58  ;;  %20956 = vmatprep.mubr.msk.f32.mxu1 %vm23881_vm1, %v23882_v42 }
 0x395   :  { %22551 = vmatprep.subr.bf16.mxu1 %v23880_v36 }
 0x397   :  { %20915 = vmatmul.mubr.f32.vlgmr.msra.gmra.mrb[10].mxu0 %v2791_v15 }
 0x398   :  { %22535 = vmatpush3.bf16.msra.mxu0 %v24413_v46  ;;  %20921 = vmatprep.mubr.msk.f32.mxu0 %vm23881_vm1, %v23882_v42 }
 0x399   :  { %22536 = vmatprep.subr.bf16.mxu0 %v23880_v36 }
 0x39b   :  { %20957 = vmatmul.mubr.f32.vlgmr.msra.gmra.mrb[10].mxu1 %v3293_v23 }
 0x39c   :  { %22553 = vmatpush3.bf16.msra.mxu1 %v24415_v52  ;;  %20963 = vmatprep.mubr.msk.f32.mxu1 %vm23881_vm1, %v23882_v42 }
 0x39d   :  { %22554 = vmatprep.subr.bf16.mxu1 %v23880_v36 }
 0x39f   :  { %20922 = vmatmul.mubr.f32.vlgmr.msra.gmra.mrb[10].mxu0 %v2789_v48 }
 0x3a0   :  { %22538 = vmatpush3.bf16.msra.mxu0 %v24328_v27  ;;  %20928 = vmatprep.mubr.msk.f32.mxu0 %vm23881_vm1, %v23882_v42 }
 0x3a1   :  { %22557 = vmatprep.subr.bf16.mxu0 %v23880_v36 }
 0x3a3   :  { %20964 = vmatmul.mubr.f32.vlgmr.msra.gmra.mrb[10].mxu1 %v3291_v22 }
 0x3a4   :  { %22556 = vmatpush3.bf16.msra.mxu1 %v24339_v58  ;;  %20970 = vmatprep.mubr.msk.f32.mxu1 %vm23881_vm1, %v23882_v42 }
 0x3a5   :  { %22575 = vmatprep.subr.bf16.mxu1 %v23880_v36 }
 0x3a7   :  { %20929 = vmatmul.mubr.f32.vlgmr.msra.gmra.mrb[10].mxu0 %v2789_v48 }
 0x3a8   :  { %22559 = vmatpush3.bf16.msra.mxu0 %v24328_v27  ;;  %20977 = vmatprep.mubr.msk.f32.mxu0 %vm23881_vm1, %v23882_v42 }
 0x3a9   :  { %22560 = vmatprep.subr.bf16.mxu0 %v23880_v36 }
 0x3ab   :  { %20971 = vmatmul.mubr.f32.vlgmr.msra.gmra.mrb[10].mxu1 %v3291_v22 }
 0x3ac   :  { %22577 = vmatpush3.bf16.msra.mxu1 %v24339_v58  ;;  %21019 = vmatprep.mubr.msk.f32.mxu1 %vm23881_vm1, %v23882_v42 }
 0x3ad   :  { %22578 = vmatprep.subr.bf16.mxu1 %v23880_v36 }
 0x47a   :  { %v3177_v50 = vpop.f32.mrb[10].mxu0 }
 0x47b   :  { %v3194_v55 = vadd.f32 %v3192_v49, %v3177_v50  ;;  %v20930_v57 = vpop.f32.mrb[11].mxu0  ;;  %v3181_v39 = vadd.f32 %v3177_v50, %v2716_v28 }
 0x47d   :  { %3196 = vrot.lane.b32.xlu0 %v3194_v55, %s23883_s20  ;;  %v3182_v14 = vmul.f32 0.5, %v3181_v39 }
 0x47e   :  { %v3679_v63 = vpop.f32.mrb[10].mxu1 }
 0x47f   :  { %v3696_v24 = vadd.f32 %v3694_v59, %v3679_v63  ;;  %v20972_v3 = vpop.f32.mrb[11].mxu1  ;;  %v3683_v18 = vadd.f32 %v3679_v63, %v3215_v4  ;;  %23687 = vtanh.f32 %v3182_v14 }
 0x481   :  { %3698 = vrot.lane.b32.xlu1 %v3696_v24, %s23883_s20  ;;  %v3684_v41 = vmul.f32 0.5, %v3683_v18 }
 0x483   :  { %23689 = vtanh.f32 %v3684_v41 }
 0x489   :  { %v23688_v19 = vpop.eup %23687 }
 0x48a   :  { %v3184_v25 = vmul.f32 0.5, %v23688_v19 }
 0x48c   :  { %v3185_v54 = vadd.f32 0.5, %v3184_v25 }
 0x48d   :  { %v23690_v53 = vpop.eup %23689 }
 0x48e   :  { %v3686_v56 = vmul.f32 0.5, %v23690_v53  ;;  %v3206_v8 = vsub.f32 1.0, %v3185_v54  ;;  %v3212_v21 = vmul.f32 %v3185_v54, %v24475_v20 }
 0x490   :  { %v3687_v62 = vadd.f32 0.5, %v3686_v56 }
 0x492   :  { %v3708_v31 = vsub.f32 1.0, %v3687_v62  ;;  %v3714_v45 = vmul.f32 %v3687_v62, %v24479_v34 }
 0x4ef   :  { %v3197_v60 = vpop.permute.xlu0 %3196 }
 0x4f0   :  { %v3199_v61 = vmul.f32 %v3197_v60, %v3185_v54 }
 0x4f2   :  { %3201 = vrot.lane.b32.xlu0 %v3199_v61, %s23879_s27 }
 0x4f3   :  { %v3699_v0 = vpop.permute.xlu1 %3698 }
 0x4f4   :  { %v3701_v1 = vmul.f32 %v3699_v0, %v3687_v62 }
 0x4f6   :  { %3703 = vrot.lane.b32.xlu1 %v3701_v1, %s23879_s27 }
 0x564   :  { %v3202_v12 = vpop.permute.xlu0 %3201 }
 0x565   :  { %v3204_v16 = vadd.f32 %v3202_v12, %v2716_v28  ;;  %v3725_v28 = vld [vmem:[#allocation2 + $0x10] sm:$0xff] }
 0x567   :  { %23691 = vtanh.f32 %v3204_v16 }
 0x568   :  { %v3704_v13 = vpop.permute.xlu1 %3703 }
 0x569   :  { %v3706_v17 = vadd.f32 %v3704_v13, %v3215_v4  ;;  %v4224_v4 = vld [vmem:[#allocation3 + $0x28] sm:$0xff] }
 0x56b   :  { %23693 = vtanh.f32 %v3706_v17 }
 0x571   :  { %v23692_v7 = vpop.eup %23691 }
 0x572   :  { %3208 = vrot.lane.b32.xlu0 %v23692_v7, %s23884_s21 }
 0x575   :  { %v23694_v10 = vpop.eup %23693 }
 0x576   :  { %3710 = vrot.lane.b32.xlu1 %v23694_v10, %s23884_s21 }
 0x5e4   :  { %v3209_v11 = vpop.permute.xlu0 %3208 }
 0x5e5   :  { %v3211_v2 = vmul.f32 %v3209_v11, %v3206_v8 }
 0x5e7   :  { %v24547_v26 = vadd.f32 %v3212_v21, %v3211_v2 }
 0x5e8   :  { %v3711_v43 = vpop.permute.xlu1 %3710 }
 0x5e9   :  { %v3713_v48 = vmul.f32 %v3711_v43, %v3708_v31  ;;  %3717 = vrot.lane.b32.xlu0 %v24547_v26, %s23884_s21 }
 0x5eb   :  { %v24552_v32 = vadd.f32 %v3714_v45, %v3713_v48 }
 0x5ed   :  { %4229 = vrot.lane.b32.xlu1 %v24552_v32, %s23884_s21  ;;  %4200 = vrot.lane.b32.xlu0 %v24206_v9, %s23879_s27  ;;  %3723 = vst.msk [vmem:[#allocation4 + $0x30] sm:$0xff] %vm2713_vm3, %v24552_v32 }
 0x5f1   :  { %4702 = vrot.lane.b32.xlu1 %v24215_v35, %s23879_s27 }
 0x65b   :  { %v3718_v20 = vpop.permute.xlu0 %3717 }
 0x65c   :  { %3721 = vst.msk [vmem:[#allocation4 + $0x8] sm:$0xff] %vm1714_vm4, %v3718_v20  ;;  %v3729_v34 = vsel %vm1714_vm4, %v3718_v20, 0 }
 0x65d   :  { %v3798_v29 = vand.u32 4294901760, %v3729_v34 }
 0x65f   :  { %v3799_v30 = vsub.f32 %v3729_v34, %v3798_v29  ;;  %v4230_v15 = vpop.permute.xlu1 %4229  ;;  %v4201_v49 = vpop.permute.xlu0 %4200 }
 0x660   :  { %v4231_v22 = vsel %vm1714_vm4, %v4230_v15, 0 }
 0x661   :  { %v3800_v37 = vand.u32 4294901760, %v3799_v30  ;;  %v4300_v38 = vand.u32 4294901760, %v4231_v22 }
 0x663   :  { %v4301_v23 = vsub.f32 %v4231_v22, %v4300_v38  ;;  %v3801_v9 = vsub.f32 %v3799_v30, %v3800_v37  ;;  %v4703_v59 = vpop.permute.xlu1 %4702 }
 0x665   :  { %v4302_v40 = vand.u32 4294901760, %v4301_v23  ;;  %v3802_v44 = vand.u32 4294901760, %v3801_v9 }
 0x667   :  { %v4303_v47 = vsub.f32 %v4301_v23, %v4302_v40  ;;  %20978 = vmatmul.mubr.f32.vlgmr.msra.gmra.mrb[12].mxu0 %v3802_v44 }
 0x668   :  { %22562 = vmatpush3.bf16.msra.mxu0 %v24369_v5  ;;  %20984 = vmatprep.mubr.msk.f32.mxu0 %vm23881_vm1, %v23882_v42 }
 0x669   :  { %v4304_v35 = vand.u32 4294901760, %v4303_v47  ;;  %22563 = vmatprep.subr.bf16.mxu0 %v23880_v36 }
 0x66b   :  { %21020 = vmatmul.mubr.f32.vlgmr.msra.gmra.mrb[12].mxu1 %v4304_v35 }
 0x66c   :  { %22580 = vmatpush3.bf16.msra.mxu1 %v24373_v51  ;;  %21026 = vmatprep.mubr.msk.f32.mxu1 %vm23881_vm1, %v23882_v42 }
 0x66d   :  { %22581 = vmatprep.subr.bf16.mxu1 %v23880_v36 }
 0x66f   :  { %20985 = vmatmul.mubr.f32.vlgmr.msra.gmra.mrb[12].mxu0 %v3798_v29 }
 0x670   :  { %22565 = vmatpush3.bf16.msra.mxu0 %v24387_v6  ;;  %20991 = vmatprep.mubr.msk.f32.mxu0 %vm23881_vm1, %v23882_v42 }
 0x671   :  { %22566 = vmatprep.subr.bf16.mxu0 %v23880_v36 }
 0x673   :  { %21027 = vmatmul.mubr.f32.vlgmr.msra.gmra.mrb[12].mxu1 %v4300_v38 }
 0x674   :  { %22583 = vmatpush3.bf16.msra.mxu1 %v24391_v33  ;;  %21033 = vmatprep.mubr.msk.f32.mxu1 %vm23881_vm1, %v23882_v42 }
 0x675   :  { %22584 = vmatprep.subr.bf16.mxu1 %v23880_v36 }
 0x677   :  { %20992 = vmatmul.mubr.f32.vlgmr.msra.gmra.mrb[12].mxu0 %v3799_v30 }
 0x678   :  { %22568 = vmatpush3.bf16.msra.mxu0 %v24328_v27  ;;  %20998 = vmatprep.mubr.msk.f32.mxu0 %vm23881_vm1, %v23882_v42 }
 0x679   :  { %22569 = vmatprep.subr.bf16.mxu0 %v23880_v36 }
 0x67b   :  { %21034 = vmatmul.mubr.f32.vlgmr.msra.gmra.mrb[12].mxu1 %v4301_v23 }
 0x67c   :  { %22586 = vmatpush3.bf16.msra.mxu1 %v24339_v58  ;;  %21040 = vmatprep.mubr.msk.f32.mxu1 %vm23881_vm1, %v23882_v42 }
 0x67d   :  { %22587 = vmatprep.subr.bf16.mxu1 %v23880_v36 }
 0x67f   :  { %20999 = vmatmul.mubr.f32.vlgmr.msra.gmra.mrb[12].mxu0 %v3800_v37 }
 0x680   :  { %22571 = vmatpush3.bf16.msra.mxu0 %v24413_v46  ;;  %21005 = vmatprep.mubr.msk.f32.mxu0 %vm23881_vm1, %v23882_v42 }
 0x681   :  { %22572 = vmatprep.subr.bf16.mxu0 %v23880_v36 }
 0x683   :  { %21041 = vmatmul.mubr.f32.vlgmr.msra.gmra.mrb[12].mxu1 %v4302_v40 }
 0x684   :  { %22589 = vmatpush3.bf16.msra.mxu1 %v24415_v52  ;;  %21047 = vmatprep.mubr.msk.f32.mxu1 %vm23881_vm1, %v23882_v42 }
 0x685   :  { %22590 = vmatprep.subr.bf16.mxu1 %v23880_v36 }
 0x687   :  { %21006 = vmatmul.mubr.f32.vlgmr.msra.gmra.mrb[12].mxu0 %v3798_v29 }
 0x688   :  { %22574 = vmatpush3.bf16.msra.mxu0 %v24328_v27  ;;  %21012 = vmatprep.mubr.msk.f32.mxu0 %vm23881_vm1, %v23882_v42 }
 0x689   :  { %22593 = vmatprep.subr.bf16.mxu0 %v23880_v36 }
 0x68b   :  { %21048 = vmatmul.mubr.f32.vlgmr.msra.gmra.mrb[12].mxu1 %v4300_v38 }
 0x68c   :  { %22592 = vmatpush3.bf16.msra.mxu1 %v24339_v58  ;;  %21054 = vmatprep.mubr.msk.f32.mxu1 %vm23881_vm1, %v23882_v42 }
 0x68d   :  { %22611 = vmatprep.subr.bf16.mxu1 %v23880_v36 }
 0x68f   :  { %21013 = vmatmul.mubr.f32.vlgmr.msra.gmra.mrb[12].mxu0 %v3798_v29 }
 0x690   :  { %22595 = vmatpush3.bf16.msra.mxu0 %v24328_v27  ;;  %21061 = vmatprep.mubr.msk.f32.mxu0 %vm23881_vm1, %v23882_v42 }
 0x691   :  { %22596 = vmatprep.subr.bf16.mxu0 %v23880_v36 }
 0x693   :  { %21055 = vmatmul.mubr.f32.vlgmr.msra.gmra.mrb[12].mxu1 %v4300_v38 }
 0x694   :  { %22613 = vmatpush3.bf16.msra.mxu1 %v24339_v58  ;;  %21103 = vmatprep.mubr.msk.f32.mxu1 %vm23881_vm1, %v23882_v42 }
 0x695   :  { %22614 = vmatprep.subr.bf16.mxu1 %v23880_v36 }
 0x762   :  { %v4186_v50 = vpop.f32.mrb[12].mxu0 }
 0x763   :  { %v4203_v55 = vadd.f32 %v4201_v49, %v4186_v50  ;;  %v21014_v57 = vpop.f32.mrb[13].mxu0  ;;  %v4190_v39 = vadd.f32 %v4186_v50, %v3725_v28 }
 0x765   :  { %4205 = vrot.lane.b32.xlu0 %v4203_v55, %s23883_s20  ;;  %v4191_v14 = vmul.f32 0.5, %v4190_v39  ;;  %v4734_v55 = vld [vmem:[#allocation2 + $0x18] sm:$0xff] }
 0x766   :  { %v4688_v63 = vpop.f32.mrb[12].mxu1 }
 0x767   :  { %v4705_v24 = vadd.f32 %v4703_v59, %v4688_v63  ;;  %v21056_v3 = vpop.f32.mrb[13].mxu1  ;;  %v4692_v18 = vadd.f32 %v4688_v63, %v4224_v4  ;;  %23695 = vtanh.f32 %v4191_v14  ;;  %v5233_v59 = vld [vmem:[#allocation3 + $0x20] sm:$0xff] }
 0x769   :  { %4707 = vrot.lane.b32.xlu1 %v4705_v24, %s23883_s20  ;;  %v4693_v41 = vmul.f32 0.5, %v4692_v18 }
 0x76b   :  { %23697 = vtanh.f32 %v4693_v41 }
 0x771   :  { %v23696_v19 = vpop.eup %23695 }
 0x772   :  { %v4193_v25 = vmul.f32 0.5, %v23696_v19 }
 0x774   :  { %v4194_v54 = vadd.f32 0.5, %v4193_v25 }
 0x775   :  { %v23698_v53 = vpop.eup %23697 }
 0x776   :  { %v4695_v56 = vmul.f32 0.5, %v23698_v53  ;;  %v4215_v8 = vsub.f32 1.0, %v4194_v54  ;;  %v4221_v21 = vmul.f32 %v4194_v54, %v24547_v26  ;;  %v23823_v26 = vld [vmem:[%s26197_s7] ss:$0 sm:$0xff] }
 0x778   :  { %v4696_v62 = vadd.f32 0.5, %v4695_v56 }
 0x77a   :  { %v4717_v43 = vsub.f32 1.0, %v4696_v62  ;;  %v4723_v48 = vmul.f32 %v4696_v62, %v24552_v32  ;;  %v23824_v32 = vld [vmem:[%s26198_s8] ss:$0 sm:$0xff] }
 0x7d7   :  { %v4206_v60 = vpop.permute.xlu0 %4205 }
 0x7d8   :  { %v4208_v61 = vmul.f32 %v4206_v60, %v4194_v54 }
 0x7da   :  { %4210 = vrot.lane.b32.xlu0 %v4208_v61, %s23879_s27 }
 0x7db   :  { %v4708_v0 = vpop.permute.xlu1 %4707 }
 0x7dc   :  { %v4710_v1 = vmul.f32 %v4708_v0, %v4696_v62 }
 0x7de   :  { %4712 = vrot.lane.b32.xlu1 %v4710_v1, %s23879_s27 }
 0x84c   :  { %v4211_v12 = vpop.permute.xlu0 %4210 }
 0x84d   :  { %v4213_v16 = vadd.f32 %v4211_v12, %v3725_v28  ;;  %v5744_v12 = vld [vmem:[%s26195_s5] sm:$0xff] }
 0x84f   :  { %23699 = vtanh.f32 %v4213_v16  ;;  %v5745_v16 = vld [vmem:[%s26195_s5 + $0x8] sm:$0xff] }
 0x850   :  { %v4713_v13 = vpop.permute.xlu1 %4712 }
 0x851   :  { %v4715_v17 = vadd.f32 %v4713_v13, %v4224_v4  ;;  %v5750_v13 = vand.u32 4294901760, %v5744_v12 }
 0x853   :  { %23701 = vtanh.f32 %v4715_v17  ;;  %v5753_v17 = vand.u32 4294901760, %v5745_v16 }
 0x859   :  { %v23700_v7 = vpop.eup %23699 }
 0x85a   :  { %4217 = vrot.lane.b32.xlu0 %v23700_v7, %s23884_s21 }
 0x85d   :  { %v23702_v10 = vpop.eup %23701 }
 0x85e   :  { %4719 = vrot.lane.b32.xlu1 %v23702_v10, %s23884_s21  ;;  %v24698_v10 = vpack.c.bf16 %v5753_v17, %v5750_v13 }
 0x8cc   :  { %v4218_v11 = vpop.permute.xlu0 %4217 }
 0x8cd   :  { %v4220_v2 = vmul.f32 %v4218_v11, %v4215_v8  ;;  %v5828_v8 = vsub.f32 %v5744_v12, %v5750_v13  ;;  %v5835_v11 = vsub.f32 %v5745_v16, %v5753_v17 }
 0x8cf   :  { %v24620_v31 = vadd.f32 %v4221_v21, %v4220_v2 }
 0x8d0   :  { %v4720_v45 = vpop.permute.xlu1 %4719 }
 0x8d1   :  { %v4722_v20 = vmul.f32 %v4720_v45, %v4717_v43  ;;  %4726 = vrot.lane.b32.xlu0 %v24620_v31, %s23884_s21  ;;  %v6243_v43 = vld [vmem:[#allocation7] sm:$0xff]  ;;  %v6244_v45 = vld [vmem:[#allocation7 + $0x8] sm:$0xff] }
 0x8d3   :  { %v24625_v34 = vadd.f32 %v4723_v48, %v4722_v20  ;;  %v5829_v20 = vand.u32 4294901760, %v5828_v8 }
 0x8d5   :  { %5238 = vrot.lane.b32.xlu1 %v24625_v34, %s23884_s21  ;;  %5209 = vrot.lane.b32.xlu0 %v23823_v26, %s23879_s27  ;;  %4732 = vst.msk [vmem:[#allocation4 + $0x28] sm:$0xff] %vm2713_vm3, %v24625_v34  ;;  %v5836_v26 = vand.u32 4294901760, %v5835_v11 }
 0x8d9   :  { %5711 = vrot.lane.b32.xlu1 %v23824_v32, %s23879_s27  ;;  %v6252_v32 = vand.u32 4294901760, %v6243_v43 }
 0x943   :  { %v4727_v29 = vpop.permute.xlu0 %4726 }
 0x944   :  { %4730 = vst.msk [vmem:[#allocation4 + $0x10] sm:$0xff] %vm1714_vm4, %v4727_v29  ;;  %v4738_v30 = vsel %vm1714_vm4, %v4727_v29, 0 }
 0x945   :  { %v4807_v15 = vand.u32 4294901760, %v4738_v30 }
 0x947   :  { %v4808_v22 = vsub.f32 %v4738_v30, %v4807_v15  ;;  %v5239_v37 = vpop.permute.xlu1 %5238  ;;  %v6255_v30 = vand.u32 4294901760, %v6244_v45 }
 0x948   :  { %v5240_v38 = vsel %vm1714_vm4, %v5239_v37, 0  ;;  %v5837_v37 = vsub.f32 %v5835_v11, %v5836_v26 }
 0x949   :  { %v4809_v23 = vand.u32 4294901760, %v4808_v22  ;;  %v5309_v9 = vand.u32 4294901760, %v5240_v38 }
 0x94b   :  { %v5310_v40 = vsub.f32 %v5240_v38, %v5309_v9  ;;  %v4810_v44 = vsub.f32 %v4808_v22, %v4809_v23  ;;  %v6330_v38 = vsub.f32 %v6243_v43, %v6252_v32 }
 0x94d   :  { %v5311_v47 = vand.u32 4294901760, %v5310_v40  ;;  %v4811_v35 = vand.u32 4294901760, %v4810_v44 }
 0x94f   :  { %v5312_v49 = vsub.f32 %v5310_v40, %v5311_v47  ;;  %21062 = vmatmul.mubr.f32.vlgmr.msra.gmra.mrb[14].mxu0 %v4811_v35  ;;  %v5838_v35 = vand.u32 4294901760, %v5837_v37 }
 0x950   :  { %22598 = vmatpush3.bf16.msra.mxu0 %v24369_v5  ;;  %21068 = vmatprep.mubr.msk.f32.mxu0 %vm23881_vm1, %v23882_v42 }
 0x951   :  { %v5313_v50 = vand.u32 4294901760, %v5312_v49  ;;  %22599 = vmatprep.subr.bf16.mxu0 %v23880_v36  ;;  %v6331_v49 = vand.u32 4294901760, %v6330_v38 }
 0x953   :  { %21104 = vmatmul.mubr.f32.vlgmr.msra.gmra.mrb[14].mxu1 %v5313_v50 }
 0x954   :  { %22616 = vmatpush3.bf16.msra.mxu1 %v24373_v51  ;;  %21110 = vmatprep.mubr.msk.f32.mxu1 %vm23881_vm1, %v23882_v42 }
 0x955   :  { %22617 = vmatprep.subr.bf16.mxu1 %v23880_v36 }
 0x957   :  { %21069 = vmatmul.mubr.f32.vlgmr.msra.gmra.mrb[14].mxu0 %v4807_v15 }
 0x958   :  { %22601 = vmatpush3.bf16.msra.mxu0 %v24387_v6  ;;  %21075 = vmatprep.mubr.msk.f32.mxu0 %vm23881_vm1, %v23882_v42 }
 0x959   :  { %22602 = vmatprep.subr.bf16.mxu0 %v23880_v36 }
 0x95b   :  { %21111 = vmatmul.mubr.f32.vlgmr.msra.gmra.mrb[14].mxu1 %v5309_v9 }
 0x95c   :  { %22619 = vmatpush3.bf16.msra.mxu1 %v24391_v33  ;;  %21117 = vmatprep.mubr.msk.f32.mxu1 %vm23881_vm1, %v23882_v42  ;;  %v5712_v33 = vpop.permute.xlu1 %5711 }
 0x95d   :  { %22620 = vmatprep.subr.bf16.mxu1 %v23880_v36 }
 0x95f   :  { %21076 = vmatmul.mubr.f32.vlgmr.msra.gmra.mrb[14].mxu0 %v4808_v22  ;;  %v5830_v22 = vsub.f32 %v5828_v8, %v5829_v20 }
 0x960   :  { %22604 = vmatpush3.bf16.msra.mxu0 %v24328_v27  ;;  %21082 = vmatprep.mubr.msk.f32.mxu0 %vm23881_vm1, %v23882_v42 }
 0x961   :  { %22605 = vmatprep.subr.bf16.mxu0 %v23880_v36 }
 0x963   :  { %21118 = vmatmul.mubr.f32.vlgmr.msra.gmra.mrb[14].mxu1 %v5310_v40  ;;  %v6337_v40 = vsub.f32 %v6244_v45, %v6255_v30 }
 0x964   :  { %22622 = vmatpush3.bf16.msra.mxu1 %v24339_v58  ;;  %21124 = vmatprep.mubr.msk.f32.mxu1 %vm23881_vm1, %v23882_v42 }
 0x965   :  { %22623 = vmatprep.subr.bf16.mxu1 %v23880_v36  ;;  %v6338_v50 = vand.u32 4294901760, %v6337_v40 }
 0x967   :  { %21083 = vmatmul.mubr.f32.vlgmr.msra.gmra.mrb[14].mxu0 %v4809_v23 }
 0x968   :  { %22607 = vmatpush3.bf16.msra.mxu0 %v24413_v46  ;;  %21089 = vmatprep.mubr.msk.f32.mxu0 %vm23881_vm1, %v23882_v42 }
 0x969   :  { %22608 = vmatprep.subr.bf16.mxu0 %v23880_v36 }
 0x96b   :  { %21125 = vmatmul.mubr.f32.vlgmr.msra.gmra.mrb[14].mxu1 %v5311_v47  ;;  %v5831_v47 = vand.u32 4294901760, %v5830_v22 }
 0x96c   :  { %22625 = vmatpush3.bf16.msra.mxu1 %v24415_v52  ;;  %21131 = vmatprep.mubr.msk.f32.mxu1 %vm23881_vm1, %v23882_v42 }
 0x96d   :  { %22626 = vmatprep.subr.bf16.mxu1 %v23880_v36 }
 0x96f   :  { %21090 = vmatmul.mubr.f32.vlgmr.msra.gmra.mrb[14].mxu0 %v4807_v15 }
 0x970   :  { %22610 = vmatpush3.bf16.msra.mxu0 %v24328_v27  ;;  %21096 = vmatprep.mubr.msk.f32.mxu0 %vm23881_vm1, %v23882_v42  ;;  %v5210_v27 = vpop.permute.xlu0 %5209 }
 0x971   :  { %22629 = vmatprep.subr.bf16.mxu0 %v23880_v36 }
 0x973   :  { %21132 = vmatmul.mubr.f32.vlgmr.msra.gmra.mrb[14].mxu1 %v5309_v9 }
 0x974   :  { %22628 = vmatpush3.bf16.msra.mxu1 %v24339_v58  ;;  %21138 = vmatprep.mubr.msk.f32.mxu1 %vm23881_vm1, %v23882_v42 }
 0x975   :  { %22647 = vmatprep.subr.bf16.mxu1 %v23880_v36 }
 0x977   :  { %21097 = vmatmul.mubr.f32.vlgmr.msra.gmra.mrb[14].mxu0 %v4807_v15 }
 0x978   :  { %21145 = vmatprep.mubr.msk.f32.mxu0 %vm23881_vm1, %v23882_v42  ;;  %22631 = vmatpush3.bf16.msra.mxu0 %v24698_v10 }
 0x979   :  { %22632 = vmatprep.subr.bf16.mxu0 %v23880_v36 }
 0x97b   :  { %21139 = vmatmul.mubr.f32.vlgmr.msra.gmra.mrb[14].mxu1 %v5309_v9  ;;  %v24706_v9 = vpack.c.bf16 %v6255_v30, %v6252_v32 }
 0x97c   :  { %21187 = vmatprep.mubr.msk.f32.mxu1 %vm23881_vm1, %v23882_v42 }
 0x97d   :  { %22649 = vmatpush3.bf16.msra.mxu1 %v24706_v9 }
 0x97e   :  { %22650 = vmatprep.subr.bf16.mxu1 %v23880_v36 }
 0xa4a   :  { %v5195_v5 = vpop.f32.mrb[14].mxu0 }
 0xa4b   :  { %v5212_v51 = vadd.f32 %v5210_v27, %v5195_v5  ;;  %v21098_v6 = vpop.f32.mrb[15].mxu0  ;;  %v5199_v57 = vadd.f32 %v5195_v5, %v4734_v55  ;;  %v24713_v5 = vpack.c.bf16 %v5838_v35, %v5831_v47 }
 0xa4d   :  { %5214 = vrot.lane.b32.xlu0 %v5212_v51, %s23883_s20  ;;  %v5200_v63 = vmul.f32 0.5, %v5199_v57  ;;  %v6339_v51 = vsub.f32 %v6337_v40, %v6338_v50  ;;  %v24728_v57 = vpack.c.bf16 %v6338_v50, %v6331_v49 }
 0xa4e   :  { %v5697_v58 = vpop.f32.mrb[14].mxu1 }
 0xa4f   :  { %v5714_v46 = vadd.f32 %v5712_v33, %v5697_v58  ;;  %v21140_v52 = vpop.f32.mrb[15].mxu1  ;;  %v5701_v24 = vadd.f32 %v5697_v58, %v5233_v59  ;;  %23703 = vtanh.f32 %v5200_v63  ;;  %v6340_v33 = vand.u32 4294901760, %v6339_v51  ;;  %v24738_v63 = vld [vmem:[%s26198_s8] ss:$0 sm:$0xff] }
 0xa50   :  { %v24720_v58 = vpack.c.bf16 %v5835_v11, %v5828_v8  ;;  %v24724_v52 = vpack.c.bf16 %v6337_v40, %v6330_v38  ;;  %v6242_v11 = vld [vmem:[#allocation3 + $0x18] sm:$0xff] }
 0xa51   :  { %5716 = vrot.lane.b32.xlu1 %v5714_v46, %s23883_s20  ;;  %v5702_v3 = vmul.f32 0.5, %v5701_v24 }
 0xa53   :  { %23705 = vtanh.f32 %v5702_v3 }
 0xa59   :  { %v23704_v28 = vpop.eup %23703 }
 0xa5a   :  { %v5202_v39 = vmul.f32 0.5, %v23704_v28 }
 0xa5c   :  { %v5203_v14 = vadd.f32 0.5, %v5202_v39 }
 0xa5d   :  { %v23706_v4 = vpop.eup %23705 }
 0xa5e   :  { %v5704_v18 = vmul.f32 0.5, %v23706_v4  ;;  %v5224_v7 = vsub.f32 1.0, %v5203_v14  ;;  %v5230_v21 = vmul.f32 %v5203_v14, %v24620_v31 }
 0xa60   :  { %v5705_v25 = vadd.f32 0.5, %v5704_v18 }
 0xa62   :  { %v5726_v29 = vsub.f32 1.0, %v5705_v25  ;;  %v5732_v31 = vmul.f32 %v5705_v25, %v24625_v34  ;;  %v6332_v34 = vsub.f32 %v6330_v38, %v6331_v49 }
 0xa64   :  { %v6333_v6 = vand.u32 4294901760, %v6332_v34 }
 0xa66   :  { %v24722_v46 = vpack.c.bf16 %v6340_v33, %v6333_v6 }
 0xabf   :  { %v5215_v41 = vpop.permute.xlu0 %5214 }
 0xac0   :  { %v5217_v19 = vmul.f32 %v5215_v41, %v5203_v14 }
 0xac2   :  { %5219 = vrot.lane.b32.xlu0 %v5217_v19, %s23879_s27 }
 0xac3   :  { %v5717_v53 = vpop.permute.xlu1 %5716 }
 0xac4   :  { %v5719_v54 = vmul.f32 %v5717_v53, %v5705_v25 }
 0xac6   :  { %5721 = vrot.lane.b32.xlu1 %v5719_v54, %s23879_s27 }
 0xb34   :  { %v5220_v56 = vpop.permute.xlu0 %5219 }
 0xb35   :  { %v5222_v60 = vadd.f32 %v5220_v56, %v4734_v55  ;;  %v24726_v55 = vpack.c.bf16 %v5836_v26, %v5829_v20 }
 0xb37   :  { %23707 = vtanh.f32 %v5222_v60 }
 0xb38   :  { %v5722_v61 = vpop.permute.xlu1 %5721 }
 0xb39   :  { %v5724_v62 = vadd.f32 %v5722_v61, %v5233_v59  ;;  %v24733_v59 = vld [vmem:[%s26197_s7] ss:$0 sm:$0xff] }
 0xb3b   :  { %23709 = vtanh.f32 %v5724_v62 }
 0xb41   :  { %v23708_v0 = vpop.eup %23707 }
 0xb42   :  { %5226 = vrot.lane.b32.xlu0 %v23708_v0, %s23884_s21 }
 0xb45   :  { %v23710_v1 = vpop.eup %23709 }
 0xb46   :  { %5728 = vrot.lane.b32.xlu1 %v23710_v1, %s23884_s21 }
 0xbb4   :  { %v5227_v2 = vpop.permute.xlu0 %5226 }
 0xbb5   :  { %v5229_v48 = vmul.f32 %v5227_v2, %v5224_v7  ;;  %v5743_v7 = vld [vmem:[#allocation2 + $0x20] sm:$0xff] }
 0xbb7   :  { %v24703_v15 = vadd.f32 %v5230_v21, %v5229_v48 }
 0xbb8   :  { %v5729_v23 = vpop.permute.xlu1 %5728 }
 0xbb9   :  { %v5731_v44 = vmul.f32 %v5729_v23, %v5726_v29  ;;  %5735 = vrot.lane.b32.xlu0 %v24703_v15, %s23884_s21 }
 0xbbb   :  { %v24711_v27 = vadd.f32 %v5732_v31, %v5731_v44 }
 0xbbd   :  { %6247 = vrot.lane.b32.xlu1 %v24711_v27, %s23884_s21  ;;  %5741 = vst.msk [vmem:[#allocation4 + $0x20] sm:$0xff] %vm2713_vm3, %v24711_v27  ;;  %6218 = vrot.lane.b32.xlu0 %v24733_v59, %s23879_s27 }
 0xbc1   :  { %6720 = vrot.lane.b32.xlu1 %v24738_v63, %s23879_s27 }
 0xc2b   :  { %v5736_v24 = vpop.permute.xlu0 %5735 }
 0xc2c   :  { %5739 = vst.msk [vmem:[#allocation4 + $0x18] sm:$0xff] %vm1714_vm4, %v5736_v24  ;;  %v5747_v3 = vsel %vm1714_vm4, %v5736_v24, 0 }
 0xc2d   :  { %v5816_v28 = vand.u32 4294901760, %v5747_v3 }
 0xc2f   :  { %v5817_v39 = vsub.f32 %v5747_v3, %v5816_v28  ;;  %v6248_v4 = vpop.permute.xlu1 %6247  ;;  %v6219_v61 = vpop.permute.xlu0 %6218 }
 0xc30   :  { %v6249_v14 = vsel %vm1714_vm4, %v6248_v4, 0 }
 0xc31   :  { %v5818_v18 = vand.u32 4294901760, %v5817_v39  ;;  %v6318_v41 = vand.u32 4294901760, %v6249_v14 }
 0xc33   :  { %v6319_v19 = vsub.f32 %v6249_v14, %v6318_v41  ;;  %v5819_v25 = vsub.f32 %v5817_v39, %v5818_v18  ;;  %v6721_v12 = vpop.permute.xlu1 %6720 }
 0xc35   :  { %v6320_v53 = vand.u32 4294901760, %v6319_v19  ;;  %v5820_v54 = vand.u32 4294901760, %v5819_v25 }
 0xc37   :  { %v6321_v56 = vsub.f32 %v6319_v19, %v6320_v53  ;;  %21146 = vmatmul.mubr.f32.vlgmr.msra.gmra.mrb[16].mxu0 %v5820_v54 }
 0xc38   :  { %22634 = vmatpush3.bf16.msra.mxu0 %v24713_v5  ;;  %21152 = vmatprep.mubr.msk.f32.mxu0 %vm23881_vm1, %v23882_v42 }
 0xc39   :  { %v6322_v60 = vand.u32 4294901760, %v6321_v56  ;;  %22635 = vmatprep.subr.bf16.mxu0 %v23880_v36 }
 0xc3b   :  { %21188 = vmatmul.mubr.f32.vlgmr.msra.gmra.mrb[16].mxu1 %v6322_v60 }
 0xc3c   :  { %22652 = vmatpush3.bf16.msra.mxu1 %v24722_v46  ;;  %21194 = vmatprep.mubr.msk.f32.mxu1 %vm23881_vm1, %v23882_v42 }
 0xc3d   :  { %22653 = vmatprep.subr.bf16.mxu1 %v23880_v36 }
 0xc3f   :  { %21153 = vmatmul.mubr.f32.vlgmr.msra.gmra.mrb[16].mxu0 %v5816_v28 }
 0xc40   :  { %22637 = vmatpush3.bf16.msra.mxu0 %v24720_v58  ;;  %21159 = vmatprep.mubr.msk.f32.mxu0 %vm23881_vm1, %v23882_v42 }
 0xc41   :  { %22638 = vmatprep.subr.bf16.mxu0 %v23880_v36 }
 0xc43   :  { %21195 = vmatmul.mubr.f32.vlgmr.msra.gmra.mrb[16].mxu1 %v6318_v41 }
 0xc44   :  { %22655 = vmatpush3.bf16.msra.mxu1 %v24724_v52  ;;  %21201 = vmatprep.mubr.msk.f32.mxu1 %vm23881_vm1, %v23882_v42 }
 0xc45   :  { %22656 = vmatprep.subr.bf16.mxu1 %v23880_v36 }
 0xc47   :  { %21160 = vmatmul.mubr.f32.vlgmr.msra.gmra.mrb[16].mxu0 %v5817_v39 }
 0xc48   :  { %22640 = vmatpush3.bf16.msra.mxu0 %v24698_v10  ;;  %21166 = vmatprep.mubr.msk.f32.mxu0 %vm23881_vm1, %v23882_v42 }
 0xc49   :  { %22641 = vmatprep.subr.bf16.mxu0 %v23880_v36 }
 0xc4b   :  { %21202 = vmatmul.mubr.f32.vlgmr.msra.gmra.mrb[16].mxu1 %v6319_v19 }
 0xc4c   :  { %22658 = vmatpush3.bf16.msra.mxu1 %v24706_v9  ;;  %21208 = vmatprep.mubr.msk.f32.mxu1 %vm23881_vm1, %v23882_v42 }
 0xc4d   :  { %22659 = vmatprep.subr.bf16.mxu1 %v23880_v36 }
 0xc4f   :  { %21167 = vmatmul.mubr.f32.vlgmr.msra.gmra.mrb[16].mxu0 %v5818_v18 }
 0xc50   :  { %22643 = vmatpush3.bf16.msra.mxu0 %v24726_v55  ;;  %21173 = vmatprep.mubr.msk.f32.mxu0 %vm23881_vm1, %v23882_v42 }
 0xc51   :  { %22644 = vmatprep.subr.bf16.mxu0 %v23880_v36 }
 0xc53   :  { %21209 = vmatmul.mubr.f32.vlgmr.msra.gmra.mrb[16].mxu1 %v6320_v53 }
 0xc54   :  { %22661 = vmatpush3.bf16.msra.mxu1 %v24728_v57  ;;  %21215 = vmatprep.mubr.msk.f32.mxu1 %vm23881_vm1, %v23882_v42 }
 0xc55   :  { %22662 = vmatprep.subr.bf16.mxu1 %v23880_v36 }
 0xc57   :  { %21174 = vmatmul.mubr.f32.vlgmr.msra.gmra.mrb[16].mxu0 %v5816_v28 }
 0xc58   :  { %22646 = vmatpush3.bf16.msra.mxu0 %v24698_v10  ;;  %21180 = vmatprep.mubr.msk.f32.mxu0 %vm23881_vm1, %v23882_v42 }
 0xc59   :  { %22665 = vmatprep.subr.bf16.mxu0 %v23880_v36 }
 0xc5b   :  { %21216 = vmatmul.mubr.f32.vlgmr.msra.gmra.mrb[16].mxu1 %v6318_v41 }
 0xc5c   :  { %22664 = vmatpush3.bf16.msra.mxu1 %v24706_v9  ;;  %21222 = vmatprep.mubr.msk.f32.mxu1 %vm23881_vm1, %v23882_v42 }
 0xc5d   :  { %22683 = vmatprep.subr.bf16.mxu1 %v23880_v36 }
 0xc5f   :  { %21181 = vmatmul.mubr.f32.vlgmr.msra.gmra.mrb[16].mxu0 %v5816_v28 }
 0xc60   :  { %22667 = vmatpush3.bf16.msra.mxu0 %v24698_v10  ;;  %21229 = vmatprep.mubr.msk.f32.mxu0 %vm23881_vm1, %v23882_v42 }
 0xc61   :  { %22668 = vmatprep.subr.bf16.mxu0 %v23880_v36 }
 0xc63   :  { %21223 = vmatmul.mubr.f32.vlgmr.msra.gmra.mrb[16].mxu1 %v6318_v41 }
 0xc64   :  { %22685 = vmatpush3.bf16.msra.mxu1 %v24706_v9  ;;  %21271 = vmatprep.mubr.msk.f32.mxu1 %vm23881_vm1, %v23882_v42 }
 0xc65   :  { %22686 = vmatprep.subr.bf16.mxu1 %v23880_v36 }
 0xd32   :  { %v6204_v62 = vpop.f32.mrb[16].mxu0 }
 0xd33   :  { %v6221_v0 = vadd.f32 %v6219_v61, %v6204_v62  ;;  %v21182_v1 = vpop.f32.mrb[17].mxu0  ;;  %v6208_v8 = vadd.f32 %v6204_v62, %v5743_v7 }
 0xd35   :  { %6223 = vrot.lane.b32.xlu0 %v6221_v0, %s23883_s20  ;;  %v6209_v21 = vmul.f32 0.5, %v6208_v8 }
 0xd36   :  { %v6706_v16 = vpop.f32.mrb[16].mxu1 }
 0xd37   :  { %v6723_v13 = vadd.f32 %v6721_v12, %v6706_v16  ;;  %v21224_v17 = vpop.f32.mrb[17].mxu1  ;;  %v6710_v2 = vadd.f32 %v6706_v16, %v6242_v11  ;;  %23711 = vtanh.f32 %v6209_v21 }
 0xd39   :  { %6725 = vrot.lane.b32.xlu1 %v6723_v13, %s23883_s20  ;;  %v6711_v43 = vmul.f32 0.5, %v6710_v2  ;;  %v7249_v2 = vld [vmem:[#allocation3 + $0x10] sm:$0xff] }
 0xd3b   :  { %23713 = vtanh.f32 %v6711_v43 }
 0xd41   :  { %v23712_v45 = vpop.eup %23711 }
 0xd42   :  { %v6211_v48 = vmul.f32 0.5, %v23712_v45 }
 0xd44   :  { %v6212_v26 = vadd.f32 0.5, %v6211_v48 }
 0xd45   :  { %v23714_v20 = vpop.eup %23713 }
 0xd46   :  { %v6713_v32 = vmul.f32 0.5, %v23714_v20  ;;  %v6233_v49 = vsub.f32 1.0, %v6212_v26  ;;  %v6239_v34 = vmul.f32 %v6212_v26, %v24703_v15 }
 0xd48   :  { %v6714_v22 = vadd.f32 0.5, %v6713_v32 }
 0xd4a   :  { %v6735_v33 = vsub.f32 1.0, %v6714_v22  ;;  %v6741_v3 = vmul.f32 %v6714_v22, %v24711_v27 }
 0xda7   :  { %v6224_v29 = vpop.permute.xlu0 %6223 }
 0xda8   :  { %v6226_v30 = vmul.f32 %v6224_v29, %v6212_v26 }
 0xdaa   :  { %6228 = vrot.lane.b32.xlu0 %v6226_v30, %s23879_s27 }
 0xdab   :  { %v6726_v37 = vpop.permute.xlu1 %6725 }
 0xdac   :  { %v6728_v38 = vmul.f32 %v6726_v37, %v6714_v22 }
 0xdae   :  { %6730 = vrot.lane.b32.xlu1 %v6728_v38, %s23879_s27 }
 0xe1c   :  { %v6229_v31 = vpop.permute.xlu0 %6228 }
 0xe1d   :  { %v6231_v23 = vadd.f32 %v6229_v31, %v5743_v7 }
 0xe1f   :  { %23715 = vtanh.f32 %v6231_v23 }
 0xe20   :  { %v6731_v40 = vpop.permute.xlu1 %6730 }
 0xe21   :  { %v6733_v44 = vadd.f32 %v6731_v40, %v6242_v11  ;;  %v6750_v11 = vld [vmem:[#allocation2 + $0x28] sm:$0xff] }
 0xe23   :  { %23717 = vtanh.f32 %v6733_v44 }
 0xe29   :  { %v23716_v47 = vpop.eup %23715 }
 0xe2a   :  { %6235 = vrot.lane.b32.xlu0 %v23716_v47, %s23884_s21 }
 0xe2d   :  { %v23718_v35 = vpop.eup %23717 }
 0xe2e   :  { %6737 = vrot.lane.b32.xlu1 %v23718_v35, %s23884_s21 }
 0xe9c   :  { %v6236_v50 = vpop.permute.xlu0 %6235 }
 0xe9d   :  { %v6238_v51 = vmul.f32 %v6236_v50, %v6233_v49 }
 0xe9f   :  { %v24802_v6 = vadd.f32 %v6239_v34, %v6238_v51 }
 0xea0   :  { %v6738_v24 = vpop.permute.xlu1 %6737 }
 0xea1   :  { %v6740_v28 = vmul.f32 %v6738_v24, %v6735_v33  ;;  %6744 = vrot.lane.b32.xlu0 %v24802_v6, %s23884_s21 }
 0xea3   :  { %v24807_v39 = vadd.f32 %v6741_v3, %v6740_v28 }
 0xea5   :  { %6748 = vst.msk [vmem:[#allocation4 + $0x18] sm:$0xff] %vm2713_vm3, %v24807_v39  ;;  %7254 = vrot.lane.b32.xlu1 %v24807_v39, %s23884_s21  ;;  %7225 = vrot.lane.b32.xlu0 %v24733_v59, %s23879_s27 }
 0xea9   :  { %7727 = vrot.lane.b32.xlu1 %v24738_v63, %s23879_s27 }
 0xf13   :  { %v6745_v15 = vpop.permute.xlu0 %6744 }
 0xf14   :  { %6747 = vst.msk [vmem:[#allocation4 + $0x20] sm:$0xff] %vm1714_vm4, %v6745_v15  ;;  %v6754_v27 = vsel %vm1714_vm4, %v6745_v15, 0 }
 0xf15   :  { %v6823_v4 = vand.u32 4294901760, %v6754_v27 }
 0xf17   :  { %v6824_v14 = vsub.f32 %v6754_v27, %v6823_v4  ;;  %v7255_v18 = vpop.permute.xlu1 %7254  ;;  %v7226_v0 = vpop.permute.xlu0 %7225 }
 0xf18   :  { %v7256_v41 = vsel %vm1714_vm4, %v7255_v18, 0 }
 0xf19   :  { %v6825_v19 = vand.u32 4294901760, %v6824_v14  ;;  %v7325_v25 = vand.u32 4294901760, %v7256_v41 }
 0xf1b   :  { %v7326_v53 = vsub.f32 %v7256_v41, %v7325_v25  ;;  %v6826_v54 = vsub.f32 %v6824_v14, %v6825_v19  ;;  %v7728_v13 = vpop.permute.xlu1 %7727 }
 0xf1d   :  { %v7327_v56 = vand.u32 4294901760, %v7326_v53  ;;  %v6827_v60 = vand.u32 4294901760, %v6826_v54 }
 0xf1f   :  { %v7328_v61 = vsub.f32 %v7326_v53, %v7327_v56  ;;  %21230 = vmatmul.mubr.f32.vlgmr.msra.gmra.mrb[18].mxu0 %v6827_v60 }
 0xf20   :  { %22670 = vmatpush3.bf16.msra.mxu0 %v24713_v5  ;;  %21236 = vmatprep.mubr.msk.f32.mxu0 %vm23881_vm1, %v23882_v42 }
 0xf21   :  { %v7329_v62 = vand.u32 4294901760, %v7328_v61  ;;  %22671 = vmatprep.subr.bf16.mxu0 %v23880_v36 }
 0xf23   :  { %21272 = vmatmul.mubr.f32.vlgmr.msra.gmra.mrb[18].mxu1 %v7329_v62 }
 0xf24   :  { %22688 = vmatpush3.bf16.msra.mxu1 %v24722_v46  ;;  %21278 = vmatprep.mubr.msk.f32.mxu1 %vm23881_vm1, %v23882_v42 }
 0xf25   :  { %22689 = vmatprep.subr.bf16.mxu1 %v23880_v36 }
 0xf27   :  { %21237 = vmatmul.mubr.f32.vlgmr.msra.gmra.mrb[18].mxu0 %v6823_v4 }
 0xf28   :  { %22673 = vmatpush3.bf16.msra.mxu0 %v24720_v58  ;;  %21243 = vmatprep.mubr.msk.f32.mxu0 %vm23881_vm1, %v23882_v42 }
 0xf29   :  { %22674 = vmatprep.subr.bf16.mxu0 %v23880_v36 }
 0xf2b   :  { %21279 = vmatmul.mubr.f32.vlgmr.msra.gmra.mrb[18].mxu1 %v7325_v25 }
 0xf2c   :  { %22691 = vmatpush3.bf16.msra.mxu1 %v24724_v52  ;;  %21285 = vmatprep.mubr.msk.f32.mxu1 %vm23881_vm1, %v23882_v42 }
 0xf2d   :  { %22692 = vmatprep.subr.bf16.mxu1 %v23880_v36 }
 0xf2f   :  { %21244 = vmatmul.mubr.f32.vlgmr.msra.gmra.mrb[18].mxu0 %v6824_v14 }
 0xf30   :  { %22676 = vmatpush3.bf16.msra.mxu0 %v24698_v10  ;;  %21250 = vmatprep.mubr.msk.f32.mxu0 %vm23881_vm1, %v23882_v42 }
 0xf31   :  { %22677 = vmatprep.subr.bf16.mxu0 %v23880_v36 }
 0xf33   :  { %21286 = vmatmul.mubr.f32.vlgmr.msra.gmra.mrb[18].mxu1 %v7326_v53 }
 0xf34   :  { %22694 = vmatpush3.bf16.msra.mxu1 %v24706_v9  ;;  %21292 = vmatprep.mubr.msk.f32.mxu1 %vm23881_vm1, %v23882_v42 }
 0xf35   :  { %22695 = vmatprep.subr.bf16.mxu1 %v23880_v36 }
 0xf37   :  { %21251 = vmatmul.mubr.f32.vlgmr.msra.gmra.mrb[18].mxu0 %v6825_v19 }
 0xf38   :  { %22679 = vmatpush3.bf16.msra.mxu0 %v24726_v55  ;;  %21257 = vmatprep.mubr.msk.f32.mxu0 %vm23881_vm1, %v23882_v42 }
 0xf39   :  { %22680 = vmatprep.subr.bf16.mxu0 %v23880_v36 }
 0xf3b   :  { %21293 = vmatmul.mubr.f32.vlgmr.msra.gmra.mrb[18].mxu1 %v7327_v56 }
 0xf3c   :  { %22697 = vmatpush3.bf16.msra.mxu1 %v24728_v57  ;;  %21299 = vmatprep.mubr.msk.f32.mxu1 %vm23881_vm1, %v23882_v42 }
 0xf3d   :  { %22698 = vmatprep.subr.bf16.mxu1 %v23880_v36 }
 0xf3f   :  { %21258 = vmatmul.mubr.f32.vlgmr.msra.gmra.mrb[18].mxu0 %v6823_v4 }
 0xf40   :  { %22682 = vmatpush3.bf16.msra.mxu0 %v24698_v10  ;;  %21264 = vmatprep.mubr.msk.f32.mxu0 %vm23881_vm1, %v23882_v42 }
 0xf41   :  { %22701 = vmatprep.subr.bf16.mxu0 %v23880_v36 }
 0xf43   :  { %21300 = vmatmul.mubr.f32.vlgmr.msra.gmra.mrb[18].mxu1 %v7325_v25 }
 0xf44   :  { %22700 = vmatpush3.bf16.msra.mxu1 %v24706_v9  ;;  %21306 = vmatprep.mubr.msk.f32.mxu1 %vm23881_vm1, %v23882_v42 }
 0xf45   :  { %22719 = vmatprep.subr.bf16.mxu1 %v23880_v36 }
 0xf47   :  { %21265 = vmatmul.mubr.f32.vlgmr.msra.gmra.mrb[18].mxu0 %v6823_v4 }
 0xf48   :  { %22703 = vmatpush3.bf16.msra.mxu0 %v24698_v10  ;;  %21313 = vmatprep.mubr.msk.f32.mxu0 %vm23881_vm1, %v23882_v42 }
 0xf49   :  { %22704 = vmatprep.subr.bf16.mxu0 %v23880_v36 }
 0xf4b   :  { %21307 = vmatmul.mubr.f32.vlgmr.msra.gmra.mrb[18].mxu1 %v7325_v25 }
 0xf4c   :  { %22721 = vmatpush3.bf16.msra.mxu1 %v24706_v9  ;;  %21355 = vmatprep.mubr.msk.f32.mxu1 %vm23881_vm1, %v23882_v42 }
 0xf4d   :  { %22722 = vmatprep.subr.bf16.mxu1 %v23880_v36 }
0x101a   :  { %v7211_v1 = vpop.f32.mrb[18].mxu0 }
0x101b   :  { %v7228_v12 = vadd.f32 %v7226_v0, %v7211_v1  ;;  %v21266_v16 = vpop.f32.mrb[19].mxu0  ;;  %v7215_v21 = vadd.f32 %v7211_v1, %v6750_v11 }
0x101d   :  { %7230 = vrot.lane.b32.xlu0 %v7228_v12, %s23883_s20  ;;  %v7216_v43 = vmul.f32 0.5, %v7215_v21 }
0x101e   :  { %v7713_v17 = vpop.f32.mrb[18].mxu1 }
0x101f   :  { %v7730_v7 = vadd.f32 %v7728_v13, %v7713_v17  ;;  %v21308_v8 = vpop.f32.mrb[19].mxu1  ;;  %v7717_v45 = vadd.f32 %v7713_v17, %v7249_v2  ;;  %23719 = vtanh.f32 %v7216_v43 }
0x1021   :  { %7732 = vrot.lane.b32.xlu1 %v7730_v7, %s23883_s20  ;;  %v7718_v48 = vmul.f32 0.5, %v7717_v45  ;;  %v8256_v45 = vld [vmem:[#allocation3 + $0x8] sm:$0xff] }
0x1023   :  { %23721 = vtanh.f32 %v7718_v48 }
0x1029   :  { %v23720_v20 = vpop.eup %23719 }
0x102a   :  { %v7218_v26 = vmul.f32 0.5, %v23720_v20 }
0x102c   :  { %v7219_v29 = vadd.f32 0.5, %v7218_v26 }
0x102d   :  { %v23722_v32 = vpop.eup %23721 }
0x102e   :  { %v7720_v30 = vmul.f32 0.5, %v23722_v32  ;;  %v7240_v34 = vsub.f32 1.0, %v7219_v29  ;;  %v7246_v33 = vmul.f32 %v7219_v29, %v24802_v6 }
0x1030   :  { %v7721_v38 = vadd.f32 0.5, %v7720_v30 }
0x1032   :  { %v7742_v28 = vsub.f32 1.0, %v7721_v38  ;;  %v7748_v27 = vmul.f32 %v7721_v38, %v24807_v39 }
0x108f   :  { %v7231_v22 = vpop.permute.xlu0 %7230 }
0x1090   :  { %v7233_v37 = vmul.f32 %v7231_v22, %v7219_v29 }
0x1092   :  { %7235 = vrot.lane.b32.xlu0 %v7233_v37, %s23879_s27 }
0x1093   :  { %v7733_v31 = vpop.permute.xlu1 %7732 }
0x1094   :  { %v7735_v23 = vmul.f32 %v7733_v31, %v7721_v38 }
0x1096   :  { %7737 = vrot.lane.b32.xlu1 %v7735_v23, %s23879_s27 }
0x1104   :  { %v7236_v40 = vpop.permute.xlu0 %7235 }
0x1105   :  { %v7238_v44 = vadd.f32 %v7236_v40, %v6750_v11 }
0x1107   :  { %23723 = vtanh.f32 %v7238_v44 }
0x1108   :  { %v7738_v47 = vpop.permute.xlu1 %7737 }
0x1109   :  { %v7740_v35 = vadd.f32 %v7738_v47, %v7249_v2  ;;  %v7757_v2 = vld [vmem:[#allocation2 + $0x30] sm:$0xff] }
0x110b   :  { %23725 = vtanh.f32 %v7740_v35 }
0x1111   :  { %v23724_v49 = vpop.eup %23723 }
0x1112   :  { %7242 = vrot.lane.b32.xlu0 %v23724_v49, %s23884_s21 }
0x1115   :  { %v23726_v50 = vpop.eup %23725 }
0x1116   :  { %7744 = vrot.lane.b32.xlu1 %v23726_v50, %s23884_s21 }
0x1184   :  { %v7243_v51 = vpop.permute.xlu0 %7242 }
0x1185   :  { %v7245_v24 = vmul.f32 %v7243_v51, %v7240_v34 }
0x1187   :  { %v24875_v3 = vadd.f32 %v7246_v33, %v7245_v24 }
0x1188   :  { %v7745_v15 = vpop.permute.xlu1 %7744 }
0x1189   :  { %v7747_v4 = vmul.f32 %v7745_v15, %v7742_v28  ;;  %7751 = vrot.lane.b32.xlu0 %v24875_v3, %s23884_s21 }
0x118b   :  { %v24880_v14 = vadd.f32 %v7748_v27, %v7747_v4 }
0x118d   :  { %7755 = vst.msk [vmem:[#allocation4 + $0x10] sm:$0xff] %vm2713_vm3, %v24880_v14  ;;  %8261 = vrot.lane.b32.xlu1 %v24880_v14, %s23884_s21  ;;  %8232 = vrot.lane.b32.xlu0 %v24733_v59, %s23879_s27 }
0x1191   :  { %8734 = vrot.lane.b32.xlu1 %v24738_v63, %s23879_s27 }
0x11fb   :  { %v7752_v6 = vpop.permute.xlu0 %7751 }
0x11fc   :  { %7754 = vst.msk [vmem:[#allocation4 + $0x28] sm:$0xff] %vm1714_vm4, %v7752_v6  ;;  %v7761_v39 = vsel %vm1714_vm4, %v7752_v6, 0 }
0x11fd   :  { %v7830_v18 = vand.u32 4294901760, %v7761_v39 }
0x11ff   :  { %v7831_v41 = vsub.f32 %v7761_v39, %v7830_v18  ;;  %v8262_v19 = vpop.permute.xlu1 %8261  ;;  %v8233_v12 = vpop.permute.xlu0 %8232 }
0x1200   :  { %v8263_v25 = vsel %vm1714_vm4, %v8262_v19, 0 }
0x1201   :  { %v7832_v53 = vand.u32 4294901760, %v7831_v41  ;;  %v8332_v54 = vand.u32 4294901760, %v8263_v25 }
0x1203   :  { %v8333_v56 = vsub.f32 %v8263_v25, %v8332_v54  ;;  %v7833_v60 = vsub.f32 %v7831_v41, %v7832_v53  ;;  %v8735_v7 = vpop.permute.xlu1 %8734 }
0x1205   :  { %v8334_v61 = vand.u32 4294901760, %v8333_v56  ;;  %v7834_v62 = vand.u32 4294901760, %v7833_v60 }
0x1207   :  { %v8335_v0 = vsub.f32 %v8333_v56, %v8334_v61  ;;  %21314 = vmatmul.mubr.f32.vlgmr.msra.gmra.mrb[20].mxu0 %v7834_v62 }
0x1208   :  { %22706 = vmatpush3.bf16.msra.mxu0 %v24713_v5  ;;  %21320 = vmatprep.mubr.msk.f32.mxu0 %vm23881_vm1, %v23882_v42 }
0x1209   :  { %v8336_v1 = vand.u32 4294901760, %v8335_v0  ;;  %22707 = vmatprep.subr.bf16.mxu0 %v23880_v36 }
0x120b   :  { %21356 = vmatmul.mubr.f32.vlgmr.msra.gmra.mrb[20].mxu1 %v8336_v1 }
0x120c   :  { %22724 = vmatpush3.bf16.msra.mxu1 %v24722_v46  ;;  %21362 = vmatprep.mubr.msk.f32.mxu1 %vm23881_vm1, %v23882_v42 }
0x120d   :  { %22725 = vmatprep.subr.bf16.mxu1 %v23880_v36 }
0x120f   :  { %21321 = vmatmul.mubr.f32.vlgmr.msra.gmra.mrb[20].mxu0 %v7830_v18 }
0x1210   :  { %22709 = vmatpush3.bf16.msra.mxu0 %v24720_v58  ;;  %21327 = vmatprep.mubr.msk.f32.mxu0 %vm23881_vm1, %v23882_v42 }
0x1211   :  { %22710 = vmatprep.subr.bf16.mxu0 %v23880_v36 }
0x1213   :  { %21363 = vmatmul.mubr.f32.vlgmr.msra.gmra.mrb[20].mxu1 %v8332_v54 }
0x1214   :  { %22727 = vmatpush3.bf16.msra.mxu1 %v24724_v52  ;;  %21369 = vmatprep.mubr.msk.f32.mxu1 %vm23881_vm1, %v23882_v42 }
0x1215   :  { %22728 = vmatprep.subr.bf16.mxu1 %v23880_v36 }
0x1217   :  { %21328 = vmatmul.mubr.f32.vlgmr.msra.gmra.mrb[20].mxu0 %v7831_v41 }
0x1218   :  { %22712 = vmatpush3.bf16.msra.mxu0 %v24698_v10  ;;  %21334 = vmatprep.mubr.msk.f32.mxu0 %vm23881_vm1, %v23882_v42 }
0x1219   :  { %22713 = vmatprep.subr.bf16.mxu0 %v23880_v36 }
0x121b   :  { %21370 = vmatmul.mubr.f32.vlgmr.msra.gmra.mrb[20].mxu1 %v8333_v56 }
0x121c   :  { %22730 = vmatpush3.bf16.msra.mxu1 %v24706_v9  ;;  %21376 = vmatprep.mubr.msk.f32.mxu1 %vm23881_vm1, %v23882_v42 }
0x121d   :  { %22731 = vmatprep.subr.bf16.mxu1 %v23880_v36 }
0x121f   :  { %21335 = vmatmul.mubr.f32.vlgmr.msra.gmra.mrb[20].mxu0 %v7832_v53 }
0x1220   :  { %22715 = vmatpush3.bf16.msra.mxu0 %v24726_v55  ;;  %21341 = vmatprep.mubr.msk.f32.mxu0 %vm23881_vm1, %v23882_v42 }
0x1221   :  { %22716 = vmatprep.subr.bf16.mxu0 %v23880_v36 }
0x1223   :  { %21377 = vmatmul.mubr.f32.vlgmr.msra.gmra.mrb[20].mxu1 %v8334_v61 }
0x1224   :  { %22733 = vmatpush3.bf16.msra.mxu1 %v24728_v57  ;;  %21383 = vmatprep.mubr.msk.f32.mxu1 %vm23881_vm1, %v23882_v42 }
0x1225   :  { %22734 = vmatprep.subr.bf16.mxu1 %v23880_v36 }
0x1227   :  { %21342 = vmatmul.mubr.f32.vlgmr.msra.gmra.mrb[20].mxu0 %v7830_v18 }
0x1228   :  { %22718 = vmatpush3.bf16.msra.mxu0 %v24698_v10  ;;  %21348 = vmatprep.mubr.msk.f32.mxu0 %vm23881_vm1, %v23882_v42 }
0x1229   :  { %22737 = vmatprep.subr.bf16.mxu0 %v23880_v36 }
0x122b   :  { %21384 = vmatmul.mubr.f32.vlgmr.msra.gmra.mrb[20].mxu1 %v8332_v54 }
0x122c   :  { %22736 = vmatpush3.bf16.msra.mxu1 %v24706_v9  ;;  %21390 = vmatprep.mubr.msk.f32.mxu1 %vm23881_vm1, %v23882_v42 }
0x122d   :  { %22755 = vmatprep.subr.bf16.mxu1 %v23880_v36 }
0x122f   :  { %21349 = vmatmul.mubr.f32.vlgmr.msra.gmra.mrb[20].mxu0 %v7830_v18 }
0x1230   :  { %22739 = vmatpush3.bf16.msra.mxu0 %v24698_v10  ;;  %21397 = vmatprep.mubr.msk.f32.mxu0 %vm23881_vm1, %v23882_v42 }
0x1231   :  { %22740 = vmatprep.subr.bf16.mxu0 %v23880_v36 }
0x1233   :  { %21391 = vmatmul.mubr.f32.vlgmr.msra.gmra.mrb[20].mxu1 %v8332_v54 }
0x1234   :  { %22757 = vmatpush3.bf16.msra.mxu1 %v24706_v9  ;;  %21439 = vmatprep.mubr.msk.f32.mxu1 %vm23881_vm1, %v23882_v42 }
0x1235   :  { %22758 = vmatprep.subr.bf16.mxu1 %v23880_v36 }
0x1302   :  { %v8218_v16 = vpop.f32.mrb[20].mxu0 }
0x1303   :  { %v8235_v13 = vadd.f32 %v8233_v12, %v8218_v16  ;;  %v21350_v17 = vpop.f32.mrb[21].mxu0  ;;  %v8222_v43 = vadd.f32 %v8218_v16, %v7757_v2  ;;  %v8764_v16 = vld [vmem:[#allocation2 + $0x38] sm:$0xff] }
0x1305   :  { %8237 = vrot.lane.b32.xlu0 %v8235_v13, %s23883_s20  ;;  %v8223_v48 = vmul.f32 0.5, %v8222_v43 }
0x1306   :  { %v8720_v8 = vpop.f32.mrb[20].mxu1 }
0x1307   :  { %v8737_v11 = vadd.f32 %v8735_v7, %v8720_v8  ;;  %v21392_v21 = vpop.f32.mrb[21].mxu1  ;;  %v8724_v20 = vadd.f32 %v8720_v8, %v8256_v45  ;;  %23727 = vtanh.f32 %v8223_v48 }
0x1309   :  { %8739 = vrot.lane.b32.xlu1 %v8737_v11, %s23883_s20  ;;  %v8725_v26 = vmul.f32 0.5, %v8724_v20 }
0x130b   :  { %23729 = vtanh.f32 %v8725_v26 }
0x1311   :  { %v23728_v32 = vpop.eup %23727 }
0x1312   :  { %v8225_v29 = vmul.f32 0.5, %v23728_v32 }
0x1314   :  { %v8226_v22 = vadd.f32 0.5, %v8225_v29 }
0x1315   :  { %v23730_v30 = vpop.eup %23729 }
0x1316   :  { %v8727_v37 = vmul.f32 0.5, %v23730_v30  ;;  %v8247_v33 = vsub.f32 1.0, %v8226_v22  ;;  %v8253_v28 = vmul.f32 %v8226_v22, %v24875_v3 }
0x1318   :  { %v8728_v23 = vadd.f32 0.5, %v8727_v37 }
0x131a   :  { %v8749_v4 = vsub.f32 1.0, %v8728_v23  ;;  %v8755_v39 = vmul.f32 %v8728_v23, %v24880_v14 }
0x1377   :  { %v8238_v38 = vpop.permute.xlu0 %8237 }
0x1378   :  { %v8240_v31 = vmul.f32 %v8238_v38, %v8226_v22 }
0x137a   :  { %8242 = vrot.lane.b32.xlu0 %v8240_v31, %s23879_s27  ;;  %v19643_v31 = vld [vmem:[%s26191_s1 + $0x20] sm:$0xff] }
0x137b   :  { %v8740_v40 = vpop.permute.xlu1 %8739 }
0x137c   :  { %v8742_v44 = vmul.f32 %v8740_v40, %v8728_v23  ;;  %v19644_v23 = vld [vmem:[%s26191_s1 + $0x28] sm:$0xff]  ;;  %v10609_v40 = vld [vmem:[#allocation5 + $0x20] sm:$0xff] }
0x137e   :  { %8744 = vrot.lane.b32.xlu1 %v8742_v44, %s23879_s27  ;;  %v9815_v44 = vand.u32 4294901760, %v19643_v31 }
0x13ec   :  { %v8243_v47 = vpop.permute.xlu0 %8242 }
0x13ed   :  { %v8245_v35 = vadd.f32 %v8243_v47, %v7757_v2  ;;  %v9818_v47 = vand.u32 4294901760, %v19644_v23 }
0x13ef   :  { %23731 = vtanh.f32 %v8245_v35  ;;  %v10610_v35 = vld [vmem:[#allocation5 + $0x28] sm:$0xff] }
0x13f0   :  { %v8745_v49 = vpop.permute.xlu1 %8744 }
0x13f1   :  { %v8747_v50 = vadd.f32 %v8745_v49, %v8256_v45  ;;  %v10622_v49 = vand.u32 4294901760, %v10609_v40 }
0x13f3   :  { %23733 = vtanh.f32 %v8747_v50  ;;  %v25023_v50 = vld [vmem:[%s26191_s1 + $0x30] sm:$0xff] }
0x13f9   :  { %v23732_v34 = vpop.eup %23731 }
0x13fa   :  { %8249 = vrot.lane.b32.xlu0 %v23732_v34, %s23884_s21  ;;  %v25028_v34 = vld [vmem:[%s26191_s1 + $0x38] sm:$0xff] }
0x13fd   :  { %v23734_v51 = vpop.eup %23733 }
0x13fe   :  { %8751 = vrot.lane.b32.xlu1 %v23734_v51, %s23884_s21  ;;  %v10625_v51 = vand.u32 4294901760, %v10610_v35 }
0x146c   :  { %v8250_v24 = vpop.permute.xlu0 %8249 }
0x146d   :  { %v8252_v15 = vmul.f32 %v8250_v24, %v8247_v33  ;;  %v9821_v33 = vand.u32 4294901760, %v25023_v50  ;;  %v9824_v24 = vand.u32 4294901760, %v25028_v34 }
0x146f   :  { %v24948_v27 = vadd.f32 %v8253_v28, %v8252_v15  ;;  %v25032_v28 = vld [vmem:[#allocation5 + $0x30] sm:$0xff]  ;;  %v25034_v15 = vld [vmem:[#allocation5 + $0x38] sm:$0xff] }
0x1470   :  { %v8752_v6 = vpop.permute.xlu1 %8751 }
0x1471   :  { %v8754_v18 = vmul.f32 %v8752_v6, %v8749_v4  ;;  %8758 = vrot.lane.b32.xlu0 %v24948_v27, %s23884_s21  ;;  %v25036_v4 = vpack.c.bf16 %v9818_v47, %v9815_v44  ;;  %v10628_v6 = vand.u32 4294901760, %v25032_v28 }
0x1473   :  { %v24953_v41 = vadd.f32 %v8755_v39, %v8754_v18  ;;  %v10631_v39 = vand.u32 4294901760, %v25034_v15 }
0x1475   :  { %8762 = vst.msk [vmem:[#allocation4 + $0x8] sm:$0xff] %vm2713_vm3, %v24953_v41  ;;  %9267 = vrot.lane.b32.xlu1 %v24953_v41, %s23884_s21  ;;  %9239 = vrot.lane.b32.xlu0 %v24733_v59, %s23879_s27 }
0x1479   :  { %9740 = vrot.lane.b32.xlu1 %v24738_v63, %s23879_s27 }
0x14e3   :  { %v8759_v3 = vpop.permute.xlu0 %8758 }
0x14e4   :  { %8761 = vst.msk [vmem:[#allocation4 + $0x30] sm:$0xff] %vm1714_vm4, %v8759_v3  ;;  %v8768_v14 = vsel %vm1714_vm4, %v8759_v3, 0  ;;  %v25040_v3 = vpack.c.bf16 %v10625_v51, %v10622_v49 }
0x14e5   :  { %v8837_v19 = vand.u32 4294901760, %v8768_v14 }
0x14e7   :  { %v8838_v25 = vsub.f32 %v8768_v14, %v8837_v19  ;;  %v9268_v53 = vpop.permute.xlu1 %9267  ;;  %v25046_v14 = vpack.c.bf16 %v9824_v24, %v9821_v33 }
0x14e8   :  { %v9269_v54 = vsel %vm1714_vm4, %v9268_v53, 0  ;;  %v25060_v53 = vsub.f32 %v19643_v31, %v9815_v44  ;;  %v25114_v31 = vsub.f32 %v25028_v34, %v9824_v24 }
0x14e9   :  { %v8839_v56 = vand.u32 4294901760, %v8838_v25  ;;  %v9338_v60 = vand.u32 4294901760, %v9269_v54 }
0x14eb   :  { %v9339_v61 = vsub.f32 %v9269_v54, %v9338_v60  ;;  %v8840_v62 = vsub.f32 %v8838_v25, %v8839_v56  ;;  %v25062_v54 = vsub.f32 %v19644_v23, %v9818_v47  ;;  %v25117_v23 = vsub.f32 %v25032_v28, %v10628_v6  ;;  %v9775_v47 = vld [vmem:[#allocation4 + $0x30] sm:$0xff] }
0x14ec   :  { %v9809_v24 = vsel %vm85_vm0, %v9775_v47, 0  ;;  %v9987_v28 = vand.u32 4294901760, %v25114_v31 }
0x14ed   :  { %v9340_v0 = vand.u32 4294901760, %v9339_v61  ;;  %v8841_v1 = vand.u32 4294901760, %v8840_v62  ;;  %v9973_v62 = vand.u32 4294901760, %v25062_v54 }
0x14ef   :  { %v9341_v59 = vsub.f32 %v9339_v61, %v9340_v0  ;;  %21398 = vmatmul.mubr.f32.vlgmr.msra.gmra.mrb[22].mxu0 %v8841_v1 }
0x14f0   :  { %22742 = vmatpush3.bf16.msra.mxu0 %v24713_v5  ;;  %21404 = vmatprep.mubr.msk.f32.mxu0 %vm23881_vm1, %v23882_v42  ;;  %v9240_v5 = vpop.permute.xlu0 %9239 }
0x14f1   :  { %v9342_v63 = vand.u32 4294901760, %v9341_v59  ;;  %22743 = vmatprep.subr.bf16.mxu0 %v23880_v36 }
0x14f3   :  { %21440 = vmatmul.mubr.f32.vlgmr.msra.gmra.mrb[22].mxu1 %v9342_v63  ;;  %v9974_v63 = vsub.f32 %v25062_v54, %v9973_v62 }
0x14f4   :  { %22760 = vmatpush3.bf16.msra.mxu1 %v24722_v46  ;;  %21446 = vmatprep.mubr.msk.f32.mxu1 %vm23881_vm1, %v23882_v42 }
0x14f5   :  { %22761 = vmatprep.subr.bf16.mxu1 %v23880_v36 }
0x14f7   :  { %21405 = vmatmul.mubr.f32.vlgmr.msra.gmra.mrb[22].mxu0 %v8837_v19 }
0x14f8   :  { %22745 = vmatpush3.bf16.msra.mxu0 %v24720_v58  ;;  %21411 = vmatprep.mubr.msk.f32.mxu0 %vm23881_vm1, %v23882_v42 }
0x14f9   :  { %22746 = vmatprep.subr.bf16.mxu0 %v23880_v36 }
0x14fb   :  { %21447 = vmatmul.mubr.f32.vlgmr.msra.gmra.mrb[22].mxu1 %v9338_v60 }
0x14fc   :  { %22763 = vmatpush3.bf16.msra.mxu1 %v24724_v52  ;;  %21453 = vmatprep.mubr.msk.f32.mxu1 %vm23881_vm1, %v23882_v42 }
0x14fd   :  { %22764 = vmatprep.subr.bf16.mxu1 %v23880_v36 }
0x14ff   :  { %21412 = vmatmul.mubr.f32.vlgmr.msra.gmra.mrb[22].mxu0 %v8838_v25 }
0x1500   :  { %22748 = vmatpush3.bf16.msra.mxu0 %v24698_v10  ;;  %21418 = vmatprep.mubr.msk.f32.mxu0 %vm23881_vm1, %v23882_v42 }
0x1501   :  { %22749 = vmatprep.subr.bf16.mxu0 %v23880_v36 }
0x1503   :  { %21454 = vmatmul.mubr.f32.vlgmr.msra.gmra.mrb[22].mxu1 %v9339_v61  ;;  %v9966_v61 = vand.u32 4294901760, %v25060_v53 }
0x1504   :  { %22766 = vmatpush3.bf16.msra.mxu1 %v24706_v9  ;;  %21460 = vmatprep.mubr.msk.f32.mxu1 %vm23881_vm1, %v23882_v42 }
0x1505   :  { %22767 = vmatprep.subr.bf16.mxu1 %v23880_v36  ;;  %v9967_v59 = vsub.f32 %v25060_v53, %v9966_v61 }
0x1507   :  { %21419 = vmatmul.mubr.f32.vlgmr.msra.gmra.mrb[22].mxu0 %v8839_v56  ;;  %v25064_v56 = vsub.f32 %v10609_v40, %v10622_v49  ;;  %v25120_v40 = vsub.f32 %v25034_v15, %v10631_v39  ;;  %v10787_v15 = vand.u32 4294901760, %v25117_v23 }
0x1508   :  { %22751 = vmatpush3.bf16.msra.mxu0 %v24726_v55  ;;  %21425 = vmatprep.mubr.msk.f32.mxu0 %vm23881_vm1, %v23882_v42  ;;  %v9741_v55 = vpop.permute.xlu1 %9740 }
0x1509   :  { %22752 = vmatprep.subr.bf16.mxu0 %v23880_v36 }
0x150b   :  { %21461 = vmatmul.mubr.f32.vlgmr.msra.gmra.mrb[22].mxu1 %v9340_v0  ;;  %v10773_v0 = vand.u32 4294901760, %v25064_v56 }
0x150c   :  { %22769 = vmatpush3.bf16.msra.mxu1 %v24728_v57  ;;  %21467 = vmatprep.mubr.msk.f32.mxu1 %vm23881_vm1, %v23882_v42 }
0x150d   :  { %22770 = vmatprep.subr.bf16.mxu1 %v23880_v36 }
0x150f   :  { %21426 = vmatmul.mubr.f32.vlgmr.msra.gmra.mrb[22].mxu0 %v8837_v19 }
0x1510   :  { %22754 = vmatpush3.bf16.msra.mxu0 %v24698_v10  ;;  %21432 = vmatprep.mubr.msk.f32.mxu0 %vm23881_vm1, %v23882_v42 }
0x1511   :  { %22774 = vmatprep.subr.bf16.mxu0 %v25036_v4 }
0x1513   :  { %21468 = vmatmul.mubr.f32.vlgmr.msra.gmra.mrb[22].mxu1 %v9338_v60 }
0x1514   :  { %22772 = vmatpush3.bf16.msra.mxu1 %v24706_v9  ;;  %21474 = vmatprep.mubr.msk.f32.mxu1 %vm23881_vm1, %v23882_v42  ;;  %v9262_v9 = vld [vmem:[#allocation3] sm:$0xff] }
0x1515   :  { %22822 = vmatprep.subr.bf16.mxu1 %v25040_v3 }
0x1517   :  { %21433 = vmatmul.mubr.f32.vlgmr.msra.gmra.mrb[22].mxu0 %v8837_v19  ;;  %v25050_v19 = vpack.c.bf16 %v10631_v39, %v10628_v6  ;;  %v10794_v6 = vand.u32 4294901760, %v25120_v40 }
0x1518   :  { %22776 = vmatpush3.bf16.msra.mxu0 %v25036_v4 }
0x1519   :  { %22778 = vmatprep.subr.bf16.mxu0 %v25046_v14 }
0x151b   :  { %21475 = vmatmul.mubr.f32.vlgmr.msra.gmra.mrb[22].mxu1 %v9338_v60  ;;  %v25066_v60 = vsub.f32 %v10610_v35, %v10625_v51 }
0x151c   :  { %22824 = vmatpush3.bf16.msra.mxu1 %v25040_v3  ;;  %22780 = vmatpush3.bf16.msra.mxu0 %v25046_v14 }
0x151d   :  { %22826 = vmatprep.subr.bf16.mxu1 %v25050_v19  ;;  %v10780_v1 = vand.u32 4294901760, %v25066_v60 }
0x1520   :  { %22828 = vmatpush3.bf16.msra.mxu1 %v25050_v19 }
0x15ea   :  { %v9225_v58 = vpop.f32.mrb[22].mxu0 }
0x15eb   :  { %v9242_v46 = vadd.f32 %v9240_v5, %v9225_v58  ;;  %v21434_v52 = vpop.f32.mrb[23].mxu0  ;;  %v9229_v13 = vadd.f32 %v9225_v58, %v8764_v16  ;;  %v10774_v5 = vsub.f32 %v25064_v56, %v10773_v0  ;;  %v10781_v58 = vsub.f32 %v25066_v60, %v10780_v1 }
0x15ec   :  { %v9975_v52 = vand.u32 4294901760, %v9974_v63 }
0x15ed   :  { %9244 = vrot.lane.b32.xlu0 %v9242_v46, %s23883_s20  ;;  %v9230_v17 = vmul.f32 0.5, %v9229_v13  ;;  %v9968_v46 = vand.u32 4294901760, %v9967_v59 }
0x15ee   :  { %v9726_v57 = vpop.f32.mrb[22].mxu1 }
0x15ef   :  { %v9743_v10 = vadd.f32 %v9741_v55, %v9726_v57  ;;  %v21476_v12 = vpop.f32.mrb[23].mxu1  ;;  %v9730_v7 = vadd.f32 %v9726_v57, %v9262_v9  ;;  %23735 = vtanh.f32 %v9230_v17  ;;  %v10775_v57 = vand.u32 4294901760, %v10774_v5 }
0x15f1   :  { %9745 = vrot.lane.b32.xlu1 %v9743_v10, %s23883_s20  ;;  %v9731_v8 = vmul.f32 0.5, %v9730_v7  ;;  %v10782_v10 = vand.u32 4294901760, %v10781_v58 }
0x15f3   :  { %23737 = vtanh.f32 %v9731_v8  ;;  %v25089_v17 = vpack.c.bf16 %v10782_v10, %v10775_v57  ;;  %v9988_v57 = vsub.f32 %v25114_v31, %v9987_v28  ;;  %v10788_v10 = vsub.f32 %v25117_v23, %v10787_v15 }
0x15f5   :  { %22830 = vmatprep.subr.bf16.mxu1 %v25089_v17 }
0x15f9   :  { %v23736_v11 = vpop.eup %23735 }
0x15fa   :  { %v9232_v21 = vmul.f32 0.5, %v23736_v11 }
0x15fc   :  { %v25006_v43 = vadd.f32 0.5, %v9232_v21  ;;  %v9771_v21 = vld [vmem:[#allocation4 + $0x10] sm:$0xff] }
0x15fd   :  { %v23738_v2 = vpop.eup %23737 }
0x15fe   :  { %v9733_v45 = vmul.f32 0.5, %v23738_v2  ;;  %v9254_v55 = vsub.f32 1.0, %v25006_v43  ;;  %v9260_v13 = vmul.f32 %v25006_v43, %v24948_v27 }
0x1600   :  { %v25009_v26 = vadd.f32 0.5, %v9733_v45 }
0x1602   :  { %v9755_v8 = vsub.f32 1.0, %v25009_v26  ;;  %v9761_v2 = vmul.f32 %v25009_v26, %v24953_v41 }
0x165f   :  { %v9245_v48 = vpop.permute.xlu0 %9244 }
0x1660   :  { %v9247_v20 = vmul.f32 %v9245_v48, %v25006_v43  ;;  %v9770_v48 = vld [vmem:[#allocation4 + $0x8] sm:$0xff]  ;;  %v9797_v43 = vsel %vm85_vm0, %v9771_v21, 0 }
0x1662   :  { %9249 = vrot.lane.b32.xlu0 %v9247_v20, %s23879_s27  ;;  %v9772_v20 = vld [vmem:[#allocation4 + $0x18] sm:$0xff] }
0x1663   :  { %v9746_v32 = vpop.permute.xlu1 %9745 }
0x1664   :  { %v9748_v29 = vmul.f32 %v9746_v32, %v25009_v26  ;;  %v9794_v32 = vsel %vm85_vm0, %v9770_v48, 0  ;;  %v25109_v26 = vsub.f32 %v25023_v50, %v9821_v33 }
0x1666   :  { %9750 = vrot.lane.b32.xlu1 %v9748_v29, %s23879_s27  ;;  %v9773_v29 = vld [vmem:[#allocation4 + $0x20] sm:$0xff]  ;;  %v9980_v51 = vand.u32 4294901760, %v25109_v26  ;;  %v25193_v48 = vpack.c.bf16 %v25114_v31, %v25109_v26 }
0x1667   :  { %v9803_v41 = vsel %vm85_vm0, %v9773_v29, 0  ;;  %v25261_v31 = vld [vmem:[%s26198_s8 + $0x1] ss:$0 sm:$0xff] }
0x1668   :  { %v25127_v49 = vand.u32 4294901760, %v9803_v41 }
0x166a   :  { %v25148_v63 = vsub.f32 %v9803_v41, %v25127_v49 }
0x16d4   :  { %v9250_v30 = vpop.permute.xlu0 %9249 }
0x16d5   :  { %v9252_v22 = vadd.f32 %v9250_v30, %v8764_v16  ;;  %v25085_v16 = vpack.c.bf16 %v9975_v52, %v9968_v46  ;;  %v25100_v30 = vand.u32 4294901760, %v9797_v43  ;;  %v25155_v46 = vand.u32 4294901760, %v9809_v24 }
0x16d6   :  { %v9981_v52 = vsub.f32 %v25109_v26, %v9980_v51  ;;  %v25256_v26 = vld [vmem:[%s26197_s7 + $0x1] ss:$0 sm:$0xff] }
0x16d7   :  { %23739 = vtanh.f32 %v9252_v22  ;;  %22782 = vmatprep.subr.bf16.mxu0 %v25085_v16  ;;  %v9800_v22 = vsel %vm85_vm0, %v9772_v20, 0  ;;  %v25125_v35 = vsub.f32 %v9797_v43, %v25100_v30  ;;  %v9989_v43 = vand.u32 4294901760, %v9988_v57 }
0x16d8   :  { %v9751_v37 = vpop.permute.xlu1 %9750  ;;  %v25122_v44 = vand.u32 4294901760, %v9800_v22  ;;  %v10789_v20 = vand.u32 4294901760, %v10788_v10 }
0x16d9   :  { %v9753_v38 = vadd.f32 %v9751_v37, %v9262_v9  ;;  %v25103_v37 = vand.u32 4294901760, %v9794_v32  ;;  %v25145_v59 = vand.u32 4294901760, %v25125_v35 }
0x16db   :  { %23741 = vtanh.f32 %v9753_v38  ;;  %v9774_v38 = vld [vmem:[#allocation4 + $0x28] sm:$0xff]  ;;  %v25130_v50 = vsub.f32 %v9794_v32, %v25103_v37 }
0x16dc   :  { %v9806_v34 = vsel %vm85_vm0, %v9774_v38, 0 }
0x16dd   :  { %v25150_v5 = vand.u32 4294901760, %v9806_v34  ;;  %v25153_v58 = vand.u32 4294901760, %v25130_v50 }
0x16df   :  { %v9896_v21 = vsub.f32 %v25130_v50, %v25153_v58 }
0x16e1   :  { %v23740_v18 = vpop.eup %23739  ;;  %v9897_v41 = vand.u32 4294901760, %v9896_v21  ;;  %v22789_v21 = vpack.c.bf16 %v25062_v54, %v25060_v53  ;;  %v25243_v53 = vpack.c.bf16 %v10794_v6, %v10787_v15 }
0x16e2   :  { %9256 = vrot.lane.b32.xlu0 %v23740_v18, %s23884_s21  ;;  %v25140_v18 = vsub.f32 %v9800_v22, %v25122_v44  ;;  %v25199_v22 = vpack.c.bf16 %v25120_v40, %v25117_v23 }
0x16e5   :  { %v23742_v25 = vpop.eup %23741 }
0x16e6   :  { %9757 = vrot.lane.b32.xlu1 %v23742_v25, %s23884_s21 }
0x16ea   :  { %11890 = vrot.lane.b32.xlu1 %v25256_v26, %s23879_s27 }
0x1754   :  { %v9257_v12 = vpop.permute.xlu0 %9256 }
0x1755   :  { %v9259_v9 = vmul.f32 %v9257_v12, %v9254_v55  ;;  %v10795_v12 = vsub.f32 %v25120_v40, %v10794_v6  ;;  %v19651_v40 = vld [vmem:[%s26195_s5 + $0x10] sm:$0xff] }
0x1757   :  { %v9261_v7 = vadd.f32 %v9260_v13, %v9259_v9  ;;  %v25173_v13 = vand.u32 4294901760, %v25140_v18  ;;  %v10796_v32 = vand.u32 4294901760, %v10795_v12 }
0x1758   :  { %v9758_v11 = vpop.permute.xlu1 %9757 }
0x1759   :  { %v9760_v45 = vmul.f32 %v9758_v11, %v9755_v8  ;;  %9764 = vrot.lane.b32.xlu0 %v9261_v7, %s23884_s21  ;;  %v9906_v7 = vsub.f32 %v25125_v35, %v25145_v59  ;;  %v25181_v8 = vand.u32 4294901760, %v25148_v63  ;;  %v25184_v11 = vsub.f32 %v9806_v34, %v25150_v5 }
0x175a   :  { %v9916_v38 = vsub.f32 %v25140_v18, %v25173_v13 }
0x175b   :  { %v9762_v27 = vadd.f32 %v9761_v2, %v9760_v45  ;;  %v25189_v2 = vsub.f32 %v9809_v24, %v25155_v46  ;;  %v9982_v45 = vand.u32 4294901760, %v9981_v52  ;;  %v9926_v47 = vsub.f32 %v25148_v63, %v25181_v8 }
0x175c   :  { %v25206_v34 = vand.u32 4294901760, %v25184_v11  ;;  %v22833_v52 = vpack.c.bf16 %v10796_v32, %v10789_v20  ;;  %v9917_v57 = vand.u32 4294901760, %v9916_v38  ;;  %v25237_v20 = vpack.c.bf16 %v9987_v28, %v9980_v51  ;;  %v19650_v38 = vld [vmem:[%s26194_s4 + $0x1] ss:$0 sm:$0xff] }
0x175d   :  { %9768 = vst.msk [vmem:[#allocation4] sm:$0xff] %vm2713_vm3, %v9762_v27  ;;  %v25209_v24 = vand.u32 4294901760, %v25189_v2  ;;  %v9927_v12 = vand.u32 4294901760, %v9926_v47  ;;  %12388 = vrot.lane.b32.xlu0 %v25261_v31, %s23879_s27 }
0x175e   :  { %v9936_v10 = vsub.f32 %v25184_v11, %v25206_v34 }
0x1764   :  { %v9769_v33 = vld [vmem:[#allocation4] sm:$0xff] }
0x1765   :  { %v9791_v39 = vsel %vm85_vm0, %v9769_v33, 0  ;;  %v9907_v33 = vand.u32 4294901760, %v9906_v7  ;;  %v9946_v7 = vsub.f32 %v25189_v2, %v25209_v24 }
0x1766   :  { %v25142_v25 = vand.u32 4294901760, %v9791_v39 }
0x1768   :  { %v25161_v55 = vsub.f32 %v9791_v39, %v25142_v25  ;;  %v22785_v39 = vpack.c.bf16 %v9989_v43, %v9982_v45  ;;  %v22837_v45 = vpack.c.bf16 %v25066_v60, %v25064_v56  ;;  %v25231_v43 = vpack.c.bf16 %v10780_v1, %v10773_v0 }
0x176a   :  { %v25176_v9 = vand.u32 4294901760, %v25161_v55 }
0x176c   :  { %v9886_v27 = vsub.f32 %v25161_v55, %v25176_v9 }
0x176e   :  { %v9887_v29 = vand.u32 4294901760, %v9886_v27  ;;  %v9937_v27 = vand.u32 4294901760, %v9936_v10 }
0x1770   :  { %21485 = vmatprep.mubr.f32.mxu0 %v9887_v29  ;;  %21605 = vmatprep.mubr.f32.mxu1 %v9887_v29 }
0x1771   :  { %21486 = vmatmul.mubr.f32.vlgmr.msra.gmra.mrb[24].mxu0 %v9897_v41  ;;  %21606 = vmatmul.mubr.f32.vlgmr.msra.gmra.mrb[24].mxu1 %v9897_v41  ;;  %v19648_v41 = vld [vmem:[%s26193_s3 + $0x1] ss:$0 sm:$0xff] }
0x1772   :  { %21488 = vmatprep.mubr.f32.mxu0 %v9907_v33  ;;  %21608 = vmatprep.mubr.f32.mxu1 %v9907_v33 }
0x1773   :  { %22784 = vmatpush3.bf16.msra.mxu0 %v25085_v16  ;;  %22832 = vmatpush3.bf16.msra.mxu1 %v25089_v17  ;;  %v9947_v16 = vand.u32 4294901760, %v9946_v7  ;;  %v25225_v17 = vpack.c.bf16 %v9973_v62, %v9966_v61 }
0x1774   :  { %22786 = vmatprep.subr.bf16.mxu0 %v22785_v39  ;;  %22834 = vmatprep.subr.bf16.mxu1 %v22833_v52 }
0x1775   :  { %21489 = vmatmul.mubr.f32.gmra.mrb[26].mxu0 %v9917_v57  ;;  %21609 = vmatmul.mubr.f32.gmra.mrb[26].mxu1 %v9917_v57 }
0x1776   :  { %21491 = vmatprep.mubr.f32.mxu0 %v9927_v12  ;;  %21611 = vmatprep.mubr.f32.mxu1 %v9927_v12 }
0x1777   :  { %22788 = vmatpush3.bf16.msra.mxu0 %v22785_v39  ;;  %22836 = vmatpush3.bf16.msra.mxu1 %v22833_v52 }
0x1778   :  { %22790 = vmatprep.subr.bf16.mxu0 %v22789_v21  ;;  %22838 = vmatprep.subr.bf16.mxu1 %v22837_v45 }
0x1779   :  { %21492 = vmatmul.mubr.f32.gmra.mrb[28].mxu0 %v9937_v27  ;;  %21612 = vmatmul.mubr.f32.gmra.mrb[28].mxu1 %v9937_v27 }
0x177a   :  { %21494 = vmatprep.mubr.f32.mxu0 %v9947_v16  ;;  %21614 = vmatprep.mubr.f32.mxu1 %v9947_v16 }
0x17cb   :  { %v9765_v54 = vpop.permute.xlu0 %9764 }
0x17cc   :  { %9767 = vst.msk [vmem:[#allocation4 + $0x38] sm:$0xff] %vm1714_vm4, %v9765_v54 }
0x17d3   :  { %v9776_v56 = vld [vmem:[#allocation4 + $0x38] sm:$0xff] }
0x17d4   :  { %v9812_v60 = vsel %vm85_vm0, %v9776_v56, 0 }
0x17d5   :  { %v25247_v61 = vand.u32 4294901760, %v9812_v60 }
0x17d7   :  { %v9954_v62 = vsub.f32 %v9812_v60, %v25247_v61 }
0x17d9   :  { %v25250_v0 = vand.u32 4294901760, %v9954_v62 }
0x17db   :  { %v9956_v1 = vsub.f32 %v9954_v62, %v25250_v0 }
0x17dd   :  { %v9957_v23 = vand.u32 4294901760, %v9956_v1 }
0x17df   :  { %21495 = vmatmul.mubr.f32.gmra.mrb[30].mxu0 %v9957_v23  ;;  %21615 = vmatmul.mubr.f32.gmra.mrb[30].mxu1 %v9957_v23 }
0x17e0   :  { %21505 = vmatprep.mubr.f32.mxu0 %v25142_v25  ;;  %21625 = vmatprep.mubr.f32.mxu1 %v25142_v25 }
0x17e3   :  { %21506 = vmatmul.mubr.f32.vlgmr.msra.gmra.mrb[24].mxu0 %v25103_v37  ;;  %21626 = vmatmul.mubr.f32.vlgmr.msra.gmra.mrb[24].mxu1 %v25103_v37 }
0x17e4   :  { %21508 = vmatprep.mubr.f32.mxu0 %v25100_v30  ;;  %22792 = vmatpush3.bf16.msra.mxu0 %v22789_v21 }
0x17e5   :  { %21628 = vmatprep.mubr.f32.mxu1 %v25100_v30  ;;  %22794 = vmatprep.subr.bf16.mxu0 %v25193_v48 }
0x17e6   :  { %22840 = vmatpush3.bf16.msra.mxu1 %v22837_v45 }
0x17e7   :  { %21509 = vmatmul.mubr.f32.gmra.mrb[26].mxu0 %v25122_v44  ;;  %21629 = vmatmul.mubr.f32.gmra.mrb[26].mxu1 %v25122_v44 }
0x17e8   :  { %21511 = vmatprep.mubr.f32.mxu0 %v25127_v49  ;;  %21631 = vmatprep.mubr.f32.mxu1 %v25127_v49 }
0x17e9   :  { %22796 = vmatpush3.bf16.msra.mxu0 %v25193_v48  ;;  %22842 = vmatprep.subr.bf16.mxu1 %v25199_v22 }
0x17ea   :  { %22844 = vmatpush3.bf16.msra.mxu1 %v25199_v22  ;;  %22798 = vmatprep.subr.bf16.mxu0 %v25036_v4 }
0x17eb   :  { %21512 = vmatmul.mubr.f32.gmra.mrb[28].mxu0 %v25150_v5  ;;  %21632 = vmatmul.mubr.f32.gmra.mrb[28].mxu1 %v25150_v5 }
0x17ec   :  { %21514 = vmatprep.mubr.f32.mxu0 %v25155_v46  ;;  %21634 = vmatprep.mubr.f32.mxu1 %v25155_v46 }
0x17ed   :  { %22846 = vmatprep.subr.bf16.mxu1 %v25040_v3 }
0x17ef   :  { %21515 = vmatmul.mubr.f32.gmra.mrb[30].mxu0 %v25247_v61  ;;  %21635 = vmatmul.mubr.f32.gmra.mrb[30].mxu1 %v25247_v61 }
0x17f0   :  { %21525 = vmatprep.mubr.f32.mxu0 %v25161_v55  ;;  %21645 = vmatprep.mubr.f32.mxu1 %v25161_v55 }
0x17f3   :  { %21526 = vmatmul.mubr.f32.vlgmr.msra.gmra.mrb[24].mxu0 %v25130_v50  ;;  %21646 = vmatmul.mubr.f32.vlgmr.msra.gmra.mrb[24].mxu1 %v25130_v50  ;;  %v11422_v50 = vand.u32 4294901760, %v19651_v40 }
0x17f4   :  { %21528 = vmatprep.mubr.f32.mxu0 %v25125_v35  ;;  %22800 = vmatpush3.bf16.msra.mxu0 %v25036_v4 }
0x17f5   :  { %21648 = vmatprep.mubr.f32.mxu1 %v25125_v35  ;;  %22802 = vmatprep.subr.bf16.mxu0 %v25046_v14  ;;  %v11916_v35 = vld [vmem:[#allocation7 + $0x18] sm:$0xff] }
0x17f6   :  { %22848 = vmatpush3.bf16.msra.mxu1 %v25040_v3  ;;  %v11923_v28 = vand.u32 4294901760, %v11916_v35 }
0x17f7   :  { %21529 = vmatmul.mubr.f32.gmra.mrb[26].mxu0 %v25140_v18  ;;  %21649 = vmatmul.mubr.f32.gmra.mrb[26].mxu1 %v25140_v18 }
0x17f8   :  { %21531 = vmatprep.mubr.f32.mxu0 %v25148_v63  ;;  %21651 = vmatprep.mubr.f32.mxu1 %v25148_v63  ;;  %v25373_v18 = vsub.f32 %v11916_v35, %v11923_v28 }
0x17f9   :  { %22804 = vmatpush3.bf16.msra.mxu0 %v25046_v14  ;;  %22850 = vmatprep.subr.bf16.mxu1 %v25050_v19 }
0x17fa   :  { %22852 = vmatpush3.bf16.msra.mxu1 %v25050_v19  ;;  %22806 = vmatprep.subr.bf16.mxu0 %v25225_v17 }
0x17fb   :  { %21532 = vmatmul.mubr.f32.gmra.mrb[28].mxu0 %v25184_v11  ;;  %21652 = vmatmul.mubr.f32.gmra.mrb[28].mxu1 %v25184_v11 }
0x17fc   :  { %21534 = vmatprep.mubr.f32.mxu0 %v25189_v2  ;;  %21654 = vmatprep.mubr.f32.mxu1 %v25189_v2 }
0x17fd   :  { %22854 = vmatprep.subr.bf16.mxu1 %v25231_v43 }
0x17ff   :  { %21535 = vmatmul.mubr.f32.gmra.mrb[30].mxu0 %v9954_v62  ;;  %21655 = vmatmul.mubr.f32.gmra.mrb[30].mxu1 %v9954_v62 }
0x1800   :  { %21545 = vmatprep.mubr.f32.mxu0 %v25176_v9  ;;  %21665 = vmatprep.mubr.f32.mxu1 %v25176_v9 }
0x1803   :  { %21546 = vmatmul.mubr.f32.vlgmr.msra.gmra.mrb[24].mxu0 %v25153_v58  ;;  %21666 = vmatmul.mubr.f32.vlgmr.msra.gmra.mrb[24].mxu1 %v25153_v58 }
0x1804   :  { %21548 = vmatprep.mubr.f32.mxu0 %v25145_v59  ;;  %22808 = vmatpush3.bf16.msra.mxu0 %v25225_v17 }
0x1805   :  { %21668 = vmatprep.mubr.f32.mxu1 %v25145_v59  ;;  %22810 = vmatprep.subr.bf16.mxu0 %v25237_v20 }
0x1806   :  { %22856 = vmatpush3.bf16.msra.mxu1 %v25231_v43 }
0x1807   :  { %21549 = vmatmul.mubr.f32.gmra.mrb[26].mxu0 %v25173_v13  ;;  %21669 = vmatmul.mubr.f32.gmra.mrb[26].mxu1 %v25173_v13  ;;  %v12006_v13 = vand.u32 4294901760, %v25373_v18 }
0x1808   :  { %21551 = vmatprep.mubr.f32.mxu0 %v25181_v8  ;;  %21671 = vmatprep.mubr.f32.mxu1 %v25181_v8 }
0x1809   :  { %22812 = vmatpush3.bf16.msra.mxu0 %v25237_v20  ;;  %22858 = vmatprep.subr.bf16.mxu1 %v25243_v53  ;;  %v12007_v8 = vsub.f32 %v25373_v18, %v12006_v13 }
0x180a   :  { %22860 = vmatpush3.bf16.msra.mxu1 %v25243_v53  ;;  %22814 = vmatprep.subr.bf16.mxu0 %v25036_v4 }
0x180b   :  { %21552 = vmatmul.mubr.f32.gmra.mrb[28].mxu0 %v25206_v34  ;;  %21672 = vmatmul.mubr.f32.gmra.mrb[28].mxu1 %v25206_v34  ;;  %v12008_v48 = vand.u32 4294901760, %v12007_v8 }
0x180c   :  { %21554 = vmatprep.mubr.f32.mxu0 %v25209_v24  ;;  %21674 = vmatprep.mubr.f32.mxu1 %v25209_v24 }
0x180d   :  { %22862 = vmatprep.subr.bf16.mxu1 %v25040_v3 }
0x180f   :  { %21555 = vmatmul.mubr.f32.gmra.mrb[30].mxu0 %v25250_v0  ;;  %21675 = vmatmul.mubr.f32.gmra.mrb[30].mxu1 %v25250_v0 }
0x1810   :  { %21565 = vmatprep.mubr.f32.mxu0 %v25142_v25  ;;  %21685 = vmatprep.mubr.f32.mxu1 %v25142_v25 }
0x1813   :  { %21566 = vmatmul.mubr.f32.vlgmr.msra.gmra.mrb[24].mxu0 %v25103_v37  ;;  %21686 = vmatmul.mubr.f32.vlgmr.msra.gmra.mrb[24].mxu1 %v25103_v37 }
0x1814   :  { %21568 = vmatprep.mubr.f32.mxu0 %v25100_v30  ;;  %22816 = vmatpush3.bf16.msra.mxu0 %v25036_v4  ;;  %v19652_v4 = vld [vmem:[%s26195_s5 + $0x18] sm:$0xff] }
0x1815   :  { %21688 = vmatprep.mubr.f32.mxu1 %v25100_v30  ;;  %22818 = vmatprep.subr.bf16.mxu0 %v25046_v14 }
0x1816   :  { %22864 = vmatpush3.bf16.msra.mxu1 %v25040_v3  ;;  %v11915_v3 = vld [vmem:[#allocation7 + $0x10] sm:$0xff] }
0x1817   :  { %21569 = vmatmul.mubr.f32.gmra.mrb[26].mxu0 %v25122_v44  ;;  %21689 = vmatmul.mubr.f32.gmra.mrb[26].mxu1 %v25122_v44  ;;  %v11920_v51 = vand.u32 4294901760, %v11915_v3 }
0x1818   :  { %21571 = vmatprep.mubr.f32.mxu0 %v25127_v49  ;;  %21691 = vmatprep.mubr.f32.mxu1 %v25127_v49 }
0x1819   :  { %22820 = vmatpush3.bf16.msra.mxu0 %v25046_v14  ;;  %22866 = vmatprep.subr.bf16.mxu1 %v25050_v19  ;;  %v11425_v14 = vand.u32 4294901760, %v19652_v4  ;;  %v25371_v6 = vsub.f32 %v11915_v3, %v11920_v51  ;;  %v25377_v63 = vpack.c.bf16 %v11923_v28, %v11920_v51  ;;  %v11891_v51 = vpop.permute.xlu1 %11890  ;;  %v12389_v28 = vpop.permute.xlu0 %12388 }
0x181a   :  { %22868 = vmatpush3.bf16.msra.mxu1 %v25050_v19  ;;  %22869 = vmatprep.subr.bf16.mxu0 %v23880_v36  ;;  %v25365_v19 = vsub.f32 %v19651_v40, %v11422_v50 }
0x181b   :  { %21572 = vmatmul.mubr.f32.gmra.mrb[28].mxu0 %v25150_v5  ;;  %21692 = vmatmul.mubr.f32.gmra.mrb[28].mxu1 %v25150_v5  ;;  %v25369_v15 = vsub.f32 %v19652_v4, %v11425_v14  ;;  %v25375_v59 = vpack.c.bf16 %v11425_v14, %v11422_v50  ;;  %v11999_v55 = vand.u32 4294901760, %v25371_v6  ;;  %v25429_v32 = vpack.c.bf16 %v25373_v18, %v25371_v6 }
0x181c   :  { %21574 = vmatprep.mubr.f32.mxu0 %v25155_v46  ;;  %21694 = vmatprep.mubr.f32.mxu1 %v25155_v46  ;;  %v11501_v58 = vand.u32 4294901760, %v25365_v19 }
0x181d   :  { %22887 = vmatprep.subr.bf16.mxu1 %v23880_v36  ;;  %v12000_v9 = vsub.f32 %v25371_v6, %v11999_v55  ;;  %v25453_v22 = vpack.c.bf16 %v12006_v13, %v11999_v55 }
0x181f   :  { %21575 = vmatmul.mubr.f32.gmra.mrb[30].mxu0 %v25247_v61  ;;  %21695 = vmatmul.mubr.f32.gmra.mrb[30].mxu1 %v25247_v61  ;;  %v12001_v2 = vand.u32 4294901760, %v12000_v9 }
0x1820   :  { %21585 = vmatprep.mubr.f32.mxu0 %v25142_v25  ;;  %21705 = vmatprep.mubr.f32.mxu1 %v25142_v25  ;;  %v11508_v25 = vand.u32 4294901760, %v25369_v15 }
0x1822   :  { %v25451_v29 = vpack.c.bf16 %v11508_v25, %v11501_v58 }
0x1823   :  { %21586 = vmatmul.mubr.f32.vlgmr.msra.gmra.mrb[24].mxu0 %v25103_v37  ;;  %21706 = vmatmul.mubr.f32.vlgmr.msra.gmra.mrb[24].mxu1 %v25103_v37  ;;  %v11509_v37 = vsub.f32 %v25369_v15, %v11508_v25 }
0x1824   :  { %21588 = vmatprep.mubr.f32.mxu0 %v25100_v30  ;;  %21708 = vmatprep.mubr.f32.mxu1 %v25100_v30  ;;  %v11502_v30 = vsub.f32 %v25365_v19, %v11501_v58 }
0x1825   :  { %22871 = vmatpush3.bf16.msra.mxu0 %v25375_v59  ;;  %22889 = vmatpush3.bf16.msra.mxu1 %v25377_v63  ;;  %v11510_v11 = vand.u32 4294901760, %v11509_v37 }
0x1826   :  { %22872 = vmatprep.subr.bf16.mxu0 %v23880_v36  ;;  %22890 = vmatprep.subr.bf16.mxu1 %v23880_v36 }
0x1827   :  { %21589 = vmatmul.mubr.f32.gmra.mrb[26].mxu0 %v25122_v44  ;;  %21709 = vmatmul.mubr.f32.gmra.mrb[26].mxu1 %v25122_v44  ;;  %v11503_v44 = vand.u32 4294901760, %v11502_v30 }
0x1828   :  { %21591 = vmatprep.mubr.f32.mxu0 %v25127_v49  ;;  %21711 = vmatprep.mubr.f32.mxu1 %v25127_v49 }
0x1829   :  { %v25409_v49 = vpack.c.bf16 %v11510_v11, %v11503_v44 }
0x182b   :  { %21592 = vmatmul.mubr.f32.gmra.mrb[28].mxu0 %v25150_v5  ;;  %21712 = vmatmul.mubr.f32.gmra.mrb[28].mxu1 %v25150_v5  ;;  %v25411_v5 = vpack.c.bf16 %v12008_v48, %v12001_v2 }
0x182c   :  { %21594 = vmatprep.mubr.f32.mxu0 %v25155_v46  ;;  %21714 = vmatprep.mubr.f32.mxu1 %v25155_v46  ;;  %v25425_v46 = vpack.c.bf16 %v25369_v15, %v25365_v19 }
0x182f   :  { %21595 = vmatmul.mubr.f32.gmra.mrb[30].mxu0 %v25247_v61  ;;  %21715 = vmatmul.mubr.f32.gmra.mrb[30].mxu1 %v25247_v61 }
0x1830   :  { %21721 = vmatprep.mubr.msk.f32.mxu0 %vm23881_vm1, %v23882_v42  ;;  %21763 = vmatprep.mubr.msk.f32.mxu1 %vm23881_vm1, %v23882_v42 }
0x1833   :  { %21722 = vmatmul.mubr.f32.vlgmr.msra.gmra.mrb[32].mxu0 %v23882_v42  ;;  %21764 = vmatmul.mubr.f32.vlgmr.msra.gmra.mrb[32].mxu1 %v23882_v42 }
0x1834   :  { %22874 = vmatpush3.bf16.msra.mxu0 %v25409_v49  ;;  %22892 = vmatpush3.bf16.msra.mxu1 %v25411_v5 }
0x1835   :  { %21728 = vmatprep.mubr.msk.f32.mxu0 %vm23881_vm1, %v23882_v42  ;;  %21770 = vmatprep.mubr.msk.f32.mxu1 %vm23881_vm1, %v23882_v42 }
0x1836   :  { %22875 = vmatprep.subr.bf16.mxu0 %v23880_v36  ;;  %22893 = vmatprep.subr.bf16.mxu1 %v23880_v36 }
0x183b   :  { %21729 = vmatmul.mubr.f32.vlgmr.msra.gmra.mrb[32].mxu0 %v23882_v42  ;;  %21771 = vmatmul.mubr.f32.vlgmr.msra.gmra.mrb[32].mxu1 %v23882_v42 }
0x183c   :  { %22877 = vmatpush3.bf16.msra.mxu0 %v25425_v46  ;;  %22895 = vmatpush3.bf16.msra.mxu1 %v25429_v32 }
0x183d   :  { %21735 = vmatprep.mubr.msk.f32.mxu0 %vm23881_vm1, %v23882_v42  ;;  %21777 = vmatprep.mubr.msk.f32.mxu1 %vm23881_vm1, %v23882_v42 }
0x183e   :  { %22878 = vmatprep.subr.bf16.mxu0 %v23880_v36  ;;  %22896 = vmatprep.subr.bf16.mxu1 %v23880_v36 }
0x1843   :  { %21736 = vmatmul.mubr.f32.vlgmr.msra.gmra.mrb[32].mxu0 %v23882_v42  ;;  %21778 = vmatmul.mubr.f32.vlgmr.msra.gmra.mrb[32].mxu1 %v23882_v42 }
0x1844   :  { %22880 = vmatpush3.bf16.msra.mxu0 %v25375_v59  ;;  %22898 = vmatpush3.bf16.msra.mxu1 %v25377_v63 }
0x1845   :  { %21742 = vmatprep.mubr.msk.f32.mxu0 %vm23881_vm1, %v23882_v42  ;;  %21784 = vmatprep.mubr.msk.f32.mxu1 %vm23881_vm1, %v23882_v42 }
0x1846   :  { %22881 = vmatprep.subr.bf16.mxu0 %v23880_v36  ;;  %22899 = vmatprep.subr.bf16.mxu1 %v23880_v36 }
0x184b   :  { %21743 = vmatmul.mubr.f32.vlgmr.msra.gmra.mrb[32].mxu0 %v23882_v42  ;;  %21785 = vmatmul.mubr.f32.vlgmr.msra.gmra.mrb[32].mxu1 %v23882_v42 }
0x184c   :  { %22883 = vmatpush3.bf16.msra.mxu0 %v25451_v29  ;;  %22901 = vmatpush3.bf16.msra.mxu1 %v25453_v22 }
0x184d   :  { %21749 = vmatprep.mubr.msk.f32.mxu0 %vm23881_vm1, %v23882_v42  ;;  %21791 = vmatprep.mubr.msk.f32.mxu1 %vm23881_vm1, %v23882_v42 }
0x184e   :  { %22884 = vmatprep.subr.bf16.mxu0 %v23880_v36  ;;  %22902 = vmatprep.subr.bf16.mxu1 %v23880_v36 }
0x1853   :  { %21750 = vmatmul.mubr.f32.vlgmr.msra.gmra.mrb[32].mxu0 %v23882_v42  ;;  %21792 = vmatmul.mubr.f32.vlgmr.msra.gmra.mrb[32].mxu1 %v23882_v42 }
0x1854   :  { %22886 = vmatpush3.bf16.msra.mxu0 %v25375_v59  ;;  %22904 = vmatpush3.bf16.msra.mxu1 %v25377_v63 }
0x1855   :  { %21756 = vmatprep.mubr.msk.f32.mxu0 %vm23881_vm1, %v23882_v42  ;;  %21798 = vmatprep.mubr.msk.f32.mxu1 %vm23881_vm1, %v23882_v42 }
0x1856   :  { %22905 = vmatprep.subr.bf16.mxu0 %v23880_v36  ;;  %22923 = vmatprep.subr.bf16.mxu1 %v23880_v36 }
0x185b   :  { %21757 = vmatmul.mubr.f32.vlgmr.msra.gmra.mrb[32].mxu0 %v23882_v42  ;;  %21799 = vmatmul.mubr.f32.vlgmr.msra.gmra.mrb[32].mxu1 %v23882_v42 }
0x185c   :  { %22907 = vmatpush3.bf16.msra.mxu0 %v25375_v59  ;;  %22925 = vmatpush3.bf16.msra.mxu1 %v25377_v63 }
0x185d   :  { %21805 = vmatprep.mubr.msk.f32.mxu0 %vm23881_vm1, %v23882_v42  ;;  %21847 = vmatprep.mubr.msk.f32.mxu1 %vm23881_vm1, %v23882_v42 }
0x185e   :  { %22908 = vmatprep.subr.bf16.mxu0 %v23880_v36  ;;  %22926 = vmatprep.subr.bf16.mxu1 %v23880_v36 }
0x18f6   :  { %v21587_v47 = vpop.f32.mrb[24].mxu0  ;;  %v21707_v34 = vpop.f32.mrb[24].mxu1 }
0x18f7   :  { %v23173_v33 = vadd.f32 %v21587_v47, %v19648_v41  ;;  %v23181_v24 = vadd.f32 %v21707_v34, %v19650_v38  ;;  %v10554_v39 = vpop.f32.mrb[25].mxu0  ;;  %v11361_v52 = vpop.f32.mrb[25].mxu1 }
0x18f8   :  { %v23174_v57 = vadd.f32 %v19648_v41, %v10554_v39  ;;  %v23182_v10 = vadd.f32 %v19650_v38, %v11361_v52 }
0x18f9   :  { %10601 = vst.msk [vmem:[#allocation2 + $0x8] sm:$0xff] %vm896_vm2, %v23173_v33  ;;  %11408 = vst.msk [vmem:[#allocation3 + $0x8] sm:$0xff] %vm896_vm2, %v23181_v24 }
0x18fa   :  { %10600 = vst.msk [vmem:[#allocation2] sm:$0xff] %vm896_vm2, %v23174_v57  ;;  %11407 = vst.msk [vmem:[#allocation3] sm:$0xff] %vm896_vm2, %v23182_v10  ;;  %v21590_v12 = vpop.f32.mrb[26].mxu0  ;;  %v21710_v7 = vpop.f32.mrb[26].mxu1 }
0x18fb   :  { %v23175_v21 = vadd.f32 %v21590_v12, %v19648_v41  ;;  %v23183_v45 = vadd.f32 %v21710_v7, %v19650_v38  ;;  %v10566_v27 = vpop.f32.mrb[27].mxu0  ;;  %v11373_v16 = vpop.f32.mrb[27].mxu1 }
0x18fc   :  { %v23176_v17 = vadd.f32 %v19648_v41, %v10566_v27  ;;  %v23184_v43 = vadd.f32 %v19650_v38, %v11373_v16 }
0x18fd   :  { %10603 = vst.msk [vmem:[#allocation2 + $0x18] sm:$0xff] %vm896_vm2, %v23175_v21  ;;  %11410 = vst.msk [vmem:[#allocation3 + $0x18] sm:$0xff] %vm896_vm2, %v23183_v45 }
0x18fe   :  { %10602 = vst.msk [vmem:[#allocation2 + $0x10] sm:$0xff] %vm896_vm2, %v23176_v17  ;;  %11409 = vst.msk [vmem:[#allocation3 + $0x10] sm:$0xff] %vm896_vm2, %v23184_v43  ;;  %v21593_v20 = vpop.f32.mrb[28].mxu0  ;;  %v21713_v53 = vpop.f32.mrb[28].mxu1 }
0x18ff   :  { %v23177_v54 = vadd.f32 %v21593_v20, %v19648_v41  ;;  %v23185_v56 = vadd.f32 %v21713_v53, %v19650_v38  ;;  %v10578_v60 = vpop.f32.mrb[29].mxu0  ;;  %v11385_v61 = vpop.f32.mrb[29].mxu1 }
0x1900   :  { %v23178_v62 = vadd.f32 %v19648_v41, %v10578_v60  ;;  %v23186_v0 = vadd.f32 %v19650_v38, %v11385_v61 }
0x1901   :  { %10605 = vst.msk [vmem:[#allocation2 + $0x28] sm:$0xff] %vm896_vm2, %v23177_v54  ;;  %11412 = vst.msk [vmem:[#allocation3 + $0x28] sm:$0xff] %vm896_vm2, %v23185_v56  ;;  %v11415_v55 = vld [vmem:[#allocation2] sm:$0xff] }
0x1902   :  { %10604 = vst.msk [vmem:[#allocation2 + $0x20] sm:$0xff] %vm896_vm2, %v23178_v62  ;;  %11411 = vst.msk [vmem:[#allocation3 + $0x20] sm:$0xff] %vm896_vm2, %v23186_v0  ;;  %v21596_v1 = vpop.f32.mrb[30].mxu0  ;;  %v21716_v23 = vpop.f32.mrb[30].mxu1 }
0x1903   :  { %v23179_v40 = vadd.f32 %v21596_v1, %v19648_v41  ;;  %v23187_v4 = vadd.f32 %v21716_v23, %v19650_v38  ;;  %v10590_v3 = vpop.f32.mrb[31].mxu0  ;;  %v11397_v35 = vpop.f32.mrb[31].mxu1 }
0x1904   :  { %v23180_v50 = vadd.f32 %v19648_v41, %v10590_v3  ;;  %v23188_v14 = vadd.f32 %v19650_v38, %v11397_v35 }
0x1905   :  { %10607 = vst.msk [vmem:[#allocation2 + $0x38] sm:$0xff] %vm896_vm2, %v23179_v40  ;;  %11414 = vst.msk [vmem:[#allocation3 + $0x38] sm:$0xff] %vm896_vm2, %v23187_v4 }
0x1906   :  { %10606 = vst.msk [vmem:[#allocation2 + $0x30] sm:$0xff] %vm896_vm2, %v23180_v50  ;;  %11413 = vst.msk [vmem:[#allocation3 + $0x30] sm:$0xff] %vm896_vm2, %v23188_v14 }
0x190c   :  { %v11913_v30 = vld [vmem:[#allocation3 + $0x38] sm:$0xff] }
0x192e   :  { %v11876_v19 = vpop.f32.mrb[32].mxu0  ;;  %v12374_v15 = vpop.f32.mrb[32].mxu1 }
0x192f   :  { %v11893_v6 = vadd.f32 %v11891_v51, %v11876_v19  ;;  %v12391_v18 = vadd.f32 %v12389_v28, %v12374_v15  ;;  %v21758_v58 = vpop.f32.mrb[33].mxu0  ;;  %v21800_v25 = vpop.f32.mrb[33].mxu1  ;;  %v11880_v13 = vadd.f32 %v11876_v19, %v11415_v55  ;;  %v12378_v37 = vadd.f32 %v12374_v15, %v11913_v30 }
0x1931   :  { %11895 = vrot.lane.b32.xlu1 %v11893_v6, %s23883_s20  ;;  %12393 = vrot.lane.b32.xlu0 %v12391_v18, %s23883_s20  ;;  %v11881_v9 = vmul.f32 0.5, %v11880_v13  ;;  %v12379_v8 = vmul.f32 0.5, %v12378_v37 }
0x1933   :  { %23743 = vtanh.f32 %v11881_v9  ;;  %v12915_v9 = vld [vmem:[#allocation3 + $0x30] sm:$0xff] }
0x1934   :  { %23745 = vtanh.f32 %v12379_v8 }
0x193d   :  { %v23744_v44 = vpop.eup %23743 }
0x193e   :  { %v23746_v11 = vpop.eup %23745  ;;  %v11883_v2 = vmul.f32 0.5, %v23744_v44 }
0x193f   :  { %v12381_v48 = vmul.f32 0.5, %v23746_v11 }
0x1940   :  { %v11884_v41 = vadd.f32 0.5, %v11883_v2 }
0x1941   :  { %v12382_v38 = vadd.f32 0.5, %v12381_v48 }
0x1942   :  { %v11905_v21 = vsub.f32 1.0, %v11884_v41  ;;  %v11911_v16 = vmul.f32 0.0, %v11884_v41 }
0x1943   :  { %v12403_v27 = vsub.f32 1.0, %v12382_v38  ;;  %v12409_v20 = vmul.f32 0.0, %v12382_v38 }
0x19a3   :  { %v11896_v47 = vpop.permute.xlu1 %11895  ;;  %v12394_v34 = vpop.permute.xlu0 %12393 }
0x19a4   :  { %v11898_v33 = vmul.f32 %v11896_v47, %v11884_v41  ;;  %v12396_v24 = vmul.f32 %v12394_v34, %v12382_v38 }
0x19a6   :  { %11900 = vrot.lane.b32.xlu1 %v11898_v33, %s23879_s27  ;;  %12398 = vrot.lane.b32.xlu0 %v12396_v24, %s23879_s27 }
0x1a18   :  { %v11901_v39 = vpop.permute.xlu1 %11900  ;;  %v12399_v52 = vpop.permute.xlu0 %12398 }
0x1a19   :  { %v11903_v57 = vadd.f32 %v11901_v39, %v11415_v55  ;;  %v12401_v10 = vadd.f32 %v12399_v52, %v11913_v30  ;;  %v12417_v30 = vld [vmem:[#allocation2 + $0x8] sm:$0xff] }
0x1a1b   :  { %23747 = vtanh.f32 %v11903_v57 }
0x1a1c   :  { %23749 = vtanh.f32 %v12401_v10 }
0x1a25   :  { %v23748_v12 = vpop.eup %23747 }
0x1a26   :  { %v23750_v7 = vpop.eup %23749  ;;  %11907 = vrot.lane.b32.xlu1 %v23748_v12, %s23884_s21 }
0x1a27   :  { %12405 = vrot.lane.b32.xlu0 %v23750_v7, %s23884_s21 }
0x1a98   :  { %v11908_v45 = vpop.permute.xlu1 %11907 }
0x1a99   :  { %v11910_v17 = vmul.f32 %v11908_v45, %v11905_v21  ;;  %v12406_v43 = vpop.permute.xlu0 %12405 }
0x1a9a   :  { %v12408_v53 = vmul.f32 %v12406_v43, %v12403_v27 }
0x1a9b   :  { %v25513_v54 = vadd.f32 %v11911_v16, %v11910_v17 }
0x1a9c   :  { %v25515_v56 = vadd.f32 %v12409_v20, %v12408_v53 }
0x1a9d   :  { %12412 = vrot.lane.b32.xlu1 %v25513_v54, %s23884_s21 }
0x1a9e   :  { %12416 = vst.msk [vmem:[#allocation4 + $0x38] sm:$0xff] %vm2713_vm3, %v25515_v56  ;;  %12920 = vrot.lane.b32.xlu0 %v25515_v56, %s23884_s21 }
0x1aa1   :  { %12892 = vrot.lane.b32.xlu1 %v25256_v26, %s23879_s27 }
0x1aa2   :  { %13393 = vrot.lane.b32.xlu0 %v25261_v31, %s23879_s27 }
0x1b0f   :  { %v12413_v60 = vpop.permute.xlu1 %12412 }
0x1b10   :  { %12415 = vst.msk [vmem:[#allocation4] sm:$0xff] %vm1714_vm4, %v12413_v60  ;;  %v12421_v61 = vsel %vm1714_vm4, %v12413_v60, 0  ;;  %v12921_v62 = vpop.permute.xlu0 %12920 }
0x1b11   :  { %v12490_v0 = vand.u32 4294901760, %v12421_v61  ;;  %v12922_v1 = vsel %vm1714_vm4, %v12921_v62, 0 }
0x1b12   :  { %v12991_v23 = vand.u32 4294901760, %v12922_v1 }
0x1b13   :  { %v12491_v40 = vsub.f32 %v12421_v61, %v12490_v0  ;;  %v12893_v19 = vpop.permute.xlu1 %12892 }
0x1b14   :  { %v12992_v4 = vsub.f32 %v12922_v1, %v12991_v23  ;;  %v13394_v15 = vpop.permute.xlu0 %13393 }
0x1b15   :  { %v12492_v3 = vand.u32 4294901760, %v12491_v40 }
0x1b16   :  { %v12993_v35 = vand.u32 4294901760, %v12992_v4 }
0x1b17   :  { %v12493_v50 = vsub.f32 %v12491_v40, %v12492_v3 }
0x1b18   :  { %v12994_v14 = vsub.f32 %v12992_v4, %v12993_v35 }
0x1b19   :  { %v12494_v51 = vand.u32 4294901760, %v12493_v50 }
0x1b1a   :  { %v12995_v28 = vand.u32 4294901760, %v12994_v14 }
0x1b1b   :  { %21806 = vmatmul.mubr.f32.vlgmr.msra.gmra.mrb[34].mxu0 %v12494_v51 }
0x1b1c   :  { %21848 = vmatmul.mubr.f32.vlgmr.msra.gmra.mrb[34].mxu1 %v12995_v28  ;;  %22910 = vmatpush3.bf16.msra.mxu0 %v25409_v49 }
0x1b1d   :  { %22928 = vmatpush3.bf16.msra.mxu1 %v25411_v5  ;;  %21812 = vmatprep.mubr.msk.f32.mxu0 %vm23881_vm1, %v23882_v42 }
0x1b1e   :  { %21854 = vmatprep.mubr.msk.f32.mxu1 %vm23881_vm1, %v23882_v42  ;;  %22911 = vmatprep.subr.bf16.mxu0 %v23880_v36 }
0x1b1f   :  { %22929 = vmatprep.subr.bf16.mxu1 %v23880_v36 }
0x1b23   :  { %21813 = vmatmul.mubr.f32.vlgmr.msra.gmra.mrb[34].mxu0 %v12490_v0 }
0x1b24   :  { %21855 = vmatmul.mubr.f32.vlgmr.msra.gmra.mrb[34].mxu1 %v12991_v23  ;;  %22913 = vmatpush3.bf16.msra.mxu0 %v25425_v46 }
0x1b25   :  { %22931 = vmatpush3.bf16.msra.mxu1 %v25429_v32  ;;  %21819 = vmatprep.mubr.msk.f32.mxu0 %vm23881_vm1, %v23882_v42 }
0x1b26   :  { %21861 = vmatprep.mubr.msk.f32.mxu1 %vm23881_vm1, %v23882_v42  ;;  %22914 = vmatprep.subr.bf16.mxu0 %v23880_v36 }
0x1b27   :  { %22932 = vmatprep.subr.bf16.mxu1 %v23880_v36 }
0x1b2b   :  { %21820 = vmatmul.mubr.f32.vlgmr.msra.gmra.mrb[34].mxu0 %v12491_v40 }
0x1b2c   :  { %21862 = vmatmul.mubr.f32.vlgmr.msra.gmra.mrb[34].mxu1 %v12992_v4  ;;  %22916 = vmatpush3.bf16.msra.mxu0 %v25375_v59 }
0x1b2d   :  { %22934 = vmatpush3.bf16.msra.mxu1 %v25377_v63  ;;  %21826 = vmatprep.mubr.msk.f32.mxu0 %vm23881_vm1, %v23882_v42 }
0x1b2e   :  { %21868 = vmatprep.mubr.msk.f32.mxu1 %vm23881_vm1, %v23882_v42  ;;  %22917 = vmatprep.subr.bf16.mxu0 %v23880_v36 }
0x1b2f   :  { %22935 = vmatprep.subr.bf16.mxu1 %v23880_v36 }
0x1b33   :  { %21827 = vmatmul.mubr.f32.vlgmr.msra.gmra.mrb[34].mxu0 %v12492_v3 }
0x1b34   :  { %21869 = vmatmul.mubr.f32.vlgmr.msra.gmra.mrb[34].mxu1 %v12993_v35  ;;  %22919 = vmatpush3.bf16.msra.mxu0 %v25451_v29 }
0x1b35   :  { %22937 = vmatpush3.bf16.msra.mxu1 %v25453_v22  ;;  %21833 = vmatprep.mubr.msk.f32.mxu0 %vm23881_vm1, %v23882_v42 }
0x1b36   :  { %21875 = vmatprep.mubr.msk.f32.mxu1 %vm23881_vm1, %v23882_v42  ;;  %22920 = vmatprep.subr.bf16.mxu0 %v23880_v36 }
0x1b37   :  { %22938 = vmatprep.subr.bf16.mxu1 %v23880_v36 }
0x1b3b   :  { %21834 = vmatmul.mubr.f32.vlgmr.msra.gmra.mrb[34].mxu0 %v12490_v0 }
0x1b3c   :  { %21876 = vmatmul.mubr.f32.vlgmr.msra.gmra.mrb[34].mxu1 %v12991_v23  ;;  %22922 = vmatpush3.bf16.msra.mxu0 %v25375_v59 }
0x1b3d   :  { %22940 = vmatpush3.bf16.msra.mxu1 %v25377_v63  ;;  %21840 = vmatprep.mubr.msk.f32.mxu0 %vm23881_vm1, %v23882_v42 }
0x1b3e   :  { %21882 = vmatprep.mubr.msk.f32.mxu1 %vm23881_vm1, %v23882_v42  ;;  %22941 = vmatprep.subr.bf16.mxu0 %v23880_v36 }
0x1b3f   :  { %22959 = vmatprep.subr.bf16.mxu1 %v23880_v36 }
0x1b43   :  { %21841 = vmatmul.mubr.f32.vlgmr.msra.gmra.mrb[34].mxu0 %v12490_v0 }
0x1b44   :  { %21883 = vmatmul.mubr.f32.vlgmr.msra.gmra.mrb[34].mxu1 %v12991_v23  ;;  %22943 = vmatpush3.bf16.msra.mxu0 %v25375_v59 }
0x1b45   :  { %22961 = vmatpush3.bf16.msra.mxu1 %v25377_v63  ;;  %21889 = vmatprep.mubr.msk.f32.mxu0 %vm23881_vm1, %v23882_v42 }
0x1b46   :  { %21931 = vmatprep.mubr.msk.f32.mxu1 %vm23881_vm1, %v23882_v42  ;;  %22944 = vmatprep.subr.bf16.mxu0 %v23880_v36 }
0x1b47   :  { %22962 = vmatprep.subr.bf16.mxu1 %v23880_v36 }
0x1c16   :  { %v12878_v6 = vpop.f32.mrb[34].mxu0 }
0x1c17   :  { %v12895_v18 = vadd.f32 %v12893_v19, %v12878_v6  ;;  %v13379_v58 = vpop.f32.mrb[34].mxu1  ;;  %v21842_v25 = vpop.f32.mrb[35].mxu0  ;;  %v12882_v37 = vadd.f32 %v12878_v6, %v12417_v30 }
0x1c18   :  { %v13396_v55 = vadd.f32 %v13394_v15, %v13379_v58  ;;  %v21884_v13 = vpop.f32.mrb[35].mxu1  ;;  %v13383_v8 = vadd.f32 %v13379_v58, %v12915_v9 }
0x1c19   :  { %12897 = vrot.lane.b32.xlu1 %v12895_v18, %s23883_s20  ;;  %v12883_v44 = vmul.f32 0.5, %v12882_v37 }
0x1c1a   :  { %13398 = vrot.lane.b32.xlu0 %v13396_v55, %s23883_s20  ;;  %v13384_v11 = vmul.f32 0.5, %v13383_v8 }
0x1c1b   :  { %23751 = vtanh.f32 %v12883_v44 }
0x1c1c   :  { %23753 = vtanh.f32 %v13384_v11 }
0x1c25   :  { %v23752_v2 = vpop.eup %23751 }
0x1c26   :  { %v23754_v48 = vpop.eup %23753  ;;  %v12885_v41 = vmul.f32 0.5, %v23752_v2 }
0x1c27   :  { %v13386_v38 = vmul.f32 0.5, %v23754_v48 }
0x1c28   :  { %v12886_v47 = vadd.f32 0.5, %v12885_v41 }
0x1c29   :  { %v13387_v33 = vadd.f32 0.5, %v13386_v38 }
0x1c2a   :  { %v12907_v27 = vsub.f32 1.0, %v12886_v47  ;;  %v12913_v43 = vmul.f32 %v12886_v47, %v25513_v54 }
0x1c2b   :  { %v13408_v17 = vsub.f32 1.0, %v13387_v33  ;;  %v13414_v60 = vmul.f32 %v13387_v33, %v25515_v56 }
0x1c8b   :  { %v12898_v34 = vpop.permute.xlu1 %12897 }
0x1c8c   :  { %v12900_v24 = vmul.f32 %v12898_v34, %v12886_v47  ;;  %v13399_v39 = vpop.permute.xlu0 %13398 }
0x1c8d   :  { %v13401_v52 = vmul.f32 %v13399_v39, %v13387_v33 }
0x1c8e   :  { %12902 = vrot.lane.b32.xlu1 %v12900_v24, %s23879_s27 }
0x1c8f   :  { %13403 = vrot.lane.b32.xlu0 %v13401_v52, %s23879_s27 }
0x1d00   :  { %v12903_v57 = vpop.permute.xlu1 %12902 }
0x1d01   :  { %v12905_v10 = vadd.f32 %v12903_v57, %v12417_v30  ;;  %v13404_v12 = vpop.permute.xlu0 %13403  ;;  %v13422_v30 = vld [vmem:[#allocation2 + $0x10] sm:$0xff] }
0x1d02   :  { %v13406_v7 = vadd.f32 %v13404_v12, %v12915_v9  ;;  %v13920_v9 = vld [vmem:[#allocation3 + $0x28] sm:$0xff] }
0x1d03   :  { %23755 = vtanh.f32 %v12905_v10 }
0x1d04   :  { %23757 = vtanh.f32 %v13406_v7 }
0x1d0d   :  { %v23756_v21 = vpop.eup %23755 }
0x1d0e   :  { %v23758_v45 = vpop.eup %23757  ;;  %12909 = vrot.lane.b32.xlu1 %v23756_v21, %s23884_s21 }
0x1d0f   :  { %13410 = vrot.lane.b32.xlu0 %v23758_v45, %s23884_s21 }
0x1d80   :  { %v12910_v16 = vpop.permute.xlu1 %12909 }
0x1d81   :  { %v12912_v20 = vmul.f32 %v12910_v16, %v12907_v27  ;;  %v13411_v53 = vpop.permute.xlu0 %13410 }
0x1d82   :  { %v13413_v61 = vmul.f32 %v13411_v53, %v13408_v17 }
0x1d83   :  { %v25586_v62 = vadd.f32 %v12913_v43, %v12912_v20 }
0x1d84   :  { %v25588_v0 = vadd.f32 %v13414_v60, %v13413_v61 }
0x1d85   :  { %13417 = vrot.lane.b32.xlu1 %v25586_v62, %s23884_s21 }
0x1d86   :  { %13421 = vst.msk [vmem:[#allocation4 + $0x30] sm:$0xff] %vm2713_vm3, %v25588_v0  ;;  %13925 = vrot.lane.b32.xlu0 %v25588_v0, %s23884_s21 }
0x1d89   :  { %13897 = vrot.lane.b32.xlu1 %v25256_v26, %s23879_s27 }
0x1d8a   :  { %14398 = vrot.lane.b32.xlu0 %v25261_v31, %s23879_s27 }
0x1df7   :  { %v13418_v54 = vpop.permute.xlu1 %13417 }
0x1df8   :  { %13420 = vst.msk [vmem:[#allocation4 + $0x8] sm:$0xff] %vm1714_vm4, %v13418_v54  ;;  %v13426_v56 = vsel %vm1714_vm4, %v13418_v54, 0  ;;  %v13926_v1 = vpop.permute.xlu0 %13925 }
0x1df9   :  { %v13495_v23 = vand.u32 4294901760, %v13426_v56  ;;  %v13927_v40 = vsel %vm1714_vm4, %v13926_v1, 0 }
0x1dfa   :  { %v13996_v4 = vand.u32 4294901760, %v13927_v40 }
0x1dfb   :  { %v13496_v3 = vsub.f32 %v13426_v56, %v13495_v23  ;;  %v13898_v31 = vpop.permute.xlu1 %13897 }
0x1dfc   :  { %v13997_v35 = vsub.f32 %v13927_v40, %v13996_v4  ;;  %v14399_v15 = vpop.permute.xlu0 %14398 }
0x1dfd   :  { %v13497_v50 = vand.u32 4294901760, %v13496_v3 }
0x1dfe   :  { %v13998_v14 = vand.u32 4294901760, %v13997_v35 }
0x1dff   :  { %v13498_v51 = vsub.f32 %v13496_v3, %v13497_v50 }
0x1e00   :  { %v13999_v28 = vsub.f32 %v13997_v35, %v13998_v14 }
0x1e01   :  { %v13499_v26 = vand.u32 4294901760, %v13498_v51 }
0x1e02   :  { %v14000_v19 = vand.u32 4294901760, %v13999_v28 }
0x1e03   :  { %21890 = vmatmul.mubr.f32.vlgmr.msra.gmra.mrb[36].mxu0 %v13499_v26 }
0x1e04   :  { %21932 = vmatmul.mubr.f32.vlgmr.msra.gmra.mrb[36].mxu1 %v14000_v19  ;;  %22946 = vmatpush3.bf16.msra.mxu0 %v25409_v49 }
0x1e05   :  { %22964 = vmatpush3.bf16.msra.mxu1 %v25411_v5  ;;  %21896 = vmatprep.mubr.msk.f32.mxu0 %vm23881_vm1, %v23882_v42 }
0x1e06   :  { %21938 = vmatprep.mubr.msk.f32.mxu1 %vm23881_vm1, %v23882_v42  ;;  %22947 = vmatprep.subr.bf16.mxu0 %v23880_v36 }
0x1e07   :  { %22965 = vmatprep.subr.bf16.mxu1 %v23880_v36 }
0x1e0b   :  { %21897 = vmatmul.mubr.f32.vlgmr.msra.gmra.mrb[36].mxu0 %v13495_v23 }
0x1e0c   :  { %21939 = vmatmul.mubr.f32.vlgmr.msra.gmra.mrb[36].mxu1 %v13996_v4  ;;  %22949 = vmatpush3.bf16.msra.mxu0 %v25425_v46 }
0x1e0d   :  { %22967 = vmatpush3.bf16.msra.mxu1 %v25429_v32  ;;  %21903 = vmatprep.mubr.msk.f32.mxu0 %vm23881_vm1, %v23882_v42 }
0x1e0e   :  { %21945 = vmatprep.mubr.msk.f32.mxu1 %vm23881_vm1, %v23882_v42  ;;  %22950 = vmatprep.subr.bf16.mxu0 %v23880_v36 }
0x1e0f   :  { %22968 = vmatprep.subr.bf16.mxu1 %v23880_v36 }
0x1e13   :  { %21904 = vmatmul.mubr.f32.vlgmr.msra.gmra.mrb[36].mxu0 %v13496_v3 }
0x1e14   :  { %21946 = vmatmul.mubr.f32.vlgmr.msra.gmra.mrb[36].mxu1 %v13997_v35  ;;  %22952 = vmatpush3.bf16.msra.mxu0 %v25375_v59 }
0x1e15   :  { %22970 = vmatpush3.bf16.msra.mxu1 %v25377_v63  ;;  %21910 = vmatprep.mubr.msk.f32.mxu0 %vm23881_vm1, %v23882_v42 }
0x1e16   :  { %21952 = vmatprep.mubr.msk.f32.mxu1 %vm23881_vm1, %v23882_v42  ;;  %22953 = vmatprep.subr.bf16.mxu0 %v23880_v36 }
0x1e17   :  { %22971 = vmatprep.subr.bf16.mxu1 %v23880_v36 }
0x1e1b   :  { %21911 = vmatmul.mubr.f32.vlgmr.msra.gmra.mrb[36].mxu0 %v13497_v50 }
0x1e1c   :  { %21953 = vmatmul.mubr.f32.vlgmr.msra.gmra.mrb[36].mxu1 %v13998_v14  ;;  %22955 = vmatpush3.bf16.msra.mxu0 %v25451_v29 }
0x1e1d   :  { %22973 = vmatpush3.bf16.msra.mxu1 %v25453_v22  ;;  %21917 = vmatprep.mubr.msk.f32.mxu0 %vm23881_vm1, %v23882_v42 }
0x1e1e   :  { %21959 = vmatprep.mubr.msk.f32.mxu1 %vm23881_vm1, %v23882_v42  ;;  %22956 = vmatprep.subr.bf16.mxu0 %v23880_v36 }
0x1e1f   :  { %22974 = vmatprep.subr.bf16.mxu1 %v23880_v36 }
0x1e23   :  { %21918 = vmatmul.mubr.f32.vlgmr.msra.gmra.mrb[36].mxu0 %v13495_v23 }
0x1e24   :  { %21960 = vmatmul.mubr.f32.vlgmr.msra.gmra.mrb[36].mxu1 %v13996_v4  ;;  %22958 = vmatpush3.bf16.msra.mxu0 %v25375_v59 }
0x1e25   :  { %22976 = vmatpush3.bf16.msra.mxu1 %v25377_v63  ;;  %21924 = vmatprep.mubr.msk.f32.mxu0 %vm23881_vm1, %v23882_v42 }
0x1e26   :  { %21966 = vmatprep.mubr.msk.f32.mxu1 %vm23881_vm1, %v23882_v42  ;;  %22977 = vmatprep.subr.bf16.mxu0 %v23880_v36 }
0x1e27   :  { %22995 = vmatprep.subr.bf16.mxu1 %v23880_v36 }
0x1e2b   :  { %21925 = vmatmul.mubr.f32.vlgmr.msra.gmra.mrb[36].mxu0 %v13495_v23 }
0x1e2c   :  { %21967 = vmatmul.mubr.f32.vlgmr.msra.gmra.mrb[36].mxu1 %v13996_v4  ;;  %22979 = vmatpush3.bf16.msra.mxu0 %v25375_v59 }
0x1e2d   :  { %22997 = vmatpush3.bf16.msra.mxu1 %v25377_v63  ;;  %21973 = vmatprep.mubr.msk.f32.mxu0 %vm23881_vm1, %v23882_v42 }
0x1e2e   :  { %22015 = vmatprep.mubr.msk.f32.mxu1 %vm23881_vm1, %v23882_v42  ;;  %22980 = vmatprep.subr.bf16.mxu0 %v23880_v36 }
0x1e2f   :  { %22998 = vmatprep.subr.bf16.mxu1 %v23880_v36 }
0x1efe   :  { %v13883_v6 = vpop.f32.mrb[36].mxu0 }
0x1eff   :  { %v13900_v18 = vadd.f32 %v13898_v31, %v13883_v6  ;;  %v14384_v58 = vpop.f32.mrb[36].mxu1  ;;  %v21926_v25 = vpop.f32.mrb[37].mxu0  ;;  %v13887_v37 = vadd.f32 %v13883_v6, %v13422_v30  ;;  %v14427_v6 = vld [vmem:[#allocation2 + $0x18] sm:$0xff] }
0x1f00   :  { %v14401_v55 = vadd.f32 %v14399_v15, %v14384_v58  ;;  %v21968_v13 = vpop.f32.mrb[37].mxu1  ;;  %v14388_v8 = vadd.f32 %v14384_v58, %v13920_v9  ;;  %v14925_v58 = vld [vmem:[#allocation3 + $0x20] sm:$0xff] }
0x1f01   :  { %13902 = vrot.lane.b32.xlu1 %v13900_v18, %s23883_s20  ;;  %v13888_v44 = vmul.f32 0.5, %v13887_v37 }
0x1f02   :  { %14403 = vrot.lane.b32.xlu0 %v14401_v55, %s23883_s20  ;;  %v14389_v11 = vmul.f32 0.5, %v14388_v8 }
0x1f03   :  { %23759 = vtanh.f32 %v13888_v44 }
0x1f04   :  { %23761 = vtanh.f32 %v14389_v11 }
0x1f0d   :  { %v23760_v2 = vpop.eup %23759 }
0x1f0e   :  { %v23762_v48 = vpop.eup %23761  ;;  %v13890_v41 = vmul.f32 0.5, %v23760_v2 }
0x1f0f   :  { %v14391_v38 = vmul.f32 0.5, %v23762_v48 }
0x1f10   :  { %v13891_v47 = vadd.f32 0.5, %v13890_v41 }
0x1f11   :  { %v14392_v33 = vadd.f32 0.5, %v14391_v38 }
0x1f12   :  { %v13912_v27 = vsub.f32 1.0, %v13891_v47  ;;  %v13918_v43 = vmul.f32 %v13891_v47, %v25586_v62  ;;  %v23825_v62 = vld [vmem:[%s26197_s7 + $0x1] ss:$0 sm:$0xff] }
0x1f13   :  { %v14413_v17 = vsub.f32 1.0, %v14392_v33  ;;  %v14419_v60 = vmul.f32 %v14392_v33, %v25588_v0  ;;  %v23826_v0 = vld [vmem:[%s26198_s8 + $0x1] ss:$0 sm:$0xff] }
0x1f73   :  { %v13903_v34 = vpop.permute.xlu1 %13902 }
0x1f74   :  { %v13905_v24 = vmul.f32 %v13903_v34, %v13891_v47  ;;  %v14404_v39 = vpop.permute.xlu0 %14403 }
0x1f75   :  { %v14406_v52 = vmul.f32 %v14404_v39, %v14392_v33 }
0x1f76   :  { %13907 = vrot.lane.b32.xlu1 %v13905_v24, %s23879_s27 }
0x1f77   :  { %14408 = vrot.lane.b32.xlu0 %v14406_v52, %s23879_s27 }
0x1fe8   :  { %v13908_v57 = vpop.permute.xlu1 %13907 }
0x1fe9   :  { %v13910_v10 = vadd.f32 %v13908_v57, %v13422_v30  ;;  %v14409_v12 = vpop.permute.xlu0 %14408  ;;  %v19675_v57 = vld [vmem:[%s26195_s5 + $0x10] sm:$0xff] }
0x1fea   :  { %v14411_v7 = vadd.f32 %v14409_v12, %v13920_v9  ;;  %v15931_v12 = vld [vmem:[#allocation7 + $0x10] sm:$0xff] }
0x1feb   :  { %23763 = vtanh.f32 %v13910_v10  ;;  %v19676_v10 = vld [vmem:[%s26195_s5 + $0x18] sm:$0xff] }
0x1fec   :  { %23765 = vtanh.f32 %v14411_v7  ;;  %v15439_v7 = vand.u32 4294901760, %v19675_v57 }
0x1ff5   :  { %v23764_v21 = vpop.eup %23763 }
0x1ff6   :  { %v23766_v45 = vpop.eup %23765  ;;  %13914 = vrot.lane.b32.xlu1 %v23764_v21, %s23884_s21  ;;  %v15442_v21 = vand.u32 4294901760, %v19676_v10 }
0x1ff7   :  { %14415 = vrot.lane.b32.xlu0 %v23766_v45, %s23884_s21  ;;  %v15932_v45 = vld [vmem:[#allocation7 + $0x18] sm:$0xff] }
0x2068   :  { %v13915_v16 = vpop.permute.xlu1 %13914 }
0x2069   :  { %v13917_v20 = vmul.f32 %v13915_v16, %v13912_v27  ;;  %v14416_v53 = vpop.permute.xlu0 %14415  ;;  %v15940_v27 = vand.u32 4294901760, %v15931_v12 }
0x206a   :  { %v14418_v61 = vmul.f32 %v14416_v53, %v14413_v17  ;;  %v15943_v17 = vand.u32 4294901760, %v15932_v45  ;;  %v15524_v53 = vsub.f32 %v19676_v10, %v15442_v21 }
0x206b   :  { %v25659_v54 = vadd.f32 %v13918_v43, %v13917_v20  ;;  %v25736_v43 = vpack.c.bf16 %v15442_v21, %v15439_v7  ;;  %v15517_v20 = vsub.f32 %v19675_v57, %v15439_v7  ;;  %v15432_v21 = vld [vmem:[#allocation2 + $0x20] sm:$0xff] }
0x206c   :  { %v25661_v56 = vadd.f32 %v14419_v60, %v14418_v61  ;;  %v16018_v60 = vsub.f32 %v15931_v12, %v15940_v27 }
0x206d   :  { %14422 = vrot.lane.b32.xlu1 %v25659_v54, %s23884_s21 }
0x206e   :  { %14426 = vst.msk [vmem:[#allocation4 + $0x28] sm:$0xff] %vm2713_vm3, %v25661_v56  ;;  %14930 = vrot.lane.b32.xlu0 %v25661_v56, %s23884_s21 }
0x2071   :  { %14902 = vrot.lane.b32.xlu1 %v23825_v62, %s23879_s27 }
0x2072   :  { %15403 = vrot.lane.b32.xlu0 %v23826_v0, %s23879_s27 }
0x20df   :  { %v14423_v1 = vpop.permute.xlu1 %14422 }
0x20e0   :  { %14425 = vst.msk [vmem:[#allocation4 + $0x10] sm:$0xff] %vm1714_vm4, %v14423_v1  ;;  %v14431_v23 = vsel %vm1714_vm4, %v14423_v1, 0  ;;  %v14931_v40 = vpop.permute.xlu0 %14930  ;;  %v25739_v1 = vpack.c.bf16 %v15943_v17, %v15940_v27  ;;  %v15930_v27 = vld [vmem:[#allocation3 + $0x18] sm:$0xff] }
0x20e1   :  { %v14500_v4 = vand.u32 4294901760, %v14431_v23  ;;  %v14932_v3 = vsel %vm1714_vm4, %v14931_v40, 0 }
0x20e2   :  { %v15001_v35 = vand.u32 4294901760, %v14932_v3 }
0x20e3   :  { %v14501_v50 = vsub.f32 %v14431_v23, %v14500_v4  ;;  %v16025_v23 = vsub.f32 %v15932_v45, %v15943_v17 }
0x20e4   :  { %v15002_v14 = vsub.f32 %v14932_v3, %v15001_v35  ;;  %v15518_v3 = vand.u32 4294901760, %v15517_v20 }
0x20e5   :  { %v14502_v51 = vand.u32 4294901760, %v14501_v50 }
0x20e6   :  { %v15003_v28 = vand.u32 4294901760, %v15002_v14 }
0x20e7   :  { %v14503_v26 = vsub.f32 %v14501_v50, %v14502_v51 }
0x20e8   :  { %v15004_v19 = vsub.f32 %v15002_v14, %v15003_v28 }
0x20e9   :  { %v14504_v31 = vand.u32 4294901760, %v14503_v26  ;;  %v15519_v26 = vsub.f32 %v15517_v20, %v15518_v3 }
0x20ea   :  { %v15005_v15 = vand.u32 4294901760, %v15004_v19 }
0x20eb   :  { %21974 = vmatmul.mubr.f32.vlgmr.msra.gmra.mrb[38].mxu0 %v14504_v31 }
0x20ec   :  { %22016 = vmatmul.mubr.f32.vlgmr.msra.gmra.mrb[38].mxu1 %v15005_v15  ;;  %22982 = vmatpush3.bf16.msra.mxu0 %v25409_v49 }
0x20ed   :  { %23000 = vmatpush3.bf16.msra.mxu1 %v25411_v5  ;;  %21980 = vmatprep.mubr.msk.f32.mxu0 %vm23881_vm1, %v23882_v42 }
0x20ee   :  { %22022 = vmatprep.mubr.msk.f32.mxu1 %vm23881_vm1, %v23882_v42  ;;  %22983 = vmatprep.subr.bf16.mxu0 %v23880_v36 }
0x20ef   :  { %23001 = vmatprep.subr.bf16.mxu1 %v23880_v36 }
0x20f3   :  { %21981 = vmatmul.mubr.f32.vlgmr.msra.gmra.mrb[38].mxu0 %v14500_v4 }
0x20f4   :  { %22023 = vmatmul.mubr.f32.vlgmr.msra.gmra.mrb[38].mxu1 %v15001_v35  ;;  %22985 = vmatpush3.bf16.msra.mxu0 %v25425_v46 }
0x20f5   :  { %23003 = vmatpush3.bf16.msra.mxu1 %v25429_v32  ;;  %21987 = vmatprep.mubr.msk.f32.mxu0 %vm23881_vm1, %v23882_v42 }
0x20f6   :  { %22029 = vmatprep.mubr.msk.f32.mxu1 %vm23881_vm1, %v23882_v42  ;;  %22986 = vmatprep.subr.bf16.mxu0 %v23880_v36 }
0x20f7   :  { %23004 = vmatprep.subr.bf16.mxu1 %v23880_v36 }
0x20fb   :  { %21988 = vmatmul.mubr.f32.vlgmr.msra.gmra.mrb[38].mxu0 %v14501_v50  ;;  %v16019_v50 = vand.u32 4294901760, %v16018_v60 }
0x20fc   :  { %22030 = vmatmul.mubr.f32.vlgmr.msra.gmra.mrb[38].mxu1 %v15002_v14  ;;  %22988 = vmatpush3.bf16.msra.mxu0 %v25375_v59 }
0x20fd   :  { %23006 = vmatpush3.bf16.msra.mxu1 %v25377_v63  ;;  %21994 = vmatprep.mubr.msk.f32.mxu0 %vm23881_vm1, %v23882_v42  ;;  %v16020_v31 = vsub.f32 %v16018_v60, %v16019_v50 }
0x20fe   :  { %22036 = vmatprep.mubr.msk.f32.mxu1 %vm23881_vm1, %v23882_v42  ;;  %22989 = vmatprep.subr.bf16.mxu0 %v23880_v36 }
0x20ff   :  { %23007 = vmatprep.subr.bf16.mxu1 %v23880_v36 }
0x2103   :  { %21995 = vmatmul.mubr.f32.vlgmr.msra.gmra.mrb[38].mxu0 %v14502_v51 }
0x2104   :  { %22037 = vmatmul.mubr.f32.vlgmr.msra.gmra.mrb[38].mxu1 %v15003_v28  ;;  %22991 = vmatpush3.bf16.msra.mxu0 %v25451_v29 }
0x2105   :  { %23009 = vmatpush3.bf16.msra.mxu1 %v25453_v22  ;;  %22001 = vmatprep.mubr.msk.f32.mxu0 %vm23881_vm1, %v23882_v42 }
0x2106   :  { %22043 = vmatprep.mubr.msk.f32.mxu1 %vm23881_vm1, %v23882_v42  ;;  %22992 = vmatprep.subr.bf16.mxu0 %v23880_v36 }
0x2107   :  { %23010 = vmatprep.subr.bf16.mxu1 %v23880_v36 }
0x210b   :  { %22002 = vmatmul.mubr.f32.vlgmr.msra.gmra.mrb[38].mxu0 %v14500_v4 }
0x210c   :  { %22044 = vmatmul.mubr.f32.vlgmr.msra.gmra.mrb[38].mxu1 %v15001_v35  ;;  %22994 = vmatpush3.bf16.msra.mxu0 %v25375_v59  ;;  %v14903_v59 = vpop.permute.xlu1 %14902 }
0x210d   :  { %23012 = vmatpush3.bf16.msra.mxu1 %v25377_v63  ;;  %22008 = vmatprep.mubr.msk.f32.mxu0 %vm23881_vm1, %v23882_v42  ;;  %v15404_v63 = vpop.permute.xlu0 %15403 }
0x210e   :  { %22050 = vmatprep.mubr.msk.f32.mxu1 %vm23881_vm1, %v23882_v42  ;;  %23013 = vmatprep.subr.bf16.mxu0 %v23880_v36 }
0x210f   :  { %23031 = vmatprep.subr.bf16.mxu1 %v23880_v36 }
0x2113   :  { %22009 = vmatmul.mubr.f32.vlgmr.msra.gmra.mrb[38].mxu0 %v14500_v4 }
0x2114   :  { %22051 = vmatmul.mubr.f32.vlgmr.msra.gmra.mrb[38].mxu1 %v15001_v35  ;;  %22057 = vmatprep.mubr.msk.f32.mxu0 %vm23881_vm1, %v23882_v42  ;;  %v15525_v35 = vand.u32 4294901760, %v15524_v53 }
0x2115   :  { %22099 = vmatprep.mubr.msk.f32.mxu1 %vm23881_vm1, %v23882_v42  ;;  %23015 = vmatpush3.bf16.msra.mxu0 %v25736_v43 }
0x2116   :  { %23033 = vmatpush3.bf16.msra.mxu1 %v25739_v1  ;;  %23016 = vmatprep.subr.bf16.mxu0 %v23880_v36  ;;  %v15526_v19 = vsub.f32 %v15524_v53, %v15525_v35 }
0x2117   :  { %23034 = vmatprep.subr.bf16.mxu1 %v23880_v36 }
0x21e6   :  { %v14888_v49 = vpop.f32.mrb[38].mxu0 }
0x21e7   :  { %v14905_v5 = vadd.f32 %v14903_v59, %v14888_v49  ;;  %v15389_v46 = vpop.f32.mrb[38].mxu1  ;;  %v22010_v32 = vpop.f32.mrb[39].mxu0  ;;  %v14892_v18 = vadd.f32 %v14888_v49, %v14427_v6  ;;  %v16021_v49 = vand.u32 4294901760, %v16020_v31 }
0x21e8   :  { %v15406_v29 = vadd.f32 %v15404_v63, %v15389_v46  ;;  %v22052_v22 = vpop.f32.mrb[39].mxu1  ;;  %v15393_v25 = vadd.f32 %v15389_v46, %v14925_v58  ;;  %v15527_v63 = vand.u32 4294901760, %v15526_v19 }
0x21e9   :  { %14907 = vrot.lane.b32.xlu1 %v14905_v5, %s23883_s20  ;;  %v14893_v55 = vmul.f32 0.5, %v14892_v18  ;;  %v25762_v22 = vpack.c.bf16 %v16025_v23, %v16018_v60 }
0x21ea   :  { %15408 = vrot.lane.b32.xlu0 %v15406_v29, %s23883_s20  ;;  %v15394_v13 = vmul.f32 0.5, %v15393_v25  ;;  %v25760_v29 = vpack.c.bf16 %v15524_v53, %v15517_v20  ;;  %v25776_v25 = vld [vmem:[%s26198_s8 + $0x1] ss:$0 sm:$0xff] }
0x21eb   :  { %23767 = vtanh.f32 %v14893_v55 }
0x21ec   :  { %23769 = vtanh.f32 %v15394_v13 }
0x21f5   :  { %v23768_v30 = vpop.eup %23767 }
0x21f6   :  { %v23770_v37 = vpop.eup %23769  ;;  %v14895_v9 = vmul.f32 0.5, %v23768_v30 }
0x21f7   :  { %v15396_v8 = vmul.f32 0.5, %v23770_v37 }
0x21f8   :  { %v14896_v44 = vadd.f32 0.5, %v14895_v9 }
0x21f9   :  { %v15397_v2 = vadd.f32 0.5, %v15396_v8 }
0x21fa   :  { %v14917_v16 = vsub.f32 1.0, %v14896_v44  ;;  %v14923_v61 = vmul.f32 %v14896_v44, %v25659_v54  ;;  %v16026_v54 = vand.u32 4294901760, %v16025_v23 }
0x21fb   :  { %v15418_v0 = vsub.f32 1.0, %v15397_v2  ;;  %v15424_v14 = vmul.f32 %v15397_v2, %v25661_v56  ;;  %v15520_v56 = vand.u32 4294901760, %v15519_v26 }
0x21fc   :  { %v16027_v59 = vsub.f32 %v16025_v23, %v16026_v54  ;;  %v25766_v18 = vpack.c.bf16 %v16026_v54, %v16019_v50 }
0x21fd   :  { %v25756_v46 = vpack.c.bf16 %v15527_v63, %v15520_v56 }
0x21fe   :  { %v16028_v5 = vand.u32 4294901760, %v16027_v59 }
0x2200   :  { %v25758_v32 = vpack.c.bf16 %v16028_v5, %v16021_v49 }
0x225b   :  { %v14908_v11 = vpop.permute.xlu1 %14907 }
0x225c   :  { %v14910_v48 = vmul.f32 %v14908_v11, %v14896_v44  ;;  %v15409_v41 = vpop.permute.xlu0 %15408 }
0x225d   :  { %v15411_v38 = vmul.f32 %v15409_v41, %v15397_v2 }
0x225e   :  { %14912 = vrot.lane.b32.xlu1 %v14910_v48, %s23879_s27 }
0x225f   :  { %15413 = vrot.lane.b32.xlu0 %v15411_v38, %s23879_s27 }
0x22d0   :  { %v14913_v47 = vpop.permute.xlu1 %14912 }
0x22d1   :  { %v14915_v34 = vadd.f32 %v14913_v47, %v14427_v6  ;;  %v15414_v33 = vpop.permute.xlu0 %15413  ;;  %v25764_v6 = vpack.c.bf16 %v15525_v35, %v15518_v3 }
0x22d2   :  { %v15416_v24 = vadd.f32 %v15414_v33, %v14925_v58  ;;  %v25771_v58 = vld [vmem:[%s26197_s7 + $0x1] ss:$0 sm:$0xff] }
0x22d3   :  { %23771 = vtanh.f32 %v14915_v34 }
0x22d4   :  { %23773 = vtanh.f32 %v15416_v24 }
0x22dd   :  { %v23772_v39 = vpop.eup %23771 }
0x22de   :  { %v23774_v52 = vpop.eup %23773  ;;  %14919 = vrot.lane.b32.xlu1 %v23772_v39, %s23884_s21 }
0x22df   :  { %15420 = vrot.lane.b32.xlu0 %v23774_v52, %s23884_s21 }
0x2350   :  { %v14920_v62 = vpop.permute.xlu1 %14919 }
0x2351   :  { %v14922_v40 = vmul.f32 %v14920_v62, %v14917_v16  ;;  %v15421_v4 = vpop.permute.xlu0 %15420 }
0x2352   :  { %v15423_v51 = vmul.f32 %v15421_v4, %v15418_v0 }
0x2353   :  { %v25745_v28 = vadd.f32 %v14923_v61, %v14922_v40 }
0x2354   :  { %v25748_v15 = vadd.f32 %v15424_v14, %v15423_v51 }
0x2355   :  { %15427 = vrot.lane.b32.xlu1 %v25745_v28, %s23884_s21 }
0x2356   :  { %15431 = vst.msk [vmem:[#allocation4 + $0x20] sm:$0xff] %vm2713_vm3, %v25748_v15  ;;  %15935 = vrot.lane.b32.xlu0 %v25748_v15, %s23884_s21 }
0x2359   :  { %15907 = vrot.lane.b32.xlu1 %v25771_v58, %s23879_s27 }
0x235a   :  { %16408 = vrot.lane.b32.xlu0 %v25776_v25, %s23879_s27 }
0x23c7   :  { %v15428_v55 = vpop.permute.xlu1 %15427 }
0x23c8   :  { %15430 = vst.msk [vmem:[#allocation4 + $0x18] sm:$0xff] %vm1714_vm4, %v15428_v55  ;;  %v15436_v13 = vsel %vm1714_vm4, %v15428_v55, 0  ;;  %v15936_v30 = vpop.permute.xlu0 %15935 }
0x23c9   :  { %v15505_v37 = vand.u32 4294901760, %v15436_v13  ;;  %v15937_v9 = vsel %vm1714_vm4, %v15936_v30, 0 }
0x23ca   :  { %v16006_v8 = vand.u32 4294901760, %v15937_v9 }
0x23cb   :  { %v15506_v44 = vsub.f32 %v15436_v13, %v15505_v37  ;;  %v15908_v33 = vpop.permute.xlu1 %15907 }
0x23cc   :  { %v16007_v11 = vsub.f32 %v15937_v9, %v16006_v8  ;;  %v16409_v24 = vpop.permute.xlu0 %16408 }
0x23cd   :  { %v15507_v2 = vand.u32 4294901760, %v15506_v44 }
0x23ce   :  { %v16008_v48 = vand.u32 4294901760, %v16007_v11 }
0x23cf   :  { %v15508_v41 = vsub.f32 %v15506_v44, %v15507_v2 }
0x23d0   :  { %v16009_v38 = vsub.f32 %v16007_v11, %v16008_v48 }
0x23d1   :  { %v15509_v47 = vand.u32 4294901760, %v15508_v41 }
0x23d2   :  { %v16010_v34 = vand.u32 4294901760, %v16009_v38 }
0x23d3   :  { %22058 = vmatmul.mubr.f32.vlgmr.msra.gmra.mrb[40].mxu0 %v15509_v47 }
0x23d4   :  { %22100 = vmatmul.mubr.f32.vlgmr.msra.gmra.mrb[40].mxu1 %v16010_v34  ;;  %23018 = vmatpush3.bf16.msra.mxu0 %v25756_v46 }
0x23d5   :  { %23036 = vmatpush3.bf16.msra.mxu1 %v25758_v32  ;;  %22064 = vmatprep.mubr.msk.f32.mxu0 %vm23881_vm1, %v23882_v42 }
0x23d6   :  { %22106 = vmatprep.mubr.msk.f32.mxu1 %vm23881_vm1, %v23882_v42  ;;  %23019 = vmatprep.subr.bf16.mxu0 %v23880_v36 }
0x23d7   :  { %23037 = vmatprep.subr.bf16.mxu1 %v23880_v36 }
0x23db   :  { %22065 = vmatmul.mubr.f32.vlgmr.msra.gmra.mrb[40].mxu0 %v15505_v37 }
0x23dc   :  { %22107 = vmatmul.mubr.f32.vlgmr.msra.gmra.mrb[40].mxu1 %v16006_v8  ;;  %23021 = vmatpush3.bf16.msra.mxu0 %v25760_v29 }
0x23dd   :  { %23039 = vmatpush3.bf16.msra.mxu1 %v25762_v22  ;;  %22071 = vmatprep.mubr.msk.f32.mxu0 %vm23881_vm1, %v23882_v42 }
0x23de   :  { %22113 = vmatprep.mubr.msk.f32.mxu1 %vm23881_vm1, %v23882_v42  ;;  %23022 = vmatprep.subr.bf16.mxu0 %v23880_v36 }
0x23df   :  { %23040 = vmatprep.subr.bf16.mxu1 %v23880_v36 }
0x23e3   :  { %22072 = vmatmul.mubr.f32.vlgmr.msra.gmra.mrb[40].mxu0 %v15506_v44 }
0x23e4   :  { %22114 = vmatmul.mubr.f32.vlgmr.msra.gmra.mrb[40].mxu1 %v16007_v11  ;;  %23024 = vmatpush3.bf16.msra.mxu0 %v25736_v43 }
0x23e5   :  { %23042 = vmatpush3.bf16.msra.mxu1 %v25739_v1  ;;  %22078 = vmatprep.mubr.msk.f32.mxu0 %vm23881_vm1, %v23882_v42 }
0x23e6   :  { %22120 = vmatprep.mubr.msk.f32.mxu1 %vm23881_vm1, %v23882_v42  ;;  %23025 = vmatprep.subr.bf16.mxu0 %v23880_v36 }
0x23e7   :  { %23043 = vmatprep.subr.bf16.mxu1 %v23880_v36 }
0x23eb   :  { %22079 = vmatmul.mubr.f32.vlgmr.msra.gmra.mrb[40].mxu0 %v15507_v2 }
0x23ec   :  { %22121 = vmatmul.mubr.f32.vlgmr.msra.gmra.mrb[40].mxu1 %v16008_v48  ;;  %23027 = vmatpush3.bf16.msra.mxu0 %v25764_v6 }
0x23ed   :  { %23045 = vmatpush3.bf16.msra.mxu1 %v25766_v18  ;;  %22085 = vmatprep.mubr.msk.f32.mxu0 %vm23881_vm1, %v23882_v42 }
0x23ee   :  { %22127 = vmatprep.mubr.msk.f32.mxu1 %vm23881_vm1, %v23882_v42  ;;  %23028 = vmatprep.subr.bf16.mxu0 %v23880_v36 }
0x23ef   :  { %23046 = vmatprep.subr.bf16.mxu1 %v23880_v36 }
0x23f3   :  { %22086 = vmatmul.mubr.f32.vlgmr.msra.gmra.mrb[40].mxu0 %v15505_v37 }
0x23f4   :  { %22128 = vmatmul.mubr.f32.vlgmr.msra.gmra.mrb[40].mxu1 %v16006_v8  ;;  %23030 = vmatpush3.bf16.msra.mxu0 %v25736_v43 }
0x23f5   :  { %23048 = vmatpush3.bf16.msra.mxu1 %v25739_v1  ;;  %22092 = vmatprep.mubr.msk.f32.mxu0 %vm23881_vm1, %v23882_v42 }
0x23f6   :  { %22134 = vmatprep.mubr.msk.f32.mxu1 %vm23881_vm1, %v23882_v42  ;;  %23049 = vmatprep.subr.bf16.mxu0 %v23880_v36 }
0x23f7   :  { %23067 = vmatprep.subr.bf16.mxu1 %v23880_v36 }
0x23fb   :  { %22093 = vmatmul.mubr.f32.vlgmr.msra.gmra.mrb[40].mxu0 %v15505_v37 }
0x23fc   :  { %22135 = vmatmul.mubr.f32.vlgmr.msra.gmra.mrb[40].mxu1 %v16006_v8  ;;  %23051 = vmatpush3.bf16.msra.mxu0 %v25736_v43 }
0x23fd   :  { %23069 = vmatpush3.bf16.msra.mxu1 %v25739_v1  ;;  %22141 = vmatprep.mubr.msk.f32.mxu0 %vm23881_vm1, %v23882_v42 }
0x23fe   :  { %22183 = vmatprep.mubr.msk.f32.mxu1 %vm23881_vm1, %v23882_v42  ;;  %23052 = vmatprep.subr.bf16.mxu0 %v23880_v36 }
0x23ff   :  { %23070 = vmatprep.subr.bf16.mxu1 %v23880_v36 }
0x24ce   :  { %v15893_v39 = vpop.f32.mrb[40].mxu0 }
0x24cf   :  { %v15910_v52 = vadd.f32 %v15908_v33, %v15893_v39  ;;  %v16394_v57 = vpop.f32.mrb[40].mxu1  ;;  %v22094_v10 = vpop.f32.mrb[41].mxu0  ;;  %v15897_v45 = vadd.f32 %v15893_v39, %v15432_v21 }
0x24d0   :  { %v16411_v12 = vadd.f32 %v16409_v24, %v16394_v57  ;;  %v22136_v7 = vpop.f32.mrb[41].mxu1  ;;  %v16398_v16 = vadd.f32 %v16394_v57, %v15930_v27 }
0x24d1   :  { %15912 = vrot.lane.b32.xlu1 %v15910_v52, %s23883_s20  ;;  %v15898_v17 = vmul.f32 0.5, %v15897_v45 }
0x24d2   :  { %16413 = vrot.lane.b32.xlu0 %v16411_v12, %s23883_s20  ;;  %v16399_v20 = vmul.f32 0.5, %v16398_v16 }
0x24d3   :  { %23775 = vtanh.f32 %v15898_v17  ;;  %v16935_v17 = vld [vmem:[#allocation3 + $0x10] sm:$0xff] }
0x24d4   :  { %23777 = vtanh.f32 %v16399_v20 }
0x24dd   :  { %v23776_v53 = vpop.eup %23775 }
0x24de   :  { %v23778_v60 = vpop.eup %23777  ;;  %v15900_v61 = vmul.f32 0.5, %v23776_v53 }
0x24df   :  { %v16401_v62 = vmul.f32 0.5, %v23778_v60 }
0x24e0   :  { %v15901_v0 = vadd.f32 0.5, %v15900_v61 }
0x24e1   :  { %v16402_v40 = vadd.f32 0.5, %v16401_v62 }
0x24e2   :  { %v15922_v31 = vsub.f32 1.0, %v15901_v0  ;;  %v15928_v63 = vmul.f32 %v15901_v0, %v25745_v28 }
0x24e3   :  { %v16423_v56 = vsub.f32 1.0, %v16402_v40  ;;  %v16429_v55 = vmul.f32 %v16402_v40, %v25748_v15 }
0x2543   :  { %v15913_v23 = vpop.permute.xlu1 %15912 }
0x2544   :  { %v15915_v4 = vmul.f32 %v15913_v23, %v15901_v0  ;;  %v16414_v3 = vpop.permute.xlu0 %16413 }
0x2545   :  { %v16416_v35 = vmul.f32 %v16414_v3, %v16402_v40 }
0x2546   :  { %15917 = vrot.lane.b32.xlu1 %v15915_v4, %s23879_s27 }
0x2547   :  { %16418 = vrot.lane.b32.xlu0 %v16416_v35, %s23879_s27 }
0x25b8   :  { %v15918_v50 = vpop.permute.xlu1 %15917 }
0x25b9   :  { %v15920_v14 = vadd.f32 %v15918_v50, %v15432_v21  ;;  %v16419_v51 = vpop.permute.xlu0 %16418 }
0x25ba   :  { %v16421_v54 = vadd.f32 %v16419_v51, %v15930_v27  ;;  %v16437_v27 = vld [vmem:[#allocation2 + $0x28] sm:$0xff] }
0x25bb   :  { %23779 = vtanh.f32 %v15920_v14 }
0x25bc   :  { %23781 = vtanh.f32 %v16421_v54 }
0x25c5   :  { %v23780_v26 = vpop.eup %23779 }
0x25c6   :  { %v23782_v19 = vpop.eup %23781  ;;  %15924 = vrot.lane.b32.xlu1 %v23780_v26, %s23884_s21 }
0x25c7   :  { %16425 = vrot.lane.b32.xlu0 %v23782_v19, %s23884_s21 }
0x2638   :  { %v15925_v59 = vpop.permute.xlu1 %15924 }
0x2639   :  { %v15927_v49 = vmul.f32 %v15925_v59, %v15922_v31  ;;  %v16426_v5 = vpop.permute.xlu0 %16425 }
0x263a   :  { %v16428_v13 = vmul.f32 %v16426_v5, %v16423_v56 }
0x263b   :  { %v25841_v30 = vadd.f32 %v15928_v63, %v15927_v49 }
0x263c   :  { %v25843_v37 = vadd.f32 %v16429_v55, %v16428_v13 }
0x263d   :  { %16432 = vrot.lane.b32.xlu1 %v25841_v30, %s23884_s21 }
0x263e   :  { %16436 = vst.msk [vmem:[#allocation4 + $0x18] sm:$0xff] %vm2713_vm3, %v25843_v37  ;;  %16940 = vrot.lane.b32.xlu0 %v25843_v37, %s23884_s21 }
0x2641   :  { %16912 = vrot.lane.b32.xlu1 %v25771_v58, %s23879_s27 }
0x2642   :  { %17413 = vrot.lane.b32.xlu0 %v25776_v25, %s23879_s27 }
0x26af   :  { %v16433_v28 = vpop.permute.xlu1 %16432 }
0x26b0   :  { %16435 = vst.msk [vmem:[#allocation4 + $0x20] sm:$0xff] %vm1714_vm4, %v16433_v28  ;;  %v16441_v15 = vsel %vm1714_vm4, %v16433_v28, 0  ;;  %v16941_v9 = vpop.permute.xlu0 %16940 }
0x26b1   :  { %v16510_v8 = vand.u32 4294901760, %v16441_v15  ;;  %v16942_v44 = vsel %vm1714_vm4, %v16941_v9, 0 }
0x26b2   :  { %v17011_v11 = vand.u32 4294901760, %v16942_v44 }
0x26b3   :  { %v16511_v2 = vsub.f32 %v16441_v15, %v16510_v8  ;;  %v16913_v39 = vpop.permute.xlu1 %16912 }
0x26b4   :  { %v17012_v48 = vsub.f32 %v16942_v44, %v17011_v11  ;;  %v17414_v52 = vpop.permute.xlu0 %17413 }
0x26b5   :  { %v16512_v41 = vand.u32 4294901760, %v16511_v2 }
0x26b6   :  { %v17013_v38 = vand.u32 4294901760, %v17012_v48 }
0x26b7   :  { %v16513_v47 = vsub.f32 %v16511_v2, %v16512_v41 }
0x26b8   :  { %v17014_v34 = vsub.f32 %v17012_v48, %v17013_v38 }
0x26b9   :  { %v16514_v33 = vand.u32 4294901760, %v16513_v47 }
0x26ba   :  { %v17015_v24 = vand.u32 4294901760, %v17014_v34 }
0x26bb   :  { %22142 = vmatmul.mubr.f32.vlgmr.msra.gmra.mrb[42].mxu0 %v16514_v33 }
0x26bc   :  { %22184 = vmatmul.mubr.f32.vlgmr.msra.gmra.mrb[42].mxu1 %v17015_v24  ;;  %23054 = vmatpush3.bf16.msra.mxu0 %v25756_v46 }
0x26bd   :  { %23072 = vmatpush3.bf16.msra.mxu1 %v25758_v32  ;;  %22148 = vmatprep.mubr.msk.f32.mxu0 %vm23881_vm1, %v23882_v42 }
0x26be   :  { %22190 = vmatprep.mubr.msk.f32.mxu1 %vm23881_vm1, %v23882_v42  ;;  %23055 = vmatprep.subr.bf16.mxu0 %v23880_v36 }
0x26bf   :  { %23073 = vmatprep.subr.bf16.mxu1 %v23880_v36 }
0x26c3   :  { %22149 = vmatmul.mubr.f32.vlgmr.msra.gmra.mrb[42].mxu0 %v16510_v8 }
0x26c4   :  { %22191 = vmatmul.mubr.f32.vlgmr.msra.gmra.mrb[42].mxu1 %v17011_v11  ;;  %23057 = vmatpush3.bf16.msra.mxu0 %v25760_v29 }
0x26c5   :  { %23075 = vmatpush3.bf16.msra.mxu1 %v25762_v22  ;;  %22155 = vmatprep.mubr.msk.f32.mxu0 %vm23881_vm1, %v23882_v42 }
0x26c6   :  { %22197 = vmatprep.mubr.msk.f32.mxu1 %vm23881_vm1, %v23882_v42  ;;  %23058 = vmatprep.subr.bf16.mxu0 %v23880_v36 }
0x26c7   :  { %23076 = vmatprep.subr.bf16.mxu1 %v23880_v36 }
0x26cb   :  { %22156 = vmatmul.mubr.f32.vlgmr.msra.gmra.mrb[42].mxu0 %v16511_v2 }
0x26cc   :  { %22198 = vmatmul.mubr.f32.vlgmr.msra.gmra.mrb[42].mxu1 %v17012_v48  ;;  %23060 = vmatpush3.bf16.msra.mxu0 %v25736_v43 }
0x26cd   :  { %23078 = vmatpush3.bf16.msra.mxu1 %v25739_v1  ;;  %22162 = vmatprep.mubr.msk.f32.mxu0 %vm23881_vm1, %v23882_v42 }
0x26ce   :  { %22204 = vmatprep.mubr.msk.f32.mxu1 %vm23881_vm1, %v23882_v42  ;;  %23061 = vmatprep.subr.bf16.mxu0 %v23880_v36 }
0x26cf   :  { %23079 = vmatprep.subr.bf16.mxu1 %v23880_v36 }
0x26d3   :  { %22163 = vmatmul.mubr.f32.vlgmr.msra.gmra.mrb[42].mxu0 %v16512_v41 }
0x26d4   :  { %22205 = vmatmul.mubr.f32.vlgmr.msra.gmra.mrb[42].mxu1 %v17013_v38  ;;  %23063 = vmatpush3.bf16.msra.mxu0 %v25764_v6 }
0x26d5   :  { %23081 = vmatpush3.bf16.msra.mxu1 %v25766_v18  ;;  %22169 = vmatprep.mubr.msk.f32.mxu0 %vm23881_vm1, %v23882_v42 }
0x26d6   :  { %22211 = vmatprep.mubr.msk.f32.mxu1 %vm23881_vm1, %v23882_v42  ;;  %23064 = vmatprep.subr.bf16.mxu0 %v23880_v36 }
0x26d7   :  { %23082 = vmatprep.subr.bf16.mxu1 %v23880_v36 }
0x26db   :  { %22170 = vmatmul.mubr.f32.vlgmr.msra.gmra.mrb[42].mxu0 %v16510_v8 }
0x26dc   :  { %22212 = vmatmul.mubr.f32.vlgmr.msra.gmra.mrb[42].mxu1 %v17011_v11  ;;  %23066 = vmatpush3.bf16.msra.mxu0 %v25736_v43 }
0x26dd   :  { %23084 = vmatpush3.bf16.msra.mxu1 %v25739_v1  ;;  %22176 = vmatprep.mubr.msk.f32.mxu0 %vm23881_vm1, %v23882_v42 }
0x26de   :  { %22218 = vmatprep.mubr.msk.f32.mxu1 %vm23881_vm1, %v23882_v42  ;;  %23085 = vmatprep.subr.bf16.mxu0 %v23880_v36 }
0x26df   :  { %23103 = vmatprep.subr.bf16.mxu1 %v23880_v36 }
0x26e3   :  { %22177 = vmatmul.mubr.f32.vlgmr.msra.gmra.mrb[42].mxu0 %v16510_v8 }
0x26e4   :  { %22219 = vmatmul.mubr.f32.vlgmr.msra.gmra.mrb[42].mxu1 %v17011_v11  ;;  %23087 = vmatpush3.bf16.msra.mxu0 %v25736_v43 }
0x26e5   :  { %23105 = vmatpush3.bf16.msra.mxu1 %v25739_v1  ;;  %22225 = vmatprep.mubr.msk.f32.mxu0 %vm23881_vm1, %v23882_v42 }
0x26e6   :  { %22267 = vmatprep.mubr.msk.f32.mxu1 %vm23881_vm1, %v23882_v42  ;;  %23088 = vmatprep.subr.bf16.mxu0 %v23880_v36 }
0x26e7   :  { %23106 = vmatprep.subr.bf16.mxu1 %v23880_v36 }
0x27b6   :  { %v16898_v57 = vpop.f32.mrb[42].mxu0 }
0x27b7   :  { %v16915_v10 = vadd.f32 %v16913_v39, %v16898_v57  ;;  %v17399_v12 = vpop.f32.mrb[42].mxu1  ;;  %v22178_v7 = vpop.f32.mrb[43].mxu0  ;;  %v16902_v16 = vadd.f32 %v16898_v57, %v16437_v27 }
0x27b8   :  { %v17416_v21 = vadd.f32 %v17414_v52, %v17399_v12  ;;  %v22220_v45 = vpop.f32.mrb[43].mxu1  ;;  %v17403_v20 = vadd.f32 %v17399_v12, %v16935_v17 }
0x27b9   :  { %16917 = vrot.lane.b32.xlu1 %v16915_v10, %s23883_s20  ;;  %v16903_v53 = vmul.f32 0.5, %v16902_v16 }
0x27ba   :  { %17418 = vrot.lane.b32.xlu0 %v17416_v21, %s23883_s20  ;;  %v17404_v60 = vmul.f32 0.5, %v17403_v20 }
0x27bb   :  { %23783 = vtanh.f32 %v16903_v53  ;;  %v17940_v53 = vld [vmem:[#allocation3 + $0x8] sm:$0xff] }
0x27bc   :  { %23785 = vtanh.f32 %v17404_v60 }
0x27c5   :  { %v23784_v61 = vpop.eup %23783 }
0x27c6   :  { %v23786_v62 = vpop.eup %23785  ;;  %v16905_v0 = vmul.f32 0.5, %v23784_v61 }
0x27c7   :  { %v17406_v23 = vmul.f32 0.5, %v23786_v62 }
0x27c8   :  { %v16906_v40 = vadd.f32 0.5, %v16905_v0 }
0x27c9   :  { %v17407_v3 = vadd.f32 0.5, %v17406_v23 }
0x27ca   :  { %v16927_v56 = vsub.f32 1.0, %v16906_v40  ;;  %v16933_v5 = vmul.f32 %v16906_v40, %v25841_v30 }
0x27cb   :  { %v17428_v49 = vsub.f32 1.0, %v17407_v3  ;;  %v17434_v28 = vmul.f32 %v17407_v3, %v25843_v37 }
0x282b   :  { %v16918_v4 = vpop.permute.xlu1 %16917 }
0x282c   :  { %v16920_v35 = vmul.f32 %v16918_v4, %v16906_v40  ;;  %v17419_v50 = vpop.permute.xlu0 %17418 }
0x282d   :  { %v17421_v14 = vmul.f32 %v17419_v50, %v17407_v3 }
0x282e   :  { %16922 = vrot.lane.b32.xlu1 %v16920_v35, %s23879_s27 }
0x282f   :  { %17423 = vrot.lane.b32.xlu0 %v17421_v14, %s23879_s27 }
0x28a0   :  { %v16923_v51 = vpop.permute.xlu1 %16922 }
0x28a1   :  { %v16925_v54 = vadd.f32 %v16923_v51, %v16437_v27  ;;  %v17424_v26 = vpop.permute.xlu0 %17423 }
0x28a2   :  { %v17426_v19 = vadd.f32 %v17424_v26, %v16935_v17  ;;  %v17442_v17 = vld [vmem:[#allocation2 + $0x30] sm:$0xff] }
0x28a3   :  { %23787 = vtanh.f32 %v16925_v54 }
0x28a4   :  { %23789 = vtanh.f32 %v17426_v19 }
0x28ad   :  { %v23788_v31 = vpop.eup %23787 }
0x28ae   :  { %v23790_v59 = vpop.eup %23789  ;;  %16929 = vrot.lane.b32.xlu1 %v23788_v31, %s23884_s21 }
0x28af   :  { %17430 = vrot.lane.b32.xlu0 %v23790_v59, %s23884_s21 }
0x2920   :  { %v16930_v63 = vpop.permute.xlu1 %16929 }
0x2921   :  { %v16932_v55 = vmul.f32 %v16930_v63, %v16927_v56  ;;  %v17431_v13 = vpop.permute.xlu0 %17430 }
0x2922   :  { %v17433_v15 = vmul.f32 %v17431_v13, %v17428_v49 }
0x2923   :  { %v25914_v9 = vadd.f32 %v16933_v5, %v16932_v55 }
0x2924   :  { %v25916_v8 = vadd.f32 %v17434_v28, %v17433_v15 }
0x2925   :  { %17437 = vrot.lane.b32.xlu1 %v25914_v9, %s23884_s21 }
0x2926   :  { %17441 = vst.msk [vmem:[#allocation4 + $0x10] sm:$0xff] %vm2713_vm3, %v25916_v8  ;;  %17945 = vrot.lane.b32.xlu0 %v25916_v8, %s23884_s21 }
0x2929   :  { %17917 = vrot.lane.b32.xlu1 %v25771_v58, %s23879_s27 }
0x292a   :  { %18418 = vrot.lane.b32.xlu0 %v25776_v25, %s23879_s27 }
0x2997   :  { %v17438_v30 = vpop.permute.xlu1 %17437 }
0x2998   :  { %17440 = vst.msk [vmem:[#allocation4 + $0x28] sm:$0xff] %vm1714_vm4, %v17438_v30  ;;  %v17446_v37 = vsel %vm1714_vm4, %v17438_v30, 0  ;;  %v17946_v44 = vpop.permute.xlu0 %17945 }
0x2999   :  { %v17515_v11 = vand.u32 4294901760, %v17446_v37  ;;  %v17947_v2 = vsel %vm1714_vm4, %v17946_v44, 0 }
0x299a   :  { %v18016_v48 = vand.u32 4294901760, %v17947_v2 }
0x299b   :  { %v17516_v41 = vsub.f32 %v17446_v37, %v17515_v11  ;;  %v17918_v57 = vpop.permute.xlu1 %17917 }
0x299c   :  { %v18017_v38 = vsub.f32 %v17947_v2, %v18016_v48  ;;  %v18419_v10 = vpop.permute.xlu0 %18418 }
0x299d   :  { %v17517_v47 = vand.u32 4294901760, %v17516_v41 }
0x299e   :  { %v18018_v34 = vand.u32 4294901760, %v18017_v38 }
0x299f   :  { %v17518_v33 = vsub.f32 %v17516_v41, %v17517_v47 }
0x29a0   :  { %v18019_v24 = vsub.f32 %v18017_v38, %v18018_v34 }
0x29a1   :  { %v17519_v39 = vand.u32 4294901760, %v17518_v33 }
0x29a2   :  { %v18020_v52 = vand.u32 4294901760, %v18019_v24 }
0x29a3   :  { %22226 = vmatmul.mubr.f32.vlgmr.msra.gmra.mrb[44].mxu0 %v17519_v39 }
0x29a4   :  { %22268 = vmatmul.mubr.f32.vlgmr.msra.gmra.mrb[44].mxu1 %v18020_v52  ;;  %23090 = vmatpush3.bf16.msra.mxu0 %v25756_v46 }
0x29a5   :  { %23108 = vmatpush3.bf16.msra.mxu1 %v25758_v32  ;;  %22232 = vmatprep.mubr.msk.f32.mxu0 %vm23881_vm1, %v23882_v42 }
0x29a6   :  { %22274 = vmatprep.mubr.msk.f32.mxu1 %vm23881_vm1, %v23882_v42  ;;  %23091 = vmatprep.subr.bf16.mxu0 %v23880_v36 }
0x29a7   :  { %23109 = vmatprep.subr.bf16.mxu1 %v23880_v36 }
0x29ab   :  { %22233 = vmatmul.mubr.f32.vlgmr.msra.gmra.mrb[44].mxu0 %v17515_v11 }
0x29ac   :  { %22275 = vmatmul.mubr.f32.vlgmr.msra.gmra.mrb[44].mxu1 %v18016_v48  ;;  %23093 = vmatpush3.bf16.msra.mxu0 %v25760_v29 }
0x29ad   :  { %23111 = vmatpush3.bf16.msra.mxu1 %v25762_v22  ;;  %22239 = vmatprep.mubr.msk.f32.mxu0 %vm23881_vm1, %v23882_v42 }
0x29ae   :  { %22281 = vmatprep.mubr.msk.f32.mxu1 %vm23881_vm1, %v23882_v42  ;;  %23094 = vmatprep.subr.bf16.mxu0 %v23880_v36 }
0x29af   :  { %23112 = vmatprep.subr.bf16.mxu1 %v23880_v36 }
0x29b3   :  { %22240 = vmatmul.mubr.f32.vlgmr.msra.gmra.mrb[44].mxu0 %v17516_v41 }
0x29b4   :  { %22282 = vmatmul.mubr.f32.vlgmr.msra.gmra.mrb[44].mxu1 %v18017_v38  ;;  %23096 = vmatpush3.bf16.msra.mxu0 %v25736_v43 }
0x29b5   :  { %23114 = vmatpush3.bf16.msra.mxu1 %v25739_v1  ;;  %22246 = vmatprep.mubr.msk.f32.mxu0 %vm23881_vm1, %v23882_v42 }
0x29b6   :  { %22288 = vmatprep.mubr.msk.f32.mxu1 %vm23881_vm1, %v23882_v42  ;;  %23097 = vmatprep.subr.bf16.mxu0 %v23880_v36 }
0x29b7   :  { %23115 = vmatprep.subr.bf16.mxu1 %v23880_v36 }
0x29bb   :  { %22247 = vmatmul.mubr.f32.vlgmr.msra.gmra.mrb[44].mxu0 %v17517_v47 }
0x29bc   :  { %22289 = vmatmul.mubr.f32.vlgmr.msra.gmra.mrb[44].mxu1 %v18018_v34  ;;  %23099 = vmatpush3.bf16.msra.mxu0 %v25764_v6 }
0x29bd   :  { %23117 = vmatpush3.bf16.msra.mxu1 %v25766_v18  ;;  %22253 = vmatprep.mubr.msk.f32.mxu0 %vm23881_vm1, %v23882_v42 }
0x29be   :  { %22295 = vmatprep.mubr.msk.f32.mxu1 %vm23881_vm1, %v23882_v42  ;;  %23100 = vmatprep.subr.bf16.mxu0 %v23880_v36 }
0x29bf   :  { %23118 = vmatprep.subr.bf16.mxu1 %v23880_v36 }
0x29c3   :  { %22254 = vmatmul.mubr.f32.vlgmr.msra.gmra.mrb[44].mxu0 %v17515_v11 }
0x29c4   :  { %22296 = vmatmul.mubr.f32.vlgmr.msra.gmra.mrb[44].mxu1 %v18016_v48  ;;  %23102 = vmatpush3.bf16.msra.mxu0 %v25736_v43 }
0x29c5   :  { %23120 = vmatpush3.bf16.msra.mxu1 %v25739_v1  ;;  %22260 = vmatprep.mubr.msk.f32.mxu0 %vm23881_vm1, %v23882_v42 }
0x29c6   :  { %22302 = vmatprep.mubr.msk.f32.mxu1 %vm23881_vm1, %v23882_v42  ;;  %23121 = vmatprep.subr.bf16.mxu0 %v23880_v36 }
0x29c7   :  { %23139 = vmatprep.subr.bf16.mxu1 %v23880_v36 }
0x29cb   :  { %22261 = vmatmul.mubr.f32.vlgmr.msra.gmra.mrb[44].mxu0 %v17515_v11 }
0x29cc   :  { %22303 = vmatmul.mubr.f32.vlgmr.msra.gmra.mrb[44].mxu1 %v18016_v48  ;;  %23123 = vmatpush3.bf16.msra.mxu0 %v25736_v43 }
0x29cd   :  { %23141 = vmatpush3.bf16.msra.mxu1 %v25739_v1  ;;  %22309 = vmatprep.mubr.msk.f32.mxu0 %vm23881_vm1, %v23882_v42 }
0x29ce   :  { %22351 = vmatprep.mubr.msk.f32.mxu1 %vm23881_vm1, %v23882_v42  ;;  %23124 = vmatprep.subr.bf16.mxu0 %v23880_v36 }
0x29cf   :  { %23142 = vmatprep.subr.bf16.mxu1 %v23880_v36 }
0x2a9e   :  { %v17903_v12 = vpop.f32.mrb[44].mxu0 }
0x2a9f   :  { %v17920_v7 = vadd.f32 %v17918_v57, %v17903_v12  ;;  %v18404_v21 = vpop.f32.mrb[44].mxu1  ;;  %v22262_v45 = vpop.f32.mrb[45].mxu0  ;;  %v17907_v20 = vadd.f32 %v17903_v12, %v17442_v17 }
0x2aa0   :  { %v18421_v27 = vadd.f32 %v18419_v10, %v18404_v21  ;;  %v22304_v16 = vpop.f32.mrb[45].mxu1  ;;  %v18408_v60 = vadd.f32 %v18404_v21, %v17940_v53  ;;  %v18945_v10 = vld [vmem:[#allocation3] sm:$0xff] }
0x2aa1   :  { %17922 = vrot.lane.b32.xlu1 %v17920_v7, %s23883_s20  ;;  %v17908_v61 = vmul.f32 0.5, %v17907_v20 }
0x2aa2   :  { %18423 = vrot.lane.b32.xlu0 %v18421_v27, %s23883_s20  ;;  %v18409_v62 = vmul.f32 0.5, %v18408_v60 }
0x2aa3   :  { %23791 = vtanh.f32 %v17908_v61 }
0x2aa4   :  { %23793 = vtanh.f32 %v18409_v62 }
0x2aad   :  { %v23792_v0 = vpop.eup %23791 }
0x2aae   :  { %v23794_v23 = vpop.eup %23793  ;;  %v17910_v40 = vmul.f32 0.5, %v23792_v0 }
0x2aaf   :  { %v18411_v4 = vmul.f32 0.5, %v23794_v23 }
0x2ab0   :  { %v17911_v3 = vadd.f32 0.5, %v17910_v40 }
0x2ab1   :  { %v18412_v50 = vadd.f32 0.5, %v18411_v4 }
0x2ab2   :  { %v17932_v49 = vsub.f32 1.0, %v17911_v3  ;;  %v17938_v13 = vmul.f32 %v17911_v3, %v25914_v9 }
0x2ab3   :  { %v18433_v55 = vsub.f32 1.0, %v18412_v50  ;;  %v18439_v30 = vmul.f32 %v18412_v50, %v25916_v8 }
0x2b13   :  { %v17923_v35 = vpop.permute.xlu1 %17922 }
0x2b14   :  { %v17925_v14 = vmul.f32 %v17923_v35, %v17911_v3  ;;  %v18424_v51 = vpop.permute.xlu0 %18423 }
0x2b15   :  { %v18426_v54 = vmul.f32 %v18424_v51, %v18412_v50  ;;  %v19454_v50 = vld [vmem:[#allocation4 + $0x10] sm:$0xff] }
0x2b16   :  { %17927 = vrot.lane.b32.xlu1 %v17925_v14, %s23879_s27  ;;  %v19462_v14 = vld [vmem:[%s26190_s0 + $0x10] sm:$0xff] }
0x2b17   :  { %18428 = vrot.lane.b32.xlu0 %v18426_v54, %s23879_s27  ;;  %v19470_v51 = vadd.f32 %v19462_v14, %v19454_v50  ;;  %v19455_v54 = vld [vmem:[#allocation4 + $0x18] sm:$0xff] }
0x2b88   :  { %v17928_v26 = vpop.permute.xlu1 %17927 }
0x2b89   :  { %v17930_v19 = vadd.f32 %v17928_v26, %v17442_v17  ;;  %v18429_v31 = vpop.permute.xlu0 %18428  ;;  %v19463_v26 = vld [vmem:[%s26190_s0 + $0x18] sm:$0xff] }
0x2b8a   :  { %v18431_v59 = vadd.f32 %v18429_v31, %v17940_v53  ;;  %v19471_v31 = vadd.f32 %v19463_v26, %v19455_v54 }
0x2b8b   :  { %23795 = vtanh.f32 %v17930_v19  ;;  %v19482_v19 = vsel %vm85_vm0, %v19470_v51, 0.0 }
0x2b8c   :  { %23797 = vtanh.f32 %v18431_v59  ;;  %v19457_v59 = vld [vmem:[#allocation4 + $0x28] sm:$0xff] }
0x2b95   :  { %v23796_v56 = vpop.eup %23795 }
0x2b96   :  { %v23798_v63 = vpop.eup %23797  ;;  %17934 = vrot.lane.b32.xlu1 %v23796_v56, %s23884_s21  ;;  %v19465_v56 = vld [vmem:[%s26190_s0 + $0x28] sm:$0xff] }
0x2b97   :  { %18435 = vrot.lane.b32.xlu0 %v23798_v63, %s23884_s21  ;;  %v19485_v63 = vsel %vm85_vm0, %v19471_v31, 0.0 }
0x2c08   :  { %v17935_v5 = vpop.permute.xlu1 %17934 }
0x2c09   :  { %v17937_v28 = vmul.f32 %v17935_v5, %v17932_v49  ;;  %v18436_v15 = vpop.permute.xlu0 %18435  ;;  %v26059_v49 = vadd.f32 %v19465_v56, %v19457_v59 }
0x2c0a   :  { %v18438_v37 = vmul.f32 %v18436_v15, %v18433_v55 }
0x2c0b   :  { %v25987_v44 = vadd.f32 %v17938_v13, %v17937_v28  ;;  %v19491_v5 = vsel %vm85_vm0, %v26059_v49, 0.0 }
0x2c0c   :  { %v25989_v11 = vadd.f32 %v18439_v30, %v18438_v37 }
0x2c0d   :  { %18442 = vrot.lane.b32.xlu1 %v25987_v44, %s23884_s21 }
0x2c0e   :  { %18446 = vst.msk [vmem:[#allocation4 + $0x8] sm:$0xff] %vm2713_vm3, %v25989_v11  ;;  %18950 = vrot.lane.b32.xlu0 %v25989_v11, %s23884_s21 }
0x2c11   :  { %18922 = vrot.lane.b32.xlu1 %v25771_v58, %s23879_s27 }
0x2c12   :  { %19423 = vrot.lane.b32.xlu0 %v25776_v25, %s23879_s27 }
0x2c7f   :  { %v18443_v9 = vpop.permute.xlu1 %18442 }
0x2c80   :  { %18445 = vst.msk [vmem:[#allocation4 + $0x30] sm:$0xff] %vm1714_vm4, %v18443_v9  ;;  %v18451_v8 = vsel %vm1714_vm4, %v18443_v9, 0  ;;  %v18951_v2 = vpop.permute.xlu0 %18950 }
0x2c81   :  { %v18520_v48 = vand.u32 4294901760, %v18451_v8  ;;  %v18952_v41 = vsel %vm1714_vm4, %v18951_v2, 0 }
0x2c82   :  { %v19021_v38 = vand.u32 4294901760, %v18952_v41 }
0x2c83   :  { %v18521_v47 = vsub.f32 %v18451_v8, %v18520_v48 }
0x2c84   :  { %v19022_v34 = vsub.f32 %v18952_v41, %v19021_v38  ;;  %v19460_v41 = vld [vmem:[%s26190_s0] sm:$0xff] }
0x2c85   :  { %v18522_v33 = vand.u32 4294901760, %v18521_v47 }
0x2c86   :  { %v19023_v24 = vand.u32 4294901760, %v19022_v34 }
0x2c87   :  { %v18523_v39 = vsub.f32 %v18521_v47, %v18522_v33 }
0x2c88   :  { %v19024_v52 = vsub.f32 %v19022_v34, %v19023_v24 }
0x2c89   :  { %v18524_v58 = vand.u32 4294901760, %v18523_v39  ;;  %v19464_v39 = vld [vmem:[%s26190_s0 + $0x20] sm:$0xff] }
0x2c8a   :  { %v19025_v57 = vand.u32 4294901760, %v19024_v52 }
0x2c8b   :  { %22310 = vmatmul.mubr.f32.vlgmr.msra.gmra.mrb[46].mxu0 %v18524_v58 }
0x2c8c   :  { %22352 = vmatmul.mubr.f32.vlgmr.msra.gmra.mrb[46].mxu1 %v19025_v57  ;;  %23126 = vmatpush3.bf16.msra.mxu0 %v25756_v46  ;;  %v18923_v46 = vpop.permute.xlu1 %18922  ;;  %v19458_v57 = vld [vmem:[#allocation4 + $0x30] sm:$0xff] }
0x2c8d   :  { %23144 = vmatpush3.bf16.msra.mxu1 %v25758_v32  ;;  %22316 = vmatprep.mubr.msk.f32.mxu0 %vm23881_vm1, %v23882_v42  ;;  %v19424_v32 = vpop.permute.xlu0 %19423 }
0x2c8e   :  { %22358 = vmatprep.mubr.msk.f32.mxu1 %vm23881_vm1, %v23882_v42  ;;  %23127 = vmatprep.subr.bf16.mxu0 %v23880_v36 }
0x2c8f   :  { %23145 = vmatprep.subr.bf16.mxu1 %v23880_v36 }
0x2c93   :  { %22317 = vmatmul.mubr.f32.vlgmr.msra.gmra.mrb[46].mxu0 %v18520_v48 }
0x2c94   :  { %22359 = vmatmul.mubr.f32.vlgmr.msra.gmra.mrb[46].mxu1 %v19021_v38  ;;  %23129 = vmatpush3.bf16.msra.mxu0 %v25760_v29 }
0x2c95   :  { %23147 = vmatpush3.bf16.msra.mxu1 %v25762_v22  ;;  %22323 = vmatprep.mubr.msk.f32.mxu0 %vm23881_vm1, %v23882_v42 }
0x2c96   :  { %22365 = vmatprep.mubr.msk.f32.mxu1 %vm23881_vm1, %v23882_v42  ;;  %23130 = vmatprep.subr.bf16.mxu0 %v23880_v36 }
0x2c97   :  { %23148 = vmatprep.subr.bf16.mxu1 %v23880_v36 }
0x2c9b   :  { %22324 = vmatmul.mubr.f32.vlgmr.msra.gmra.mrb[46].mxu0 %v18521_v47 }
0x2c9c   :  { %22366 = vmatmul.mubr.f32.vlgmr.msra.gmra.mrb[46].mxu1 %v19022_v34  ;;  %23132 = vmatpush3.bf16.msra.mxu0 %v25736_v43 }
0x2c9d   :  { %23150 = vmatpush3.bf16.msra.mxu1 %v25739_v1  ;;  %22330 = vmatprep.mubr.msk.f32.mxu0 %vm23881_vm1, %v23882_v42 }
0x2c9e   :  { %22372 = vmatprep.mubr.msk.f32.mxu1 %vm23881_vm1, %v23882_v42  ;;  %23133 = vmatprep.subr.bf16.mxu0 %v23880_v36 }
0x2c9f   :  { %23151 = vmatprep.subr.bf16.mxu1 %v23880_v36 }
0x2ca3   :  { %22331 = vmatmul.mubr.f32.vlgmr.msra.gmra.mrb[46].mxu0 %v18522_v33 }
0x2ca4   :  { %22373 = vmatmul.mubr.f32.vlgmr.msra.gmra.mrb[46].mxu1 %v19023_v24  ;;  %23135 = vmatpush3.bf16.msra.mxu0 %v25764_v6  ;;  %v19456_v24 = vld [vmem:[#allocation4 + $0x20] sm:$0xff] }
0x2ca5   :  { %23153 = vmatpush3.bf16.msra.mxu1 %v25766_v18  ;;  %22337 = vmatprep.mubr.msk.f32.mxu0 %vm23881_vm1, %v23882_v42  ;;  %v19472_v58 = vadd.f32 %v19464_v39, %v19456_v24 }
0x2ca6   :  { %22379 = vmatprep.mubr.msk.f32.mxu1 %vm23881_vm1, %v23882_v42  ;;  %23136 = vmatprep.subr.bf16.mxu0 %v23880_v36 }
0x2ca7   :  { %23154 = vmatprep.subr.bf16.mxu1 %v23880_v36 }
0x2cab   :  { %22338 = vmatmul.mubr.f32.vlgmr.msra.gmra.mrb[46].mxu0 %v18520_v48 }
0x2cac   :  { %22380 = vmatmul.mubr.f32.vlgmr.msra.gmra.mrb[46].mxu1 %v19021_v38  ;;  %23138 = vmatpush3.bf16.msra.mxu0 %v25736_v43  ;;  %v18447_v43 = vld [vmem:[#allocation2 + $0x38] sm:$0xff] }
0x2cad   :  { %23156 = vmatpush3.bf16.msra.mxu1 %v25739_v1  ;;  %22344 = vmatprep.mubr.msk.f32.mxu0 %vm23881_vm1, %v23882_v42 }
0x2cae   :  { %22386 = vmatprep.mubr.msk.f32.mxu1 %vm23881_vm1, %v23882_v42 }
0x2cb3   :  { %22345 = vmatmul.mubr.f32.vlgmr.msra.gmra.mrb[46].mxu0 %v18520_v48 }
0x2cb4   :  { %22387 = vmatmul.mubr.f32.vlgmr.msra.gmra.mrb[46].mxu1 %v19021_v38 }
0x2d86   :  { %v18908_v29 = vpop.f32.mrb[46].mxu0 }
0x2d87   :  { %v18925_v22 = vadd.f32 %v18923_v46, %v18908_v29  ;;  %v19409_v6 = vpop.f32.mrb[46].mxu1  ;;  %v22346_v36 = vpop.f32.mrb[47].mxu0  ;;  %v18912_v1 = vadd.f32 %v18908_v29, %v18447_v43  ;;  %v19466_v46 = vld [vmem:[%s26190_s0 + $0x30] sm:$0xff] }
0x2d88   :  { %v19426_v18 = vadd.f32 %v19424_v32, %v19409_v6  ;;  %v22388_v25 = vpop.f32.mrb[47].mxu1  ;;  %v19413_v12 = vadd.f32 %v19409_v6, %v18945_v10  ;;  %v19488_v32 = vsel %vm85_vm0, %v19472_v58, 0.0  ;;  %v19474_v29 = vadd.f32 %v19466_v46, %v19458_v57 }
0x2d89   :  { %18927 = vrot.lane.b32.xlu1 %v18925_v22, %s23883_s20  ;;  %v18913_v7 = vmul.f32 0.5, %v18912_v1 }
0x2d8a   :  { %19428 = vrot.lane.b32.xlu0 %v19426_v18, %s23883_s20  ;;  %v19414_v42 = vmul.f32 0.5, %v19413_v12  ;;  %v19494_v22 = vsel %vm85_vm0, %v19474_v29, 0.0 }
0x2d8b   :  { %23799 = vtanh.f32 %v18913_v7 }
0x2d8c   :  { %23801 = vtanh.f32 %v19414_v42 }
0x2d95   :  { %v23800_v21 = vpop.eup %23799 }
0x2d96   :  { %v23802_v45 = vpop.eup %23801  ;;  %v18915_v27 = vmul.f32 0.5, %v23800_v21 }
0x2d97   :  { %v19416_v16 = vmul.f32 0.5, %v23802_v45 }
0x2d98   :  { %v18916_v17 = vadd.f32 0.5, %v18915_v27 }
0x2d99   :  { %v19417_v53 = vadd.f32 0.5, %v19416_v16 }
0x2d9a   :  { %v18937_v55 = vsub.f32 1.0, %v18916_v17  ;;  %v18943_v15 = vmul.f32 %v18916_v17, %v25987_v44  ;;  %v19453_v44 = vld [vmem:[#allocation4 + $0x8] sm:$0xff] }
0x2d9b   :  { %v19438_v28 = vsub.f32 1.0, %v19417_v53  ;;  %v19444_v9 = vmul.f32 %v19417_v53, %v25989_v11  ;;  %v19461_v11 = vld [vmem:[%s26190_s0 + $0x8] sm:$0xff] }
0x2d9c   :  { %v19469_v33 = vadd.f32 %v19461_v11, %v19453_v44 }
0x2d9e   :  { %v19479_v52 = vsel %vm85_vm0, %v19469_v33, 0.0 }
0x2dfb   :  { %v18928_v20 = vpop.permute.xlu1 %18927 }
0x2dfc   :  { %v18930_v60 = vmul.f32 %v18928_v20, %v18916_v17  ;;  %v19429_v61 = vpop.permute.xlu0 %19428 }
0x2dfd   :  { %v19431_v62 = vmul.f32 %v19429_v61, %v19417_v53 }
0x2dfe   :  { %18932 = vrot.lane.b32.xlu1 %v18930_v60, %s23879_s27 }
0x2dff   :  { %19433 = vrot.lane.b32.xlu0 %v19431_v62, %s23879_s27 }
0x2e70   :  { %v18933_v0 = vpop.permute.xlu1 %18932 }
0x2e71   :  { %v18935_v23 = vadd.f32 %v18933_v0, %v18447_v43  ;;  %v19434_v40 = vpop.permute.xlu0 %19433 }
0x2e72   :  { %v19436_v4 = vadd.f32 %v19434_v40, %v18945_v10  ;;  %v19467_v10 = vld [vmem:[%s26190_s0 + $0x38] sm:$0xff] }
0x2e73   :  { %23803 = vtanh.f32 %v18935_v23 }
0x2e74   :  { %23805 = vtanh.f32 %v19436_v4 }
0x2e7d   :  { %v23804_v3 = vpop.eup %23803 }
0x2e7e   :  { %v23806_v35 = vpop.eup %23805  ;;  %18939 = vrot.lane.b32.xlu1 %v23804_v3, %s23884_s21 }
0x2e7f   :  { %19440 = vrot.lane.b32.xlu0 %v23806_v35, %s23884_s21 }
0x2e9e   :  { %19483 = vadd.xlane.f32.xlu0 %v19482_v19 }
0x2ea2   :  { %19486 = vadd.xlane.f32.xlu0 %v19485_v63 }
0x2ea6   :  { %19492 = vadd.xlane.f32.xlu0 %v19491_v5 }
0x2ef0   :  { %v18940_v13 = vpop.permute.xlu1 %18939 }
0x2ef1   :  { %v18942_v30 = vmul.f32 %v18940_v13, %v18937_v55  ;;  %v19441_v37 = vpop.permute.xlu0 %19440 }
0x2ef2   :  { %v19443_v8 = vmul.f32 %v19441_v37, %v19438_v28 }
0x2ef3   :  { %v18944_v2 = vadd.f32 %v18943_v15, %v18942_v30 }
0x2ef4   :  { %v19445_v48 = vadd.f32 %v19444_v9, %v19443_v8  ;;  %v26123_v9 = vld [vmem:[%s26199_s9] ss:$0 sm:$0xff] }
0x2ef5   :  { %19447 = vrot.lane.b32.xlu1 %v18944_v2, %s23884_s21  ;;  %v26128_v2 = vld [vmem:[%s26200_s10] ss:$0 sm:$0xff] }
0x2ef6   :  { %19451 = vst.msk [vmem:[#allocation4] sm:$0xff] %vm2713_vm3, %v19445_v48 }
0x2efd   :  { %v19452_v38 = vld [vmem:[#allocation4] sm:$0xff] }
0x2efe   :  { %v19468_v47 = vadd.f32 %v19460_v41, %v19452_v38 }
0x2f00   :  { %v19476_v34 = vsel %vm85_vm0, %v19468_v47, 0.0 }
0x2f01   :  { %19477 = vadd.xlane.f32.xlu0 %v19476_v34 }
0x2f19   :  { %19480 = vadd.xlane.f32.xlu1 %v19479_v52 }
0x2f1d   :  { %19489 = vadd.xlane.f32.xlu1 %v19488_v32 }
0x2f21   :  { %19495 = vadd.xlane.f32.xlu1 %v19494_v22 }
0x2f2b   :  { %v19484_v6 = vpop.xlane.xlu0 %19483 }
0x2f2c   :  { %v19503_v36 = vmul.f32 0.03125, %v19484_v6 }
0x2f2e   :  { %v19511_v18 = vsub.f32 %v19470_v51, %v19503_v36 }
0x2f2f   :  { %v19487_v21 = vpop.xlane.xlu0 %19486 }
0x2f30   :  { %v19519_v25 = vmul.f32 %v19511_v18, %v19511_v18  ;;  %v19504_v27 = vmul.f32 0.03125, %v19487_v21 }
0x2f32   :  { %v19531_v43 = vsel %vm85_vm0, %v19519_v25, 0.0  ;;  %v26089_v53 = vsub.f32 %v19471_v31, %v19504_v27 }
0x2f33   :  { %19532 = vadd.xlane.f32.xlu1 %v19531_v43  ;;  %v19493_v45 = vpop.xlane.xlu0 %19492 }
0x2f34   :  { %v19506_v60 = vmul.f32 0.03125, %v19493_v45  ;;  %v19520_v4 = vmul.f32 %v26089_v53, %v26089_v53 }
0x2f36   :  { %v26098_v3 = vsub.f32 %v26059_v49, %v19506_v60  ;;  %v19534_v19 = vsel %vm85_vm0, %v19520_v4, 0.0 }
0x2f38   :  { %v19522_v63 = vmul.f32 %v26098_v3, %v26098_v3 }
0x2f3a   :  { %v19540_v5 = vsel %vm85_vm0, %v19522_v63, 0.0 }
0x2f67   :  { %v19448_v1 = vpop.permute.xlu1 %19447 }
0x2f68   :  { %19450 = vst.msk [vmem:[#allocation4 + $0x38] sm:$0xff] %vm1714_vm4, %v19448_v1 }
0x2f6f   :  { %v19459_v12 = vld [vmem:[#allocation4 + $0x38] sm:$0xff] }
0x2f70   :  { %v19475_v7 = vadd.f32 %v19467_v10, %v19459_v12 }
0x2f72   :  { %v19497_v42 = vsel %vm85_vm0, %v19475_v7, 0.0 }
0x2f73   :  { %19498 = vadd.xlane.f32.xlu0 %v19497_v42 }
0x2f8e   :  { %v19478_v16 = vpop.xlane.xlu0 %19477 }
0x2f8f   :  { %v19501_v61 = vmul.f32 0.03125, %v19478_v16 }
0x2f91   :  { %v26100_v35 = vsub.f32 %v19468_v47, %v19501_v61 }
0x2f93   :  { %v19517_v56 = vmul.f32 %v26100_v35, %v26100_v35 }
0x2f95   :  { %v19525_v49 = vsel %vm85_vm0, %v19517_v56, 0.0 }
0x2fa6   :  { %v19481_v17 = vpop.xlane.xlu1 %19480 }
0x2fa7   :  { %v19502_v20 = vmul.f32 0.03125, %v19481_v17 }
0x2fa9   :  { %v26091_v62 = vsub.f32 %v19469_v33, %v19502_v20 }
0x2faa   :  { %v19490_v0 = vpop.xlane.xlu1 %19489 }
0x2fab   :  { %v19505_v23 = vmul.f32 0.03125, %v19490_v0  ;;  %v19518_v40 = vmul.f32 %v26091_v62, %v26091_v62 }
0x2fad   :  { %v26102_v50 = vsub.f32 %v19472_v58, %v19505_v23  ;;  %v19528_v14 = vsel %vm85_vm0, %v19518_v40, 0.0 }
0x2fae   :  { %v19496_v51 = vpop.xlane.xlu1 %19495  ;;  %19529 = vadd.xlane.f32.xlu0 %v19528_v14 }
0x2faf   :  { %v19507_v54 = vmul.f32 0.03125, %v19496_v51  ;;  %v19521_v26 = vmul.f32 %v26102_v50, %v26102_v50 }
0x2fb1   :  { %v26108_v31 = vsub.f32 %v19474_v29, %v19507_v54  ;;  %v19537_v59 = vsel %vm85_vm0, %v19521_v26, 0.0 }
0x2fb2   :  { %19538 = vadd.xlane.f32.xlu1 %v19537_v59  ;;  %19535 = vadd.xlane.f32.xlu0 %v19534_v19 }
0x2fb3   :  { %v19523_v55 = vmul.f32 %v26108_v31, %v26108_v31 }
0x2fb5   :  { %v19543_v13 = vsel %vm85_vm0, %v19523_v55, 0.0 }
0x2fb6   :  { %19526 = vadd.xlane.f32.xlu1 %v19525_v49  ;;  %19541 = vadd.xlane.f32.xlu0 %v19540_v5 }
0x2fba   :  { %19544 = vadd.xlane.f32.xlu1 %v19543_v13 }
0x2fc0   :  { %v19533_v28 = vpop.xlane.xlu1 %19532 }
0x2fc1   :  { %v19551_v15 = vmul.f32 0.03125, %v19533_v28 }
0x2fc3   :  { %v19559_v30 = vadd.f32 1e-05, %v19551_v15 }
0x2fc5   :  { %23807 = vrsqrt.f32 %v19559_v30 }
0x2fcf   :  { %v23808_v37 = vpop.eup %23807 }
0x2fd0   :  { %v19575_v8 = vmul.f32 %v23808_v37, %v19511_v18 }
0x2fd2   :  { %v19590_v48 = vmul.f32 %v26123_v9, %v19575_v8 }
0x2fd4   :  { %v19605_v41 = vadd.f32 %v26128_v2, %v19590_v48 }
0x2fd6   :  { %19613 = vst.msk [vmem:[%s26201_s11 + $0x10] sm:$0xff] %vm85_vm0, %v19605_v41 }
0x3000   :  { %v19499_v38 = vpop.xlane.xlu0 %19498 }
0x3001   :  { %v19508_v47 = vmul.f32 0.03125, %v19499_v38 }
0x3003   :  { %v26136_v34 = vsub.f32 %v19475_v7, %v19508_v47 }
0x3005   :  { %v19524_v44 = vmul.f32 %v26136_v34, %v26136_v34 }
0x3007   :  { %v19546_v11 = vsel %vm85_vm0, %v19524_v44, 0.0 }
0x3008   :  { %19547 = vadd.xlane.f32.xlu0 %v19546_v11 }
0x303b   :  { %v19530_v33 = vpop.xlane.xlu0 %19529 }
0x303c   :  { %v19550_v24 = vmul.f32 0.03125, %v19530_v33 }
0x303e   :  { %v19558_v39 = vadd.f32 1e-05, %v19550_v24 }
0x303f   :  { %v19539_v52 = vpop.xlane.xlu1 %19538  ;;  %v19536_v58 = vpop.xlane.xlu0 %19535 }
0x3040   :  { %23809 = vrsqrt.f32 %v19558_v39  ;;  %v19553_v57 = vmul.f32 0.03125, %v19539_v52  ;;  %v19552_v46 = vmul.f32 0.03125, %v19536_v58 }
0x3042   :  { %v19561_v32 = vadd.f32 1e-05, %v19553_v57  ;;  %v19560_v29 = vadd.f32 1e-05, %v19552_v46 }
0x3043   :  { %v19527_v22 = vpop.xlane.xlu1 %19526  ;;  %v19542_v6 = vpop.xlane.xlu0 %19541 }
0x3044   :  { %23811 = vrsqrt.f32 %v19561_v32  ;;  %v19549_v36 = vmul.f32 0.03125, %v19527_v22  ;;  %v19554_v18 = vmul.f32 0.03125, %v19542_v6 }
0x3045   :  { %23813 = vrsqrt.f32 %v19560_v29 }
0x3046   :  { %v19557_v25 = vadd.f32 1e-05, %v19549_v36  ;;  %v19562_v43 = vadd.f32 1e-05, %v19554_v18 }
0x3047   :  { %v19545_v1 = vpop.xlane.xlu1 %19544 }
0x3048   :  { %23815 = vrsqrt.f32 %v19557_v25  ;;  %v19555_v10 = vmul.f32 0.03125, %v19545_v1 }
0x3049   :  { %23817 = vrsqrt.f32 %v19562_v43 }
0x304a   :  { %v23810_v12 = vpop.eup %23809  ;;  %v19563_v7 = vadd.f32 1e-05, %v19555_v10 }
0x304b   :  { %v19574_v42 = vmul.f32 %v23810_v12, %v26091_v62 }
0x304c   :  { %23819 = vrsqrt.f32 %v19563_v7 }
0x304d   :  { %v19589_v21 = vmul.f32 %v26123_v9, %v19574_v42 }
0x304e   :  { %v23812_v45 = vpop.eup %23811 }
0x304f   :  { %v23814_v27 = vpop.eup %23813  ;;  %v19604_v16 = vadd.f32 %v26128_v2, %v19589_v21  ;;  %v19577_v17 = vmul.f32 %v23812_v45, %v26102_v50 }
0x3050   :  { %v19576_v20 = vmul.f32 %v23814_v27, %v26089_v53 }
0x3051   :  { %19612 = vst.msk [vmem:[%s26201_s11 + $0x8] sm:$0xff] %vm85_vm0, %v19604_v16  ;;  %v19592_v60 = vmul.f32 %v26123_v9, %v19577_v17 }
0x3052   :  { %v23816_v61 = vpop.eup %23815  ;;  %v19591_v62 = vmul.f32 %v26123_v9, %v19576_v20 }
0x3053   :  { %v23818_v0 = vpop.eup %23817  ;;  %v19607_v23 = vadd.f32 %v26128_v2, %v19592_v60  ;;  %v19573_v40 = vmul.f32 %v23816_v61, %v26100_v35 }
0x3054   :  { %v19606_v4 = vadd.f32 %v26128_v2, %v19591_v62  ;;  %v19578_v50 = vmul.f32 %v23818_v0, %v26098_v3 }
0x3055   :  { %19615 = vst.msk [vmem:[%s26201_s11 + $0x20] sm:$0xff] %vm85_vm0, %v19607_v23  ;;  %v19588_v53 = vmul.f32 %v26123_v9, %v19573_v40 }
0x3056   :  { %v23820_v14 = vpop.eup %23819  ;;  %19614 = vst.msk [vmem:[%s26201_s11 + $0x18] sm:$0xff] %vm85_vm0, %v19606_v4  ;;  %v19593_v51 = vmul.f32 %v26123_v9, %v19578_v50 }
0x3057   :  { %v19603_v35 = vadd.f32 %v26128_v2, %v19588_v53  ;;  %v19579_v54 = vmul.f32 %v23820_v14, %v26108_v31 }
0x3058   :  { %v19608_v3 = vadd.f32 %v26128_v2, %v19593_v51 }
0x3059   :  { %19611 = vst.msk [vmem:[%s26201_s11] sm:$0xff] %vm85_vm0, %v19603_v35  ;;  %v19594_v26 = vmul.f32 %v26123_v9, %v19579_v54 }
0x305a   :  { %19616 = vst.msk [vmem:[%s26201_s11 + $0x28] sm:$0xff] %vm85_vm0, %v19608_v3 }
0x305b   :  { %v19609_v19 = vadd.f32 %v26128_v2, %v19594_v26 }
0x305d   :  { %19617 = vst.msk [vmem:[%s26201_s11 + $0x30] sm:$0xff] %vm85_vm0, %v19609_v19 }
0x3095   :  { %v19548_v31 = vpop.xlane.xlu0 %19547 }
0x3096   :  { %v19556_v59 = vmul.f32 0.03125, %v19548_v31 }
0x3098   :  { %v19564_v56 = vadd.f32 1e-05, %v19556_v59 }
0x309a   :  { %23821 = vrsqrt.f32 %v19564_v56 }
0x30a4   :  { %v23822_v63 = vpop.eup %23821 }
0x30a5   :  { %v19580_v49 = vmul.f32 %v23822_v63, %v26136_v34 }
0x30a7   :  { %v19595_v5 = vmul.f32 %v26123_v9, %v19580_v49 }
0x30a9   :  { %v19610_v55 = vadd.f32 %v26128_v2, %v19595_v5 }
0x30ab   :  { %19618 = vst.msk [vmem:[%s26201_s11 + $0x38] sm:$0xff] %vm85_vm0, %v19610_v55 }
0x30ac   :  { %19623 = vsyncpa [#allocation6], 1 }
0x30ad   :  { %19624 = vsyncpa [#allocation8], 1 }

</bundles_post_ra>
